<compile_context>
chip_gen: v7x
topology: tpu7x:2x2x1
jax: 0.10.0
libtpu: 0.0.40
codegen_flags: <defaults>
</compile_context>

<pallas_src>
import functools

import jax
import jax.numpy as jnp
import numpy as np
from jax.experimental import pallas as pl
from jax.experimental.pallas import tpu as pltpu

_NEG_SLOPE = 0.2


# -----------------------------------------------------------------------------
# In-kernel helpers (operate on traced values inside Pallas kernel bodies)
# -----------------------------------------------------------------------------

def _leaky_relu(x):
    return jnp.where(x > 0.0, x, _NEG_SLOPE * x)


def _pool_spatial_major(y, cout, sp_pre, pool_k):
    """Max-pool along the spatial-major axis of a [rows, sp_pre*cout] layout
    (floor mode, like nn.MaxPool2d)."""
    if pool_k == 1:
        return y
    sp_out = sp_pre // pool_k
    parts = []
    for p in range(sp_out):
        seg = y[:, (p * pool_k) * cout:(p * pool_k + 1) * cout]
        for j in range(1, pool_k):
            lo = (p * pool_k + j) * cout
            seg = jnp.maximum(seg, y[:, lo:lo + cout])
        parts.append(seg)
    return parts[0] if len(parts) == 1 else jnp.concatenate(parts, axis=1)


def _conv_layer(a, m, scale, shift, cout, sp_pre, pool_k):
    """conv (as dense matmul) -> maxpool -> BN affine -> LeakyReLU(0.2)."""
    y = jnp.dot(a.astype(jnp.bfloat16), m, preferred_element_type=jnp.float32)
    y = _pool_spatial_major(y, cout, sp_pre, pool_k)
    return _leaky_relu(y * scale + shift)


# -----------------------------------------------------------------------------
# Kernel 1: fused conv blocks 1-3 (convolve along W; rows = B*S*H)
# -----------------------------------------------------------------------------

def _make_conv_stack_kernel(metas):
    def kernel(*refs):
        x_ref = refs[0]
        o_ref = refs[-1]
        a = x_ref[...]
        for li, meta in enumerate(metas):
            m_ref, s_ref, sh_ref = refs[1 + 3 * li:4 + 3 * li]
            a = _conv_layer(a, m_ref[...], s_ref[...], sh_ref[...],
                            meta["cout"], meta["sp_pre"], meta["pool_k"])
        o_ref[...] = a
    return kernel


# -----------------------------------------------------------------------------
# Kernel 2: fused conv blocks 4-5 + 2-layer BiLSTM + fc1 + fc2
# -----------------------------------------------------------------------------

def _make_body_kernel(B, S, hid, h_metas):
    c4, c5 = h_metas

    def kernel(feat_ref,
               m4_ref, s4_ref, sh4_ref,
               m5_ref, s5_ref, sh5_ref,
               wihf0_ref, wihb0_ref, whh0_ref, bf0_ref, bb0_ref,
               wihf1_ref, wihb1_ref, whh1_ref, bf1_ref, bb1_ref,
               wfc1_ref, bfc1_ref, wfc2_ref, bfc2_ref,
               rnn_ref, out_ref,
               h0_ref, gx_ref):
        # Direction mask for the packed [2B, .] recurrent state.  Built
        # in-kernel with a 2-D iota so no host constant is captured by the
        # kernel (that was the previous compile failure).
        row_ids = jax.lax.broadcasted_iota(jnp.int32, (2 * B, 4 * hid), 0)
        is_fwd = row_ids < B                                # rows [0,B) = fwd

        # ---- conv blocks 4 & 5 (convs along H; rows are time-major S*B) ----
        a = _conv_layer(feat_ref[...], m4_ref[...], s4_ref[...], sh4_ref[...],
                        c4["cout"], c4["sp_pre"], c4["pool_k"])
        x0 = _conv_layer(a, m5_ref[...], s5_ref[...], sh5_ref[...],
                         c5["cout"], c5["sp_pre"], c5["pool_k"])     # [S*B, 256]

        # ---- one bidirectional LSTM layer (fwd/bwd packed as [2B, H]) ----
        # PyTorch gate order: i, f, g, o.
        def bilstm(x_val, wih_f, wih_b, whh_cat, bias_f, bias_b, write_fn):
            # Hoisted input projections: one big matmul per direction,
            # biases (b_ih + b_hh) folded in once.
            gx_f = jnp.dot(x_val.astype(jnp.bfloat16), wih_f,
                           preferred_element_type=jnp.float32) + bias_f
            gx_b = jnp.dot(x_val.astype(jnp.bfloat16), wih_b,
                           preferred_element_type=jnp.float32) + bias_b
            # Pack per-step gate inputs: rows [t*2B, t*2B+B) = fwd @ t,
            # rows [t*2B+B, (t+1)*2B) = bwd @ (S-1-t).
            for t in range(S):
                gx_ref[t * 2 * B:t * 2 * B + B, :] = gx_f[t * B:(t + 1) * B, :]
                gx_ref[t * 2 * B + B:(t + 1) * 2 * B, :] = \
                    gx_b[(S - 1 - t) * B:(S - t) * B, :]

            h_cat = jnp.zeros((2 * B, hid), jnp.float32)
            c_cat = jnp.zeros((2 * B, hid), jnp.float32)
            for t in range(S):                          # statically unrolled
                # one merged recurrent matmul for both directions
                g_rec = jnp.dot(h_cat.astype(jnp.bfloat16), whh_cat,
                                preferred_element_type=jnp.float32)  # [2B, 8H]
                g_rec = jnp.where(is_fwd, g_rec[:, :4 * hid], g_rec[:, 4 * hid:])
                gates = gx_ref[t * 2 * B:(t + 1) * 2 * B, :] + g_rec
                ig = jax.nn.sigmoid(gates[:, 0:hid])
                fg = jax.nn.sigmoid(gates[:, hid:2 * hid])
                gg = jnp.tanh(gates[:, 2 * hid:3 * hid])
                og = jax.nn.sigmoid(gates[:, 3 * hid:4 * hid])
                c_cat = fg * c_cat + ig * gg
                h_cat = og * jnp.tanh(c_cat)
                write_fn(t, h_cat)

        # Layer 0: output sequence (time-major) goes to VMEM scratch.
        def write_l0(t, h_cat):
            h0_ref[t * B:(t + 1) * B, 0:hid] = h_cat[:B, :]
            h0_ref[(S - 1 - t) * B:(S - t) * B, hid:2 * hid] = h_cat[B:, :]

        bilstm(x0, wihf0_ref[...], wihb0_ref[...], whh0_ref[...],
               bf0_ref[...], bb0_ref[...], write_l0)

        # Layer 1: write directly in batch-major order (matches torch's
        # output.view(B*S, -1)) straight into the rnn_out ref.
        def write_l1(t, h_cat):
            for b in range(B):
                rnn_ref[b * S + t:b * S + t + 1, 0:hid] = h_cat[b:b + 1, :]
                rnn_ref[b * S + (S - 1 - t):b * S + (S - t), hid:2 * hid] = \
                    h_cat[B + b:B + b + 1, :]

        bilstm(h0_ref[...], wihf1_ref[...], wihb1_ref[...], whh1_ref[...],
               bf1_ref[...], bb1_ref[...], write_l1)

        # ---- fc1 -> LeakyReLU -> (dropout = id) -> fc2 -> LeakyReLU ----
        rnn_bm = rnn_ref[...]
        y = jnp.dot(rnn_bm.astype(jnp.bfloat16), wfc1_ref[...],
                    preferred_element_type=jnp.float32) + bfc1_ref[...]
        y = _leaky_relu(y)
        y = jnp.dot(y.astype(jnp.bfloat16), wfc2_ref[...],
                    preferred_element_type=jnp.float32) + bfc2_ref[...]
        out_ref[...] = _leaky_relu(y)

    return kernel


# -----------------------------------------------------------------------------
# One-time parameter preparation (hoisted out of the forward pass)
# -----------------------------------------------------------------------------

def _conv1d_dense(w_taps, l_in, c_in, stride):
    """Dense matrix for a valid 1-D conv: [l_in*c_in, l_out*c_out].
    Feature layouts are spatial-major / channel-minor on both sides."""
    c_out, c_in_w, k = w_taps.shape
    assert c_in_w == c_in
    l_out = (l_in - k) // stride + 1
    m = np.zeros((l_in * c_in, l_out * c_out), dtype=np.float32)
    for lo in range(l_out):
        for t in range(k):
            li = lo * stride + t
            m[li * c_in:(li + 1) * c_in, lo * c_out:(lo + 1) * c_out] = w_taps[:, :, t].T
    return m, l_out


def prepare_params(raw, H, W):
    """Fold BN(eval)+conv-bias into per-channel affines, build dense conv
    matrices, pre-transpose/combine LSTM & fc weights (bf16 MXU operands)."""
    eps = 1e-5

    def bn_affine(blk, sp_out):
        scale_c = blk["gamma"] / jnp.sqrt(blk["var"] + eps)
        shift_c = blk["beta"] + scale_c * (blk["b"] - blk["mean"])
        scale = jnp.tile(scale_c, sp_out).reshape(1, -1).astype(jnp.float32)
        shift = jnp.tile(shift_c, sp_out).reshape(1, -1).astype(jnp.float32)
        return scale, shift

    blocks = raw["blocks"]

    # -- W-stage: blocks 1-3 convolve along W only (rows = B*S*H) --
    w_layers, w_metas = [], []
    l_cur, c_cur = W, 1
    for blk in blocks[:3]:
        (kh, kw), (sh, sw), (ph, pw) = blk["kernel"], blk["stride"], blk["pool"]
        assert kh == 1 and sh == 1 and ph == 1
        cout = blk["w"].shape[0]
        m, l_out = _conv1d_dense(np.asarray(blk["w"])[:, :, 0, :], l_cur, c_cur, sw)
        sp_out = l_out // pw
        scale, shift = bn_affine(blk, sp_out)
        w_layers.append(dict(m=jnp.asarray(m, jnp.bfloat16), scale=scale, shift=shift))
        w_metas.append(dict(cout=int(cout), sp_pre=int(l_out), pool_k=int(pw)))
        l_cur, c_cur = sp_out, cout
    assert l_cur == 1, "conv stack must collapse W to 1 before blocks 4-5"

    # -- H-stage: blocks 4-5 convolve along H only (rows = B*S) --
    h_layers, h_metas = [], []
    l_cur2, c_cur2 = H, c_cur
    for blk in blocks[3:]:
        (kh, kw), (sh, sw), (ph, pw) = blk["kernel"], blk["stride"], blk["pool"]
        assert kw == 1 and sw == 1 and pw == 1
        cout = blk["w"].shape[0]
        m, l_out = _conv1d_dense(np.asarray(blk["w"])[:, :, :, 0], l_cur2, c_cur2, sh)
        sp_out = l_out // ph
        scale, shift = bn_affine(blk, sp_out)
        h_layers.append(dict(m=jnp.asarray(m, jnp.bfloat16), scale=scale, shift=shift))
        h_metas.append(dict(cout=int(cout), sp_pre=int(l_out), pool_k=int(ph)))
        l_cur2, c_cur2 = sp_out, cout
    assert l_cur2 == 1, "conv stack must collapse H to 1 before the LSTM"
    assert c_cur2 == raw["lstm"][0]["fwd"]["wih"].shape[1]

    # -- LSTM: 2 layers x 2 directions (PyTorch gate order i,f,g,o) --
    hid = int(raw["lstm"][0]["fwd"]["whh"].shape[1])
    lstm = []
    for layer in raw["lstm"]:
        f, b = layer["fwd"], layer["bwd"]
        lstm.append(dict(
            wih_f=jnp.asarray(f["wih"].T, jnp.bfloat16),                 # [In, 4H]
            wih_b=jnp.asarray(b["wih"].T, jnp.bfloat16),
            whh_cat=jnp.concatenate([f["whh"].T, b["whh"].T],
                                    axis=1).astype(jnp.bfloat16),        # [H, 8H]
            bias_f=(f["bih"] + f["bhh"]).reshape(1, -1).astype(jnp.float32),
            bias_b=(b["bih"] + b["bhh"]).reshape(1, -1).astype(jnp.float32),
        ))

    fc = dict(
        w1=jnp.asarray(raw["fc1_w"].T, jnp.bfloat16),
        b1=raw["fc1_b"].reshape(1, -1).astype(jnp.float32),
        w2=jnp.asarray(raw["fc2_w"].T, jnp.bfloat16),
        b2=raw["fc2_b"].reshape(1, -1).astype(jnp.float32),
    )

    prep = dict(w_stage=w_layers, h_stage=h_layers, lstm=lstm, fc=fc)
    meta = dict(w_metas=w_metas, h_metas=h_metas, hidden=hid)
    return prep, meta


# -----------------------------------------------------------------------------
# Forward pass: 2 pallas_calls + one tiny layout transpose in between
# -----------------------------------------------------------------------------

def audio2au_forward(meta, prep, audio_inputs):
    """audio_inputs: [B, S, 1, H, W] -> (rnn_out [B*S, 2*hid], out [B*S, 64])."""
    B, S, C, H, W = audio_inputs.shape
    assert C == 1
    N = B * S
    hid = meta["hidden"]

    w_metas = meta["w_metas"]
    last = w_metas[-1]
    c3_feat = (last["sp_pre"] // last["pool_k"]) * last["cout"]

    # ---- kernel 1: fused conv blocks 1-3 ----
    x_mat = audio_inputs.reshape(N * H, W)          # free row-major reshape (Cin=1)
    args = [x_mat]
    for layer in prep["w_stage"]:
        args += [layer["m"], layer["scale"], layer["shift"]]
    feat_w = pl.pallas_call(
        _make_conv_stack_kernel(w_metas),
        out_shape=jax.ShapeDtypeStruct((N * H, c3_feat), jnp.float32),
    )(*args)

    # [B*S*H, C3] -> [B*S, H*C3] is a free reshape; one tiny transpose makes
    # the rows time-major for the LSTM inside kernel 2.
    feat_tm = (feat_w.reshape(B, S, H * c3_feat)
               .transpose(1, 0, 2)
               .reshape(N, H * c3_feat))

    # ---- kernel 2: fused conv blocks 4-5 + 2-layer BiLSTM + fc1 + fc2 ----
    h4, h5 = prep["h_stage"]
    l0, l1 = prep["lstm"]
    fc = prep["fc"]
    out_dim = fc["w2"].shape[1]
    rnn_out, out = pl.pallas_call(
        _make_body_kernel(B, S, hid, meta["h_metas"]),
        out_shape=(jax.ShapeDtypeStruct((N, 2 * hid), jnp.float32),
                   jax.ShapeDtypeStruct((N, out_dim), jnp.float32)),
        scratch_shapes=[pltpu.VMEM((N, 2 * hid), jnp.float32),       # layer-0 seq
                        pltpu.VMEM((2 * N, 4 * hid), jnp.float32)],  # packed gx
    )(feat_tm,
      h4["m"], h4["scale"], h4["shift"],
      h5["m"], h5["scale"], h5["shift"],
      l0["wih_f"], l0["wih_b"], l0["whh_cat"], l0["bias_f"], l0["bias_b"],
      l1["wih_f"], l1["wih_b"], l1["whh_cat"], l1["bias_f"], l1["bias_b"],
      fc["w1"], fc["b1"], fc["w2"], fc["b2"])
    return rnn_out, out


# -----------------------------------------------------------------------------
# Deterministic parameter init (synthetic; shapes from the module __init__)
# -----------------------------------------------------------------------------

def init_params(key):
    cfg = [  # (cin, cout, kernel, stride, maxpool)
        (1,   8,   (1, 4), (1, 2), (1, 1)),
        (8,   32,  (1, 3), (1, 2), (1, 1)),
        (32,  64,  (1, 3), (1, 2), (1, 2)),
        (64,  128, (3, 1), (2, 1), (1, 1)),
        (128, 256, (3, 1), (2, 1), (2, 1)),
    ]
    keys = iter(jax.random.split(key, 64))

    def nrm(shape, scale):
        return scale * jax.random.normal(next(keys), shape, dtype=jnp.float32)

    blocks = []
    for cin, cout, k, st, p in cfg:
        blocks.append(dict(
            w=nrm((cout, cin, k[0], k[1]), 0.1),
            b=nrm((cout,), 0.1),
            gamma=1.0 + nrm((cout,), 0.1),
            beta=nrm((cout,), 0.1),
            mean=nrm((cout,), 0.1),
            var=0.5 + jnp.abs(nrm((cout,), 0.1)),
            kernel=k, stride=st, pool=p,
        ))

    hid = 128
    lstm = []
    for _layer in range(2):
        in_sz = 256  # layer 0: conv features (256); layer 1: 2*hidden (256)
        layer = {}
        for d in ("fwd", "bwd"):
            layer[d] = dict(
                wih=nrm((4 * hid, in_sz), 0.05),
                whh=nrm((4 * hid, hid), 0.05),
                bih=nrm((4 * hid,), 0.05),
                bhh=nrm((4 * hid,), 0.05),
            )
        lstm.append(layer)

    return dict(
        blocks=blocks,
        lstm=lstm,
        fc1_w=nrm((128, 256), 0.05), fc1_b=nrm((128,), 0.05),
        fc2_w=nrm((64, 128), 0.05),  fc2_b=nrm((64,), 0.05),
    )


# -----------------------------------------------------------------------------

if __name__ == "__main__":
    key = jax.random.PRNGKey(0)
    k_x, k_p = jax.random.split(key)

    # Smallest spatial size for which the conv stack collapses to [N, 256, 1, 1]
    # (as the module's view(..., 256) / LSTM input_size=256 requires).
    B, S, H, W = 2, 4, 12, 24
    audio_inputs = jax.random.normal(k_x, (B, S, 1, H, W), dtype=jnp.float32)

    raw = init_params(k_p)
    prep, meta = prepare_params(raw, H, W)   # one-time weight preprocessing

    fwd = jax.jit(functools.partial(audio2au_forward, meta))
    rnn_out, out = fwd(prep, audio_inputs)
    jax.block_until_ready((rnn_out, out))

    assert rnn_out.shape == (B * S, 256), rnn_out.shape
    assert out.shape == (B * S, 64), out.shape
    assert bool(jnp.all(jnp.isfinite(rnn_out))) and bool(jnp.all(jnp.isfinite(out)))
    print("KERNEL_OK")
</pallas_src>

<mosaic_0001>
module attributes {stable_mosaic.version = 11 : i64} {
  func.func @kernel(%arg0: memref<96x24xf32, #tpu.memory_space<vmem>>, %arg1: memref<24x88xbf16, #tpu.memory_space<vmem>>, %arg2: memref<1x88xf32, #tpu.memory_space<vmem>>, %arg3: memref<1x88xf32, #tpu.memory_space<vmem>>, %arg4: memref<88x160xbf16, #tpu.memory_space<vmem>>, %arg5: memref<1x160xf32, #tpu.memory_space<vmem>>, %arg6: memref<1x160xf32, #tpu.memory_space<vmem>>, %arg7: memref<160x128xbf16, #tpu.memory_space<vmem>>, %arg8: memref<1x64xf32, #tpu.memory_space<vmem>>, %arg9: memref<1x64xf32, #tpu.memory_space<vmem>>, %arg10: memref<96x64xf32, #tpu.memory_space<vmem>>) attributes {dimension_semantics = [], scalar_prefetch = 0 : i64, scratch_operands = 0 : i64, tpu.core_type = #tpu.core_type<tc>} {
    %c0 = arith.constant 0 : index
    %c0_0 = arith.constant 0 : index
    %0 = vector.load %arg0[%c0, %c0_0] : memref<96x24xf32, #tpu.memory_space<vmem>>, vector<96x24xf32>
    %c0_1 = arith.constant 0 : index
    %c0_2 = arith.constant 0 : index
    %1 = vector.load %arg1[%c0_1, %c0_2] : memref<24x88xbf16, #tpu.memory_space<vmem>>, vector<24x88xbf16>
    %c0_3 = arith.constant 0 : index
    %c0_4 = arith.constant 0 : index
    %2 = vector.load %arg2[%c0_3, %c0_4] : memref<1x88xf32, #tpu.memory_space<vmem>>, vector<1x88xf32>
    %c0_5 = arith.constant 0 : index
    %c0_6 = arith.constant 0 : index
    %3 = vector.load %arg3[%c0_5, %c0_6] : memref<1x88xf32, #tpu.memory_space<vmem>>, vector<1x88xf32>
    %4 = arith.truncf %0 : vector<96x24xf32> to vector<96x24xbf16>
    %cst = arith.constant dense<0.000000e+00> : vector<96x88xf32>
    %5 = tpu.matmul %4, %1, %cst {dimension_numbers = #tpu.dot_dimension_numbers<[1], [0], [0], [1], [0, 0, 1, 1], [], []>} : vector<96x24xbf16>, vector<24x88xbf16>, vector<96x88xf32> -> vector<96x88xf32>
    %6 = vector.broadcast %2 : vector<1x88xf32> to vector<96x88xf32>
    %7 = arith.mulf %5, %6 : vector<96x88xf32>
    %8 = vector.broadcast %3 : vector<1x88xf32> to vector<96x88xf32>
    %9 = arith.addf %7, %8 : vector<96x88xf32>
    %cst_7 = arith.constant 0.000000e+00 : f32
    %10 = vector.broadcast %cst_7 : f32 to vector<96x88xf32>
    %11 = arith.cmpf ogt, %9, %10 : vector<96x88xf32>
    %cst_8 = arith.constant 2.000000e-01 : f32
    %12 = vector.broadcast %cst_8 : f32 to vector<96x88xf32>
    %13 = arith.mulf %12, %9 : vector<96x88xf32>
    %14 = arith.select %11, %9, %13 : vector<96x88xi1>, vector<96x88xf32>
    %c0_9 = arith.constant 0 : index
    %c0_10 = arith.constant 0 : index
    %15 = vector.load %arg4[%c0_9, %c0_10] : memref<88x160xbf16, #tpu.memory_space<vmem>>, vector<88x160xbf16>
    %c0_11 = arith.constant 0 : index
    %c0_12 = arith.constant 0 : index
    %16 = vector.load %arg5[%c0_11, %c0_12] : memref<1x160xf32, #tpu.memory_space<vmem>>, vector<1x160xf32>
    %c0_13 = arith.constant 0 : index
    %c0_14 = arith.constant 0 : index
    %17 = vector.load %arg6[%c0_13, %c0_14] : memref<1x160xf32, #tpu.memory_space<vmem>>, vector<1x160xf32>
    %18 = arith.truncf %14 : vector<96x88xf32> to vector<96x88xbf16>
    %cst_15 = arith.constant dense<0.000000e+00> : vector<96x160xf32>
    %19 = tpu.matmul %18, %15, %cst_15 {dimension_numbers = #tpu.dot_dimension_numbers<[1], [0], [0], [1], [0, 0, 1, 1], [], []>} : vector<96x88xbf16>, vector<88x160xbf16>, vector<96x160xf32> -> vector<96x160xf32>
    %20 = vector.broadcast %16 : vector<1x160xf32> to vector<96x160xf32>
    %21 = arith.mulf %19, %20 : vector<96x160xf32>
    %22 = vector.broadcast %17 : vector<1x160xf32> to vector<96x160xf32>
    %23 = arith.addf %21, %22 : vector<96x160xf32>
    %cst_16 = arith.constant 0.000000e+00 : f32
    %24 = vector.broadcast %cst_16 : f32 to vector<96x160xf32>
    %25 = arith.cmpf ogt, %23, %24 : vector<96x160xf32>
    %cst_17 = arith.constant 2.000000e-01 : f32
    %26 = vector.broadcast %cst_17 : f32 to vector<96x160xf32>
    %27 = arith.mulf %26, %23 : vector<96x160xf32>
    %28 = arith.select %25, %23, %27 : vector<96x160xi1>, vector<96x160xf32>
    %c0_18 = arith.constant 0 : index
    %c0_19 = arith.constant 0 : index
    %29 = vector.load %arg7[%c0_18, %c0_19] : memref<160x128xbf16, #tpu.memory_space<vmem>>, vector<160x128xbf16>
    %c0_20 = arith.constant 0 : index
    %c0_21 = arith.constant 0 : index
    %30 = vector.load %arg8[%c0_20, %c0_21] : memref<1x64xf32, #tpu.memory_space<vmem>>, vector<1x64xf32>
    %c0_22 = arith.constant 0 : index
    %c0_23 = arith.constant 0 : index
    %31 = vector.load %arg9[%c0_22, %c0_23] : memref<1x64xf32, #tpu.memory_space<vmem>>, vector<1x64xf32>
    %32 = arith.truncf %28 : vector<96x160xf32> to vector<96x160xbf16>
    %cst_24 = arith.constant dense<0.000000e+00> : vector<96x128xf32>
    %33 = tpu.matmul %32, %29, %cst_24 {dimension_numbers = #tpu.dot_dimension_numbers<[1], [0], [0], [1], [0, 0, 1, 1], [], []>} : vector<96x160xbf16>, vector<160x128xbf16>, vector<96x128xf32> -> vector<96x128xf32>
    %34 = vector.extract_strided_slice %33 {offsets = [0, 0], sizes = [96, 64], strides = [1, 1]} : vector<96x128xf32> to vector<96x64xf32>
    %35 = vector.extract_strided_slice %33 {offsets = [0, 64], sizes = [96, 64], strides = [1, 1]} : vector<96x128xf32> to vector<96x64xf32>
    %36 = arith.maximumf %34, %35 : vector<96x64xf32>
    %37 = vector.broadcast %30 : vector<1x64xf32> to vector<96x64xf32>
    %38 = arith.mulf %36, %37 : vector<96x64xf32>
    %39 = vector.broadcast %31 : vector<1x64xf32> to vector<96x64xf32>
    %40 = arith.addf %38, %39 : vector<96x64xf32>
    %cst_25 = arith.constant 0.000000e+00 : f32
    %41 = vector.broadcast %cst_25 : f32 to vector<96x64xf32>
    %42 = arith.cmpf ogt, %40, %41 : vector<96x64xf32>
    %cst_26 = arith.constant 2.000000e-01 : f32
    %43 = vector.broadcast %cst_26 : f32 to vector<96x64xf32>
    %44 = arith.mulf %43, %40 : vector<96x64xf32>
    %45 = arith.select %42, %40, %44 : vector<96x64xi1>, vector<96x64xf32>
    %c0_27 = arith.constant 0 : index
    %c0_28 = arith.constant 0 : index
    %46 = vector.load %arg10[%c0_27, %c0_28] : memref<96x64xf32, #tpu.memory_space<vmem>>, vector<96x64xf32>
    tpu.vector_store %arg10[%c0_27, %c0_28], %45 {strides = array<i32>} : memref<96x64xf32, #tpu.memory_space<vmem>>, vector<96x64xf32>,
    return
  }
}

module attributes {stable_mosaic.version = 11 : i64} {
  func.func @kernel(%arg0: memref<8x768xf32, #tpu.memory_space<vmem>>, %arg1: memref<768x640xbf16, #tpu.memory_space<vmem>>, %arg2: memref<1x640xf32, #tpu.memory_space<vmem>>, %arg3: memref<1x640xf32, #tpu.memory_space<vmem>>, %arg4: memref<640x512xbf16, #tpu.memory_space<vmem>>, %arg5: memref<1x256xf32, #tpu.memory_space<vmem>>, %arg6: memref<1x256xf32, #tpu.memory_space<vmem>>, %arg7: memref<256x512xbf16, #tpu.memory_space<vmem>>, %arg8: memref<256x512xbf16, #tpu.memory_space<vmem>>, %arg9: memref<128x1024xbf16, #tpu.memory_space<vmem>>, %arg10: memref<1x512xf32, #tpu.memory_space<vmem>>, %arg11: memref<1x512xf32, #tpu.memory_space<vmem>>, %arg12: memref<256x512xbf16, #tpu.memory_space<vmem>>, %arg13: memref<256x512xbf16, #tpu.memory_space<vmem>>, %arg14: memref<128x1024xbf16, #tpu.memory_space<vmem>>, %arg15: memref<1x512xf32, #tpu.memory_space<vmem>>, %arg16: memref<1x512xf32, #tpu.memory_space<vmem>>, %arg17: memref<256x128xbf16, #tpu.memory_space<vmem>>, %arg18: memref<1x128xf32, #tpu.memory_space<vmem>>, %arg19: memref<128x64xbf16, #tpu.memory_space<vmem>>, %arg20: memref<1x64xf32, #tpu.memory_space<vmem>>, %arg21: memref<8x256xf32, #tpu.memory_space<vmem>>, %arg22: memref<8x64xf32, #tpu.memory_space<vmem>>, %arg23: memref<8x256xf32, #tpu.memory_space<vmem>>, %arg24: memref<16x512xf32, #tpu.memory_space<vmem>>) attributes {dimension_semantics = [], scalar_prefetch = 0 : i64, scratch_operands = 2 : i64, tpu.core_type = #tpu.core_type<tc>} {
    %0 = tpu.iota {dimensions = array<i32: 0>} : vector<4x512xi32>
    %c2_i32 = arith.constant 2 : i32
    %1 = vector.broadcast %c2_i32 : i32 to vector<4x512xi32>
    %2 = arith.cmpi slt, %0, %1 : vector<4x512xi32>
    %c0 = arith.constant 0 : index
    %c0_0 = arith.constant 0 : index
    %3 = vector.load %arg0[%c0, %c0_0] : memref<8x768xf32, #tpu.memory_space<vmem>>, vector<8x768xf32>
    %c0_1 = arith.constant 0 : index
    %c0_2 = arith.constant 0 : index
    %4 = vector.load %arg1[%c0_1, %c0_2] : memref<768x640xbf16, #tpu.memory_space<vmem>>, vector<768x640xbf16>
    %c0_3 = arith.constant 0 : index
    %c0_4 = arith.constant 0 : index
    %5 = vector.load %arg2[%c0_3, %c0_4] : memref<1x640xf32, #tpu.memory_space<vmem>>, vector<1x640xf32>
    %c0_5 = arith.constant 0 : index
    %c0_6 = arith.constant 0 : index
    %6 = vector.load %arg3[%c0_5, %c0_6] : memref<1x640xf32, #tpu.memory_space<vmem>>, vector<1x640xf32>
    %7 = arith.truncf %3 : vector<8x768xf32> to vector<8x768xbf16>
    %cst = arith.constant dense<0.000000e+00> : vector<8x640xf32>
    %8 = tpu.matmul %7, %4, %cst {dimension_numbers = #tpu.dot_dimension_numbers<[1], [0], [0], [1], [0, 0, 1, 1], [], []>} : vector<8x768xbf16>, vector<768x640xbf16>, vector<8x640xf32> -> vector<8x640xf32>
    %9 = vector.broadcast %5 : vector<1x640xf32> to vector<8x640xf32>
    %10 = arith.mulf %8, %9 : vector<8x640xf32>
    %11 = vector.broadcast %6 : vector<1x640xf32> to vector<8x640xf32>
    %12 = arith.addf %10, %11 : vector<8x640xf32>
    %cst_7 = arith.constant 0.000000e+00 : f32
    %13 = vector.broadcast %cst_7 : f32 to vector<8x640xf32>
    %14 = arith.cmpf ogt, %12, %13 : vector<8x640xf32>
    %cst_8 = arith.constant 2.000000e-01 : f32
    %15 = vector.broadcast %cst_8 : f32 to vector<8x640xf32>
    %16 = arith.mulf %15, %12 : vector<8x640xf32>
    %17 = arith.select %14, %12, %16 : vector<8x640xi1>, vector<8x640xf32>
    %c0_9 = arith.constant 0 : index
    %c0_10 = arith.constant 0 : index
    %18 = vector.load %arg4[%c0_9, %c0_10] : memref<640x512xbf16, #tpu.memory_space<vmem>>, vector<640x512xbf16>
    %c0_11 = arith.constant 0 : index
    %c0_12 = arith.constant 0 : index
    %19 = vector.load %arg5[%c0_11, %c0_12] : memref<1x256xf32, #tpu.memory_space<vmem>>, vector<1x256xf32>
    %c0_13 = arith.constant 0 : index
    %c0_14 = arith.constant 0 : index
    %20 = vector.load %arg6[%c0_13, %c0_14] : memref<1x256xf32, #tpu.memory_space<vmem>>, vector<1x256xf32>
    %21 = arith.truncf %17 : vector<8x640xf32> to vector<8x640xbf16>
    %cst_15 = arith.constant dense<0.000000e+00> : vector<8x512xf32>
    %22 = tpu.matmul %21, %18, %cst_15 {dimension_numbers = #tpu.dot_dimension_numbers<[1], [0], [0], [1], [0, 0, 1, 1], [], []>} : vector<8x640xbf16>, vector<640x512xbf16>, vector<8x512xf32> -> vector<8x512xf32>
    %23 = vector.extract_strided_slice %22 {offsets = [0, 0], sizes = [8, 256], strides = [1, 1]} : vector<8x512xf32> to vector<8x256xf32>
    %24 = vector.extract_strided_slice %22 {offsets = [0, 256], sizes = [8, 256], strides = [1, 1]} : vector<8x512xf32> to vector<8x256xf32>
    %25 = arith.maximumf %23, %24 : vector<8x256xf32>
    %26 = vector.broadcast %19 : vector<1x256xf32> to vector<8x256xf32>
    %27 = arith.mulf %25, %26 : vector<8x256xf32>
    %28 = vector.broadcast %20 : vector<1x256xf32> to vector<8x256xf32>
    %29 = arith.addf %27, %28 : vector<8x256xf32>
    %cst_16 = arith.constant 0.000000e+00 : f32
    %30 = vector.broadcast %cst_16 : f32 to vector<8x256xf32>
    %31 = arith.cmpf ogt, %29, %30 : vector<8x256xf32>
    %cst_17 = arith.constant 2.000000e-01 : f32
    %32 = vector.broadcast %cst_17 : f32 to vector<8x256xf32>
    %33 = arith.mulf %32, %29 : vector<8x256xf32>
    %34 = arith.select %31, %29, %33 : vector<8x256xi1>, vector<8x256xf32>
    %c0_18 = arith.constant 0 : index
    %c0_19 = arith.constant 0 : index
    %35 = vector.load %arg7[%c0_18, %c0_19] : memref<256x512xbf16, #tpu.memory_space<vmem>>, vector<256x512xbf16>
    %c0_20 = arith.constant 0 : index
    %c0_21 = arith.constant 0 : index
    %36 = vector.load %arg8[%c0_20, %c0_21] : memref<256x512xbf16, #tpu.memory_space<vmem>>, vector<256x512xbf16>
    %c0_22 = arith.constant 0 : index
    %c0_23 = arith.constant 0 : index
    %37 = vector.load %arg9[%c0_22, %c0_23] : memref<128x1024xbf16, #tpu.memory_space<vmem>>, vector<128x1024xbf16>
    %c0_24 = arith.constant 0 : index
    %c0_25 = arith.constant 0 : index
    %38 = vector.load %arg10[%c0_24, %c0_25] : memref<1x512xf32, #tpu.memory_space<vmem>>, vector<1x512xf32>
    %c0_26 = arith.constant 0 : index
    %c0_27 = arith.constant 0 : index
    %39 = vector.load %arg11[%c0_26, %c0_27] : memref<1x512xf32, #tpu.memory_space<vmem>>, vector<1x512xf32>
    %40 = arith.truncf %34 : vector<8x256xf32> to vector<8x256xbf16>
    %cst_28 = arith.constant dense<0.000000e+00> : vector<8x512xf32>
    %41 = tpu.matmul %40, %35, %cst_28 {dimension_numbers = #tpu.dot_dimension_numbers<[1], [0], [0], [1], [0, 0, 1, 1], [], []>} : vector<8x256xbf16>, vector<256x512xbf16>, vector<8x512xf32> -> vector<8x512xf32>
    %42 = vector.broadcast %38 : vector<1x512xf32> to vector<8x512xf32>
    %43 = arith.addf %41, %42 : vector<8x512xf32>
    %44 = arith.truncf %34 : vector<8x256xf32> to vector<8x256xbf16>
    %cst_29 = arith.constant dense<0.000000e+00> : vector<8x512xf32>
    %45 = tpu.matmul %44, %36, %cst_29 {dimension_numbers = #tpu.dot_dimension_numbers<[1], [0], [0], [1], [0, 0, 1, 1], [], []>} : vector<8x256xbf16>, vector<256x512xbf16>, vector<8x512xf32> -> vector<8x512xf32>
    %46 = vector.broadcast %39 : vector<1x512xf32> to vector<8x512xf32>
    %47 = arith.addf %45, %46 : vector<8x512xf32>
    %48 = vector.extract_strided_slice %43 {offsets = [0, 0], sizes = [2, 512], strides = [1, 1]} : vector<8x512xf32> to vector<2x512xf32>
    %c0_30 = arith.constant 0 : index
    %c0_31 = arith.constant 0 : index
    %49 = vector.load %arg24[%c0_30, %c0_31] : memref<16x512xf32, #tpu.memory_space<vmem>>, vector<2x512xf32>
    tpu.vector_store %arg24[%c0_30, %c0_31], %48 {strides = array<i32>} : memref<16x512xf32, #tpu.memory_space<vmem>>, vector<2x512xf32>,
    %50 = vector.extract_strided_slice %47 {offsets = [6, 0], sizes = [2, 512], strides = [1, 1]} : vector<8x512xf32> to vector<2x512xf32>
    %c2 = arith.constant 2 : index
    %c0_32 = arith.constant 0 : index
    %51 = vector.load %arg24[%c2, %c0_32] : memref<16x512xf32, #tpu.memory_space<vmem>>, vector<2x512xf32>
    tpu.vector_store %arg24[%c2, %c0_32], %50 {strides = array<i32>} : memref<16x512xf32, #tpu.memory_space<vmem>>, vector<2x512xf32>,
    %52 = vector.extract_strided_slice %43 {offsets = [2, 0], sizes = [2, 512], strides = [1, 1]} : vector<8x512xf32> to vector<2x512xf32>
    %c4 = arith.constant 4 : index
    %c0_33 = arith.constant 0 : index
    %53 = vector.load %arg24[%c4, %c0_33] : memref<16x512xf32, #tpu.memory_space<vmem>>, vector<2x512xf32>
    tpu.vector_store %arg24[%c4, %c0_33], %52 {strides = array<i32>} : memref<16x512xf32, #tpu.memory_space<vmem>>, vector<2x512xf32>,
    %54 = vector.extract_strided_slice %47 {offsets = [4, 0], sizes = [2, 512], strides = [1, 1]} : vector<8x512xf32> to vector<2x512xf32>
    %c6 = arith.constant 6 : index
    %c0_34 = arith.constant 0 : index
    %55 = vector.load %arg24[%c6, %c0_34] : memref<16x512xf32, #tpu.memory_space<vmem>>, vector<2x512xf32>
    tpu.vector_store %arg24[%c6, %c0_34], %54 {strides = array<i32>} : memref<16x512xf32, #tpu.memory_space<vmem>>, vector<2x512xf32>,
    %56 = vector.extract_strided_slice %43 {offsets = [4, 0], sizes = [2, 512], strides = [1, 1]} : vector<8x512xf32> to vector<2x512xf32>
    %c8 = arith.constant 8 : index
    %c0_35 = arith.constant 0 : index
    %57 = vector.load %arg24[%c8, %c0_35] : memref<16x512xf32, #tpu.memory_space<vmem>>, vector<2x512xf32>
    tpu.vector_store %arg24[%c8, %c0_35], %56 {strides = array<i32>} : memref<16x512xf32, #tpu.memory_space<vmem>>, vector<2x512xf32>,
    %58 = vector.extract_strided_slice %47 {offsets = [2, 0], sizes = [2, 512], strides = [1, 1]} : vector<8x512xf32> to vector<2x512xf32>
    %c10 = arith.constant 10 : index
    %c0_36 = arith.constant 0 : index
    %59 = vector.load %arg24[%c10, %c0_36] : memref<16x512xf32, #tpu.memory_space<vmem>>, vector<2x512xf32>
    tpu.vector_store %arg24[%c10, %c0_36], %58 {strides = array<i32>} : memref<16x512xf32, #tpu.memory_space<vmem>>, vector<2x512xf32>,
    %60 = vector.extract_strided_slice %43 {offsets = [6, 0], sizes = [2, 512], strides = [1, 1]} : vector<8x512xf32> to vector<2x512xf32>
    %c12 = arith.constant 12 : index
    %c0_37 = arith.constant 0 : index
    %61 = vector.load %arg24[%c12, %c0_37] : memref<16x512xf32, #tpu.memory_space<vmem>>, vector<2x512xf32>
    tpu.vector_store %arg24[%c12, %c0_37], %60 {strides = array<i32>} : memref<16x512xf32, #tpu.memory_space<vmem>>, vector<2x512xf32>,
    %62 = vector.extract_strided_slice %47 {offsets = [0, 0], sizes = [2, 512], strides = [1, 1]} : vector<8x512xf32> to vector<2x512xf32>
    %c14 = arith.constant 14 : index
    %c0_38 = arith.constant 0 : index
    %63 = vector.load %arg24[%c14, %c0_38] : memref<16x512xf32, #tpu.memory_space<vmem>>, vector<2x512xf32>
    tpu.vector_store %arg24[%c14, %c0_38], %62 {strides = array<i32>} : memref<16x512xf32, #tpu.memory_space<vmem>>, vector<2x512xf32>,
    %cst_39 = arith.constant 0.000000e+00 : f32
    %64 = vector.broadcast %cst_39 : f32 to vector<4x128xf32>
    %cst_40 = arith.constant 0.000000e+00 : f32
    %65 = vector.broadcast %cst_40 : f32 to vector<4x128xf32>
    %66 = arith.truncf %64 : vector<4x128xf32> to vector<4x128xbf16>
    %cst_41 = arith.constant dense<0.000000e+00> : vector<4x1024xf32>
    %67 = tpu.matmul %66, %37, %cst_41 {dimension_numbers = #tpu.dot_dimension_numbers<[1], [0], [0], [1], [0, 0, 1, 1], [], []>} : vector<4x128xbf16>, vector<128x1024xbf16>, vector<4x1024xf32> -> vector<4x1024xf32>
    %68 = vector.extract_strided_slice %67 {offsets = [0, 0], sizes = [4, 512], strides = [1, 1]} : vector<4x1024xf32> to vector<4x512xf32>
    %69 = vector.extract_strided_slice %67 {offsets = [0, 512], sizes = [4, 512], strides = [1, 1]} : vector<4x1024xf32> to vector<4x512xf32>
    %70 = arith.select %2, %68, %69 : vector<4x512xi1>, vector<4x512xf32>
    %c0_42 = arith.constant 0 : index
    %c0_43 = arith.constant 0 : index
    %71 = vector.load %arg24[%c0_42, %c0_43] : memref<16x512xf32, #tpu.memory_space<vmem>>, vector<4x512xf32>
    %72 = arith.addf %71, %70 : vector<4x512xf32>
    %73 = vector.extract_strided_slice %72 {offsets = [0, 0], sizes = [4, 128], strides = [1, 1]} : vector<4x512xf32> to vector<4x128xf32>
    %74 = arith.negf %73 : vector<4x128xf32>
    %75 = math.exp %74 : vector<4x128xf32>
    %cst_44 = arith.constant 1.000000e+00 : f32
    %76 = vector.broadcast %cst_44 : f32 to vector<4x128xf32>
    %77 = arith.addf %76, %75 : vector<4x128xf32>
    %78 = arith.divf %76, %77 : vector<4x128xf32>
    %79 = vector.extract_strided_slice %72 {offsets = [0, 128], sizes = [4, 128], strides = [1, 1]} : vector<4x512xf32> to vector<4x128xf32>
    %80 = arith.negf %79 : vector<4x128xf32>
    %81 = math.exp %80 : vector<4x128xf32>
    %cst_45 = arith.constant 1.000000e+00 : f32
    %82 = vector.broadcast %cst_45 : f32 to vector<4x128xf32>
    %83 = arith.addf %82, %81 : vector<4x128xf32>
    %84 = arith.divf %82, %83 : vector<4x128xf32>
    %85 = vector.extract_strided_slice %72 {offsets = [0, 256], sizes = [4, 128], strides = [1, 1]} : vector<4x512xf32> to vector<4x128xf32>
    %86 = math.tanh %85 : vector<4x128xf32>
    %87 = vector.extract_strided_slice %72 {offsets = [0, 384], sizes = [4, 128], strides = [1, 1]} : vector<4x512xf32> to vector<4x128xf32>
    %88 = arith.negf %87 : vector<4x128xf32>
    %89 = math.exp %88 : vector<4x128xf32>
    %cst_46 = arith.constant 1.000000e+00 : f32
    %90 = vector.broadcast %cst_46 : f32 to vector<4x128xf32>
    %91 = arith.addf %90, %89 : vector<4x128xf32>
    %92 = arith.divf %90, %91 : vector<4x128xf32>
    %93 = arith.mulf %84, %65 : vector<4x128xf32>
    %94 = arith.mulf %78, %86 : vector<4x128xf32>
    %95 = arith.addf %93, %94 : vector<4x128xf32>
    %96 = math.tanh %95 : vector<4x128xf32>
    %97 = arith.mulf %92, %96 : vector<4x128xf32>
    %98 = vector.extract_strided_slice %97 {offsets = [0, 0], sizes = [2, 128], strides = [1, 1]} : vector<4x128xf32> to vector<2x128xf32>
    %c0_47 = arith.constant 0 : index
    %c0_48 = arith.constant 0 : index
    %99 = vector.load %arg23[%c0_47, %c0_48] : memref<8x256xf32, #tpu.memory_space<vmem>>, vector<2x128xf32>
    tpu.vector_store %arg23[%c0_47, %c0_48], %98 {strides = array<i32>} : memref<8x256xf32, #tpu.memory_space<vmem>>, vector<2x128xf32>,
    %100 = vector.extract_strided_slice %97 {offsets = [2, 0], sizes = [2, 128], strides = [1, 1]} : vector<4x128xf32> to vector<2x128xf32>
    %c6_49 = arith.constant 6 : index
    %c128 = arith.constant 128 : index
    %101 = vector.load %arg23[%c6_49, %c128] : memref<8x256xf32, #tpu.memory_space<vmem>>, vector<2x128xf32>
    tpu.vector_store %arg23[%c6_49, %c128], %100 {strides = array<i32>} : memref<8x256xf32, #tpu.memory_space<vmem>>, vector<2x128xf32>,
    %102 = arith.truncf %97 : vector<4x128xf32> to vector<4x128xbf16>
    %cst_50 = arith.constant dense<0.000000e+00> : vector<4x1024xf32>
    %103 = tpu.matmul %102, %37, %cst_50 {dimension_numbers = #tpu.dot_dimension_numbers<[1], [0], [0], [1], [0, 0, 1, 1], [], []>} : vector<4x128xbf16>, vector<128x1024xbf16>, vector<4x1024xf32> -> vector<4x1024xf32>
    %104 = vector.extract_strided_slice %103 {offsets = [0, 0], sizes = [4, 512], strides = [1, 1]} : vector<4x1024xf32> to vector<4x512xf32>
    %105 = vector.extract_strided_slice %103 {offsets = [0, 512], sizes = [4, 512], strides = [1, 1]} : vector<4x1024xf32> to vector<4x512xf32>
    %106 = arith.select %2, %104, %105 : vector<4x512xi1>, vector<4x512xf32>
    %c4_51 = arith.constant 4 : index
    %c0_52 = arith.constant 0 : index
    %107 = vector.load %arg24[%c4_51, %c0_52] : memref<16x512xf32, #tpu.memory_space<vmem>>, vector<4x512xf32>
    %108 = arith.addf %107, %106 : vector<4x512xf32>
    %109 = vector.extract_strided_slice %108 {offsets = [0, 0], sizes = [4, 128], strides = [1, 1]} : vector<4x512xf32> to vector<4x128xf32>
    %110 = arith.negf %109 : vector<4x128xf32>
    %111 = math.exp %110 : vector<4x128xf32>
    %cst_53 = arith.constant 1.000000e+00 : f32
    %112 = vector.broadcast %cst_53 : f32 to vector<4x128xf32>
    %113 = arith.addf %112, %111 : vector<4x128xf32>
    %114 = arith.divf %112, %113 : vector<4x128xf32>
    %115 = vector.extract_strided_slice %108 {offsets = [0, 128], sizes = [4, 128], strides = [1, 1]} : vector<4x512xf32> to vector<4x128xf32>
    %116 = arith.negf %115 : vector<4x128xf32>
    %117 = math.exp %116 : vector<4x128xf32>
    %cst_54 = arith.constant 1.000000e+00 : f32
    %118 = vector.broadcast %cst_54 : f32 to vector<4x128xf32>
    %119 = arith.addf %118, %117 : vector<4x128xf32>
    %120 = arith.divf %118, %119 : vector<4x128xf32>
    %121 = vector.extract_strided_slice %108 {offsets = [0, 256], sizes = [4, 128], strides = [1, 1]} : vector<4x512xf32> to vector<4x128xf32>
    %122 = math.tanh %121 : vector<4x128xf32>
    %123 = vector.extract_strided_slice %108 {offsets = [0, 384], sizes = [4, 128], strides = [1, 1]} : vector<4x512xf32> to vector<4x128xf32>
    %124 = arith.negf %123 : vector<4x128xf32>
    %125 = math.exp %124 : vector<4x128xf32>
    %cst_55 = arith.constant 1.000000e+00 : f32
    %126 = vector.broadcast %cst_55 : f32 to vector<4x128xf32>
    %127 = arith.addf %126, %125 : vector<4x128xf32>
    %128 = arith.divf %126, %127 : vector<4x128xf32>
    %129 = arith.mulf %120, %95 : vector<4x128xf32>
    %130 = arith.mulf %114, %122 : vector<4x128xf32>
    %131 = arith.addf %129, %130 : vector<4x128xf32>
    %132 = math.tanh %131 : vector<4x128xf32>
    %133 = arith.mulf %128, %132 : vector<4x128xf32>
    %134 = vector.extract_strided_slice %133 {offsets = [0, 0], sizes = [2, 128], strides = [1, 1]} : vector<4x128xf32> to vector<2x128xf32>
    %c2_56 = arith.constant 2 : index
    %c0_57 = arith.constant 0 : index
    %135 = vector.load %arg23[%c2_56, %c0_57] : memref<8x256xf32, #tpu.memory_space<vmem>>, vector<2x128xf32>
    tpu.vector_store %arg23[%c2_56, %c0_57], %134 {strides = array<i32>} : memref<8x256xf32, #tpu.memory_space<vmem>>, vector<2x128xf32>,
    %136 = vector.extract_strided_slice %133 {offsets = [2, 0], sizes = [2, 128], strides = [1, 1]} : vector<4x128xf32> to vector<2x128xf32>
    %c4_58 = arith.constant 4 : index
    %c128_59 = arith.constant 128 : index
    %137 = vector.load %arg23[%c4_58, %c128_59] : memref<8x256xf32, #tpu.memory_space<vmem>>, vector<2x128xf32>
    tpu.vector_store %arg23[%c4_58, %c128_59], %136 {strides = array<i32>} : memref<8x256xf32, #tpu.memory_space<vmem>>, vector<2x128xf32>,
    %138 = arith.truncf %133 : vector<4x128xf32> to vector<4x128xbf16>
    %cst_60 = arith.constant dense<0.000000e+00> : vector<4x1024xf32>
    %139 = tpu.matmul %138, %37, %cst_60 {dimension_numbers = #tpu.dot_dimension_numbers<[1], [0], [0], [1], [0, 0, 1, 1], [], []>} : vector<4x128xbf16>, vector<128x1024xbf16>, vector<4x1024xf32> -> vector<4x1024xf32>
    %140 = vector.extract_strided_slice %139 {offsets = [0, 0], sizes = [4, 512], strides = [1, 1]} : vector<4x1024xf32> to vector<4x512xf32>
    %141 = vector.extract_strided_slice %139 {offsets = [0, 512], sizes = [4, 512], strides = [1, 1]} : vector<4x1024xf32> to vector<4x512xf32>
    %142 = arith.select %2, %140, %141 : vector<4x512xi1>, vector<4x512xf32>
    %c8_61 = arith.constant 8 : index
    %c0_62 = arith.constant 0 : index
    %143 = vector.load %arg24[%c8_61, %c0_62] : memref<16x512xf32, #tpu.memory_space<vmem>>, vector<4x512xf32>
    %144 = arith.addf %143, %142 : vector<4x512xf32>
    %145 = vector.extract_strided_slice %144 {offsets = [0, 0], sizes = [4, 128], strides = [1, 1]} : vector<4x512xf32> to vector<4x128xf32>
    %146 = arith.negf %145 : vector<4x128xf32>
    %147 = math.exp %146 : vector<4x128xf32>
    %cst_63 = arith.constant 1.000000e+00 : f32
    %148 = vector.broadcast %cst_63 : f32 to vector<4x128xf32>
    %149 = arith.addf %148, %147 : vector<4x128xf32>
    %150 = arith.divf %148, %149 : vector<4x128xf32>
    %151 = vector.extract_strided_slice %144 {offsets = [0, 128], sizes = [4, 128], strides = [1, 1]} : vector<4x512xf32> to vector<4x128xf32>
    %152 = arith.negf %151 : vector<4x128xf32>
    %153 = math.exp %152 : vector<4x128xf32>
    %cst_64 = arith.constant 1.000000e+00 : f32
    %154 = vector.broadcast %cst_64 : f32 to vector<4x128xf32>
    %155 = arith.addf %154, %153 : vector<4x128xf32>
    %156 = arith.divf %154, %155 : vector<4x128xf32>
    %157 = vector.extract_strided_slice %144 {offsets = [0, 256], sizes = [4, 128], strides = [1, 1]} : vector<4x512xf32> to vector<4x128xf32>
    %158 = math.tanh %157 : vector<4x128xf32>
    %159 = vector.extract_strided_slice %144 {offsets = [0, 384], sizes = [4, 128], strides = [1, 1]} : vector<4x512xf32> to vector<4x128xf32>
    %160 = arith.negf %159 : vector<4x128xf32>
    %161 = math.exp %160 : vector<4x128xf32>
    %cst_65 = arith.constant 1.000000e+00 : f32
    %162 = vector.broadcast %cst_65 : f32 to vector<4x128xf32>
    %163 = arith.addf %162, %161 : vector<4x128xf32>
    %164 = arith.divf %162, %163 : vector<4x128xf32>
    %165 = arith.mulf %156, %131 : vector<4x128xf32>
    %166 = arith.mulf %150, %158 : vector<4x128xf32>
    %167 = arith.addf %165, %166 : vector<4x128xf32>
    %168 = math.tanh %167 : vector<4x128xf32>
    %169 = arith.mulf %164, %168 : vector<4x128xf32>
    %170 = vector.extract_strided_slice %169 {offsets = [0, 0], sizes = [2, 128], strides = [1, 1]} : vector<4x128xf32> to vector<2x128xf32>
    %c4_66 = arith.constant 4 : index
    %c0_67 = arith.constant 0 : index
    %171 = vector.load %arg23[%c4_66, %c0_67] : memref<8x256xf32, #tpu.memory_space<vmem>>, vector<2x128xf32>
    tpu.vector_store %arg23[%c4_66, %c0_67], %170 {strides = array<i32>} : memref<8x256xf32, #tpu.memory_space<vmem>>, vector<2x128xf32>,
    %172 = vector.extract_strided_slice %169 {offsets = [2, 0], sizes = [2, 128], strides = [1, 1]} : vector<4x128xf32> to vector<2x128xf32>
    %c2_68 = arith.constant 2 : index
    %c128_69 = arith.constant 128 : index
    %173 = vector.load %arg23[%c2_68, %c128_69] : memref<8x256xf32, #tpu.memory_space<vmem>>, vector<2x128xf32>
    tpu.vector_store %arg23[%c2_68, %c128_69], %172 {strides = array<i32>} : memref<8x256xf32, #tpu.memory_space<vmem>>, vector<2x128xf32>,
    %174 = arith.truncf %169 : vector<4x128xf32> to vector<4x128xbf16>
    %cst_70 = arith.constant dense<0.000000e+00> : vector<4x1024xf32>
    %175 = tpu.matmul %174, %37, %cst_70 {dimension_numbers = #tpu.dot_dimension_numbers<[1], [0], [0], [1], [0, 0, 1, 1], [], []>} : vector<4x128xbf16>, vector<128x1024xbf16>, vector<4x1024xf32> -> vector<4x1024xf32>
    %176 = vector.extract_strided_slice %175 {offsets = [0, 0], sizes = [4, 512], strides = [1, 1]} : vector<4x1024xf32> to vector<4x512xf32>
    %177 = vector.extract_strided_slice %175 {offsets = [0, 512], sizes = [4, 512], strides = [1, 1]} : vector<4x1024xf32> to vector<4x512xf32>
    %178 = arith.select %2, %176, %177 : vector<4x512xi1>, vector<4x512xf32>
    %c12_71 = arith.constant 12 : index
    %c0_72 = arith.constant 0 : index
    %179 = vector.load %arg24[%c12_71, %c0_72] : memref<16x512xf32, #tpu.memory_space<vmem>>, vector<4x512xf32>
    %180 = arith.addf %179, %178 : vector<4x512xf32>
    %181 = vector.extract_strided_slice %180 {offsets = [0, 0], sizes = [4, 128], strides = [1, 1]} : vector<4x512xf32> to vector<4x128xf32>
    %182 = arith.negf %181 : vector<4x128xf32>
    %183 = math.exp %182 : vector<4x128xf32>
    %cst_73 = arith.constant 1.000000e+00 : f32
    %184 = vector.broadcast %cst_73 : f32 to vector<4x128xf32>
    %185 = arith.addf %184, %183 : vector<4x128xf32>
    %186 = arith.divf %184, %185 : vector<4x128xf32>
    %187 = vector.extract_strided_slice %180 {offsets = [0, 128], sizes = [4, 128], strides = [1, 1]} : vector<4x512xf32> to vector<4x128xf32>
    %188 = arith.negf %187 : vector<4x128xf32>
    %189 = math.exp %188 : vector<4x128xf32>
    %cst_74 = arith.constant 1.000000e+00 : f32
    %190 = vector.broadcast %cst_74 : f32 to vector<4x128xf32>
    %191 = arith.addf %190, %189 : vector<4x128xf32>
    %192 = arith.divf %190, %191 : vector<4x128xf32>
    %193 = vector.extract_strided_slice %180 {offsets = [0, 256], sizes = [4, 128], strides = [1, 1]} : vector<4x512xf32> to vector<4x128xf32>
    %194 = math.tanh %193 : vector<4x128xf32>
    %195 = vector.extract_strided_slice %180 {offsets = [0, 384], sizes = [4, 128], strides = [1, 1]} : vector<4x512xf32> to vector<4x128xf32>
    %196 = arith.negf %195 : vector<4x128xf32>
    %197 = math.exp %196 : vector<4x128xf32>
    %cst_75 = arith.constant 1.000000e+00 : f32
    %198 = vector.broadcast %cst_75 : f32 to vector<4x128xf32>
    %199 = arith.addf %198, %197 : vector<4x128xf32>
    %200 = arith.divf %198, %199 : vector<4x128xf32>
    %201 = arith.mulf %192, %167 : vector<4x128xf32>
    %202 = arith.mulf %186, %194 : vector<4x128xf32>
    %203 = arith.addf %201, %202 : vector<4x128xf32>
    %204 = math.tanh %203 : vector<4x128xf32>
    %205 = arith.mulf %200, %204 : vector<4x128xf32>
    %206 = vector.extract_strided_slice %205 {offsets = [0, 0], sizes = [2, 128], strides = [1, 1]} : vector<4x128xf32> to vector<2x128xf32>
    %c6_76 = arith.constant 6 : index
    %c0_77 = arith.constant 0 : index
    %207 = vector.load %arg23[%c6_76, %c0_77] : memref<8x256xf32, #tpu.memory_space<vmem>>, vector<2x128xf32>
    tpu.vector_store %arg23[%c6_76, %c0_77], %206 {strides = array<i32>} : memref<8x256xf32, #tpu.memory_space<vmem>>, vector<2x128xf32>,
    %208 = vector.extract_strided_slice %205 {offsets = [2, 0], sizes = [2, 128], strides = [1, 1]} : vector<4x128xf32> to vector<2x128xf32>
    %c0_78 = arith.constant 0 : index
    %c128_79 = arith.constant 128 : index
    %209 = vector.load %arg23[%c0_78, %c128_79] : memref<8x256xf32, #tpu.memory_space<vmem>>, vector<2x128xf32>
    tpu.vector_store %arg23[%c0_78, %c128_79], %208 {strides = array<i32>} : memref<8x256xf32, #tpu.memory_space<vmem>>, vector<2x128xf32>,
    %c0_80 = arith.constant 0 : index
    %c0_81 = arith.constant 0 : index
    %210 = vector.load %arg23[%c0_80, %c0_81] : memref<8x256xf32, #tpu.memory_space<vmem>>, vector<8x256xf32>
    %c0_82 = arith.constant 0 : index
    %c0_83 = arith.constant 0 : index
    %211 = vector.load %arg12[%c0_82, %c0_83] : memref<256x512xbf16, #tpu.memory_space<vmem>>, vector<256x512xbf16>
    %c0_84 = arith.constant 0 : index
    %c0_85 = arith.constant 0 : index
    %212 = vector.load %arg13[%c0_84, %c0_85] : memref<256x512xbf16, #tpu.memory_space<vmem>>, vector<256x512xbf16>
    %c0_86 = arith.constant 0 : index
    %c0_87 = arith.constant 0 : index
    %213 = vector.load %arg14[%c0_86, %c0_87] : memref<128x1024xbf16, #tpu.memory_space<vmem>>, vector<128x1024xbf16>
    %c0_88 = arith.constant 0 : index
    %c0_89 = arith.constant 0 : index
    %214 = vector.load %arg15[%c0_88, %c0_89] : memref<1x512xf32, #tpu.memory_space<vmem>>, vector<1x512xf32>
    %c0_90 = arith.constant 0 : index
    %c0_91 = arith.constant 0 : index
    %215 = vector.load %arg16[%c0_90, %c0_91] : memref<1x512xf32, #tpu.memory_space<vmem>>, vector<1x512xf32>
    %216 = arith.truncf %210 : vector<8x256xf32> to vector<8x256xbf16>
    %cst_92 = arith.constant dense<0.000000e+00> : vector<8x512xf32>
    %217 = tpu.matmul %216, %211, %cst_92 {dimension_numbers = #tpu.dot_dimension_numbers<[1], [0], [0], [1], [0, 0, 1, 1], [], []>} : vector<8x256xbf16>, vector<256x512xbf16>, vector<8x512xf32> -> vector<8x512xf32>
    %218 = vector.broadcast %214 : vector<1x512xf32> to vector<8x512xf32>
    %219 = arith.addf %217, %218 : vector<8x512xf32>
    %220 = arith.truncf %210 : vector<8x256xf32> to vector<8x256xbf16>
    %cst_93 = arith.constant dense<0.000000e+00> : vector<8x512xf32>
    %221 = tpu.matmul %220, %212, %cst_93 {dimension_numbers = #tpu.dot_dimension_numbers<[1], [0], [0], [1], [0, 0, 1, 1], [], []>} : vector<8x256xbf16>, vector<256x512xbf16>, vector<8x512xf32> -> vector<8x512xf32>
    %222 = vector.broadcast %215 : vector<1x512xf32> to vector<8x512xf32>
    %223 = arith.addf %221, %222 : vector<8x512xf32>
    %224 = vector.extract_strided_slice %219 {offsets = [0, 0], sizes = [2, 512], strides = [1, 1]} : vector<8x512xf32> to vector<2x512xf32>
    %c0_94 = arith.constant 0 : index
    %c0_95 = arith.constant 0 : index
    %225 = vector.load %arg24[%c0_94, %c0_95] : memref<16x512xf32, #tpu.memory_space<vmem>>, vector<2x512xf32>
    tpu.vector_store %arg24[%c0_94, %c0_95], %224 {strides = array<i32>} : memref<16x512xf32, #tpu.memory_space<vmem>>, vector<2x512xf32>,
    %226 = vector.extract_strided_slice %223 {offsets = [6, 0], sizes = [2, 512], strides = [1, 1]} : vector<8x512xf32> to vector<2x512xf32>
    %c2_96 = arith.constant 2 : index
    %c0_97 = arith.constant 0 : index
    %227 = vector.load %arg24[%c2_96, %c0_97] : memref<16x512xf32, #tpu.memory_space<vmem>>, vector<2x512xf32>
    tpu.vector_store %arg24[%c2_96, %c0_97], %226 {strides = array<i32>} : memref<16x512xf32, #tpu.memory_space<vmem>>, vector<2x512xf32>,
    %228 = vector.extract_strided_slice %219 {offsets = [2, 0], sizes = [2, 512], strides = [1, 1]} : vector<8x512xf32> to vector<2x512xf32>
    %c4_98 = arith.constant 4 : index
    %c0_99 = arith.constant 0 : index
    %229 = vector.load %arg24[%c4_98, %c0_99] : memref<16x512xf32, #tpu.memory_space<vmem>>, vector<2x512xf32>
    tpu.vector_store %arg24[%c4_98, %c0_99], %228 {strides = array<i32>} : memref<16x512xf32, #tpu.memory_space<vmem>>, vector<2x512xf32>,
    %230 = vector.extract_strided_slice %223 {offsets = [4, 0], sizes = [2, 512], strides = [1, 1]} : vector<8x512xf32> to vector<2x512xf32>
    %c6_100 = arith.constant 6 : index
    %c0_101 = arith.constant 0 : index
    %231 = vector.load %arg24[%c6_100, %c0_101] : memref<16x512xf32, #tpu.memory_space<vmem>>, vector<2x512xf32>
    tpu.vector_store %arg24[%c6_100, %c0_101], %230 {strides = array<i32>} : memref<16x512xf32, #tpu.memory_space<vmem>>, vector<2x512xf32>,
    %232 = vector.extract_strided_slice %219 {offsets = [4, 0], sizes = [2, 512], strides = [1, 1]} : vector<8x512xf32> to vector<2x512xf32>
    %c8_102 = arith.constant 8 : index
    %c0_103 = arith.constant 0 : index
    %233 = vector.load %arg24[%c8_102, %c0_103] : memref<16x512xf32, #tpu.memory_space<vmem>>, vector<2x512xf32>
    tpu.vector_store %arg24[%c8_102, %c0_103], %232 {strides = array<i32>} : memref<16x512xf32, #tpu.memory_space<vmem>>, vector<2x512xf32>,
    %234 = vector.extract_strided_slice %223 {offsets = [2, 0], sizes = [2, 512], strides = [1, 1]} : vector<8x512xf32> to vector<2x512xf32>
    %c10_104 = arith.constant 10 : index
    %c0_105 = arith.constant 0 : index
    %235 = vector.load %arg24[%c10_104, %c0_105] : memref<16x512xf32, #tpu.memory_space<vmem>>, vector<2x512xf32>
    tpu.vector_store %arg24[%c10_104, %c0_105], %234 {strides = array<i32>} : memref<16x512xf32, #tpu.memory_space<vmem>>, vector<2x512xf32>,
    %236 = vector.extract_strided_slice %219 {offsets = [6, 0], sizes = [2, 512], strides = [1, 1]} : vector<8x512xf32> to vector<2x512xf32>
    %c12_106 = arith.constant 12 : index
    %c0_107 = arith.constant 0 : index
    %237 = vector.load %arg24[%c12_106, %c0_107] : memref<16x512xf32, #tpu.memory_space<vmem>>, vector<2x512xf32>
    tpu.vector_store %arg24[%c12_106, %c0_107], %236 {strides = array<i32>} : memref<16x512xf32, #tpu.memory_space<vmem>>, vector<2x512xf32>,
    %238 = vector.extract_strided_slice %223 {offsets = [0, 0], sizes = [2, 512], strides = [1, 1]} : vector<8x512xf32> to vector<2x512xf32>
    %c14_108 = arith.constant 14 : index
    %c0_109 = arith.constant 0 : index
    %239 = vector.load %arg24[%c14_108, %c0_109] : memref<16x512xf32, #tpu.memory_space<vmem>>, vector<2x512xf32>
    tpu.vector_store %arg24[%c14_108, %c0_109], %238 {strides = array<i32>} : memref<16x512xf32, #tpu.memory_space<vmem>>, vector<2x512xf32>,
    %cst_110 = arith.constant 0.000000e+00 : f32
    %240 = vector.broadcast %cst_110 : f32 to vector<4x128xf32>
    %cst_111 = arith.constant 0.000000e+00 : f32
    %241 = vector.broadcast %cst_111 : f32 to vector<4x128xf32>
    %242 = arith.truncf %240 : vector<4x128xf32> to vector<4x128xbf16>
    %cst_112 = arith.constant dense<0.000000e+00> : vector<4x1024xf32>
    %243 = tpu.matmul %242, %213, %cst_112 {dimension_numbers = #tpu.dot_dimension_numbers<[1], [0], [0], [1], [0, 0, 1, 1], [], []>} : vector<4x128xbf16>, vector<128x1024xbf16>, vector<4x1024xf32> -> vector<4x1024xf32>
    %244 = vector.extract_strided_slice %243 {offsets = [0, 0], sizes = [4, 512], strides = [1, 1]} : vector<4x1024xf32> to vector<4x512xf32>
    %245 = vector.extract_strided_slice %243 {offsets = [0, 512], sizes = [4, 512], strides = [1, 1]} : vector<4x1024xf32> to vector<4x512xf32>
    %246 = arith.select %2, %244, %245 : vector<4x512xi1>, vector<4x512xf32>
    %c0_113 = arith.constant 0 : index
    %c0_114 = arith.constant 0 : index
    %247 = vector.load %arg24[%c0_113, %c0_114] : memref<16x512xf32, #tpu.memory_space<vmem>>, vector<4x512xf32>
    %248 = arith.addf %247, %246 : vector<4x512xf32>
    %249 = vector.extract_strided_slice %248 {offsets = [0, 0], sizes = [4, 128], strides = [1, 1]} : vector<4x512xf32> to vector<4x128xf32>
    %250 = arith.negf %249 : vector<4x128xf32>
    %251 = math.exp %250 : vector<4x128xf32>
    %cst_115 = arith.constant 1.000000e+00 : f32
    %252 = vector.broadcast %cst_115 : f32 to vector<4x128xf32>
    %253 = arith.addf %252, %251 : vector<4x128xf32>
    %254 = arith.divf %252, %253 : vector<4x128xf32>
    %255 = vector.extract_strided_slice %248 {offsets = [0, 128], sizes = [4, 128], strides = [1, 1]} : vector<4x512xf32> to vector<4x128xf32>
    %256 = arith.negf %255 : vector<4x128xf32>
    %257 = math.exp %256 : vector<4x128xf32>
    %cst_116 = arith.constant 1.000000e+00 : f32
    %258 = vector.broadcast %cst_116 : f32 to vector<4x128xf32>
    %259 = arith.addf %258, %257 : vector<4x128xf32>
    %260 = arith.divf %258, %259 : vector<4x128xf32>
    %261 = vector.extract_strided_slice %248 {offsets = [0, 256], sizes = [4, 128], strides = [1, 1]} : vector<4x512xf32> to vector<4x128xf32>
    %262 = math.tanh %261 : vector<4x128xf32>
    %263 = vector.extract_strided_slice %248 {offsets = [0, 384], sizes = [4, 128], strides = [1, 1]} : vector<4x512xf32> to vector<4x128xf32>
    %264 = arith.negf %263 : vector<4x128xf32>
    %265 = math.exp %264 : vector<4x128xf32>
    %cst_117 = arith.constant 1.000000e+00 : f32
    %266 = vector.broadcast %cst_117 : f32 to vector<4x128xf32>
    %267 = arith.addf %266, %265 : vector<4x128xf32>
    %268 = arith.divf %266, %267 : vector<4x128xf32>
    %269 = arith.mulf %260, %241 : vector<4x128xf32>
    %270 = arith.mulf %254, %262 : vector<4x128xf32>
    %271 = arith.addf %269, %270 : vector<4x128xf32>
    %272 = math.tanh %271 : vector<4x128xf32>
    %273 = arith.mulf %268, %272 : vector<4x128xf32>
    %274 = vector.extract_strided_slice %273 {offsets = [0, 0], sizes = [1, 128], strides = [1, 1]} : vector<4x128xf32> to vector<1x128xf32>
    %c0_118 = arith.constant 0 : index
    %c0_119 = arith.constant 0 : index
    %275 = vector.load %arg21[%c0_118, %c0_119] : memref<8x256xf32, #tpu.memory_space<vmem>>, vector<1x128xf32>
    tpu.vector_store %arg21[%c0_118, %c0_119], %274 {strides = array<i32>} : memref<8x256xf32, #tpu.memory_space<vmem>>, vector<1x128xf32>,
    %276 = vector.extract_strided_slice %273 {offsets = [2, 0], sizes = [1, 128], strides = [1, 1]} : vector<4x128xf32> to vector<1x128xf32>
    %c3 = arith.constant 3 : index
    %c128_120 = arith.constant 128 : index
    %277 = vector.load %arg21[%c3, %c128_120] : memref<8x256xf32, #tpu.memory_space<vmem>>, vector<1x128xf32>
    tpu.vector_store %arg21[%c3, %c128_120], %276 {strides = array<i32>} : memref<8x256xf32, #tpu.memory_space<vmem>>, vector<1x128xf32>,
    %278 = vector.extract_strided_slice %273 {offsets = [1, 0], sizes = [1, 128], strides = [1, 1]} : vector<4x128xf32> to vector<1x128xf32>
    %c4_121 = arith.constant 4 : index
    %c0_122 = arith.constant 0 : index
    %279 = vector.load %arg21[%c4_121, %c0_122] : memref<8x256xf32, #tpu.memory_space<vmem>>, vector<1x128xf32>
    tpu.vector_store %arg21[%c4_121, %c0_122], %278 {strides = array<i32>} : memref<8x256xf32, #tpu.memory_space<vmem>>, vector<1x128xf32>,
    %280 = vector.extract_strided_slice %273 {offsets = [3, 0], sizes = [1, 128], strides = [1, 1]} : vector<4x128xf32> to vector<1x128xf32>
    %c7 = arith.constant 7 : index
    %c128_123 = arith.constant 128 : index
    %281 = vector.load %arg21[%c7, %c128_123] : memref<8x256xf32, #tpu.memory_space<vmem>>, vector<1x128xf32>
    tpu.vector_store %arg21[%c7, %c128_123], %280 {strides = array<i32>} : memref<8x256xf32, #tpu.memory_space<vmem>>, vector<1x128xf32>,
    %282 = arith.truncf %273 : vector<4x128xf32> to vector<4x128xbf16>
    %cst_124 = arith.constant dense<0.000000e+00> : vector<4x1024xf32>
    %283 = tpu.matmul %282, %213, %cst_124 {dimension_numbers = #tpu.dot_dimension_numbers<[1], [0], [0], [1], [0, 0, 1, 1], [], []>} : vector<4x128xbf16>, vector<128x1024xbf16>, vector<4x1024xf32> -> vector<4x1024xf32>
    %284 = vector.extract_strided_slice %283 {offsets = [0, 0], sizes = [4, 512], strides = [1, 1]} : vector<4x1024xf32> to vector<4x512xf32>
    %285 = vector.extract_strided_slice %283 {offsets = [0, 512], sizes = [4, 512], strides = [1, 1]} : vector<4x1024xf32> to vector<4x512xf32>
    %286 = arith.select %2, %284, %285 : vector<4x512xi1>, vector<4x512xf32>
    %c4_125 = arith.constant 4 : index
    %c0_126 = arith.constant 0 : index
    %287 = vector.load %arg24[%c4_125, %c0_126] : memref<16x512xf32, #tpu.memory_space<vmem>>, vector<4x512xf32>
    %288 = arith.addf %287, %286 : vector<4x512xf32>
    %289 = vector.extract_strided_slice %288 {offsets = [0, 0], sizes = [4, 128], strides = [1, 1]} : vector<4x512xf32> to vector<4x128xf32>
    %290 = arith.negf %289 : vector<4x128xf32>
    %291 = math.exp %290 : vector<4x128xf32>
    %cst_127 = arith.constant 1.000000e+00 : f32
    %292 = vector.broadcast %cst_127 : f32 to vector<4x128xf32>
    %293 = arith.addf %292, %291 : vector<4x128xf32>
    %294 = arith.divf %292, %293 : vector<4x128xf32>
    %295 = vector.extract_strided_slice %288 {offsets = [0, 128], sizes = [4, 128], strides = [1, 1]} : vector<4x512xf32> to vector<4x128xf32>
    %296 = arith.negf %295 : vector<4x128xf32>
    %297 = math.exp %296 : vector<4x128xf32>
    %cst_128 = arith.constant 1.000000e+00 : f32
    %298 = vector.broadcast %cst_128 : f32 to vector<4x128xf32>
    %299 = arith.addf %298, %297 : vector<4x128xf32>
    %300 = arith.divf %298, %299 : vector<4x128xf32>
    %301 = vector.extract_strided_slice %288 {offsets = [0, 256], sizes = [4, 128], strides = [1, 1]} : vector<4x512xf32> to vector<4x128xf32>
    %302 = math.tanh %301 : vector<4x128xf32>
    %303 = vector.extract_strided_slice %288 {offsets = [0, 384], sizes = [4, 128], strides = [1, 1]} : vector<4x512xf32> to vector<4x128xf32>
    %304 = arith.negf %303 : vector<4x128xf32>
    %305 = math.exp %304 : vector<4x128xf32>
    %cst_129 = arith.constant 1.000000e+00 : f32
    %306 = vector.broadcast %cst_129 : f32 to vector<4x128xf32>
    %307 = arith.addf %306, %305 : vector<4x128xf32>
    %308 = arith.divf %306, %307 : vector<4x128xf32>
    %309 = arith.mulf %300, %271 : vector<4x128xf32>
    %310 = arith.mulf %294, %302 : vector<4x128xf32>
    %311 = arith.addf %309, %310 : vector<4x128xf32>
    %312 = math.tanh %311 : vector<4x128xf32>
    %313 = arith.mulf %308, %312 : vector<4x128xf32>
    %314 = vector.extract_strided_slice %313 {offsets = [0, 0], sizes = [1, 128], strides = [1, 1]} : vector<4x128xf32> to vector<1x128xf32>
    %c1 = arith.constant 1 : index
    %c0_130 = arith.constant 0 : index
    %315 = vector.load %arg21[%c1, %c0_130] : memref<8x256xf32, #tpu.memory_space<vmem>>, vector<1x128xf32>
    tpu.vector_store %arg21[%c1, %c0_130], %314 {strides = array<i32>} : memref<8x256xf32, #tpu.memory_space<vmem>>, vector<1x128xf32>,
    %316 = vector.extract_strided_slice %313 {offsets = [2, 0], sizes = [1, 128], strides = [1, 1]} : vector<4x128xf32> to vector<1x128xf32>
    %c2_131 = arith.constant 2 : index
    %c128_132 = arith.constant 128 : index
    %317 = vector.load %arg21[%c2_131, %c128_132] : memref<8x256xf32, #tpu.memory_space<vmem>>, vector<1x128xf32>
    tpu.vector_store %arg21[%c2_131, %c128_132], %316 {strides = array<i32>} : memref<8x256xf32, #tpu.memory_space<vmem>>, vector<1x128xf32>,
    %318 = vector.extract_strided_slice %313 {offsets = [1, 0], sizes = [1, 128], strides = [1, 1]} : vector<4x128xf32> to vector<1x128xf32>
    %c5 = arith.constant 5 : index
    %c0_133 = arith.constant 0 : index
    %319 = vector.load %arg21[%c5, %c0_133] : memref<8x256xf32, #tpu.memory_space<vmem>>, vector<1x128xf32>
    tpu.vector_store %arg21[%c5, %c0_133], %318 {strides = array<i32>} : memref<8x256xf32, #tpu.memory_space<vmem>>, vector<1x128xf32>,
    %320 = vector.extract_strided_slice %313 {offsets = [3, 0], sizes = [1, 128], strides = [1, 1]} : vector<4x128xf32> to vector<1x128xf32>
    %c6_134 = arith.constant 6 : index
    %c128_135 = arith.constant 128 : index
    %321 = vector.load %arg21[%c6_134, %c128_135] : memref<8x256xf32, #tpu.memory_space<vmem>>, vector<1x128xf32>
    tpu.vector_store %arg21[%c6_134, %c128_135], %320 {strides = array<i32>} : memref<8x256xf32, #tpu.memory_space<vmem>>, vector<1x128xf32>,
    %322 = arith.truncf %313 : vector<4x128xf32> to vector<4x128xbf16>
    %cst_136 = arith.constant dense<0.000000e+00> : vector<4x1024xf32>
    %323 = tpu.matmul %322, %213, %cst_136 {dimension_numbers = #tpu.dot_dimension_numbers<[1], [0], [0], [1], [0, 0, 1, 1], [], []>} : vector<4x128xbf16>, vector<128x1024xbf16>, vector<4x1024xf32> -> vector<4x1024xf32>
    %324 = vector.extract_strided_slice %323 {offsets = [0, 0], sizes = [4, 512], strides = [1, 1]} : vector<4x1024xf32> to vector<4x512xf32>
    %325 = vector.extract_strided_slice %323 {offsets = [0, 512], sizes = [4, 512], strides = [1, 1]} : vector<4x1024xf32> to vector<4x512xf32>
    %326 = arith.select %2, %324, %325 : vector<4x512xi1>, vector<4x512xf32>
    %c8_137 = arith.constant 8 : index
    %c0_138 = arith.constant 0 : index
    %327 = vector.load %arg24[%c8_137, %c0_138] : memref<16x512xf32, #tpu.memory_space<vmem>>, vector<4x512xf32>
    %328 = arith.addf %327, %326 : vector<4x512xf32>
    %329 = vector.extract_strided_slice %328 {offsets = [0, 0], sizes = [4, 128], strides = [1, 1]} : vector<4x512xf32> to vector<4x128xf32>
    %330 = arith.negf %329 : vector<4x128xf32>
    %331 = math.exp %330 : vector<4x128xf32>
    %cst_139 = arith.constant 1.000000e+00 : f32
    %332 = vector.broadcast %cst_139 : f32 to vector<4x128xf32>
    %333 = arith.addf %332, %331 : vector<4x128xf32>
    %334 = arith.divf %332, %333 : vector<4x128xf32>
    %335 = vector.extract_strided_slice %328 {offsets = [0, 128], sizes = [4, 128], strides = [1, 1]} : vector<4x512xf32> to vector<4x128xf32>
    %336 = arith.negf %335 : vector<4x128xf32>
    %337 = math.exp %336 : vector<4x128xf32>
    %cst_140 = arith.constant 1.000000e+00 : f32
    %338 = vector.broadcast %cst_140 : f32 to vector<4x128xf32>
    %339 = arith.addf %338, %337 : vector<4x128xf32>
    %340 = arith.divf %338, %339 : vector<4x128xf32>
    %341 = vector.extract_strided_slice %328 {offsets = [0, 256], sizes = [4, 128], strides = [1, 1]} : vector<4x512xf32> to vector<4x128xf32>
    %342 = math.tanh %341 : vector<4x128xf32>
    %343 = vector.extract_strided_slice %328 {offsets = [0, 384], sizes = [4, 128], strides = [1, 1]} : vector<4x512xf32> to vector<4x128xf32>
    %344 = arith.negf %343 : vector<4x128xf32>
    %345 = math.exp %344 : vector<4x128xf32>
    %cst_141 = arith.constant 1.000000e+00 : f32
    %346 = vector.broadcast %cst_141 : f32 to vector<4x128xf32>
    %347 = arith.addf %346, %345 : vector<4x128xf32>
    %348 = arith.divf %346, %347 : vector<4x128xf32>
    %349 = arith.mulf %340, %311 : vector<4x128xf32>
    %350 = arith.mulf %334, %342 : vector<4x128xf32>
    %351 = arith.addf %349, %350 : vector<4x128xf32>
    %352 = math.tanh %351 : vector<4x128xf32>
    %353 = arith.mulf %348, %352 : vector<4x128xf32>
    %354 = vector.extract_strided_slice %353 {offsets = [0, 0], sizes = [1, 128], strides = [1, 1]} : vector<4x128xf32> to vector<1x128xf32>
    %c2_142 = arith.constant 2 : index
    %c0_143 = arith.constant 0 : index
    %355 = vector.load %arg21[%c2_142, %c0_143] : memref<8x256xf32, #tpu.memory_space<vmem>>, vector<1x128xf32>
    tpu.vector_store %arg21[%c2_142, %c0_143], %354 {strides = array<i32>} : memref<8x256xf32, #tpu.memory_space<vmem>>, vector<1x128xf32>,
    %356 = vector.extract_strided_slice %353 {offsets = [2, 0], sizes = [1, 128], strides = [1, 1]} : vector<4x128xf32> to vector<1x128xf32>
    %c1_144 = arith.constant 1 : index
    %c128_145 = arith.constant 128 : index
    %357 = vector.load %arg21[%c1_144, %c128_145] : memref<8x256xf32, #tpu.memory_space<vmem>>, vector<1x128xf32>
    tpu.vector_store %arg21[%c1_144, %c128_145], %356 {strides = array<i32>} : memref<8x256xf32, #tpu.memory_space<vmem>>, vector<1x128xf32>,
    %358 = vector.extract_strided_slice %353 {offsets = [1, 0], sizes = [1, 128], strides = [1, 1]} : vector<4x128xf32> to vector<1x128xf32>
    %c6_146 = arith.constant 6 : index
    %c0_147 = arith.constant 0 : index
    %359 = vector.load %arg21[%c6_146, %c0_147] : memref<8x256xf32, #tpu.memory_space<vmem>>, vector<1x128xf32>
    tpu.vector_store %arg21[%c6_146, %c0_147], %358 {strides = array<i32>} : memref<8x256xf32, #tpu.memory_space<vmem>>, vector<1x128xf32>,
    %360 = vector.extract_strided_slice %353 {offsets = [3, 0], sizes = [1, 128], strides = [1, 1]} : vector<4x128xf32> to vector<1x128xf32>
    %c5_148 = arith.constant 5 : index
    %c128_149 = arith.constant 128 : index
    %361 = vector.load %arg21[%c5_148, %c128_149] : memref<8x256xf32, #tpu.memory_space<vmem>>, vector<1x128xf32>
    tpu.vector_store %arg21[%c5_148, %c128_149], %360 {strides = array<i32>} : memref<8x256xf32, #tpu.memory_space<vmem>>, vector<1x128xf32>,
    %362 = arith.truncf %353 : vector<4x128xf32> to vector<4x128xbf16>
    %cst_150 = arith.constant dense<0.000000e+00> : vector<4x1024xf32>
    %363 = tpu.matmul %362, %213, %cst_150 {dimension_numbers = #tpu.dot_dimension_numbers<[1], [0], [0], [1], [0, 0, 1, 1], [], []>} : vector<4x128xbf16>, vector<128x1024xbf16>, vector<4x1024xf32> -> vector<4x1024xf32>
    %364 = vector.extract_strided_slice %363 {offsets = [0, 0], sizes = [4, 512], strides = [1, 1]} : vector<4x1024xf32> to vector<4x512xf32>
    %365 = vector.extract_strided_slice %363 {offsets = [0, 512], sizes = [4, 512], strides = [1, 1]} : vector<4x1024xf32> to vector<4x512xf32>
    %366 = arith.select %2, %364, %365 : vector<4x512xi1>, vector<4x512xf32>
    %c12_151 = arith.constant 12 : index
    %c0_152 = arith.constant 0 : index
    %367 = vector.load %arg24[%c12_151, %c0_152] : memref<16x512xf32, #tpu.memory_space<vmem>>, vector<4x512xf32>
    %368 = arith.addf %367, %366 : vector<4x512xf32>
    %369 = vector.extract_strided_slice %368 {offsets = [0, 0], sizes = [4, 128], strides = [1, 1]} : vector<4x512xf32> to vector<4x128xf32>
    %370 = arith.negf %369 : vector<4x128xf32>
    %371 = math.exp %370 : vector<4x128xf32>
    %cst_153 = arith.constant 1.000000e+00 : f32
    %372 = vector.broadcast %cst_153 : f32 to vector<4x128xf32>
    %373 = arith.addf %372, %371 : vector<4x128xf32>
    %374 = arith.divf %372, %373 : vector<4x128xf32>
    %375 = vector.extract_strided_slice %368 {offsets = [0, 128], sizes = [4, 128], strides = [1, 1]} : vector<4x512xf32> to vector<4x128xf32>
    %376 = arith.negf %375 : vector<4x128xf32>
    %377 = math.exp %376 : vector<4x128xf32>
    %cst_154 = arith.constant 1.000000e+00 : f32
    %378 = vector.broadcast %cst_154 : f32 to vector<4x128xf32>
    %379 = arith.addf %378, %377 : vector<4x128xf32>
    %380 = arith.divf %378, %379 : vector<4x128xf32>
    %381 = vector.extract_strided_slice %368 {offsets = [0, 256], sizes = [4, 128], strides = [1, 1]} : vector<4x512xf32> to vector<4x128xf32>
    %382 = math.tanh %381 : vector<4x128xf32>
    %383 = vector.extract_strided_slice %368 {offsets = [0, 384], sizes = [4, 128], strides = [1, 1]} : vector<4x512xf32> to vector<4x128xf32>
    %384 = arith.negf %383 : vector<4x128xf32>
    %385 = math.exp %384 : vector<4x128xf32>
    %cst_155 = arith.constant 1.000000e+00 : f32
    %386 = vector.broadcast %cst_155 : f32 to vector<4x128xf32>
    %387 = arith.addf %386, %385 : vector<4x128xf32>
    %388 = arith.divf %386, %387 : vector<4x128xf32>
    %389 = arith.mulf %380, %351 : vector<4x128xf32>
    %390 = arith.mulf %374, %382 : vector<4x128xf32>
    %391 = arith.addf %389, %390 : vector<4x128xf32>
    %392 = math.tanh %391 : vector<4x128xf32>
    %393 = arith.mulf %388, %392 : vector<4x128xf32>
    %394 = vector.extract_strided_slice %393 {offsets = [0, 0], sizes = [1, 128], strides = [1, 1]} : vector<4x128xf32> to vector<1x128xf32>
    %c3_156 = arith.constant 3 : index
    %c0_157 = arith.constant 0 : index
    %395 = vector.load %arg21[%c3_156, %c0_157] : memref<8x256xf32, #tpu.memory_space<vmem>>, vector<1x128xf32>
    tpu.vector_store %arg21[%c3_156, %c0_157], %394 {strides = array<i32>} : memref<8x256xf32, #tpu.memory_space<vmem>>, vector<1x128xf32>,
    %396 = vector.extract_strided_slice %393 {offsets = [2, 0], sizes = [1, 128], strides = [1, 1]} : vector<4x128xf32> to vector<1x128xf32>
    %c0_158 = arith.constant 0 : index
    %c128_159 = arith.constant 128 : index
    %397 = vector.load %arg21[%c0_158, %c128_159] : memref<8x256xf32, #tpu.memory_space<vmem>>, vector<1x128xf32>
    tpu.vector_store %arg21[%c0_158, %c128_159], %396 {strides = array<i32>} : memref<8x256xf32, #tpu.memory_space<vmem>>, vector<1x128xf32>,
    %398 = vector.extract_strided_slice %393 {offsets = [1, 0], sizes = [1, 128], strides = [1, 1]} : vector<4x128xf32> to vector<1x128xf32>
    %c7_160 = arith.constant 7 : index
    %c0_161 = arith.constant 0 : index
    %399 = vector.load %arg21[%c7_160, %c0_161] : memref<8x256xf32, #tpu.memory_space<vmem>>, vector<1x128xf32>
    tpu.vector_store %arg21[%c7_160, %c0_161], %398 {strides = array<i32>} : memref<8x256xf32, #tpu.memory_space<vmem>>, vector<1x128xf32>,
    %400 = vector.extract_strided_slice %393 {offsets = [3, 0], sizes = [1, 128], strides = [1, 1]} : vector<4x128xf32> to vector<1x128xf32>
    %c4_162 = arith.constant 4 : index
    %c128_163 = arith.constant 128 : index
    %401 = vector.load %arg21[%c4_162, %c128_163] : memref<8x256xf32, #tpu.memory_space<vmem>>, vector<1x128xf32>
    tpu.vector_store %arg21[%c4_162, %c128_163], %400 {strides = array<i32>} : memref<8x256xf32, #tpu.memory_space<vmem>>, vector<1x128xf32>,
    %c0_164 = arith.constant 0 : index
    %c0_165 = arith.constant 0 : index
    %402 = vector.load %arg21[%c0_164, %c0_165] : memref<8x256xf32, #tpu.memory_space<vmem>>, vector<8x256xf32>
    %403 = arith.truncf %402 : vector<8x256xf32> to vector<8x256xbf16>
    %c0_166 = arith.constant 0 : index
    %c0_167 = arith.constant 0 : index
    %404 = vector.load %arg17[%c0_166, %c0_167] : memref<256x128xbf16, #tpu.memory_space<vmem>>, vector<256x128xbf16>
    %cst_168 = arith.constant dense<0.000000e+00> : vector<8x128xf32>
    %405 = tpu.matmul %403, %404, %cst_168 {dimension_numbers = #tpu.dot_dimension_numbers<[1], [0], [0], [1], [0, 0, 1, 1], [], []>} : vector<8x256xbf16>, vector<256x128xbf16>, vector<8x128xf32> -> vector<8x128xf32>
    %c0_169 = arith.constant 0 : index
    %c0_170 = arith.constant 0 : index
    %406 = vector.load %arg18[%c0_169, %c0_170] : memref<1x128xf32, #tpu.memory_space<vmem>>, vector<1x128xf32>
    %407 = vector.broadcast %406 : vector<1x128xf32> to vector<8x128xf32>
    %408 = arith.addf %405, %407 : vector<8x128xf32>
    %cst_171 = arith.constant 0.000000e+00 : f32
    %409 = vector.broadcast %cst_171 : f32 to vector<8x128xf32>
    %410 = arith.cmpf ogt, %408, %409 : vector<8x128xf32>
    %cst_172 = arith.constant 2.000000e-01 : f32
    %411 = vector.broadcast %cst_172 : f32 to vector<8x128xf32>
    %412 = arith.mulf %411, %408 : vector<8x128xf32>
    %413 = arith.select %410, %408, %412 : vector<8x128xi1>, vector<8x128xf32>
    %414 = arith.truncf %413 : vector<8x128xf32> to vector<8x128xbf16>
    %c0_173 = arith.constant 0 : index
    %c0_174 = arith.constant 0 : index
    %415 = vector.load %arg19[%c0_173, %c0_174] : memref<128x64xbf16, #tpu.memory_space<vmem>>, vector<128x64xbf16>
    %cst_175 = arith.constant dense<0.000000e+00> : vector<8x64xf32>
    %416 = tpu.matmul %414, %415, %cst_175 {dimension_numbers = #tpu.dot_dimension_numbers<[1], [0], [0], [1], [0, 0, 1, 1], [], []>} : vector<8x128xbf16>, vector<128x64xbf16>, vector<8x64xf32> -> vector<8x64xf32>
    %c0_176 = arith.constant 0 : index
    %c0_177 = arith.constant 0 : index
    %417 = vector.load %arg20[%c0_176, %c0_177] : memref<1x64xf32, #tpu.memory_space<vmem>>, vector<1x64xf32>
    %418 = vector.broadcast %417 : vector<1x64xf32> to vector<8x64xf32>
    %419 = arith.addf %416, %418 : vector<8x64xf32>
    %cst_178 = arith.constant 0.000000e+00 : f32
    %420 = vector.broadcast %cst_178 : f32 to vector<8x64xf32>
    %421 = arith.cmpf ogt, %419, %420 : vector<8x64xf32>
    %cst_179 = arith.constant 2.000000e-01 : f32
    %422 = vector.broadcast %cst_179 : f32 to vector<8x64xf32>
    %423 = arith.mulf %422, %419 : vector<8x64xf32>
    %424 = arith.select %421, %419, %423 : vector<8x64xi1>, vector<8x64xf32>
    %c0_180 = arith.constant 0 : index
    %c0_181 = arith.constant 0 : index
    %425 = vector.load %arg22[%c0_180, %c0_181] : memref<8x64xf32, #tpu.memory_space<vmem>>, vector<8x64xf32>
    tpu.vector_store %arg22[%c0_180, %c0_181], %424 {strides = array<i32>} : memref<8x64xf32, #tpu.memory_space<vmem>>, vector<8x64xf32>,
    return
  }
}

</mosaic_0001>

<bundles_post_ra>
// kernel: audio2au_forward.2
= control target key start
LH: loop header
LB: loop body
LE: loop exit
PB: predicated region body
PF: predicated region fallthrough
CT: control target
= control target key end

     0   :  { %vm87_vm0 = vcmask 1043456   ;;  %vm68_vm1 = vcmask 195584   ;;  %v1024_v35 = vmov 0   ;;  %vm318_vm6 = vcmask 719872   ;;  %s1446_s1 = inlined_call_operand.vmem [shape: bf16[24,88], index: 1, kind: input, shape index: {}]   ;;  %s1447_s0 = inlined_call_operand.vmem [shape: f32[96,24], index: 0, kind: input, shape index: {}]   ;;  %s1448_s4 = inlined_call_operand.vmem [shape: bf16[88,160], index: 4, kind: input, shape index: {}]   ;;  %s1449_s7 = inlined_call_operand.vmem [shape: bf16[160,128], index: 7, kind: input, shape index: {}]   ;;  %s1450_s2 = inlined_call_operand.vmem [shape: f32[1,88], index: 2, kind: input, shape index: {}]   ;;  %s1451_s3 = inlined_call_operand.vmem [shape: f32[1,88], index: 3, kind: input, shape index: {}]   ;;  %s1452_s5 = inlined_call_operand.vmem [shape: f32[1,160], index: 5, kind: input, shape index: {}]   ;;  %s1453_s6 = inlined_call_operand.vmem [shape: f32[1,160], index: 6, kind: input, shape index: {}]   ;;  %s1454_s8 = inlined_call_operand.vmem [shape: f32[1,64], index: 8, kind: input, shape index: {}]   ;;  %s1455_s9 = inlined_call_operand.vmem [shape: f32[1,64], index: 9, kind: input, shape index: {}]   ;;  %s1456_s10 = inlined_call_operand.vmem [shape: f32[96,64], index: 10, kind: output, shape index: {}]  }
   0x1   :  { %v995_v0 = vld [vmem:[%s1446_s1] sm:$0xff]   ;;  %v996_v1 = vld [vmem:[%s1446_s1 + $0x8] ss:$0 sps:$4 sm:$0xff]   ;;  %v38_v5 = vld [vmem:[%s1447_s0 + $0x10] sm:$0xff]  ;;  %691 = vmatprep.subr.bf16.mxu0 %v1024_v35 }
   0x2   :  { %v36_v2 = vld [vmem:[%s1447_s0] sm:$0xff]  ;;  %v37_v3 = vld [vmem:[%s1447_s0 + $0x8] sm:$0xff]  ;;  %976 = vmatprep.subr.bf16.mxu1 %v995_v0  ;;  %v39_v6 = vld [vmem:[%s1447_s0 + $0x18] sm:$0xff]  ;;  %v89_v7 = vsel %vm87_vm0, %v996_v1, 0 }
   0x3   :  { %v53_v4 = vpack.c.bf16 %v37_v3, %v36_v2  ;;  %977 = vmatpush3.bf16.msra.mxu1 %v995_v0  ;;  %v40_v8 = vld [vmem:[%s1447_s0 + $0x20] sm:$0xff]  ;;  %v41_v9 = vld [vmem:[%s1447_s0 + $0x28] sm:$0xff]  ;;  %v54_v11 = vpack.c.bf16 %v39_v6, %v38_v5  ;;  %v1002_v14 = vld [vmem:[%s1448_s4 + $0x14] ss:$8 sps:$4 sm:$0xff]  }
   0x4   :  { %992 = vmatprep.subr.msk.bf16.mxu1 %vm87_vm0, %v996_v1  ;;  %v999_v10 = vld [vmem:[%s1448_s4 + $0x4] ss:$8 sps:$4 sm:$0xff]   ;;  %v55_v12 = vpack.c.bf16 %v41_v9, %v40_v8  ;;  %v997_v13 = vld [vmem:[%s1448_s4] ss:$8 sps:$4 sm:$0xff]   ;;  %v42_v15 = vld [vmem:[%s1447_s0 + $0x30] sm:$0xff] }
   0x5   :  { %980 = vmatprep.mubr.msk.bf16.mxu1 %vm68_vm1, %v53_v4  ;;  %v43_v16 = vld [vmem:[%s1447_s0 + $0x38] sm:$0xff]  ;;  %v44_v18 = vld [vmem:[%s1447_s0 + $0x40] sm:$0xff]  ;;  %v45_v19 = vld [vmem:[%s1447_s0 + $0x48] sm:$0xff] }
   0x6   :  { %v1000_v17 = vld [vmem:[%s1448_s4 + $0x10] ss:$8 sps:$4 sm:$0xff]   ;;  %v1005_v20 = vld [vmem:[%s1448_s4 + $0x24] ss:$8 sps:$4 sm:$0xff]   ;;  %v56_v21 = vpack.c.bf16 %v43_v16, %v42_v15  ;;  %v57_v22 = vpack.c.bf16 %v45_v19, %v44_v18  ;;  %v1003_v23 = vld [vmem:[%s1448_s4 + $0x20] ss:$8 sps:$4 sm:$0xff]  }
   0x7   :  { %979 = vmatpush3.bf16.msra.mxu1 %v89_v7  ;;  %v46_v24 = vld [vmem:[%s1447_s0 + $0x50] sm:$0xff]  ;;  %v47_v25 = vld [vmem:[%s1447_s0 + $0x58] sm:$0xff]  ;;  %v1011_v29 = vld [vmem:[%s1448_s4 + $0x44] ss:$8 sps:$4 sm:$0xff]  }
   0x8   :  { %343 = vmatprep.subr.bf16.mxu1 %v999_v10  ;;  %v58_v26 = vpack.c.bf16 %v47_v25, %v46_v24  ;;  %v1008_v27 = vld [vmem:[%s1448_s4 + $0x34] ss:$8 sps:$4 sm:$0xff]   ;;  %v1006_v28 = vld [vmem:[%s1448_s4 + $0x30] ss:$8 sps:$4 sm:$0xff]   ;;  %v1009_v30 = vld [vmem:[%s1448_s4 + $0x40] ss:$8 sps:$4 sm:$0xff]  }
   0x9   :  { %v254_v31 = vld [vmem:[%s1448_s4 + $0x50] sm:$0xff]  ;;  %v1014_v36 = vld [vmem:[%s1449_s7] sm:$0xff]   ;;  %v1015_v37 = vld [vmem:[%s1449_s7 + $0x8] sm:$0xff]  }
   0xa   :  { %981 = vmatmul.mubr.msk.bf16.vlgmr.msra.gmra.mrb[0].mxu1 %vm68_vm1, %v54_v11  ;;  %v942_v32 = vcombine.high %v254_v31, %v254_v31  ;;  %v941_v33 = vcombine.low %v254_v31, %v254_v31  ;;  %692 = vmatpush1.bf16.msra.mxu0 %v1014_v36  ;;  %v1016_v38 = vld [vmem:[%s1449_s7 + $0x10] sm:$0xff]   ;;  %v1017_v39 = vld [vmem:[%s1449_s7 + $0x18] sm:$0xff]   ;;  %v1018_v40 = vld [vmem:[%s1449_s7 + $0x20] sm:$0xff]  }
   0xb   :  { %984 = vmatprep.mubr.msk.bf16.mxu1 %vm68_vm1, %v55_v12  ;;  %344 = vmatpush1.bf16.msra.mxu1 %v997_v13  ;;  %v1019_v41 = vld [vmem:[%s1449_s7 + $0x28] sm:$0xff]   ;;  %v1020_v42 = vld [vmem:[%s1449_s7 + $0x30] sm:$0xff]   ;;  %v1199_v43 = vld [vmem:[%s1450_s2] ss:$0 sm:$0xff] }
   0xc   :  { %345 = vmatprep.subr.bf16.mxu1 %v1002_v14  ;;  %v338_v34 = vsel %vm87_vm0, %v941_v33, 0  ;;  %693 = vmatprep.subr.bf16.mxu0 %v1024_v35  ;;  %v1204_v44 = vld [vmem:[%s1451_s3] ss:$0 sm:$0xff] }
   0xe   :  { %694 = vmatpush1.bf16.msra.mxu0 %v1015_v37 }
   0xf   :  { %346 = vmatpush1.bf16.msra.mxu1 %v1000_v17  ;;  %695 = vmatprep.subr.bf16.mxu0 %v1024_v35 }
  0x10   :  { %347 = vmatprep.subr.bf16.mxu1 %v1005_v20 }
  0x12   :  { %985 = vmatmul.mubr.msk.bf16.gmra.mrb[4].mxu1 %vm68_vm1, %v56_v21  ;;  %696 = vmatpush1.bf16.msra.mxu0 %v1016_v38 }
  0x13   :  { %988 = vmatprep.mubr.msk.bf16.mxu1 %vm68_vm1, %v57_v22  ;;  %348 = vmatpush1.bf16.msra.mxu1 %v1003_v23 }
  0x14   :  { %349 = vmatprep.subr.bf16.mxu1 %v1008_v27  ;;  %697 = vmatprep.subr.bf16.mxu0 %v1024_v35 }
  0x16   :  { %698 = vmatpush1.bf16.msra.mxu0 %v1017_v39 }
  0x17   :  { %350 = vmatpush1.bf16.msra.mxu1 %v1006_v28  ;;  %699 = vmatprep.subr.bf16.mxu0 %v1024_v35 }
  0x18   :  { %351 = vmatprep.subr.bf16.mxu1 %v1011_v29 }
  0x1a   :  { %989 = vmatmul.mubr.msk.bf16.gmra.mrb[8].mxu1 %vm68_vm1, %v58_v26  ;;  %700 = vmatpush1.bf16.msra.mxu0 %v1018_v40 }
  0x1b   :  { %352 = vmatpush1.bf16.msra.mxu1 %v1009_v30  ;;  %375 = vmatprep.mubr.bf16.mxu1 %v1024_v35 }
  0x1c   :  { %943 = vmatprep.subr.msk.bf16.mxu1 %vm87_vm0, %v942_v32  ;;  %701 = vmatprep.subr.bf16.mxu0 %v1024_v35 }
  0x1e   :  { %702 = vmatpush1.bf16.msra.mxu0 %v1019_v41 }
  0x1f   :  { %354 = vmatpush1.bf16.msra.mxu1 %v338_v34  ;;  %703 = vmatprep.subr.bf16.mxu0 %v1024_v35 }
  0x22   :  { %704 = vmatpush1.bf16.msra.mxu0 %v1020_v42 }
  0x23   :  { %705 = vmatprep.subr.bf16.mxu0 %v1024_v35 }
  0xdd   :  { %v982_v45 = vpop.f32.mrb[0].mxu1 }
  0xde   :  { %v180_v46 = vmul.f32 %v982_v45, %v1199_v43  ;;  %v125_v47 = vpop.f32.mrb[1].mxu1 }
  0xdf   :  { %v178_v48 = vmul.f32 %v1199_v43, %v125_v47  ;;  %v983_v49 = vpop.f32.mrb[2].mxu1 }
  0xe0   :  { %v198_v50 = vadd.f32 %v1204_v44, %v180_v46  ;;  %v181_v51 = vmul.f32 %v983_v49, %v1199_v43  ;;  %v128_v52 = vpop.f32.mrb[3].mxu1  ;;  %v1022_v49 = vld [vmem:[%s1449_s7 + $0x40] sm:$0xff]  }
  0xe1   :  { %v196_v53 = vadd.f32 %v1204_v44, %v178_v48  ;;  %v179_v54 = vmul.f32 %v1199_v43, %v128_v52 }
  0xe2   :  { %v222_v55 = vmul.f32 0.2, %v198_v50  ;;  %v199_v56 = vadd.f32 %v1204_v44, %v181_v51  ;;  %vm210_vm2 = vcmp.gt.f32.partialorder %v198_v50, 0.0  ;;  %v437_v51 = vlaneseq }
  0xe3   :  { %v220_v57 = vmul.f32 0.2, %v196_v53  ;;  %v197_v58 = vadd.f32 %v1204_v44, %v179_v54  ;;  %vm208_vm3 = vcmp.gt.f32.partialorder %v196_v53, 0.0  ;;  %v255_v54 = vld [vmem:[%s1452_s5] sm:$0x3]  ;;  %s1025_s5 = smov 64  }
  0xe4   :  { %vm211_vm4 = vcmp.gt.f32.partialorder %v199_v56, 0.0  ;;  %v223_v59 = vmul.f32 0.2, %v199_v56  ;;  %v234_v62 = vsel %vm210_vm2, %v198_v50, %v222_v55  ;;  %v1023_v50 = vld [vmem:[%s1449_s7 + $0x48] sm:$0xff]   ;;  %v438_v52 = vshrl.u32 %v437_v51, 7 }
  0xe5   :  { %vm209_vm5 = vcmp.gt.f32.partialorder %v197_v58, 0.0  ;;  %v221_v60 = vmul.f32 0.2, %v197_v58  ;;  %v986_v61 = vpop.f32.mrb[4].mxu1  ;;  %v232_v2 = vsel %vm208_vm3, %v196_v53, %v220_v57  ;;  %vm672_vm3 = vcmask 261120  }
  0xe6   :  { %v235_v63 = vsel %vm211_vm4, %v199_v56, %v223_v59  ;;  %v184_v0 = vmul.f32 %v986_v61, %v1199_v43  ;;  %v141_v1 = vpop.f32.mrb[5].mxu1  ;;  %v439_v53 = vsub.s32 0, %v438_v52  ;;  %v443_v55 = vsub.s32 1, %v438_v52  ;;  %v256_v56 = vld [vmem:[%s1453_s6] sm:$0x3] }
  0xe7   :  { %v233_v3 = vsel %vm209_vm5, %v197_v58, %v221_v60  ;;  %v182_v4 = vmul.f32 %v1199_v43, %v141_v1  ;;  %v987_v5 = vpop.f32.mrb[6].mxu1  ;;  %v258_v6 = vpack.c.bf16 %v235_v63, %v234_v62 }
  0xe8   :  { %v257_v7 = vpack.c.bf16 %v233_v3, %v232_v2  ;;  %v202_v8 = vadd.f32 %v1204_v44, %v184_v0  ;;  %v185_v9 = vmul.f32 %v987_v5, %v1199_v43  ;;  %v144_v10 = vpop.f32.mrb[7].mxu1  ;;  %v1258_v57 = vrot.slane %v255_v54, %v439_v53 }
  0xe9   :  { %v200_v11 = vadd.f32 %v1204_v44, %v182_v4  ;;  %v183_v12 = vmul.f32 %v1199_v43, %v144_v10  ;;  %v1262_v58 = vrot.slane %v256_v56, %v439_v53  ;;  %v1264_v60 = vrot.slane %v256_v56, %v443_v55 }
  0xea   :  { %vm214_vm7 = vcmp.gt.f32.partialorder %v202_v8, 0.0  ;;  %v226_v13 = vmul.f32 0.2, %v202_v8  ;;  %v203_v14 = vadd.f32 %v1204_v44, %v185_v9  ;;  %944 = vmatmul.mubr.msk.bf16.vlgmr.msra.gmra.mrb[12].mxu1 %vm318_vm6, %v257_v7 }
  0xeb   :  { %vm212_vm8 = vcmp.gt.f32.partialorder %v200_v11, 0.0  ;;  %v224_v15 = vmul.f32 0.2, %v200_v11  ;;  %v201_v16 = vadd.f32 %v1204_v44, %v183_v12  ;;  %385 = vmatprep.mubr.bf16.mxu1 %v1024_v35 }
  0xec   :  { %v238_v17 = vsel %vm214_vm7, %v202_v8, %v226_v13  ;;  %vm215_vm9 = vcmp.gt.f32.partialorder %v203_v14, 0.0  ;;  %v227_v18 = vmul.f32 0.2, %v203_v14 }
  0xed   :  { %v236_v19 = vsel %vm212_vm8, %v200_v11, %v224_v15  ;;  %vm213_vm10 = vcmp.gt.f32.partialorder %v201_v16, 0.0  ;;  %v225_v20 = vmul.f32 0.2, %v201_v16  ;;  %v990_v21 = vpop.f32.mrb[8].mxu1 }
  0xee   :  { %v239_v22 = vsel %vm215_vm9, %v203_v14, %v227_v18  ;;  %v188_v23 = vmul.f32 %v990_v21, %v1199_v43  ;;  %v157_v24 = vpop.f32.mrb[9].mxu1 }
  0xef   :  { %v237_v25 = vsel %vm213_vm10, %v201_v16, %v225_v20  ;;  %v186_v26 = vmul.f32 %v1199_v43, %v157_v24  ;;  %v991_v27 = vpop.f32.mrb[10].mxu1  ;;  %v260_v28 = vpack.c.bf16 %v239_v22, %v238_v17 }
  0xf0   :  { %v206_v29 = vadd.f32 %v1204_v44, %v188_v23  ;;  %v189_v30 = vmul.f32 %v991_v27, %v1199_v43  ;;  %v259_v31 = vpack.c.bf16 %v237_v25, %v236_v19  ;;  %v160_v32 = vpop.f32.mrb[11].mxu1 }
  0xf1   :  { %v204_v33 = vadd.f32 %v1204_v44, %v186_v26  ;;  %v187_v34 = vmul.f32 %v1199_v43, %v160_v32 }
  0xf2   :  { %945 = vmatmul.mubr.msk.bf16.gmra.mrb[16].mxu1 %vm318_vm6, %v258_v6  ;;  %vm218_vm11 = vcmp.gt.f32.partialorder %v206_v29, 0.0  ;;  %v230_v36 = vmul.f32 0.2, %v206_v29  ;;  %v207_v37 = vadd.f32 %v1204_v44, %v189_v30 }
  0xf3   :  { %vm216_vm12 = vcmp.gt.f32.partialorder %v204_v33, 0.0  ;;  %v228_v38 = vmul.f32 0.2, %v204_v33  ;;  %395 = vmatprep.mubr.bf16.mxu1 %v1024_v35  ;;  %v205_v39 = vadd.f32 %v1204_v44, %v187_v34  ;;  %v1021_v44 = vld [vmem:[%s1449_s7 + $0x38] sm:$0xff]  }
  0xf4   :  { %v242_v40 = vsel %vm218_vm11, %v206_v29, %v230_v36  ;;  %vm219_vm13 = vcmp.gt.f32.partialorder %v207_v37, 0.0  ;;  %v231_v41 = vmul.f32 0.2, %v207_v37  ;;  %706 = vmatpush1.bf16.msra.mxu0 %v1021_v44 }
  0xf5   :  { %v240_v42 = vsel %vm216_vm12, %v204_v33, %v228_v38  ;;  %vm217_vm14 = vcmp.gt.f32.partialorder %v205_v39, 0.0  ;;  %v229_v45 = vmul.f32 0.2, %v205_v39  ;;  %707 = vmatprep.subr.bf16.mxu0 %v1024_v35 }
  0xf6   :  { %v243_v46 = vsel %vm219_vm13, %v207_v37, %v231_v41 }
  0xf7   :  { %v241_v43 = vsel %vm217_vm14, %v205_v39, %v229_v45  ;;  %v262_v47 = vpack.c.bf16 %v243_v46, %v242_v40 }
  0xf8   :  { %v261_v48 = vpack.c.bf16 %v241_v43, %v240_v42  ;;  %708 = vmatpush1.bf16.msra.mxu0 %v1022_v49 }
  0xf9   :  { %709 = vmatprep.subr.bf16.mxu0 %v1024_v35 }
  0xfa   :  { %946 = vmatmul.mubr.msk.bf16.gmra.mrb[20].mxu1 %vm318_vm6, %v259_v31 }
  0xfb   :  { %405 = vmatprep.mubr.bf16.mxu1 %v1024_v35 }
  0xfc   :  { %710 = vmatpush1.bf16.msra.mxu0 %v1023_v50 }
 0x102   :  { %947 = vmatmul.mubr.msk.bf16.gmra.mrb[24].mxu1 %vm318_vm6, %v260_v28 }
 0x103   :  { %415 = vmatprep.mubr.bf16.mxu1 %v1024_v35 }
 0x10a   :  { %948 = vmatmul.mubr.msk.bf16.gmra.mrb[28].mxu1 %vm318_vm6, %v261_v48 }
 0x10b   :  { %425 = vmatprep.mubr.bf16.mxu1 %v1024_v35  ;;  %v1260_v35 = vrot.slane %v255_v54, %v443_v55 }
 0x112   :  { %949 = vmatmul.mubr.msk.bf16.gmra.mrb[32].mxu1 %vm318_vm6, %v262_v47 }
 0x1bd   :  { %v377_v59 = vpop.f32.mrb[12].mxu1 }
 0x1be   :  { %v447_v61 = vmul.f32 %v1258_v57, %v377_v59  ;;  %v379_v62 = vpop.f32.mrb[13].mxu1 }
 0x1bf   :  { %v448_v63 = vmul.f32 %v1260_v35, %v379_v62  ;;  %v381_v0 = vpop.f32.mrb[14].mxu1 }
 0x1c0   :  { %v482_v1 = vadd.f32 %v1262_v58, %v447_v61  ;;  %v449_v2 = vmul.f32 %v1258_v57, %v381_v0  ;;  %v383_v3 = vpop.f32.mrb[15].mxu1 }
 0x1c1   :  { %v483_v4 = vadd.f32 %v1264_v60, %v448_v63  ;;  %v450_v5 = vmul.f32 %v1260_v35, %v383_v3 }
 0x1c2   :  { %v530_v6 = vmul.f32 0.2, %v482_v1  ;;  %v484_v7 = vadd.f32 %v1262_v58, %v449_v2  ;;  %vm506_vm15 = vcmp.gt.f32.partialorder %v482_v1, 0.0 }
 0x1c3   :  { %v485_v8 = vadd.f32 %v1264_v60, %v450_v5  ;;  %v531_v9 = vmul.f32 0.2, %v483_v4  ;;  %vm507_vm1 = vcmp.gt.f32.partialorder %v483_v4, 0.0 }
 0x1c4   :  { %vm508_vm0 = vcmp.gt.f32.partialorder %v484_v7, 0.0  ;;  %v532_v10 = vmul.f32 0.2, %v484_v7  ;;  %v554_v15 = vsel %vm506_vm15, %v482_v1, %v530_v6 }
 0x1c5   :  { %v387_v11 = vpop.f32.mrb[16].mxu1  ;;  %vm509_vm2 = vcmp.gt.f32.partialorder %v485_v8, 0.0  ;;  %v533_v12 = vmul.f32 0.2, %v485_v8  ;;  %v555_v19 = vsel %vm507_vm1, %v483_v4, %v531_v9 }
 0x1c6   :  { %v451_v13 = vmul.f32 %v1258_v57, %v387_v11  ;;  %v389_v14 = vpop.f32.mrb[17].mxu1  ;;  %v556_v16 = vsel %vm508_vm0, %v484_v7, %v532_v10 }
 0x1c7   :  { %v452_v17 = vmul.f32 %v1260_v35, %v389_v14  ;;  %v391_v18 = vpop.f32.mrb[18].mxu1  ;;  %v557_v20 = vsel %vm509_vm2, %v485_v8, %v533_v12  ;;  %v600_v21 = vpack.c.bf16 %v556_v16, %v554_v15 }
 0x1c8   :  { %v486_v22 = vadd.f32 %v1262_v58, %v451_v13  ;;  %v453_v23 = vmul.f32 %v1258_v57, %v391_v18  ;;  %v393_v24 = vpop.f32.mrb[19].mxu1  ;;  %v601_v25 = vpack.c.bf16 %v557_v20, %v555_v19 }
 0x1c9   :  { %v487_v26 = vadd.f32 %v1264_v60, %v452_v17  ;;  %v454_v27 = vmul.f32 %v1260_v35, %v393_v24 }
 0x1ca   :  { %v534_v28 = vmul.f32 0.2, %v486_v22  ;;  %v488_v29 = vadd.f32 %v1262_v58, %v453_v23  ;;  %960 = vmatprep.mubr.msk.bf16.mxu0 %vm672_vm3, %v601_v25  ;;  %vm510_vm4 = vcmp.gt.f32.partialorder %v486_v22, 0.0 }
 0x1cb   :  { %v535_v30 = vmul.f32 0.2, %v487_v26  ;;  %v489_v31 = vadd.f32 %v1264_v60, %v454_v27  ;;  %724 = vmatmul.mubr.bf16.vlgmr.msra.gmra.mrb[0].mxu0 %v600_v21  ;;  %vm511_vm5 = vcmp.gt.f32.partialorder %v487_v26, 0.0 }
 0x1cc   :  { %vm512_vm6 = vcmp.gt.f32.partialorder %v488_v29, 0.0  ;;  %v536_v32 = vmul.f32 0.2, %v488_v29  ;;  %v558_v38 = vsel %vm510_vm4, %v486_v22, %v534_v28 }
 0x1cd   :  { %vm513_vm7 = vcmp.gt.f32.partialorder %v489_v31, 0.0  ;;  %v537_v33 = vmul.f32 0.2, %v489_v31  ;;  %v397_v34 = vpop.f32.mrb[20].mxu1  ;;  %v559_v40 = vsel %vm511_vm5, %v487_v26, %v535_v30 }
 0x1ce   :  { %v455_v36 = vmul.f32 %v1258_v57, %v397_v34  ;;  %v399_v37 = vpop.f32.mrb[21].mxu1  ;;  %v560_v39 = vsel %vm512_vm6, %v488_v29, %v536_v32 }
 0x1cf   :  { %v561_v41 = vsel %vm513_vm7, %v489_v31, %v537_v33  ;;  %v456_v42 = vmul.f32 %v1260_v35, %v399_v37  ;;  %v401_v45 = vpop.f32.mrb[22].mxu1  ;;  %v602_v46 = vpack.c.bf16 %v560_v39, %v558_v38 }
 0x1d0   :  { %v490_v43 = vadd.f32 %v1262_v58, %v455_v36  ;;  %v457_v47 = vmul.f32 %v1258_v57, %v401_v45  ;;  %v403_v48 = vpop.f32.mrb[23].mxu1  ;;  %v603_v44 = vpack.c.bf16 %v561_v41, %v559_v40 }
 0x1d1   :  { %v491_v49 = vadd.f32 %v1264_v60, %v456_v42  ;;  %v458_v50 = vmul.f32 %v1260_v35, %v403_v48 }
 0x1d2   :  { %v538_v51 = vmul.f32 0.2, %v490_v43  ;;  %v492_v52 = vadd.f32 %v1262_v58, %v457_v47  ;;  %961 = vmatprep.mubr.msk.bf16.mxu0 %vm672_vm3, %v603_v44  ;;  %vm514_vm8 = vcmp.gt.f32.partialorder %v490_v43, 0.0 }
 0x1d3   :  { %v539_v53 = vmul.f32 0.2, %v491_v49  ;;  %v493_v54 = vadd.f32 %v1264_v60, %v458_v50  ;;  %732 = vmatmul.mubr.bf16.gmra.mrb[4].mxu0 %v602_v46  ;;  %vm515_vm9 = vcmp.gt.f32.partialorder %v491_v49, 0.0 }
 0x1d4   :  { %vm516_vm10 = vcmp.gt.f32.partialorder %v492_v52, 0.0  ;;  %v540_v55 = vmul.f32 0.2, %v492_v52  ;;  %v562_v63 = vsel %vm514_vm8, %v490_v43, %v538_v51 }
 0x1d5   :  { %vm517_vm11 = vcmp.gt.f32.partialorder %v493_v54, 0.0  ;;  %v541_v56 = vmul.f32 0.2, %v493_v54  ;;  %v407_v59 = vpop.f32.mrb[24].mxu1  ;;  %v563_v1 = vsel %vm515_vm9, %v491_v49, %v539_v53 }
 0x1d6   :  { %v459_v61 = vmul.f32 %v1258_v57, %v407_v59  ;;  %v409_v62 = vpop.f32.mrb[25].mxu1  ;;  %v564_v0 = vsel %vm516_vm10, %v492_v52, %v540_v55 }
 0x1d7   :  { %v565_v2 = vsel %vm517_vm11, %v493_v54, %v541_v56  ;;  %v460_v3 = vmul.f32 %v1260_v35, %v409_v62  ;;  %v411_v4 = vpop.f32.mrb[26].mxu1  ;;  %v604_v5 = vpack.c.bf16 %v564_v0, %v562_v63 }
 0x1d8   :  { %v494_v6 = vadd.f32 %v1262_v58, %v459_v61  ;;  %v461_v7 = vmul.f32 %v1258_v57, %v411_v4  ;;  %v413_v8 = vpop.f32.mrb[27].mxu1  ;;  %v605_v9 = vpack.c.bf16 %v565_v2, %v563_v1 }
 0x1d9   :  { %v495_v10 = vadd.f32 %v1264_v60, %v460_v3  ;;  %v462_v11 = vmul.f32 %v1260_v35, %v413_v8 }
 0x1da   :  { %v542_v12 = vmul.f32 0.2, %v494_v6  ;;  %v496_v13 = vadd.f32 %v1262_v58, %v461_v7  ;;  %962 = vmatprep.mubr.msk.bf16.mxu0 %vm672_vm3, %v605_v9  ;;  %vm518_vm12 = vcmp.gt.f32.partialorder %v494_v6, 0.0 }
 0x1db   :  { %v543_v14 = vmul.f32 0.2, %v495_v10  ;;  %v497_v15 = vadd.f32 %v1264_v60, %v462_v11  ;;  %740 = vmatmul.mubr.bf16.gmra.mrb[8].mxu0 %v604_v5  ;;  %vm519_vm13 = vcmp.gt.f32.partialorder %v495_v10, 0.0 }
 0x1dc   :  { %vm520_vm14 = vcmp.gt.f32.partialorder %v496_v13, 0.0  ;;  %v544_v16 = vmul.f32 0.2, %v496_v13  ;;  %v566_v21 = vsel %vm518_vm12, %v494_v6, %v542_v12 }
 0x1dd   :  { %vm521_vm15 = vcmp.gt.f32.partialorder %v497_v15, 0.0  ;;  %v545_v17 = vmul.f32 0.2, %v497_v15  ;;  %v417_v18 = vpop.f32.mrb[28].mxu1  ;;  %v567_v23 = vsel %vm519_vm13, %v495_v10, %v543_v14 }
 0x1de   :  { %v463_v19 = vmul.f32 %v1258_v57, %v417_v18  ;;  %v419_v20 = vpop.f32.mrb[29].mxu1  ;;  %v568_v22 = vsel %vm520_vm14, %v496_v13, %v544_v16 }
 0x1df   :  { %v569_v24 = vsel %vm521_vm15, %v497_v15, %v545_v17  ;;  %v464_v25 = vmul.f32 %v1260_v35, %v419_v20  ;;  %v421_v26 = vpop.f32.mrb[30].mxu1  ;;  %v606_v27 = vpack.c.bf16 %v568_v22, %v566_v21 }
 0x1e0   :  { %v498_v28 = vadd.f32 %v1262_v58, %v463_v19  ;;  %v465_v29 = vmul.f32 %v1258_v57, %v421_v26  ;;  %v423_v30 = vpop.f32.mrb[31].mxu1  ;;  %v607_v31 = vpack.c.bf16 %v569_v24, %v567_v23 }
 0x1e1   :  { %v499_v32 = vadd.f32 %v1264_v60, %v464_v25  ;;  %v466_v33 = vmul.f32 %v1260_v35, %v423_v30 }
 0x1e2   :  { %v546_v34 = vmul.f32 0.2, %v498_v28  ;;  %v500_v36 = vadd.f32 %v1262_v58, %v465_v29  ;;  %963 = vmatprep.mubr.msk.bf16.mxu0 %vm672_vm3, %v607_v31  ;;  %vm522_vm0 = vcmp.gt.f32.partialorder %v498_v28, 0.0  ;;  %v1364_v31 = vld [vmem:[%s1455_s9] ss:$0 sm:$0xff] }
 0x1e3   :  { %v547_v37 = vmul.f32 0.2, %v499_v32  ;;  %v501_v38 = vadd.f32 %v1264_v60, %v466_v33  ;;  %748 = vmatmul.mubr.bf16.gmra.mrb[12].mxu0 %v606_v27  ;;  %vm523_vm1 = vcmp.gt.f32.partialorder %v499_v32, 0.0 }
 0x1e4   :  { %vm524_vm2 = vcmp.gt.f32.partialorder %v500_v36, 0.0  ;;  %v548_v39 = vmul.f32 0.2, %v500_v36  ;;  %v570_v46 = vsel %vm522_vm0, %v498_v28, %v546_v34  ;;  %v1359_v28 = vld [vmem:[%s1454_s8] ss:$0 sm:$0xff] }
 0x1e5   :  { %vm525_vm4 = vcmp.gt.f32.partialorder %v501_v38, 0.0  ;;  %v549_v40 = vmul.f32 0.2, %v501_v38  ;;  %v427_v41 = vpop.f32.mrb[32].mxu1  ;;  %v571_v47 = vsel %vm523_vm1, %v499_v32, %v547_v37 }
 0x1e6   :  { %v467_v42 = vmul.f32 %v1258_v57, %v427_v41  ;;  %v429_v45 = vpop.f32.mrb[33].mxu1  ;;  %v572_v43 = vsel %vm524_vm2, %v500_v36, %v548_v39 }
 0x1e7   :  { %v573_v48 = vsel %vm525_vm4, %v501_v38, %v549_v40  ;;  %v468_v44 = vmul.f32 %v1260_v35, %v429_v45  ;;  %v431_v49 = vpop.f32.mrb[34].mxu1  ;;  %v608_v50 = vpack.c.bf16 %v572_v43, %v570_v46 }
 0x1e8   :  { %v502_v51 = vadd.f32 %v1262_v58, %v467_v42  ;;  %v469_v52 = vmul.f32 %v1258_v57, %v431_v49  ;;  %v433_v53 = vpop.f32.mrb[35].mxu1  ;;  %v609_v54 = vpack.c.bf16 %v573_v48, %v571_v47 }
 0x1e9   :  { %v503_v55 = vadd.f32 %v1264_v60, %v468_v44  ;;  %v470_v56 = vmul.f32 %v1260_v35, %v433_v53 }
 0x1ea   :  { %v550_v59 = vmul.f32 0.2, %v502_v51  ;;  %v504_v61 = vadd.f32 %v1262_v58, %v469_v52  ;;  %964 = vmatprep.mubr.msk.bf16.mxu0 %vm672_vm3, %v609_v54  ;;  %vm526_vm5 = vcmp.gt.f32.partialorder %v502_v51, 0.0 }
 0x1eb   :  { %v551_v62 = vmul.f32 0.2, %v503_v55  ;;  %v505_v63 = vadd.f32 %v1264_v60, %v470_v56  ;;  %756 = vmatmul.mubr.bf16.gmra.mrb[16].mxu0 %v608_v50  ;;  %vm527_vm6 = vcmp.gt.f32.partialorder %v503_v55, 0.0 }
 0x1ec   :  { %vm528_vm7 = vcmp.gt.f32.partialorder %v504_v61, 0.0  ;;  %v552_v0 = vmul.f32 0.2, %v504_v61  ;;  %v574_v1 = vsel %vm526_vm5, %v502_v51, %v550_v59 }
 0x1ed   :  { %vm529_vm8 = vcmp.gt.f32.partialorder %v505_v63, 0.0  ;;  %v553_v57 = vmul.f32 0.2, %v505_v63  ;;  %v575_v3 = vsel %vm527_vm6, %v503_v55, %v551_v62 }
 0x1ee   :  { %v576_v2 = vsel %vm528_vm7, %v504_v61, %v552_v0 }
 0x1ef   :  { %v577_v4 = vsel %vm529_vm8, %v505_v63, %v553_v57  ;;  %v610_v35 = vpack.c.bf16 %v576_v2, %v574_v1 }
 0x1f0   :  { %v611_v5 = vpack.c.bf16 %v577_v4, %v575_v3 }
 0x1f2   :  { %965 = vmatprep.mubr.msk.bf16.mxu0 %vm672_vm3, %v611_v5  ;;  %vm904_vm3 = vcmask 523264  }
 0x1f3   :  { %764 = vmatmul.mubr.bf16.gmra.mrb[20].mxu0 %v610_v35 }
 0x29e   :  { %v725_v58 = vpop.f32.mrb[0].mxu0 }
 0x29f   :  { %784 = vrot.lane.b32.xlu0 %v725_v58, %s1025_s5  ;;  %v727_v60 = vpop.f32.mrb[1].mxu0 }
 0x2a0   :  { %v728_v6 = vpop.f32.mrb[2].mxu0 }
 0x2a1   :  { %v730_v7 = vpop.f32.mrb[3].mxu0 }
 0x2a3   :  { %786 = vrot.lane.b32.xlu0 %v728_v6, %s1025_s5 }
 0x2a6   :  { %v733_v8 = vpop.f32.mrb[4].mxu0 }
 0x2a7   :  { %788 = vrot.lane.b32.xlu1 %v733_v8, %s1025_s5  ;;  %v735_v9 = vpop.f32.mrb[5].mxu0 }
 0x2a8   :  { %v736_v10 = vpop.f32.mrb[6].mxu0 }
 0x2a9   :  { %v738_v11 = vpop.f32.mrb[7].mxu0 }
 0x2ab   :  { %790 = vrot.lane.b32.xlu1 %v736_v10, %s1025_s5 }
 0x2ae   :  { %v1324_v12 = vpop.f32.mrb[8].mxu0 }
 0x2af   :  { %792 = vrot.lane.b32.xlu0 %v1324_v12, %s1025_s5  ;;  %v743_v13 = vpop.f32.mrb[9].mxu0 }
 0x2b0   :  { %v1328_v14 = vpop.f32.mrb[10].mxu0 }
 0x2b1   :  { %794 = vrot.lane.b32.xlu1 %v1328_v14, %s1025_s5  ;;  %v746_v15 = vpop.f32.mrb[11].mxu0 }
 0x2b6   :  { %v1332_v16 = vpop.f32.mrb[12].mxu0 }
 0x2b7   :  { %796 = vrot.lane.b32.xlu0 %v1332_v16, %s1025_s5  ;;  %v751_v17 = vpop.f32.mrb[13].mxu0 }
 0x2b8   :  { %v1336_v18 = vpop.f32.mrb[14].mxu0 }
 0x2b9   :  { %798 = vrot.lane.b32.xlu1 %v1336_v18, %s1025_s5  ;;  %v754_v19 = vpop.f32.mrb[15].mxu0 }
 0x2be   :  { %v1340_v20 = vpop.f32.mrb[16].mxu0 }
 0x2bf   :  { %800 = vrot.lane.b32.xlu0 %v1340_v20, %s1025_s5  ;;  %v759_v21 = vpop.f32.mrb[17].mxu0 }
 0x2c0   :  { %v1344_v22 = vpop.f32.mrb[18].mxu0 }
 0x2c1   :  { %802 = vrot.lane.b32.xlu1 %v1344_v22, %s1025_s5  ;;  %v762_v23 = vpop.f32.mrb[19].mxu0 }
 0x2c6   :  { %v1348_v24 = vpop.f32.mrb[20].mxu0 }
 0x2c7   :  { %804 = vrot.lane.b32.xlu0 %v1348_v24, %s1025_s5  ;;  %v767_v25 = vpop.f32.mrb[21].mxu0 }
 0x2c8   :  { %v1352_v26 = vpop.f32.mrb[22].mxu0 }
 0x2c9   :  { %806 = vrot.lane.b32.xlu1 %v1352_v26, %s1025_s5  ;;  %v770_v27 = vpop.f32.mrb[23].mxu0 }
 0x311   :  { %v785_v29 = vpop.permute.xlu0 %784 }
 0x312   :  { %v820_v30 = vmax.f32 %v725_v58, %v785_v29 }
 0x314   :  { %v838_v32 = vmul.f32 %v1359_v28, %v820_v30 }
 0x315   :  { %v787_v33 = vpop.permute.xlu0 %786 }
 0x316   :  { %v856_v34 = vadd.f32 %v1364_v31, %v838_v32  ;;  %v821_v36 = vmax.f32 %v728_v6, %v787_v33 }
 0x318   :  { %vm868_vm9 = vcmp.gt.f32.partialorder %v856_v34, 0.0  ;;  %v880_v37 = vmul.f32 0.2, %v856_v34  ;;  %v839_v38 = vmul.f32 %v1359_v28, %v821_v36 }
 0x319   :  { %v789_v39 = vpop.permute.xlu1 %788 }
 0x31a   :  { %v892_v40 = vsel %vm868_vm9, %v856_v34, %v880_v37  ;;  %v857_v41 = vadd.f32 %v1364_v31, %v839_v38  ;;  %v822_v42 = vmax.f32 %v733_v8, %v789_v39 }
 0x31b   :  { %905 = vst.msk [vmem:[%s1456_s10] sm:$0xff] %vm904_vm3, %v892_v40 }
 0x31c   :  { %vm869_vm10 = vcmp.gt.f32.partialorder %v857_v41, 0.0  ;;  %v881_v45 = vmul.f32 0.2, %v857_v41  ;;  %v840_v46 = vmul.f32 %v1359_v28, %v822_v42 }
 0x31d   :  { %v791_v43 = vpop.permute.xlu1 %790 }
 0x31e   :  { %v893_v47 = vsel %vm869_vm10, %v857_v41, %v881_v45  ;;  %v858_v48 = vadd.f32 %v1364_v31, %v840_v46  ;;  %v823_v44 = vmax.f32 %v736_v10, %v791_v43 }
 0x31f   :  { %906 = vst.msk [vmem:[%s1456_s10 + $0x8] sm:$0xff] %vm904_vm3, %v893_v47 }
 0x320   :  { %vm870_vm11 = vcmp.gt.f32.partialorder %v858_v48, 0.0  ;;  %v882_v49 = vmul.f32 0.2, %v858_v48  ;;  %v841_v50 = vmul.f32 %v1359_v28, %v823_v44 }
 0x321   :  { %v793_v51 = vpop.permute.xlu0 %792 }
 0x322   :  { %v894_v52 = vsel %vm870_vm11, %v858_v48, %v882_v49  ;;  %v859_v53 = vadd.f32 %v1364_v31, %v841_v50  ;;  %v824_v54 = vmax.f32 %v1324_v12, %v793_v51 }
 0x323   :  { %907 = vst.msk [vmem:[%s1456_s10 + $0x10] sm:$0xff] %vm904_vm3, %v894_v52  ;;  %v795_v55 = vpop.permute.xlu1 %794 }
 0x324   :  { %vm871_vm12 = vcmp.gt.f32.partialorder %v859_v53, 0.0  ;;  %v883_v56 = vmul.f32 0.2, %v859_v53  ;;  %v842_v59 = vmul.f32 %v1359_v28, %v824_v54  ;;  %v825_v61 = vmax.f32 %v1328_v14, %v795_v55 }
 0x326   :  { %v895_v62 = vsel %vm871_vm12, %v859_v53, %v883_v56  ;;  %v860_v63 = vadd.f32 %v1364_v31, %v842_v59  ;;  %v843_v0 = vmul.f32 %v1359_v28, %v825_v61 }
 0x327   :  { %908 = vst.msk [vmem:[%s1456_s10 + $0x18] sm:$0xff] %vm904_vm3, %v895_v62 }
 0x328   :  { %vm872_vm13 = vcmp.gt.f32.partialorder %v860_v63, 0.0  ;;  %v884_v57 = vmul.f32 0.2, %v860_v63  ;;  %v861_v1 = vadd.f32 %v1364_v31, %v843_v0 }
 0x329   :  { %v797_v2 = vpop.permute.xlu0 %796 }
 0x32a   :  { %v896_v3 = vsel %vm872_vm13, %v860_v63, %v884_v57  ;;  %vm873_vm14 = vcmp.gt.f32.partialorder %v861_v1, 0.0  ;;  %v885_v4 = vmul.f32 0.2, %v861_v1  ;;  %v826_v35 = vmax.f32 %v1332_v16, %v797_v2 }
 0x32b   :  { %909 = vst.msk [vmem:[%s1456_s10 + $0x20] sm:$0xff] %vm904_vm3, %v896_v3  ;;  %v799_v5 = vpop.permute.xlu1 %798 }
 0x32c   :  { %v897_v58 = vsel %vm873_vm14, %v861_v1, %v885_v4  ;;  %v844_v60 = vmul.f32 %v1359_v28, %v826_v35  ;;  %v827_v6 = vmax.f32 %v1336_v18, %v799_v5 }
 0x32d   :  { %910 = vst.msk [vmem:[%s1456_s10 + $0x28] sm:$0xff] %vm904_vm3, %v897_v58 }
 0x32e   :  { %v862_v7 = vadd.f32 %v1364_v31, %v844_v60  ;;  %v845_v8 = vmul.f32 %v1359_v28, %v827_v6 }
 0x330   :  { %vm874_vm15 = vcmp.gt.f32.partialorder %v862_v7, 0.0  ;;  %v886_v9 = vmul.f32 0.2, %v862_v7  ;;  %v863_v10 = vadd.f32 %v1364_v31, %v845_v8 }
 0x331   :  { %v801_v11 = vpop.permute.xlu0 %800 }
 0x332   :  { %v898_v12 = vsel %vm874_vm15, %v862_v7, %v886_v9  ;;  %vm875_vm0 = vcmp.gt.f32.partialorder %v863_v10, 0.0  ;;  %v887_v13 = vmul.f32 0.2, %v863_v10  ;;  %v828_v14 = vmax.f32 %v1340_v20, %v801_v11 }
 0x333   :  { %911 = vst.msk [vmem:[%s1456_s10 + $0x30] sm:$0xff] %vm904_vm3, %v898_v12  ;;  %v803_v15 = vpop.permute.xlu1 %802 }
 0x334   :  { %v899_v16 = vsel %vm875_vm0, %v863_v10, %v887_v13  ;;  %v846_v17 = vmul.f32 %v1359_v28, %v828_v14  ;;  %v829_v18 = vmax.f32 %v1344_v22, %v803_v15 }
 0x335   :  { %912 = vst.msk [vmem:[%s1456_s10 + $0x38] sm:$0xff] %vm904_vm3, %v899_v16 }
 0x336   :  { %v864_v19 = vadd.f32 %v1364_v31, %v846_v17  ;;  %v847_v20 = vmul.f32 %v1359_v28, %v829_v18 }
 0x338   :  { %vm876_vm1 = vcmp.gt.f32.partialorder %v864_v19, 0.0  ;;  %v888_v21 = vmul.f32 0.2, %v864_v19  ;;  %v865_v23 = vadd.f32 %v1364_v31, %v847_v20 }
 0x339   :  { %v805_v25 = vpop.permute.xlu0 %804 }
 0x33a   :  { %v900_v27 = vsel %vm876_vm1, %v864_v19, %v888_v21  ;;  %vm877_vm2 = vcmp.gt.f32.partialorder %v865_v23, 0.0  ;;  %v889_v29 = vmul.f32 0.2, %v865_v23  ;;  %v830_v30 = vmax.f32 %v1348_v24, %v805_v25 }
 0x33b   :  { %913 = vst.msk [vmem:[%s1456_s10 + $0x40] sm:$0xff] %vm904_vm3, %v900_v27  ;;  %v807_v22 = vpop.permute.xlu1 %806 }
 0x33c   :  { %v901_v32 = vsel %vm877_vm2, %v865_v23, %v889_v29  ;;  %v848_v33 = vmul.f32 %v1359_v28, %v830_v30  ;;  %v831_v34 = vmax.f32 %v1352_v26, %v807_v22 }
 0x33d   :  { %914 = vst.msk [vmem:[%s1456_s10 + $0x48] sm:$0xff] %vm904_vm3, %v901_v32 }
 0x33e   :  { %v866_v36 = vadd.f32 %v1364_v31, %v848_v33  ;;  %v849_v24 = vmul.f32 %v1359_v28, %v831_v34 }
 0x340   :  { %vm878_vm4 = vcmp.gt.f32.partialorder %v866_v36, 0.0  ;;  %v890_v37 = vmul.f32 0.2, %v866_v36  ;;  %v867_v38 = vadd.f32 %v1364_v31, %v849_v24 }
 0x342   :  { %v902_v39 = vsel %vm878_vm4, %v866_v36, %v890_v37  ;;  %vm879_vm5 = vcmp.gt.f32.partialorder %v867_v38, 0.0  ;;  %v891_v40 = vmul.f32 0.2, %v867_v38 }
 0x343   :  { %915 = vst.msk [vmem:[%s1456_s10 + $0x50] sm:$0xff] %vm904_vm3, %v902_v39 }
 0x344   :  { %v903_v26 = vsel %vm879_vm5, %v867_v38, %v891_v40 }
 0x345   :  { %916 = vst.msk [vmem:[%s1456_s10 + $0x58] sm:$0xff] %vm904_vm3, %v903_v26 }

// kernel: audio2au_forward.3
= control target key start
LH: loop header
LB: loop body
LE: loop exit
PB: predicated region body
PF: predicated region fallthrough
CT: control target
= control target key end

     0   :  { %s12311_s0 = inlined_call_operand.vmem [shape: f32[8,768], index: 0, kind: input, shape index: {}]   ;;  %s12312_s1 = inlined_call_operand.hbm [shape: bf16[768,640], index: 1, kind: input, shape index: {}]   ;;  %s12313_s2 = inlined_call_operand.vmem [shape: f32[1,640], index: 2, kind: input, shape index: {}]   ;;  %s12314_s3 = inlined_call_operand.vmem [shape: f32[1,640], index: 3, kind: input, shape index: {}]   ;;  %s12315_s4 = inlined_call_operand.hbm [shape: bf16[640,512], index: 4, kind: input, shape index: {}]   ;;  %s12316_s5 = inlined_call_operand.vmem [shape: f32[1,256], index: 5, kind: input, shape index: {}]   ;;  %s12317_s6 = inlined_call_operand.vmem [shape: f32[1,256], index: 6, kind: input, shape index: {}]   ;;  %s12318_s7 = inlined_call_operand.vmem [shape: bf16[256,512], index: 7, kind: input, shape index: {}]   ;;  %s12319_s8 = inlined_call_operand.hbm [shape: bf16[256,512], index: 8, kind: input, shape index: {}]   ;;  %s12320_s9 = inlined_call_operand.hbm [shape: bf16[128,1024], index: 9, kind: input, shape index: {}]   ;;  %s12321_s10 = inlined_call_operand.vmem [shape: f32[1,512], index: 10, kind: input, shape index: {}]   ;;  %s12322_s11 = inlined_call_operand.vmem [shape: f32[1,512], index: 11, kind: input, shape index: {}]   ;;  %s12323_s12 = inlined_call_operand.hbm [shape: bf16[256,512], index: 12, kind: input, shape index: {}]   ;;  %s12324_s13 = inlined_call_operand.hbm [shape: bf16[256,512], index: 13, kind: input, shape index: {}]   ;;  %s12325_s14 = inlined_call_operand.hbm [shape: bf16[128,1024], index: 14, kind: input, shape index: {}]   ;;  %s12326_s15 = inlined_call_operand.vmem [shape: f32[1,512], index: 15, kind: input, shape index: {}]   ;;  %s12327_s16 = inlined_call_operand.vmem [shape: f32[1,512], index: 16, kind: input, shape index: {}]   ;;  %s12328_s17 = inlined_call_operand.vmem [shape: bf16[256,128], index: 17, kind: input, shape index: {}]   ;;  %s12329_s18 = inlined_call_operand.vmem [shape: f32[1,128], index: 18, kind: input, shape index: {}]   ;;  %s12330_s19 = inlined_call_operand.vmem [shape: bf16[128,64], index: 19, kind: input, shape index: {}]   ;;  %s12331_s20 = inlined_call_operand.vmem [shape: f32[1,64], index: 20, kind: input, shape index: {}]   ;;  %s12332_s21 = inlined_call_operand.hbm [shape: f32[8,256], index: 21, kind: output, shape index: {0}]   ;;  %s12333_s22 = inlined_call_operand.hbm [shape: f32[8,64], index: 22, kind: output, shape index: {1}]  }
   0x1   :  { %12488 = sst [smem:[#allocation68_spill]] %s12311_s0 }
   0x2   :  { %12489 = sst [smem:[#allocation69_spill]] %s12312_s1 }
   0x3   :  { %12490 = sst [smem:[#allocation70_spill]] %s12313_s2 }
   0x4   :  { %12491 = sst [smem:[#allocation71_spill]] %s12314_s3 }
   0x5   :  { %12492 = sst [smem:[#allocation72_spill]] %s12315_s4 }
   0x6   :  { %12493 = sst [smem:[#allocation73_spill]] %s12316_s5 }
   0x7   :  { %12494 = sst [smem:[#allocation74_spill]] %s12317_s6 }
   0x8   :  { %12495 = sst [smem:[#allocation75_spill]] %s12331_s20 }
   0x9   :  { %12496 = sst [smem:[#allocation76_spill]] %s12333_s22 }
   0xa   :  { %28 = vsyncpa [#allocation5], 0 }
   0xb   :  { %29 = vsyncpa [#allocation8], 0 }
   0xc   :  { %30 = vsyncpa [#allocation11], 0 }
   0xd   :  { %31 = vsyncpa [#allocation14], 0 }
   0xe   :  { %32 = vsyncpa [#allocation6], 0 }
   0xf   :  { %33 = vsyncpa [#allocation18], 0  ;;  %s10713_s3 = smov [#allocation7]   ;;  %s12497_s4 = sld [smem:[#allocation72_spill]] }
  0x10   :  { %s57_s28 = sshll.u32 %s10713_s3, 4  ;;  %s58_s28 = int_to_ptr.vmem [resolvable:$true] %s57_s28 }
  0x15   :  { %s10503_s0 = scalar_lea.hbm %s12497_s4, 20480 }
  0x16   :  { %p10504_p0 = scmp.ne.s32.totalorder %s12497_s4, %s10503_s0  ;;  %p10507_p1 = scmp.lt.u32.totalorder %s10503_s0, %s12497_s4 }
  0x18   :  { %p10509_p2 = pnand %p10507_p1, %p10504_p0 }
  0x1a   :  { %10512 = shalt.err (!%p10509_p2)
}
  0x1b   :  { %s10513_s6 = scalar_lea.vmem %s58_s28, 20480  ;;  %p10518_p4 = scmp.lt.s32.totalorder %s58_s28, %s58_s28 }
  0x1c   :  { %p10514_p3 = scmp.ne.s32.totalorder %s58_s28, %s10513_s6  ;;  %p10519_p5 = scmp.lt.s32.totalorder %s10513_s6, %s10513_s6 }
  0x1e   :  { %p10520_p6 = por %p10519_p5, %p10518_p4 }
  0x20   :  { %p10521_p7 = pnand %p10520_p6, %p10514_p3 }
  0x22   :  { %10524 = shalt.err (!%p10521_p7)
}
  0x23   :  { %s12338_s25 = smov 256   ;;  %s12340_s26 = smov 16  }
  0x24   :  { %63 = dma.hbm_to_vmem [thread:$0]  %s12497_s4, 20480, %s58_s28, [#allocation8], %s12338_s25, %s12338_s25, %s12340_s26  }
  0x25   :  { %s10716_s3 = smov [#allocation10]   ;;  %s10525_s23 = scalar_lea.hbm %s12320_s9, 8192 }
  0x26   :  { %s87_s29 = sshll.u32 %s10716_s3, 4  ;;  %p10526_p8 = scmp.ne.s32.totalorder %s12320_s9, %s10525_s23  ;;  %s88_s29 = int_to_ptr.vmem [resolvable:$true] %s87_s29 }
  0x27   :  { %p10529_p9 = scmp.lt.u32.totalorder %s10525_s23, %s12320_s9 }
  0x29   :  { %p10531_p10 = pnand %p10529_p9, %p10526_p8 }
  0x2b   :  { %10534 = shalt.err (!%p10531_p10)
}
  0x2c   :  { %s10535_s22 = scalar_lea.vmem %s88_s29, 8192  ;;  %p10540_p12 = scmp.lt.s32.totalorder %s88_s29, %s88_s29 }
  0x2d   :  { %p10536_p11 = scmp.ne.s32.totalorder %s88_s29, %s10535_s22  ;;  %p10541_p13 = scmp.lt.s32.totalorder %s10535_s22, %s10535_s22 }
  0x2f   :  { %p10542_p0 = por %p10541_p13, %p10540_p12 }
  0x31   :  { %p10543_p1 = pnand %p10542_p0, %p10536_p11 }
  0x33   :  { %10546 = shalt.err (!%p10543_p1)
}
  0x34   :  { %s12342_s28 = smov 512   ;;  %s12343_s4 = smov 32  }
  0x35   :  { %93 = dma.hbm_to_vmem [thread:$0]  %s12320_s9, 8192, %s88_s29, [#allocation11], %s12342_s28, %s12342_s28, %s12343_s4  }
  0x36   :  { %s10719_s3 = smov [#allocation13]   ;;  %s10720_s0 = smov [#allocation4]  }
  0x37   :  { %s115_s30 = sshll.u32 %s10719_s3, 4  ;;  %s41_s23 = sshll.u32 %s10720_s0, 4  ;;  %s116_s30 = int_to_ptr.vmem [resolvable:$true] %s115_s30  ;;  %s10876_s23 = int_to_ptr.vmem [resolvable:$true] %s41_s23 }
  0x38   :  { %s10547_s5 = scalar_lea.hbm %s12324_s13, 8192 }
  0x39   :  { %p10548_p2 = scmp.ne.s32.totalorder %s12324_s13, %s10547_s5  ;;  %p10551_p3 = scmp.lt.u32.totalorder %s10547_s5, %s12324_s13 }
  0x3b   :  { %p10553_p4 = pnand %p10551_p3, %p10548_p2 }
  0x3d   :  { %10556 = shalt.err (!%p10553_p4)
}
  0x3e   :  { %s10557_s9 = scalar_lea.vmem %s116_s30, 8192  ;;  %p10562_p6 = scmp.lt.s32.totalorder %s116_s30, %s116_s30 }
  0x3f   :  { %p10558_p5 = scmp.ne.s32.totalorder %s116_s30, %s10557_s9  ;;  %p10563_p7 = scmp.lt.s32.totalorder %s10557_s9, %s10557_s9 }
  0x41   :  { %p10564_p8 = por %p10563_p7, %p10562_p6 }
  0x43   :  { %p10565_p9 = pnand %p10564_p8, %p10558_p5 }
  0x45   :  { %10568 = shalt.err (!%p10565_p9)
}
  0x46   :  { %s12498_s29 = smov 16   ;;  %s12499_s2 = smov 256  }
  0x47   :  { %121 = dma.hbm_to_vmem [thread:$0]  %s12324_s13, 8192, %s116_s30, [#allocation14], %s12499_s2, %s12499_s2, %s12498_s29  }
  0x48   :  { %s12500_s25 = sld [smem:[#allocation69_spill]] }
  0x4e   :  { %s10569_s26 = scalar_lea.hbm %s12500_s25, 30720 }
  0x4f   :  { %p10570_p10 = scmp.ne.s32.totalorder %s12500_s25, %s10569_s26  ;;  %p10573_p11 = scmp.lt.u32.totalorder %s10569_s26, %s12500_s25 }
  0x51   :  { %p10575_p12 = pnand %p10573_p11, %p10570_p10 }
  0x53   :  { %10578 = shalt.err (!%p10575_p12)
}
  0x54   :  { %s10579_s9 = scalar_lea.vmem %s10876_s23, 30720  ;;  %p10584_p0 = scmp.lt.s32.totalorder %s10876_s23, %s10876_s23 }
  0x55   :  { %p10580_p13 = scmp.ne.s32.totalorder %s10876_s23, %s10579_s9  ;;  %p10585_p1 = scmp.lt.s32.totalorder %s10579_s9, %s10579_s9 }
  0x57   :  { %p10586_p2 = por %p10585_p1, %p10584_p0 }
  0x59   :  { %p10587_p3 = pnand %p10586_p2, %p10580_p13 }
  0x5b   :  { %10590 = shalt.err (!%p10587_p3)
}
  0x5c   :  { %s10721_s13 = smov 320   ;;  %s10722_s30 = smov 20  }
  0x5d   :  { %47 = dma.hbm_to_vmem [thread:$0]  %s12500_s25, 30720, %s10876_s23, [#allocation5], %s10721_s13, %s10721_s13, %s10722_s30  }
  0x5e   :  { %s10723_s0 = smov [#allocation9]   ;;  %s10724_s26 = smov [#allocation12]  }
  0x5f   :  { %s75_s22 = sshll.u32 %s10723_s0, 4  ;;  %s103_s1 = sshll.u32 %s10724_s26, 4  ;;  %s76_s22 = int_to_ptr.vmem [resolvable:$true] %s75_s22  ;;  %s10910_s1 = int_to_ptr.vmem [resolvable:$true] %s103_s1 }
  0x60   :  { %s10591_s6 = scalar_lea.hbm %s12319_s8, 8192 }
  0x61   :  { %p10592_p4 = scmp.ne.s32.totalorder %s12319_s8, %s10591_s6  ;;  %p10595_p5 = scmp.lt.u32.totalorder %s10591_s6, %s12319_s8 }
  0x63   :  { %p10597_p6 = pnand %p10595_p5, %p10592_p4 }
  0x65   :  { %10600 = shalt.err (!%p10597_p6)
}
  0x66   :  { %s10601_s23 = scalar_lea.vmem %s76_s22, 8192  ;;  %p10606_p8 = scmp.lt.s32.totalorder %s76_s22, %s76_s22 }
  0x67   :  { %p10602_p7 = scmp.ne.s32.totalorder %s76_s22, %s10601_s23  ;;  %p10607_p9 = scmp.lt.s32.totalorder %s10601_s23, %s10601_s23 }
  0x69   :  { %p10608_p10 = por %p10607_p9, %p10606_p8 }
  0x6b   :  { %p10609_p11 = pnand %p10608_p10, %p10602_p7 }
  0x6d   :  { %10612 = shalt.err (!%p10609_p11)
}
  0x6e   :  { %81 = dma.hbm_to_vmem [thread:$0]  %s12319_s8, 8192, %s76_s22, [#allocation8], %s12499_s2, %s12499_s2, %s12498_s29  }
  0x6f   :  { %s10613_s20 = scalar_lea.hbm %s12323_s12, 8192 }
  0x70   :  { %p10614_p12 = scmp.ne.s32.totalorder %s12323_s12, %s10613_s20  ;;  %p10617_p13 = scmp.lt.u32.totalorder %s10613_s20, %s12323_s12 }
  0x72   :  { %p10619_p0 = pnand %p10617_p13, %p10614_p12 }
  0x74   :  { %10622 = shalt.err (!%p10619_p0)
}
  0x75   :  { %s10623_s26 = scalar_lea.vmem %s10910_s1, 8192  ;;  %p10628_p2 = scmp.lt.s32.totalorder %s10910_s1, %s10910_s1 }
  0x76   :  { %p10624_p1 = scmp.ne.s32.totalorder %s10910_s1, %s10623_s26  ;;  %p10629_p3 = scmp.lt.s32.totalorder %s10623_s26, %s10623_s26 }
  0x78   :  { %p10630_p4 = por %p10629_p3, %p10628_p2 }
  0x7a   :  { %p10631_p5 = pnand %p10630_p4, %p10624_p1 }
  0x7c   :  { %10634 = shalt.err (!%p10631_p5)
}
  0x7d   :  { %109 = dma.hbm_to_vmem [thread:$0]  %s12323_s12, 8192, %s10910_s1, [#allocation11], %s12499_s2, %s12499_s2, %s12498_s29  }
  0x7e   :  { %s10725_s5 = smov [#allocation15]   ;;  %s10635_s23 = scalar_lea.hbm %s12325_s14, 8192 }
  0x7f   :  { %s127_s24 = sshll.u32 %s10725_s5, 4  ;;  %p10636_p6 = scmp.ne.s32.totalorder %s12325_s14, %s10635_s23  ;;  %s128_s24 = int_to_ptr.vmem [resolvable:$true] %s127_s24 }
  0x80   :  { %p10639_p7 = scmp.lt.u32.totalorder %s10635_s23, %s12325_s14 }
  0x82   :  { %p10641_p8 = pnand %p10639_p7, %p10636_p6 }
  0x84   :  { %10644 = shalt.err (!%p10641_p8)
}
  0x85   :  { %s10645_s20 = scalar_lea.vmem %s128_s24, 8192  ;;  %p10650_p10 = scmp.lt.s32.totalorder %s128_s24, %s128_s24 }
  0x86   :  { %p10646_p9 = scmp.ne.s32.totalorder %s128_s24, %s10645_s20  ;;  %p10651_p11 = scmp.lt.s32.totalorder %s10645_s20, %s10645_s20 }
  0x88   :  { %p10652_p12 = por %p10651_p11, %p10650_p10 }
  0x8a   :  { %p10653_p13 = pnand %p10652_p12, %p10646_p9 }
  0x8c   :  { %10656 = shalt.err (!%p10653_p13)
}
  0x8d   :  { %s12501_s12 = smov 32   ;;  %s12502_s29 = smov 512  }
  0x8e   :  { %133 = dma.hbm_to_vmem [thread:$0]  %s12325_s14, 8192, %s128_s24, [#allocation14], %s12502_s29, %s12502_s29, %s12501_s12  }
  0x8f   :  { %10701 = dma.done.wait [#allocation5], 30720  }
  0x90   :  { %10702 = vsyncadd [#allocation5], 4294936576 }
  0x91   :  { %10703 = dma.done.wait [#allocation8], 28672  }
  0x92   :  { %10704 = vsyncadd [#allocation8], 4294938624 }
  0x93   :  { %10705 = dma.done.wait [#allocation11], 16384  }
  0x94   :  { %10706 = vsyncadd [#allocation11], 4294950912 }
  0x95   :  { %10707 = dma.done.wait [#allocation14], 16384  }
  0x96   :  { %10708 = vsyncadd [#allocation14], 4294950912  ;;  %v9391_v0 = vld [vmem:[#allocation4 + $0x4] ss:$20 sps:$4 sm:$0xff]   ;;  %v9393_v1 = vld [vmem:[#allocation4 + $0xc] ss:$20 sps:$4 sm:$0xff]  }
  0x97   :  { %1721 = vmatprep.subr.bf16.mxu0 %v9391_v0  ;;  %v9395_v2 = vld [vmem:[#allocation4] ss:$20 sps:$4 sm:$0xff]   ;;  %v9396_v3 = vld [vmem:[#allocation4 + $0x8] ss:$20 sps:$4 sm:$0xff]   ;;  %1844 = vmatprep.subr.bf16.mxu1 %v9393_v1  ;;  %v9402_v7 = vld [vmem:[#allocation4 + $0x30] ss:$20 sps:$4 sm:$0xff]  }
  0x98   :  { %v9397_v4 = vld [vmem:[#allocation4 + $0x2c] ss:$20 sps:$4 sm:$0xff]   ;;  %1722 = vmatpush1.bf16.msra.mxu0 %v9395_v2  ;;  %1845 = vmatpush1.bf16.msra.mxu1 %v9396_v3  ;;  %v9399_v5 = vld [vmem:[#allocation4 + $0x34] ss:$20 sps:$4 sm:$0xff]   ;;  %v9405_v9 = vld [vmem:[#allocation4 + $0x5c] ss:$20 sps:$4 sm:$0xff]  }
  0x99   :  { %v9401_v6 = vld [vmem:[#allocation4 + $0x28] ss:$20 sps:$4 sm:$0xff]   ;;  %1723 = vmatprep.subr.bf16.mxu0 %v9397_v4  ;;  %1846 = vmatprep.subr.bf16.mxu1 %v9399_v5  ;;  %v9407_v10 = vld [vmem:[#allocation4 + $0x50] ss:$20 sps:$4 sm:$0xff]   ;;  %v9408_v11 = vld [vmem:[#allocation4 + $0x58] ss:$20 sps:$4 sm:$0xff]  }
  0x9a   :  { %v9403_v8 = vld [vmem:[#allocation4 + $0x54] ss:$20 sps:$4 sm:$0xff]   ;;  %v9409_v12 = vld [vmem:[#allocation4 + $0x7c] ss:$20 sps:$4 sm:$0xff]   ;;  %v9411_v13 = vld [vmem:[#allocation4 + $0x84] ss:$20 sps:$4 sm:$0xff]  }
  0x9b   :  { %v9413_v14 = vld [vmem:[#allocation4 + $0x78] ss:$20 sps:$4 sm:$0xff]   ;;  %v9414_v15 = vld [vmem:[#allocation4 + $0x80] ss:$20 sps:$4 sm:$0xff]   ;;  %v9420_v19 = vld [vmem:[#allocation4 + $0xa8] ss:$20 sps:$4 sm:$0xff]  }
  0x9c   :  { %1724 = vmatpush1.bf16.msra.mxu0 %v9401_v6  ;;  %1847 = vmatpush1.bf16.msra.mxu1 %v9402_v7  ;;  %v9415_v16 = vld [vmem:[#allocation4 + $0xa4] ss:$20 sps:$4 sm:$0xff]   ;;  %v9417_v17 = vld [vmem:[#allocation4 + $0xac] ss:$20 sps:$4 sm:$0xff]   ;;  %v9423_v21 = vld [vmem:[#allocation4 + $0xd4] ss:$20 sps:$4 sm:$0xff]  }
  0x9d   :  { %1725 = vmatprep.subr.bf16.mxu0 %v9403_v8  ;;  %1848 = vmatprep.subr.bf16.mxu1 %v9405_v9  ;;  %v9419_v18 = vld [vmem:[#allocation4 + $0xa0] ss:$20 sps:$4 sm:$0xff]   ;;  %v9425_v22 = vld [vmem:[#allocation4 + $0xc8] ss:$20 sps:$4 sm:$0xff]   ;;  %v9426_v23 = vld [vmem:[#allocation4 + $0xd0] ss:$20 sps:$4 sm:$0xff]  }
  0x9e   :  { %v9421_v20 = vld [vmem:[#allocation4 + $0xcc] ss:$20 sps:$4 sm:$0xff]   ;;  %v9427_v24 = vld [vmem:[#allocation4 + $0xf4] ss:$20 sps:$4 sm:$0xff]   ;;  %v9429_v25 = vld [vmem:[#allocation4 + $0xfc] ss:$20 sps:$4 sm:$0xff]  }
  0x9f   :  { %v9431_v26 = vld [vmem:[#allocation4 + $0xf0] ss:$20 sps:$4 sm:$0xff]   ;;  %v9432_v27 = vld [vmem:[#allocation4 + $0xf8] ss:$20 sps:$4 sm:$0xff]   ;;  %v9438_v31 = vld [vmem:[#allocation4 + $0x120] ss:$20 sps:$4 sm:$0xff]  }
  0xa0   :  { %1726 = vmatpush1.bf16.msra.mxu0 %v9407_v10  ;;  %1849 = vmatpush1.bf16.msra.mxu1 %v9408_v11  ;;  %v9433_v28 = vld [vmem:[#allocation4 + $0x11c] ss:$20 sps:$4 sm:$0xff]   ;;  %v9435_v29 = vld [vmem:[#allocation4 + $0x124] ss:$20 sps:$4 sm:$0xff]   ;;  %v9441_v33 = vld [vmem:[#allocation4 + $0x14c] ss:$20 sps:$4 sm:$0xff]  }
  0xa1   :  { %1727 = vmatprep.subr.bf16.mxu0 %v9409_v12  ;;  %1850 = vmatprep.subr.bf16.mxu1 %v9411_v13  ;;  %v9437_v30 = vld [vmem:[#allocation4 + $0x118] ss:$20 sps:$4 sm:$0xff]   ;;  %v9443_v34 = vld [vmem:[#allocation4 + $0x140] ss:$20 sps:$4 sm:$0xff]   ;;  %v9444_v35 = vld [vmem:[#allocation4 + $0x148] ss:$20 sps:$4 sm:$0xff]  }
  0xa2   :  { %v9439_v32 = vld [vmem:[#allocation4 + $0x144] ss:$20 sps:$4 sm:$0xff]   ;;  %v9445_v36 = vld [vmem:[#allocation4 + $0x16c] ss:$20 sps:$4 sm:$0xff]   ;;  %v9447_v37 = vld [vmem:[#allocation4 + $0x174] ss:$20 sps:$4 sm:$0xff]  }
  0xa3   :  { %v9449_v38 = vld [vmem:[#allocation4 + $0x168] ss:$20 sps:$4 sm:$0xff]   ;;  %v9450_v39 = vld [vmem:[#allocation4 + $0x170] ss:$20 sps:$4 sm:$0xff]   ;;  %v9456_v43 = vld [vmem:[#allocation4 + $0x198] ss:$20 sps:$4 sm:$0xff]  }
  0xa4   :  { %1728 = vmatpush1.bf16.msra.mxu0 %v9413_v14  ;;  %1851 = vmatpush1.bf16.msra.mxu1 %v9414_v15  ;;  %v9451_v40 = vld [vmem:[#allocation4 + $0x194] ss:$20 sps:$4 sm:$0xff]   ;;  %v9453_v41 = vld [vmem:[#allocation4 + $0x19c] ss:$20 sps:$4 sm:$0xff]   ;;  %v9459_v45 = vld [vmem:[#allocation4 + $0x1c4] ss:$20 sps:$4 sm:$0xff]  }
  0xa5   :  { %1729 = vmatprep.subr.bf16.mxu0 %v9415_v16  ;;  %1852 = vmatprep.subr.bf16.mxu1 %v9417_v17  ;;  %v9455_v42 = vld [vmem:[#allocation4 + $0x190] ss:$20 sps:$4 sm:$0xff]   ;;  %s12503_s27 = sld [smem:[#allocation68_spill]]  ;;  %v9461_v47 = vld [vmem:[#allocation4 + $0x1b8] ss:$20 sps:$4 sm:$0xff]   ;;  %s12506_s28 = sld [smem:[#allocation70_spill]] }
  0xa6   :  { %v9457_v44 = vld [vmem:[#allocation4 + $0x1bc] ss:$20 sps:$4 sm:$0xff]   ;;  %v9462_v49 = vld [vmem:[#allocation4 + $0x1c0] ss:$20 sps:$4 sm:$0xff]   ;;  %v9463_v50 = vld [vmem:[#allocation4 + $0x1e4] ss:$20 sps:$4 sm:$0xff]  }
  0xa7   :  { %v9465_v51 = vld [vmem:[#allocation4 + $0x1ec] ss:$20 sps:$4 sm:$0xff]   ;;  %v9468_v53 = vld [vmem:[#allocation4 + $0x1e8] ss:$20 sps:$4 sm:$0xff]   ;;  %v9474_v57 = vld [vmem:[#allocation4 + $0x210] ss:$20 sps:$4 sm:$0xff]  }
  0xa8   :  { %1730 = vmatpush1.bf16.msra.mxu0 %v9419_v18  ;;  %1853 = vmatpush1.bf16.msra.mxu1 %v9420_v19  ;;  %v9467_v52 = vld [vmem:[#allocation4 + $0x1e0] ss:$20 sps:$4 sm:$0xff]   ;;  %v9473_v56 = vld [vmem:[#allocation4 + $0x208] ss:$20 sps:$4 sm:$0xff]   ;;  %v9479_v60 = vld [vmem:[#allocation4 + $0x230] ss:$20 sps:$4 sm:$0xff]  }
  0xa9   :  { %1731 = vmatprep.subr.bf16.mxu0 %v9421_v20  ;;  %1854 = vmatprep.subr.bf16.mxu1 %v9423_v21  ;;  %v9469_v54 = vld [vmem:[#allocation4 + $0x20c] ss:$20 sps:$4 sm:$0xff]   ;;  %v9471_v55 = vld [vmem:[#allocation4 + $0x214] ss:$20 sps:$4 sm:$0xff]   ;;  %v9477_v59 = vld [vmem:[#allocation4 + $0x23c] ss:$20 sps:$4 sm:$0xff]  }
  0xaa   :  { %v9475_v58 = vld [vmem:[#allocation4 + $0x234] ss:$20 sps:$4 sm:$0xff]   ;;  %v9480_v61 = vld [vmem:[#allocation4 + $0x238] ss:$20 sps:$4 sm:$0xff]   ;;  %v9481_v62 = vld [vmem:[#allocation4 + $0x25c] ss:$20 sps:$4 sm:$0xff]  }
  0xab   :  { %v172_v46 = vld [vmem:[%s12503_s27 + $0x8] sm:$0xff]  ;;  %v9486_v1 = vld [vmem:[#allocation4 + $0x260] ss:$20 sps:$4 sm:$0xff]   ;;  %v9496_v11 = vld [vmem:[#allocation4 + $0x2b0] ss:$20 sps:$4 sm:$0xff]   ;;  %s12509_s12 = sld [smem:[#allocation71_spill]] }
  0xac   :  { %1732 = vmatpush1.bf16.msra.mxu0 %v9425_v22  ;;  %1855 = vmatpush1.bf16.msra.mxu1 %v9426_v23  ;;  %v10965_v48 = vpack.c.bf16 %v172_v46, %v172_v46  ;;  %v9483_v63 = vld [vmem:[#allocation4 + $0x264] ss:$20 sps:$4 sm:$0xff]   ;;  %v171_v2 = vld [vmem:[%s12503_s27] sm:$0xff]  ;;  %v9492_v4 = vld [vmem:[#allocation4 + $0x28c] ss:$20 sps:$4 sm:$0xff]   ;;  %s12511_s20 = sld [smem:[#allocation73_spill]] }
  0xad   :  { %1733 = vmatprep.subr.bf16.mxu0 %v9427_v24  ;;  %1856 = vmatprep.subr.bf16.mxu1 %v9429_v25  ;;  %v9485_v0 = vld [vmem:[#allocation4 + $0x258] ss:$20 sps:$4 sm:$0xff]   ;;  %v10972_v5 = vpack.c.bf16 %v171_v2, %v171_v2  ;;  %v9487_v6 = vld [vmem:[#allocation4 + $0x280] ss:$20 sps:$4 sm:$0xff]   ;;  %v9490_v7 = vld [vmem:[#allocation4 + $0x288] ss:$20 sps:$4 sm:$0xff]  }
  0xae   :  { %1753 = vmatprep.mubr.bf16.mxu0 %v10965_v48  ;;  %1876 = vmatprep.mubr.bf16.mxu1 %v10965_v48  ;;  %v9489_v3 = vld [vmem:[#allocation4 + $0x284] ss:$20 sps:$4 sm:$0xff]   ;;  %v9495_v8 = vld [vmem:[#allocation4 + $0x2ac] ss:$20 sps:$4 sm:$0xff]   ;;  %v9498_v9 = vld [vmem:[#allocation4 + $0x2b4] ss:$20 sps:$4 sm:$0xff]  }
  0xaf   :  { %v9493_v10 = vld [vmem:[#allocation4 + $0x2a8] ss:$20 sps:$4 sm:$0xff]   ;;  %v9499_v14 = vld [vmem:[#allocation4 + $0x2d0] ss:$20 sps:$4 sm:$0xff]   ;;  %v9502_v15 = vld [vmem:[#allocation4 + $0x2d8] ss:$20 sps:$4 sm:$0xff]  }
  0xb0   :  { %1734 = vmatpush1.bf16.msra.mxu0 %v9431_v26  ;;  %1857 = vmatpush1.bf16.msra.mxu1 %v9432_v27  ;;  %v9501_v12 = vld [vmem:[#allocation4 + $0x2d4] ss:$20 sps:$4 sm:$0xff]   ;;  %v9504_v13 = vld [vmem:[#allocation4 + $0x2dc] ss:$20 sps:$4 sm:$0xff]   ;;  %v9510_v17 = vld [vmem:[#allocation4 + $0x304] ss:$20 sps:$4 sm:$0xff]  }
  0xb1   :  { %1735 = vmatprep.subr.bf16.mxu0 %v9433_v28  ;;  %1858 = vmatprep.subr.bf16.mxu1 %v9435_v29  ;;  %v9507_v16 = vld [vmem:[#allocation4 + $0x2fc] ss:$20 sps:$4 sm:$0xff]   ;;  %v9505_v18 = vld [vmem:[#allocation4 + $0x2f8] ss:$20 sps:$4 sm:$0xff]   ;;  %v9508_v19 = vld [vmem:[#allocation4 + $0x300] ss:$20 sps:$4 sm:$0xff]  }
  0xb2   :  { %v9513_v20 = vld [vmem:[#allocation4 + $0x324] ss:$20 sps:$4 sm:$0xff]   ;;  %v9516_v21 = vld [vmem:[#allocation4 + $0x32c] ss:$20 sps:$4 sm:$0xff]   ;;  %v9514_v23 = vld [vmem:[#allocation4 + $0x328] ss:$20 sps:$4 sm:$0xff]  }
  0xb3   :  { %v9511_v22 = vld [vmem:[#allocation4 + $0x320] ss:$20 sps:$4 sm:$0xff]   ;;  %v9517_v26 = vld [vmem:[#allocation4 + $0x348] ss:$20 sps:$4 sm:$0xff]   ;;  %v9520_v27 = vld [vmem:[#allocation4 + $0x350] ss:$20 sps:$4 sm:$0xff]  }
  0xb4   :  { %1736 = vmatpush1.bf16.msra.mxu0 %v9437_v30  ;;  %1859 = vmatpush1.bf16.msra.mxu1 %v9438_v31  ;;  %v9519_v24 = vld [vmem:[#allocation4 + $0x34c] ss:$20 sps:$4 sm:$0xff]   ;;  %v9522_v25 = vld [vmem:[#allocation4 + $0x354] ss:$20 sps:$4 sm:$0xff]   ;;  %v9528_v29 = vld [vmem:[#allocation4 + $0x37c] ss:$20 sps:$4 sm:$0xff]  }
  0xb5   :  { %1737 = vmatprep.subr.bf16.mxu0 %v9439_v32  ;;  %1860 = vmatprep.subr.bf16.mxu1 %v9441_v33  ;;  %v9525_v28 = vld [vmem:[#allocation4 + $0x374] ss:$20 sps:$4 sm:$0xff]   ;;  %v9523_v31 = vld [vmem:[#allocation4 + $0x370] ss:$20 sps:$4 sm:$0xff]   ;;  %v9526_v33 = vld [vmem:[#allocation4 + $0x378] ss:$20 sps:$4 sm:$0xff]  }
  0xb6   :  { %v174_v30 = vld [vmem:[%s12503_s27 + $0x18] sm:$0xff]  ;;  %s12512_s2 = sld [smem:[#allocation74_spill]]  ;;  %vm10728_vm8 = vmmov 0  }
  0xb7   :  { %v10979_v32 = vpack.c.bf16 %v174_v30, %v174_v30  ;;  %v9549_v46 = vld [vmem:[#allocation4 + $0x414] ss:$20 sps:$4 sm:$0xff]   ;;  %v9574_v2 = vld [vmem:[#allocation4 + $0x4b8] ss:$20 sps:$4 sm:$0xff]  }
  0xb8   :  { %1738 = vmatpush1.bf16.msra.mxu0 %v9443_v34  ;;  %1861 = vmatpush1.bf16.msra.mxu1 %v9444_v35  ;;  %v9531_v34 = vld [vmem:[#allocation4 + $0x39c] ss:$20 sps:$4 sm:$0xff]   ;;  %v9534_v35 = vld [vmem:[#allocation4 + $0x3a4] ss:$20 sps:$4 sm:$0xff]   ;;  %v9607_v30 = vld [vmem:[#allocation4 + $0x5a0] ss:$20 sps:$4 sm:$0xff]  }
  0xb9   :  { %1739 = vmatprep.subr.bf16.mxu0 %v9445_v36  ;;  %1862 = vmatprep.subr.bf16.mxu1 %v9447_v37  ;;  %v9529_v36 = vld [vmem:[#allocation4 + $0x398] ss:$20 sps:$4 sm:$0xff]   ;;  %v9532_v37 = vld [vmem:[#allocation4 + $0x3a0] ss:$20 sps:$4 sm:$0xff]  }
  0xbc   :  { %1740 = vmatpush1.bf16.msra.mxu0 %v9449_v38  ;;  %1863 = vmatpush1.bf16.msra.mxu1 %v9450_v39  ;;  %v9537_v38 = vld [vmem:[#allocation4 + $0x3c4] ss:$20 sps:$4 sm:$0xff]   ;;  %v9540_v39 = vld [vmem:[#allocation4 + $0x3cc] ss:$20 sps:$4 sm:$0xff]  }
  0xbd   :  { %1741 = vmatprep.subr.bf16.mxu0 %v9451_v40  ;;  %1864 = vmatprep.subr.bf16.mxu1 %v9453_v41  ;;  %v9535_v40 = vld [vmem:[#allocation4 + $0x3c0] ss:$20 sps:$4 sm:$0xff]   ;;  %v9538_v41 = vld [vmem:[#allocation4 + $0x3c8] ss:$20 sps:$4 sm:$0xff]  }
  0xc0   :  { %1742 = vmatpush1.bf16.msra.mxu0 %v9455_v42  ;;  %1865 = vmatpush1.bf16.msra.mxu1 %v9456_v43  ;;  %v9543_v42 = vld [vmem:[#allocation4 + $0x3ec] ss:$20 sps:$4 sm:$0xff]   ;;  %v9546_v43 = vld [vmem:[#allocation4 + $0x3f4] ss:$20 sps:$4 sm:$0xff]  }
  0xc1   :  { %1743 = vmatprep.subr.bf16.mxu0 %v9457_v44  ;;  %1866 = vmatprep.subr.bf16.mxu1 %v9459_v45  ;;  %v9541_v44 = vld [vmem:[#allocation4 + $0x3e8] ss:$20 sps:$4 sm:$0xff]   ;;  %v9544_v45 = vld [vmem:[#allocation4 + $0x3f0] ss:$20 sps:$4 sm:$0xff]  }
  0xc4   :  { %1744 = vmatpush1.bf16.msra.mxu0 %v9461_v47  ;;  %1867 = vmatpush1.bf16.msra.mxu1 %v9462_v49  ;;  %v9552_v47 = vld [vmem:[#allocation4 + $0x41c] ss:$20 sps:$4 sm:$0xff]  }
  0xc5   :  { %1745 = vmatprep.subr.bf16.mxu0 %v9463_v50  ;;  %1868 = vmatprep.subr.bf16.mxu1 %v9465_v51  ;;  %v9547_v49 = vld [vmem:[#allocation4 + $0x410] ss:$20 sps:$4 sm:$0xff]   ;;  %v9550_v50 = vld [vmem:[#allocation4 + $0x418] ss:$20 sps:$4 sm:$0xff]  }
  0xc6   :  { %v9555_v51 = vld [vmem:[#allocation4 + $0x43c] ss:$20 sps:$4 sm:$0xff]  }
  0xc8   :  { %1746 = vmatpush1.bf16.msra.mxu0 %v9467_v52  ;;  %1869 = vmatpush1.bf16.msra.mxu1 %v9468_v53  ;;  %v9558_v52 = vld [vmem:[#allocation4 + $0x444] ss:$20 sps:$4 sm:$0xff]  }
  0xc9   :  { %1747 = vmatprep.subr.bf16.mxu0 %v9469_v54  ;;  %1870 = vmatprep.subr.bf16.mxu1 %v9471_v55  ;;  %v9553_v53 = vld [vmem:[#allocation4 + $0x438] ss:$20 sps:$4 sm:$0xff]   ;;  %v9556_v54 = vld [vmem:[#allocation4 + $0x440] ss:$20 sps:$4 sm:$0xff]  }
  0xca   :  { %v9561_v55 = vld [vmem:[#allocation4 + $0x464] ss:$20 sps:$4 sm:$0xff]  }
  0xcc   :  { %1748 = vmatpush1.bf16.msra.mxu0 %v9473_v56  ;;  %1871 = vmatpush1.bf16.msra.mxu1 %v9474_v57  ;;  %v9564_v56 = vld [vmem:[#allocation4 + $0x46c] ss:$20 sps:$4 sm:$0xff]  }
  0xcd   :  { %1749 = vmatprep.subr.bf16.mxu0 %v9475_v58  ;;  %1872 = vmatprep.subr.bf16.mxu1 %v9477_v59  ;;  %v9559_v57 = vld [vmem:[#allocation4 + $0x460] ss:$20 sps:$4 sm:$0xff]   ;;  %v9562_v58 = vld [vmem:[#allocation4 + $0x468] ss:$20 sps:$4 sm:$0xff]  }
  0xce   :  { %v9567_v59 = vld [vmem:[#allocation4 + $0x48c] ss:$20 sps:$4 sm:$0xff]  }
  0xd0   :  { %1750 = vmatpush1.bf16.msra.mxu0 %v9479_v60  ;;  %1873 = vmatpush1.bf16.msra.mxu1 %v9480_v61  ;;  %v9570_v60 = vld [vmem:[#allocation4 + $0x494] ss:$20 sps:$4 sm:$0xff]  }
  0xd1   :  { %1751 = vmatprep.subr.bf16.mxu0 %v9481_v62  ;;  %1874 = vmatprep.subr.bf16.mxu1 %v9483_v63  ;;  %v9565_v61 = vld [vmem:[#allocation4 + $0x488] ss:$20 sps:$4 sm:$0xff]   ;;  %v9568_v62 = vld [vmem:[#allocation4 + $0x490] ss:$20 sps:$4 sm:$0xff]  }
  0xd2   :  { %v9573_v63 = vld [vmem:[#allocation4 + $0x4b4] ss:$20 sps:$4 sm:$0xff]  }
  0xd4   :  { %1752 = vmatpush1.bf16.msra.mxu0 %v9485_v0  ;;  %1875 = vmatpush1.bf16.msra.mxu1 %v9486_v1  ;;  %v9576_v0 = vld [vmem:[#allocation4 + $0x4bc] ss:$20 sps:$4 sm:$0xff]  }
  0xd5   :  { %1762 = vmatprep.subr.bf16.mxu0 %v9489_v3  ;;  %1885 = vmatprep.subr.bf16.mxu1 %v9492_v4  ;;  %v9571_v1 = vld [vmem:[#allocation4 + $0x4b0] ss:$20 sps:$4 sm:$0xff]  }
  0xd6   :  { %v9579_v3 = vld [vmem:[#allocation4 + $0x4dc] ss:$20 sps:$4 sm:$0xff]   ;;  %v9582_v4 = vld [vmem:[#allocation4 + $0x4e4] ss:$20 sps:$4 sm:$0xff]  }
  0xd7   :  { %1754 = vmatmul.mubr.bf16.vlgmr.msra.gmra.mrb[0].mxu0 %v10972_v5  ;;  %1877 = vmatmul.mubr.bf16.vlgmr.msra.gmra.mrb[0].mxu1 %v10972_v5 }
  0xd8   :  { %1763 = vmatpush1.bf16.msra.mxu0 %v9487_v6  ;;  %1886 = vmatpush1.bf16.msra.mxu1 %v9490_v7  ;;  %v9577_v6 = vld [vmem:[#allocation4 + $0x4d8] ss:$20 sps:$4 sm:$0xff]   ;;  %v9580_v7 = vld [vmem:[#allocation4 + $0x4e0] ss:$20 sps:$4 sm:$0xff]  }
  0xd9   :  { %1764 = vmatprep.subr.bf16.mxu0 %v9495_v8  ;;  %1887 = vmatprep.subr.bf16.mxu1 %v9498_v9  ;;  %v9585_v8 = vld [vmem:[#allocation4 + $0x504] ss:$20 sps:$4 sm:$0xff]  }
  0xda   :  { %1794 = vmatprep.mubr.bf16.mxu0 %v10979_v32  ;;  %1917 = vmatprep.mubr.bf16.mxu1 %v10979_v32  ;;  %v173_v9 = vld [vmem:[%s12503_s27 + $0x10] sm:$0xff] }
  0xdc   :  { %1765 = vmatpush1.bf16.msra.mxu0 %v9493_v10  ;;  %1888 = vmatpush1.bf16.msra.mxu1 %v9496_v11  ;;  %v9588_v10 = vld [vmem:[#allocation4 + $0x50c] ss:$20 sps:$4 sm:$0xff]  }
  0xdd   :  { %1766 = vmatprep.subr.bf16.mxu0 %v9501_v12  ;;  %1889 = vmatprep.subr.bf16.mxu1 %v9504_v13  ;;  %v9583_v11 = vld [vmem:[#allocation4 + $0x500] ss:$20 sps:$4 sm:$0xff]   ;;  %v10986_v12 = vpack.c.bf16 %v173_v9, %v173_v9  ;;  %v9586_v13 = vld [vmem:[#allocation4 + $0x508] ss:$20 sps:$4 sm:$0xff]   ;;  %v9667_v9 = vld [vmem:[#allocation4 + $0x730] ss:$20 sps:$4 sm:$0xff]  }
  0xe0   :  { %1767 = vmatpush1.bf16.msra.mxu0 %v9499_v14  ;;  %1890 = vmatpush1.bf16.msra.mxu1 %v9502_v15  ;;  %v9591_v14 = vld [vmem:[#allocation4 + $0x52c] ss:$20 sps:$4 sm:$0xff]   ;;  %v9594_v15 = vld [vmem:[#allocation4 + $0x534] ss:$20 sps:$4 sm:$0xff]  }
  0xe1   :  { %1768 = vmatprep.subr.bf16.mxu0 %v9507_v16  ;;  %1891 = vmatprep.subr.bf16.mxu1 %v9510_v17  ;;  %v176_v16 = vld [vmem:[%s12503_s27 + $0x28] sm:$0xff] }
  0xe2   :  { %v9589_v17 = vld [vmem:[#allocation4 + $0x528] ss:$20 sps:$4 sm:$0xff]  }
  0xe4   :  { %1769 = vmatpush1.bf16.msra.mxu0 %v9505_v18  ;;  %1892 = vmatpush1.bf16.msra.mxu1 %v9508_v19  ;;  %v10991_v18 = vpack.c.bf16 %v176_v16, %v176_v16  ;;  %v9592_v19 = vld [vmem:[#allocation4 + $0x530] ss:$20 sps:$4 sm:$0xff]  }
  0xe5   :  { %1770 = vmatprep.subr.bf16.mxu0 %v9513_v20  ;;  %1893 = vmatprep.subr.bf16.mxu1 %v9516_v21  ;;  %v9597_v20 = vld [vmem:[#allocation4 + $0x554] ss:$20 sps:$4 sm:$0xff]   ;;  %v9600_v21 = vld [vmem:[#allocation4 + $0x55c] ss:$20 sps:$4 sm:$0xff]  }
  0xe6   :  { %v175_v16 = vld [vmem:[%s12503_s27 + $0x20] sm:$0xff] }
  0xe8   :  { %1771 = vmatpush1.bf16.msra.mxu0 %v9511_v22  ;;  %1894 = vmatpush1.bf16.msra.mxu1 %v9514_v23  ;;  %v9595_v22 = vld [vmem:[#allocation4 + $0x550] ss:$20 sps:$4 sm:$0xff]   ;;  %v9598_v23 = vld [vmem:[#allocation4 + $0x558] ss:$20 sps:$4 sm:$0xff]  }
  0xe9   :  { %1772 = vmatprep.subr.bf16.mxu0 %v9519_v24  ;;  %1895 = vmatprep.subr.bf16.mxu1 %v9522_v25  ;;  %v9603_v24 = vld [vmem:[#allocation4 + $0x57c] ss:$20 sps:$4 sm:$0xff]   ;;  %v9606_v25 = vld [vmem:[#allocation4 + $0x584] ss:$20 sps:$4 sm:$0xff]  }
  0xec   :  { %1773 = vmatpush1.bf16.msra.mxu0 %v9517_v26  ;;  %1896 = vmatpush1.bf16.msra.mxu1 %v9520_v27  ;;  %v9601_v26 = vld [vmem:[#allocation4 + $0x578] ss:$20 sps:$4 sm:$0xff]   ;;  %v9604_v27 = vld [vmem:[#allocation4 + $0x580] ss:$20 sps:$4 sm:$0xff]  }
  0xed   :  { %1774 = vmatprep.subr.bf16.mxu0 %v9525_v28  ;;  %1897 = vmatprep.subr.bf16.mxu1 %v9528_v29  ;;  %v9609_v28 = vld [vmem:[#allocation4 + $0x5a4] ss:$20 sps:$4 sm:$0xff]   ;;  %v9612_v29 = vld [vmem:[#allocation4 + $0x5ac] ss:$20 sps:$4 sm:$0xff]  }
  0xf0   :  { %1775 = vmatpush1.bf16.msra.mxu0 %v9523_v31  ;;  %1898 = vmatpush1.bf16.msra.mxu1 %v9526_v33  ;;  %v9610_v31 = vld [vmem:[#allocation4 + $0x5a8] ss:$20 sps:$4 sm:$0xff]   ;;  %v9615_v33 = vld [vmem:[#allocation4 + $0x5cc] ss:$20 sps:$4 sm:$0xff]  }
  0xf1   :  { %1776 = vmatprep.subr.bf16.mxu0 %v9531_v34  ;;  %1899 = vmatprep.subr.bf16.mxu1 %v9534_v35  ;;  %v9618_v34 = vld [vmem:[#allocation4 + $0x5d4] ss:$20 sps:$4 sm:$0xff]  }
  0xf2   :  { %v9613_v35 = vld [vmem:[#allocation4 + $0x5c8] ss:$20 sps:$4 sm:$0xff]  }
  0xf4   :  { %1777 = vmatpush1.bf16.msra.mxu0 %v9529_v36  ;;  %1900 = vmatpush1.bf16.msra.mxu1 %v9532_v37  ;;  %v9616_v36 = vld [vmem:[#allocation4 + $0x5d0] ss:$20 sps:$4 sm:$0xff]   ;;  %v9621_v37 = vld [vmem:[#allocation4 + $0x5f4] ss:$20 sps:$4 sm:$0xff]  }
  0xf5   :  { %1778 = vmatprep.subr.bf16.mxu0 %v9537_v38  ;;  %1901 = vmatprep.subr.bf16.mxu1 %v9540_v39  ;;  %v9624_v38 = vld [vmem:[#allocation4 + $0x5fc] ss:$20 sps:$4 sm:$0xff]  }
  0xf6   :  { %v9619_v39 = vld [vmem:[#allocation4 + $0x5f0] ss:$20 sps:$4 sm:$0xff]  }
  0xf8   :  { %1779 = vmatpush1.bf16.msra.mxu0 %v9535_v40  ;;  %1902 = vmatpush1.bf16.msra.mxu1 %v9538_v41  ;;  %v9622_v40 = vld [vmem:[#allocation4 + $0x5f8] ss:$20 sps:$4 sm:$0xff]   ;;  %v9627_v41 = vld [vmem:[#allocation4 + $0x61c] ss:$20 sps:$4 sm:$0xff]  }
  0xf9   :  { %1780 = vmatprep.subr.bf16.mxu0 %v9543_v42  ;;  %1903 = vmatprep.subr.bf16.mxu1 %v9546_v43  ;;  %v9630_v42 = vld [vmem:[#allocation4 + $0x624] ss:$20 sps:$4 sm:$0xff]  }
  0xfa   :  { %v9625_v43 = vld [vmem:[#allocation4 + $0x618] ss:$20 sps:$4 sm:$0xff]  }
  0xfc   :  { %1781 = vmatpush1.bf16.msra.mxu0 %v9541_v44  ;;  %1904 = vmatpush1.bf16.msra.mxu1 %v9544_v45  ;;  %v9628_v44 = vld [vmem:[#allocation4 + $0x620] ss:$20 sps:$4 sm:$0xff]   ;;  %v9633_v45 = vld [vmem:[#allocation4 + $0x644] ss:$20 sps:$4 sm:$0xff]  }
  0xfd   :  { %1782 = vmatprep.subr.bf16.mxu0 %v9549_v46  ;;  %1905 = vmatprep.subr.bf16.mxu1 %v9552_v47  ;;  %v9636_v46 = vld [vmem:[#allocation4 + $0x64c] ss:$20 sps:$4 sm:$0xff]  }
  0xfe   :  { %v9631_v47 = vld [vmem:[#allocation4 + $0x640] ss:$20 sps:$4 sm:$0xff]  }
 0x100   :  { %1783 = vmatpush1.bf16.msra.mxu0 %v9547_v49  ;;  %1906 = vmatpush1.bf16.msra.mxu1 %v9550_v50  ;;  %v9634_v49 = vld [vmem:[#allocation4 + $0x648] ss:$20 sps:$4 sm:$0xff]   ;;  %v9639_v50 = vld [vmem:[#allocation4 + $0x66c] ss:$20 sps:$4 sm:$0xff]  }
 0x101   :  { %1784 = vmatprep.subr.bf16.mxu0 %v9555_v51  ;;  %1907 = vmatprep.subr.bf16.mxu1 %v9558_v52  ;;  %v9642_v51 = vld [vmem:[#allocation4 + $0x674] ss:$20 sps:$4 sm:$0xff]  }
 0x102   :  { %v9637_v52 = vld [vmem:[#allocation4 + $0x668] ss:$20 sps:$4 sm:$0xff]  }
 0x104   :  { %1785 = vmatpush1.bf16.msra.mxu0 %v9553_v53  ;;  %1908 = vmatpush1.bf16.msra.mxu1 %v9556_v54  ;;  %v9640_v53 = vld [vmem:[#allocation4 + $0x670] ss:$20 sps:$4 sm:$0xff]   ;;  %v9645_v54 = vld [vmem:[#allocation4 + $0x694] ss:$20 sps:$4 sm:$0xff]  }
 0x105   :  { %1786 = vmatprep.subr.bf16.mxu0 %v9561_v55  ;;  %1909 = vmatprep.subr.bf16.mxu1 %v9564_v56  ;;  %v9648_v55 = vld [vmem:[#allocation4 + $0x69c] ss:$20 sps:$4 sm:$0xff]  }
 0x106   :  { %v9643_v56 = vld [vmem:[#allocation4 + $0x690] ss:$20 sps:$4 sm:$0xff]  }
 0x108   :  { %1787 = vmatpush1.bf16.msra.mxu0 %v9559_v57  ;;  %1910 = vmatpush1.bf16.msra.mxu1 %v9562_v58  ;;  %v9646_v57 = vld [vmem:[#allocation4 + $0x698] ss:$20 sps:$4 sm:$0xff]   ;;  %v9651_v58 = vld [vmem:[#allocation4 + $0x6bc] ss:$20 sps:$4 sm:$0xff]  }
 0x109   :  { %1788 = vmatprep.subr.bf16.mxu0 %v9567_v59  ;;  %1911 = vmatprep.subr.bf16.mxu1 %v9570_v60  ;;  %v9654_v59 = vld [vmem:[#allocation4 + $0x6c4] ss:$20 sps:$4 sm:$0xff]  }
 0x10a   :  { %v9649_v60 = vld [vmem:[#allocation4 + $0x6b8] ss:$20 sps:$4 sm:$0xff]  }
 0x10c   :  { %1789 = vmatpush1.bf16.msra.mxu0 %v9565_v61  ;;  %1912 = vmatpush1.bf16.msra.mxu1 %v9568_v62  ;;  %v9652_v61 = vld [vmem:[#allocation4 + $0x6c0] ss:$20 sps:$4 sm:$0xff]   ;;  %v9657_v62 = vld [vmem:[#allocation4 + $0x6e4] ss:$20 sps:$4 sm:$0xff]  }
 0x10d   :  { %1790 = vmatprep.subr.bf16.mxu0 %v9573_v63  ;;  %1913 = vmatprep.subr.bf16.mxu1 %v9576_v0  ;;  %v9660_v63 = vld [vmem:[#allocation4 + $0x6ec] ss:$20 sps:$4 sm:$0xff]  }
 0x10e   :  { %v9655_v0 = vld [vmem:[#allocation4 + $0x6e0] ss:$20 sps:$4 sm:$0xff]  }
 0x110   :  { %1791 = vmatpush1.bf16.msra.mxu0 %v9571_v1  ;;  %1914 = vmatpush1.bf16.msra.mxu1 %v9574_v2  ;;  %v9658_v1 = vld [vmem:[#allocation4 + $0x6e8] ss:$20 sps:$4 sm:$0xff]   ;;  %v9663_v2 = vld [vmem:[#allocation4 + $0x70c] ss:$20 sps:$4 sm:$0xff]  }
 0x111   :  { %1792 = vmatprep.subr.bf16.mxu0 %v9579_v3  ;;  %1915 = vmatprep.subr.bf16.mxu1 %v9582_v4  ;;  %v9666_v3 = vld [vmem:[#allocation4 + $0x714] ss:$20 sps:$4 sm:$0xff]  }
 0x112   :  { %v9661_v4 = vld [vmem:[#allocation4 + $0x708] ss:$20 sps:$4 sm:$0xff]  }
 0x114   :  { %1793 = vmatpush1.bf16.msra.mxu0 %v9577_v6  ;;  %1916 = vmatpush1.bf16.msra.mxu1 %v9580_v7  ;;  %v9664_v6 = vld [vmem:[#allocation4 + $0x710] ss:$20 sps:$4 sm:$0xff]   ;;  %v9669_v7 = vld [vmem:[#allocation4 + $0x734] ss:$20 sps:$4 sm:$0xff]  }
 0x115   :  { %1803 = vmatprep.subr.bf16.mxu0 %v9585_v8  ;;  %1926 = vmatprep.subr.bf16.mxu1 %v9588_v10  ;;  %v9672_v8 = vld [vmem:[#allocation4 + $0x73c] ss:$20 sps:$4 sm:$0xff]   ;;  %v9670_v10 = vld [vmem:[#allocation4 + $0x738] ss:$20 sps:$4 sm:$0xff]  }
 0x117   :  { %1795 = vmatmul.mubr.bf16.vlgmr.msra.gmra.mrb[0].mxu0 %v10986_v12  ;;  %1918 = vmatmul.mubr.bf16.vlgmr.msra.gmra.mrb[0].mxu1 %v10986_v12 }
 0x118   :  { %1804 = vmatpush1.bf16.msra.mxu0 %v9583_v11  ;;  %1927 = vmatpush1.bf16.msra.mxu1 %v9586_v13  ;;  %v9675_v11 = vld [vmem:[#allocation4 + $0x75c] ss:$20 sps:$4 sm:$0xff]   ;;  %v9678_v13 = vld [vmem:[#allocation4 + $0x764] ss:$20 sps:$4 sm:$0xff]  }
 0x119   :  { %1805 = vmatprep.subr.bf16.mxu0 %v9591_v14  ;;  %1928 = vmatprep.subr.bf16.mxu1 %v9594_v15  ;;  %v9673_v14 = vld [vmem:[#allocation4 + $0x758] ss:$20 sps:$4 sm:$0xff]   ;;  %v9676_v15 = vld [vmem:[#allocation4 + $0x760] ss:$20 sps:$4 sm:$0xff]  }
 0x11a   :  { %1835 = vmatprep.mubr.bf16.mxu0 %v10991_v18  ;;  %1958 = vmatprep.mubr.bf16.mxu1 %v10991_v18 }
 0x11c   :  { %1806 = vmatpush1.bf16.msra.mxu0 %v9589_v17  ;;  %1929 = vmatpush1.bf16.msra.mxu1 %v9592_v19  ;;  %v9679_v17 = vld [vmem:[#allocation4 + $0x150] ss:$20 sps:$4 sm:$0xff]  }
 0x11d   :  { %1807 = vmatprep.subr.bf16.mxu0 %v9597_v20  ;;  %1930 = vmatprep.subr.bf16.mxu1 %v9600_v21  ;;  %v9694_v19 = vld [vmem:[#allocation4 + $0x3d0] ss:$20 sps:$4 sm:$0xff]   ;;  %v11000_v20 = vpack.c.bf16 %v175_v16, %v175_v16  ;;  %v9726_v16 = vld [vmem:[#allocation4 + $0x628] ss:$20 sps:$4 sm:$0xff]  }
 0x11e   :  { %v9680_v21 = vld [vmem:[#allocation4 + $0x10] ss:$20 sps:$4 sm:$0xff]  }
 0x120   :  { %1808 = vmatpush1.bf16.msra.mxu0 %v9595_v22  ;;  %1931 = vmatpush1.bf16.msra.mxu1 %v9598_v23  ;;  %v9696_v22 = vld [vmem:[#allocation4 + $0x290] ss:$20 sps:$4 sm:$0xff]   ;;  %v9681_v23 = vld [vmem:[#allocation4 + $0x178] ss:$20 sps:$4 sm:$0xff]  }
 0x121   :  { %1809 = vmatprep.subr.bf16.mxu0 %v9603_v24  ;;  %1932 = vmatprep.subr.bf16.mxu1 %v9606_v25  ;;  %v9697_v24 = vld [vmem:[#allocation4 + $0x3f8] ss:$20 sps:$4 sm:$0xff]  }
 0x122   :  { %v9682_v25 = vld [vmem:[#allocation4 + $0x38] ss:$20 sps:$4 sm:$0xff]  }
 0x124   :  { %1810 = vmatpush1.bf16.msra.mxu0 %v9601_v26  ;;  %1933 = vmatpush1.bf16.msra.mxu1 %v9604_v27  ;;  %v9699_v26 = vld [vmem:[#allocation4 + $0x2b8] ss:$20 sps:$4 sm:$0xff]   ;;  %v9683_v27 = vld [vmem:[#allocation4 + $0x1a0] ss:$20 sps:$4 sm:$0xff]  }
 0x125   :  { %1811 = vmatprep.subr.bf16.mxu0 %v9609_v28  ;;  %1934 = vmatprep.subr.bf16.mxu1 %v9612_v29  ;;  %v9701_v28 = vld [vmem:[#allocation4 + $0x420] ss:$20 sps:$4 sm:$0xff]  }
 0x126   :  { %v9684_v29 = vld [vmem:[#allocation4 + $0x60] ss:$20 sps:$4 sm:$0xff]  }
 0x128   :  { %1812 = vmatpush1.bf16.msra.mxu0 %v9607_v30  ;;  %1935 = vmatpush1.bf16.msra.mxu1 %v9610_v31  ;;  %v9703_v30 = vld [vmem:[#allocation4 + $0x2e0] ss:$20 sps:$4 sm:$0xff]   ;;  %v9685_v31 = vld [vmem:[#allocation4 + $0x1c8] ss:$20 sps:$4 sm:$0xff]  }
 0x129   :  { %1813 = vmatprep.subr.bf16.mxu0 %v9615_v33  ;;  %1936 = vmatprep.subr.bf16.mxu1 %v9618_v34  ;;  %v9705_v33 = vld [vmem:[#allocation4 + $0x448] ss:$20 sps:$4 sm:$0xff]  }
 0x12a   :  { %v9686_v34 = vld [vmem:[#allocation4 + $0x88] ss:$20 sps:$4 sm:$0xff]  }
 0x12c   :  { %1814 = vmatpush1.bf16.msra.mxu0 %v9613_v35  ;;  %1937 = vmatpush1.bf16.msra.mxu1 %v9616_v36  ;;  %v9707_v35 = vld [vmem:[#allocation4 + $0x308] ss:$20 sps:$4 sm:$0xff]   ;;  %v9687_v36 = vld [vmem:[#allocation4 + $0x1f0] ss:$20 sps:$4 sm:$0xff]  }
 0x12d   :  { %1815 = vmatprep.subr.bf16.mxu0 %v9621_v37  ;;  %1938 = vmatprep.subr.bf16.mxu1 %v9624_v38  ;;  %v9688_v37 = vld [vmem:[#allocation4 + $0xb0] ss:$20 sps:$4 sm:$0xff]   ;;  %v9689_v38 = vld [vmem:[#allocation4 + $0x218] ss:$20 sps:$4 sm:$0xff]  }
 0x130   :  { %1816 = vmatpush1.bf16.msra.mxu0 %v9619_v39  ;;  %1939 = vmatpush1.bf16.msra.mxu1 %v9622_v40  ;;  %v9713_v39 = vld [vmem:[#allocation4 + $0x498] ss:$20 sps:$4 sm:$0xff]  }
 0x131   :  { %1817 = vmatprep.subr.bf16.mxu0 %v9627_v41  ;;  %1940 = vmatprep.subr.bf16.mxu1 %v9630_v42  ;;  %v9690_v40 = vld [vmem:[#allocation4 + $0xd8] ss:$20 sps:$4 sm:$0xff]   ;;  %v9691_v42 = vld [vmem:[#allocation4 + $0x240] ss:$20 sps:$4 sm:$0xff]  }
 0x132   :  { %v9715_v41 = vld [vmem:[#allocation4 + $0x358] ss:$20 sps:$4 sm:$0xff]  }
 0x134   :  { %1818 = vmatpush1.bf16.msra.mxu0 %v9625_v43  ;;  %1941 = vmatpush1.bf16.msra.mxu1 %v9628_v44  ;;  %v9717_v43 = vld [vmem:[#allocation4 + $0x4c0] ss:$20 sps:$4 sm:$0xff]  }
 0x135   :  { %1819 = vmatprep.subr.bf16.mxu0 %v9633_v45  ;;  %1942 = vmatprep.subr.bf16.mxu1 %v9636_v46  ;;  %v9692_v44 = vld [vmem:[#allocation4 + $0x100] ss:$20 sps:$4 sm:$0xff]   ;;  %v9693_v45 = vld [vmem:[#allocation4 + $0x268] ss:$20 sps:$4 sm:$0xff]  }
 0x136   :  { %v9719_v46 = vld [vmem:[#allocation4 + $0x380] ss:$20 sps:$4 sm:$0xff]  }
 0x138   :  { %1820 = vmatpush1.bf16.msra.mxu0 %v9631_v47  ;;  %1943 = vmatpush1.bf16.msra.mxu1 %v9634_v49  ;;  %v9721_v47 = vld [vmem:[#allocation4 + $0x4e8] ss:$20 sps:$4 sm:$0xff]  }
 0x139   :  { %1821 = vmatprep.subr.bf16.mxu0 %v9639_v50  ;;  %1944 = vmatprep.subr.bf16.mxu1 %v9642_v51  ;;  %v9695_v49 = vld [vmem:[#allocation4 + $0x128] ss:$20 sps:$4 sm:$0xff]   ;;  %v9698_v51 = vld [vmem:[#allocation4 + $0x650] ss:$20 sps:$4 sm:$0xff]  }
 0x13a   :  { %v9723_v50 = vld [vmem:[#allocation4 + $0x3a8] ss:$20 sps:$4 sm:$0xff]  }
 0x13c   :  { %1822 = vmatpush1.bf16.msra.mxu0 %v9637_v52  ;;  %1945 = vmatpush1.bf16.msra.mxu1 %v9640_v53  ;;  %v9729_v52 = vld [vmem:[#allocation7 + $0x4] ss:$16 sps:$4 sm:$0xff]  }
 0x13d   :  { %1823 = vmatprep.subr.bf16.mxu0 %v9645_v54  ;;  %1946 = vmatprep.subr.bf16.mxu1 %v9648_v55  ;;  %v9700_v53 = vld [vmem:[#allocation4 + $0x510] ss:$20 sps:$4 sm:$0xff]   ;;  %v9702_v54 = vld [vmem:[#allocation4 + $0x678] ss:$20 sps:$4 sm:$0xff]  }
 0x13e   :  { %v9727_v55 = vld [vmem:[#allocation7] ss:$16 sps:$4 sm:$0xff]  }
 0x140   :  { %1824 = vmatpush1.bf16.msra.mxu0 %v9643_v56  ;;  %1947 = vmatpush1.bf16.msra.mxu1 %v9646_v57  ;;  %v9735_v56 = vld [vmem:[#allocation7 + $0x24] ss:$16 sps:$4 sm:$0xff]   ;;  %v9704_v57 = vld [vmem:[#allocation4 + $0x538] ss:$20 sps:$4 sm:$0xff]  }
 0x141   :  { %1825 = vmatprep.subr.bf16.mxu0 %v9651_v58  ;;  %1948 = vmatprep.subr.bf16.mxu1 %v9654_v59  ;;  %v9706_v58 = vld [vmem:[#allocation4 + $0x6a0] ss:$20 sps:$4 sm:$0xff]  }
 0x142   :  { %v9733_v59 = vld [vmem:[#allocation7 + $0x20] ss:$16 sps:$4 sm:$0xff]  }
 0x144   :  { %1826 = vmatpush1.bf16.msra.mxu0 %v9649_v60  ;;  %1949 = vmatpush1.bf16.msra.mxu1 %v9652_v61  ;;  %v9741_v60 = vld [vmem:[#allocation7 + $0x44] ss:$16 sps:$4 sm:$0xff]  }
 0x145   :  { %1827 = vmatprep.subr.bf16.mxu0 %v9657_v62  ;;  %1950 = vmatprep.subr.bf16.mxu1 %v9660_v63  ;;  %v9708_v61 = vld [vmem:[#allocation4 + $0x560] ss:$20 sps:$4 sm:$0xff]   ;;  %v9710_v62 = vld [vmem:[#allocation4 + $0x6c8] ss:$20 sps:$4 sm:$0xff]  }
 0x146   :  { %v9739_v63 = vld [vmem:[#allocation7 + $0x40] ss:$16 sps:$4 sm:$0xff]  }
 0x148   :  { %1828 = vmatpush1.bf16.msra.mxu0 %v9655_v0  ;;  %1951 = vmatpush1.bf16.msra.mxu1 %v9658_v1  ;;  %v9747_v0 = vld [vmem:[#allocation7 + $0x64] ss:$16 sps:$4 sm:$0xff]   ;;  %v9712_v1 = vld [vmem:[#allocation4 + $0x588] ss:$20 sps:$4 sm:$0xff]  }
 0x149   :  { %1829 = vmatprep.subr.bf16.mxu0 %v9663_v2  ;;  %1952 = vmatprep.subr.bf16.mxu1 %v9666_v3  ;;  %v9745_v2 = vld [vmem:[#allocation7 + $0x60] ss:$16 sps:$4 sm:$0xff]   ;;  %v9718_v3 = vld [vmem:[#allocation4 + $0x718] ss:$20 sps:$4 sm:$0xff]  }
 0x14c   :  { %1830 = vmatpush1.bf16.msra.mxu0 %v9661_v4  ;;  %1953 = vmatpush1.bf16.msra.mxu1 %v9664_v6  ;;  %v9751_v4 = vld [vmem:[#allocation7 + $0x80] ss:$16 sps:$4 sm:$0xff]   ;;  %v9759_v6 = vld [vmem:[#allocation7 + $0xa4] ss:$16 sps:$4 sm:$0xff]  }
 0x14d   :  { %1831 = vmatprep.subr.bf16.mxu0 %v9669_v7  ;;  %1954 = vmatprep.subr.bf16.mxu1 %v9672_v8  ;;  %v9720_v7 = vld [vmem:[#allocation4 + $0x5d8] ss:$20 sps:$4 sm:$0xff]   ;;  %v9722_v8 = vld [vmem:[#allocation4 + $0x740] ss:$20 sps:$4 sm:$0xff]  }
 0x150   :  { %1832 = vmatpush1.bf16.msra.mxu0 %v9667_v9  ;;  %1955 = vmatpush1.bf16.msra.mxu1 %v9670_v10  ;;  %v9757_v9 = vld [vmem:[#allocation7 + $0xa0] ss:$16 sps:$4 sm:$0xff]   ;;  %v9765_v10 = vld [vmem:[#allocation7 + $0xc4] ss:$16 sps:$4 sm:$0xff]  }
 0x151   :  { %1833 = vmatprep.subr.bf16.mxu0 %v9675_v11  ;;  %1956 = vmatprep.subr.bf16.mxu1 %v9678_v13  ;;  %v9724_v11 = vld [vmem:[#allocation4 + $0x600] ss:$20 sps:$4 sm:$0xff]   ;;  %v9725_v13 = vld [vmem:[#allocation4 + $0x768] ss:$20 sps:$4 sm:$0xff]  }
 0x154   :  { %1834 = vmatpush1.bf16.msra.mxu0 %v9673_v14  ;;  %1957 = vmatpush1.bf16.msra.mxu1 %v9676_v15  ;;  %v9763_v14 = vld [vmem:[#allocation7 + $0xc0] ss:$16 sps:$4 sm:$0xff]   ;;  %v9771_v15 = vld [vmem:[#allocation7 + $0xe4] ss:$16 sps:$4 sm:$0xff]  }
 0x155   :  { %9224 = vmatprep.subr.bf16.mxu0 %v9679_v17  ;;  %9246 = vmatprep.subr.bf16.mxu1 %v9694_v19  ;;  %v9732_v17 = vld [vmem:[#allocation7 + $0xc] ss:$16 sps:$4 sm:$0xff]   ;;  %v9769_v19 = vld [vmem:[#allocation7 + $0xe0] ss:$16 sps:$4 sm:$0xff]  }
 0x157   :  { %1836 = vmatmul.mubr.bf16.vlgmr.msra.gmra.mrb[0].mxu0 %v11000_v20  ;;  %1959 = vmatmul.mubr.bf16.vlgmr.msra.gmra.mrb[0].mxu1 %v11000_v20 }
 0x158   :  { %9225 = vmatpush3.bf16.msra.mxu0 %v9680_v21  ;;  %9247 = vmatpush3.bf16.msra.mxu1 %v9696_v22  ;;  %v9777_v21 = vld [vmem:[#allocation7 + $0x104] ss:$16 sps:$4 sm:$0xff]   ;;  %v9730_v22 = vld [vmem:[#allocation7 + $0x8] ss:$16 sps:$4 sm:$0xff]  }
 0x159   :  { %9226 = vmatprep.subr.bf16.mxu0 %v9681_v23  ;;  %1999 = vmatprep.mubr.bf16.mxu0 %v10965_v48  ;;  %v9709_v48 = vld [vmem:[#allocation4 + $0x470] ss:$20 sps:$4 sm:$0xff]   ;;  %v9738_v23 = vld [vmem:[#allocation7 + $0x2c] ss:$16 sps:$4 sm:$0xff]  }
 0x15a   :  { %9248 = vmatprep.subr.bf16.mxu1 %v9697_v24  ;;  %2039 = vmatprep.mubr.bf16.mxu1 %v10979_v32  ;;  %v9711_v32 = vld [vmem:[#allocation4 + $0x330] ss:$20 sps:$4 sm:$0xff]  }
 0x15b   :  { %v9775_v24 = vld [vmem:[#allocation7 + $0x100] ss:$16 sps:$4 sm:$0xff]  }
 0x15c   :  { %9227 = vmatpush3.bf16.msra.mxu0 %v9682_v25  ;;  %9249 = vmatpush3.bf16.msra.mxu1 %v9699_v26  ;;  %v9783_v25 = vld [vmem:[#allocation7 + $0x124] ss:$16 sps:$4 sm:$0xff]   ;;  %v9736_v26 = vld [vmem:[#allocation7 + $0x28] ss:$16 sps:$4 sm:$0xff]  }
 0x15d   :  { %9228 = vmatprep.subr.bf16.mxu0 %v9683_v27  ;;  %9250 = vmatprep.subr.bf16.mxu1 %v9701_v28  ;;  %v9744_v27 = vld [vmem:[#allocation7 + $0x4c] ss:$16 sps:$4 sm:$0xff]   ;;  %v9781_v28 = vld [vmem:[#allocation7 + $0x120] ss:$16 sps:$4 sm:$0xff]  }
 0x160   :  { %9229 = vmatpush3.bf16.msra.mxu0 %v9684_v29  ;;  %9251 = vmatpush3.bf16.msra.mxu1 %v9703_v30  ;;  %v9789_v29 = vld [vmem:[#allocation7 + $0x144] ss:$16 sps:$4 sm:$0xff]   ;;  %v9742_v30 = vld [vmem:[#allocation7 + $0x48] ss:$16 sps:$4 sm:$0xff]  }
 0x161   :  { %9230 = vmatprep.subr.bf16.mxu0 %v9685_v31  ;;  %9252 = vmatprep.subr.bf16.mxu1 %v9705_v33  ;;  %v9750_v31 = vld [vmem:[#allocation7 + $0x6c] ss:$16 sps:$4 sm:$0xff]   ;;  %v9787_v33 = vld [vmem:[#allocation7 + $0x140] ss:$16 sps:$4 sm:$0xff]  }
 0x164   :  { %9231 = vmatpush3.bf16.msra.mxu0 %v9686_v34  ;;  %9253 = vmatpush3.bf16.msra.mxu1 %v9707_v35  ;;  %v9795_v34 = vld [vmem:[#allocation7 + $0x164] ss:$16 sps:$4 sm:$0xff]   ;;  %v9748_v35 = vld [vmem:[#allocation7 + $0x68] ss:$16 sps:$4 sm:$0xff]  }
 0x165   :  { %9232 = vmatprep.subr.bf16.mxu0 %v9687_v36  ;;  %9254 = vmatprep.subr.bf16.mxu1 %v9709_v48  ;;  %v9756_v36 = vld [vmem:[#allocation7 + $0x8c] ss:$16 sps:$4 sm:$0xff]   ;;  %v9793_v48 = vld [vmem:[#allocation7 + $0x160] ss:$16 sps:$4 sm:$0xff]  }
 0x168   :  { %9233 = vmatpush3.bf16.msra.mxu0 %v9688_v37  ;;  %9255 = vmatpush3.bf16.msra.mxu1 %v9711_v32  ;;  %v9754_v37 = vld [vmem:[#allocation7 + $0x88] ss:$16 sps:$4 sm:$0xff]   ;;  %v9762_v32 = vld [vmem:[#allocation7 + $0xac] ss:$16 sps:$4 sm:$0xff]  }
 0x169   :  { %9234 = vmatprep.subr.bf16.mxu0 %v9689_v38  ;;  %9256 = vmatprep.subr.bf16.mxu1 %v9713_v39  ;;  %v9799_v38 = vld [vmem:[#allocation7 + $0x180] ss:$16 sps:$4 sm:$0xff]   ;;  %v9807_v39 = vld [vmem:[#allocation7 + $0x1a4] ss:$16 sps:$4 sm:$0xff]  }
 0x16c   :  { %9235 = vmatpush3.bf16.msra.mxu0 %v9690_v40  ;;  %9257 = vmatpush3.bf16.msra.mxu1 %v9715_v41  ;;  %v9760_v40 = vld [vmem:[#allocation7 + $0xa8] ss:$16 sps:$4 sm:$0xff]   ;;  %v9768_v41 = vld [vmem:[#allocation7 + $0xcc] ss:$16 sps:$4 sm:$0xff]  }
 0x16d   :  { %9236 = vmatprep.subr.bf16.mxu0 %v9691_v42  ;;  %9258 = vmatprep.subr.bf16.mxu1 %v9717_v43  ;;  %v9805_v42 = vld [vmem:[#allocation7 + $0x1a0] ss:$16 sps:$4 sm:$0xff]   ;;  %v9766_v43 = vld [vmem:[#allocation7 + $0xc8] ss:$16 sps:$4 sm:$0xff]  }
 0x170   :  { %9237 = vmatpush3.bf16.msra.mxu0 %v9692_v44  ;;  %9259 = vmatpush3.bf16.msra.mxu1 %v9719_v46  ;;  %v9813_v44 = vld [vmem:[#allocation7 + $0x1c4] ss:$16 sps:$4 sm:$0xff]   ;;  %v9811_v46 = vld [vmem:[#allocation7 + $0x1c0] ss:$16 sps:$4 sm:$0xff]  }
 0x171   :  { %9238 = vmatprep.subr.bf16.mxu0 %v9693_v45  ;;  %9260 = vmatprep.subr.bf16.mxu1 %v9721_v47  ;;  %v9774_v45 = vld [vmem:[#allocation7 + $0xec] ss:$16 sps:$4 sm:$0xff]   ;;  %v9772_v47 = vld [vmem:[#allocation7 + $0xe8] ss:$16 sps:$4 sm:$0xff]  }
 0x174   :  { %9239 = vmatpush3.bf16.msra.mxu0 %v9695_v49  ;;  %9261 = vmatpush3.bf16.msra.mxu1 %v9723_v50  ;;  %v9819_v49 = vld [vmem:[#allocation7 + $0x1e4] ss:$16 sps:$4 sm:$0xff]   ;;  %v9780_v50 = vld [vmem:[#allocation7 + $0x10c] ss:$16 sps:$4 sm:$0xff]  }
 0x175   :  { %9268 = vmatprep.subr.bf16.mxu0 %v9698_v51  ;;  %3131 = vmatprep.subr.bf16.mxu1 %v9729_v52  ;;  %v9817_v51 = vld [vmem:[#allocation7 + $0x1e0] ss:$16 sps:$4 sm:$0xff]   ;;  %v9825_v52 = vld [vmem:[#allocation7 + $0x204] ss:$16 sps:$4 sm:$0xff]  }
 0x177   :  { %2000 = vmatmul.mubr.bf16.vlgmr.msra.gmra.mrb[4].mxu0 %v10972_v5  ;;  %2040 = vmatmul.mubr.bf16.vlgmr.msra.gmra.mrb[4].mxu1 %v10986_v12  ;;  %v9714_v5 = vld [vmem:[#allocation4 + $0x6f0] ss:$20 sps:$4 sm:$0xff]  }
 0x178   :  { %9269 = vmatpush3.bf16.msra.mxu0 %v9700_v53  ;;  %2079 = vmatprep.mubr.bf16.mxu0 %v10991_v18  ;;  %v9753_v12 = vld [vmem:[#allocation7 + $0x84] ss:$16 sps:$4 sm:$0xff]   ;;  %v9778_v53 = vld [vmem:[#allocation7 + $0x108] ss:$16 sps:$4 sm:$0xff]  }
 0x179   :  { %9270 = vmatprep.subr.bf16.mxu0 %v9702_v54  ;;  %3132 = vmatpush1.bf16.msra.mxu1 %v9727_v55  ;;  %v9716_v18 = vld [vmem:[#allocation4 + $0x5b0] ss:$20 sps:$4 sm:$0xff]   ;;  %v9786_v54 = vld [vmem:[#allocation7 + $0x12c] ss:$16 sps:$4 sm:$0xff]   ;;  %v9784_v55 = vld [vmem:[#allocation7 + $0x128] ss:$16 sps:$4 sm:$0xff]  }
 0x17a   :  { %3133 = vmatprep.subr.bf16.mxu1 %v9735_v56  ;;  %v9792_v56 = vld [vmem:[#allocation7 + $0x14c] ss:$16 sps:$4 sm:$0xff]  }
 0x17c   :  { %9271 = vmatpush3.bf16.msra.mxu0 %v9704_v57  ;;  %v9790_v57 = vld [vmem:[#allocation7 + $0x148] ss:$16 sps:$4 sm:$0xff]  }
 0x17d   :  { %9272 = vmatprep.subr.bf16.mxu0 %v9706_v58  ;;  %3134 = vmatpush1.bf16.msra.mxu1 %v9733_v59  ;;  %v9798_v58 = vld [vmem:[#allocation7 + $0x16c] ss:$16 sps:$4 sm:$0xff]   ;;  %v9796_v59 = vld [vmem:[#allocation7 + $0x168] ss:$16 sps:$4 sm:$0xff]  }
 0x17e   :  { %3135 = vmatprep.subr.bf16.mxu1 %v9741_v60  ;;  %v9804_v60 = vld [vmem:[#allocation7 + $0x18c] ss:$16 sps:$4 sm:$0xff]  }
 0x180   :  { %9273 = vmatpush3.bf16.msra.mxu0 %v9708_v61  ;;  %v9802_v61 = vld [vmem:[#allocation7 + $0x188] ss:$16 sps:$4 sm:$0xff]  }
 0x181   :  { %9274 = vmatprep.subr.bf16.mxu0 %v9710_v62  ;;  %3136 = vmatpush1.bf16.msra.mxu1 %v9739_v63  ;;  %v9810_v62 = vld [vmem:[#allocation7 + $0x1ac] ss:$16 sps:$4 sm:$0xff]   ;;  %v9808_v63 = vld [vmem:[#allocation7 + $0x1a8] ss:$16 sps:$4 sm:$0xff]  }
 0x182   :  { %3137 = vmatprep.subr.bf16.mxu1 %v9747_v0  ;;  %v9816_v0 = vld [vmem:[#allocation7 + $0x1cc] ss:$16 sps:$4 sm:$0xff]  }
 0x184   :  { %9275 = vmatpush3.bf16.msra.mxu0 %v9712_v1  ;;  %v9814_v1 = vld [vmem:[#allocation7 + $0x1c8] ss:$16 sps:$4 sm:$0xff]  }
 0x185   :  { %9276 = vmatprep.subr.bf16.mxu0 %v9714_v5  ;;  %3138 = vmatpush1.bf16.msra.mxu1 %v9745_v2  ;;  %v9822_v5 = vld [vmem:[#allocation7 + $0x1ec] ss:$16 sps:$4 sm:$0xff]   ;;  %v9820_v2 = vld [vmem:[#allocation7 + $0x1e8] ss:$16 sps:$4 sm:$0xff]  }
 0x186   :  { %3139 = vmatprep.subr.bf16.mxu1 %v9753_v12  ;;  %v9828_v12 = vld [vmem:[#allocation7 + $0x20c] ss:$16 sps:$4 sm:$0xff]  }
 0x188   :  { %9277 = vmatpush3.bf16.msra.mxu0 %v9716_v18  ;;  %v168_v18 = vlaneseq }
 0x189   :  { %9278 = vmatprep.subr.bf16.mxu0 %v9718_v3  ;;  %3140 = vmatpush1.bf16.msra.mxu1 %v9751_v4 }
 0x18a   :  { %3141 = vmatprep.subr.bf16.mxu1 %v9759_v6  ;;  %v11010_v3 = vshrl.u32 %v168_v18, 7  ;;  %v11018_v6 = vld [vmem:[%s12506_s28] sm:$0x1f] }
 0x18c   :  { %9279 = vmatpush3.bf16.msra.mxu0 %v9720_v7  ;;  %12504 = vst [vmem:[#allocation25_spill] sm:$0xff] %v11010_v3  ;;  %v11013_v4 = vsub.s32 0, %v11010_v3  ;;  %v11021_v7 = vsub.s32 1, %v11010_v3  ;;  %vm170_vm7 = vcmp.lt.s32.totalorder %v11010_v3, 2 }
 0x18d   :  { %9280 = vmatprep.subr.bf16.mxu0 %v9722_v8  ;;  %3142 = vmatpush1.bf16.msra.mxu1 %v9757_v9  ;;  %v11024_v8 = vsub.s32 3, %v11010_v3  ;;  %v11029_v9 = vld [vmem:[%s12509_s12] sm:$0x1f] }
 0x18e   :  { %3143 = vmatprep.subr.bf16.mxu1 %v9765_v10  ;;  %12505 = vst [vmem:[#allocation26_spill] sm:$0xff] %v11013_v4  ;;  %12507 = vst [vmem:[#allocation27_spill] sm:$0xff] %v11021_v7  ;;  %v2091_v10 = vrot.slane %v11018_v6, %v11013_v4 }
 0x18f   :  { %12508 = vst [vmem:[#allocation28_spill] sm:$0xff] %v11024_v8 }
 0x190   :  { %9281 = vmatpush3.bf16.msra.mxu0 %v9724_v11  ;;  %v2095_v11 = vrot.slane %v11018_v6, %v11021_v7 }
 0x191   :  { %9282 = vmatprep.subr.bf16.mxu0 %v9725_v13  ;;  %3144 = vmatpush1.bf16.msra.mxu1 %v9763_v14  ;;  %v2103_v13 = vrot.slane %v11018_v6, %v11024_v8  ;;  %v2122_v14 = vrot.slane %v11029_v9, %v11013_v4 }
 0x192   :  { %3145 = vmatprep.subr.bf16.mxu1 %v9771_v15 }
 0x194   :  { %9283 = vmatpush3.bf16.msra.mxu0 %v9726_v16 }
 0x195   :  { %3254 = vmatprep.subr.bf16.mxu0 %v9732_v17  ;;  %3146 = vmatpush1.bf16.msra.mxu1 %v9769_v19  ;;  %v2126_v17 = vrot.slane %v11029_v9, %v11021_v7  ;;  %v2134_v19 = vrot.slane %v11029_v9, %v11024_v8 }
 0x196   :  { %3147 = vmatprep.subr.bf16.mxu1 %v9777_v21 }
 0x197   :  { %2080 = vmatmul.mubr.bf16.vlgmr.msra.gmra.mrb[8].mxu0 %v11000_v20  ;;  %v9801_v20 = vld [vmem:[#allocation7 + $0x184] ss:$16 sps:$4 sm:$0xff]  }
 0x198   :  { %3255 = vmatpush1.bf16.msra.mxu0 %v9730_v22 }
 0x199   :  { %3256 = vmatprep.subr.bf16.mxu0 %v9738_v23  ;;  %3148 = vmatpush1.bf16.msra.mxu1 %v9775_v24 }
 0x19a   :  { %3149 = vmatprep.subr.bf16.mxu1 %v9783_v25 }
 0x19c   :  { %3257 = vmatpush1.bf16.msra.mxu0 %v9736_v26 }
 0x19d   :  { %3258 = vmatprep.subr.bf16.mxu0 %v9744_v27  ;;  %3150 = vmatpush1.bf16.msra.mxu1 %v9781_v28 }
 0x19e   :  { %3151 = vmatprep.subr.bf16.mxu1 %v9789_v29 }
 0x1a0   :  { %3259 = vmatpush1.bf16.msra.mxu0 %v9742_v30 }
 0x1a1   :  { %3260 = vmatprep.subr.bf16.mxu0 %v9750_v31  ;;  %3152 = vmatpush1.bf16.msra.mxu1 %v9787_v33 }
 0x1a2   :  { %3153 = vmatprep.subr.bf16.mxu1 %v9795_v34 }
 0x1a4   :  { %3261 = vmatpush1.bf16.msra.mxu0 %v9748_v35 }
 0x1a5   :  { %3262 = vmatprep.subr.bf16.mxu0 %v9756_v36  ;;  %3154 = vmatpush1.bf16.msra.mxu1 %v9793_v48 }
 0x1a6   :  { %3155 = vmatprep.subr.bf16.mxu1 %v9801_v20 }
 0x1a8   :  { %3263 = vmatpush1.bf16.msra.mxu0 %v9754_v37 }
 0x1a9   :  { %3264 = vmatprep.subr.bf16.mxu0 %v9762_v32  ;;  %3156 = vmatpush1.bf16.msra.mxu1 %v9799_v38  ;;  %v9823_v32 = vld [vmem:[#allocation7 + $0x200] ss:$16 sps:$4 sm:$0xff]   ;;  %v9826_v38 = vld [vmem:[#allocation7 + $0x208] ss:$16 sps:$4 sm:$0xff]  }
 0x1aa   :  { %3157 = vmatprep.subr.bf16.mxu1 %v9807_v39 }
 0x1ac   :  { %3265 = vmatpush1.bf16.msra.mxu0 %v9760_v40 }
 0x1ad   :  { %3266 = vmatprep.subr.bf16.mxu0 %v9768_v41  ;;  %3158 = vmatpush1.bf16.msra.mxu1 %v9805_v42  ;;  %v9831_v41 = vld [vmem:[#allocation7 + $0x224] ss:$16 sps:$4 sm:$0xff]   ;;  %v9834_v42 = vld [vmem:[#allocation7 + $0x22c] ss:$16 sps:$4 sm:$0xff]  }
 0x1ae   :  { %3159 = vmatprep.subr.bf16.mxu1 %v9813_v44  ;;  %v9829_v44 = vld [vmem:[#allocation7 + $0x220] ss:$16 sps:$4 sm:$0xff]  }
 0x1b0   :  { %3267 = vmatpush1.bf16.msra.mxu0 %v9766_v43 }
 0x1b1   :  { %3268 = vmatprep.subr.bf16.mxu0 %v9774_v45  ;;  %3160 = vmatpush1.bf16.msra.mxu1 %v9811_v46  ;;  %v9832_v45 = vld [vmem:[#allocation7 + $0x228] ss:$16 sps:$4 sm:$0xff]   ;;  %v9837_v46 = vld [vmem:[#allocation7 + $0x244] ss:$16 sps:$4 sm:$0xff]  }
 0x1b2   :  { %3161 = vmatprep.subr.bf16.mxu1 %v9819_v49  ;;  %v9835_v49 = vld [vmem:[#allocation7 + $0x240] ss:$16 sps:$4 sm:$0xff]  }
 0x1b4   :  { %3269 = vmatpush1.bf16.msra.mxu0 %v9772_v47  ;;  %v9840_v47 = vld [vmem:[#allocation7 + $0x24c] ss:$16 sps:$4 sm:$0xff]  }
 0x1b5   :  { %3270 = vmatprep.subr.bf16.mxu0 %v9780_v50  ;;  %3162 = vmatpush1.bf16.msra.mxu1 %v9817_v51  ;;  %v9838_v50 = vld [vmem:[#allocation7 + $0x248] ss:$16 sps:$4 sm:$0xff]   ;;  %v9843_v51 = vld [vmem:[#allocation7 + $0x264] ss:$16 sps:$4 sm:$0xff]  }
 0x1b6   :  { %3172 = vmatprep.subr.bf16.mxu1 %v9825_v52  ;;  %v9846_v52 = vld [vmem:[#allocation7 + $0x26c] ss:$16 sps:$4 sm:$0xff]  }
 0x1b8   :  { %3271 = vmatpush1.bf16.msra.mxu0 %v9778_v53  ;;  %v9841_v53 = vld [vmem:[#allocation7 + $0x260] ss:$16 sps:$4 sm:$0xff]  }
 0x1b9   :  { %3272 = vmatprep.subr.bf16.mxu0 %v9786_v54  ;;  %v9844_v54 = vld [vmem:[#allocation7 + $0x268] ss:$16 sps:$4 sm:$0xff]  }
 0x1bc   :  { %3273 = vmatpush1.bf16.msra.mxu0 %v9784_v55  ;;  %v9849_v55 = vld [vmem:[#allocation7 + $0x284] ss:$16 sps:$4 sm:$0xff]  }
 0x1bd   :  { %3274 = vmatprep.subr.bf16.mxu0 %v9792_v56  ;;  %v9852_v56 = vld [vmem:[#allocation7 + $0x28c] ss:$16 sps:$4 sm:$0xff]  }
 0x1c0   :  { %3275 = vmatpush1.bf16.msra.mxu0 %v9790_v57  ;;  %v9847_v57 = vld [vmem:[#allocation7 + $0x280] ss:$16 sps:$4 sm:$0xff]  }
 0x1c1   :  { %3276 = vmatprep.subr.bf16.mxu0 %v9798_v58  ;;  %v9850_v58 = vld [vmem:[#allocation7 + $0x288] ss:$16 sps:$4 sm:$0xff]  }
 0x1c4   :  { %3277 = vmatpush1.bf16.msra.mxu0 %v9796_v59  ;;  %v9855_v59 = vld [vmem:[#allocation7 + $0x2a4] ss:$16 sps:$4 sm:$0xff]  }
 0x1c5   :  { %3278 = vmatprep.subr.bf16.mxu0 %v9804_v60  ;;  %v9858_v60 = vld [vmem:[#allocation7 + $0x2ac] ss:$16 sps:$4 sm:$0xff]  }
 0x1c8   :  { %3279 = vmatpush1.bf16.msra.mxu0 %v9802_v61  ;;  %v9853_v61 = vld [vmem:[#allocation7 + $0x2a0] ss:$16 sps:$4 sm:$0xff]  }
 0x1c9   :  { %3280 = vmatprep.subr.bf16.mxu0 %v9810_v62  ;;  %v9856_v62 = vld [vmem:[#allocation7 + $0x2a8] ss:$16 sps:$4 sm:$0xff]  }
 0x1cc   :  { %3281 = vmatpush1.bf16.msra.mxu0 %v9808_v63  ;;  %v9861_v63 = vld [vmem:[#allocation7 + $0x2c4] ss:$16 sps:$4 sm:$0xff]  }
 0x1cd   :  { %3282 = vmatprep.subr.bf16.mxu0 %v9816_v0  ;;  %v9864_v0 = vld [vmem:[#allocation7 + $0x2cc] ss:$16 sps:$4 sm:$0xff]  }
 0x1d0   :  { %3283 = vmatpush1.bf16.msra.mxu0 %v9814_v1 }
 0x1d1   :  { %3284 = vmatprep.subr.bf16.mxu0 %v9822_v5 }
 0x1d4   :  { %3285 = vmatpush1.bf16.msra.mxu0 %v9820_v2  ;;  %v9859_v2 = vld [vmem:[#allocation7 + $0x2c0] ss:$16 sps:$4 sm:$0xff]  }
 0x1d5   :  { %3295 = vmatprep.subr.bf16.mxu0 %v9828_v12  ;;  %v9862_v12 = vld [vmem:[#allocation7 + $0x2c8] ss:$16 sps:$4 sm:$0xff]  }
 0x22a   :  { %v1837_v15 = vpop.f32.mrb[0].mxu0  ;;  %v11039_v16 = vpop.f32.mrb[0].mxu1 }
 0x22b   :  { %v2113_v21 = vmul.f32 %v2091_v10, %v1837_v15  ;;  %v1839_v22 = vpop.f32.mrb[1].mxu0  ;;  %v1962_v23 = vpop.f32.mrb[1].mxu1 }
 0x22c   :  { %v2114_v24 = vmul.f32 %v2095_v11, %v1839_v22  ;;  %v2116_v25 = vmul.f32 %v2103_v13, %v1962_v23  ;;  %v1841_v26 = vpop.f32.mrb[2].mxu0  ;;  %v1964_v27 = vpop.f32.mrb[2].mxu1  ;;  %v9867_v11 = vld [vmem:[#allocation7 + $0x2e4] ss:$16 sps:$4 sm:$0xff]   ;;  %v9870_v13 = vld [vmem:[#allocation7 + $0x2ec] ss:$16 sps:$4 sm:$0xff]  }
 0x22d   :  { %v2144_v28 = vadd.f32 %v2122_v14, %v2113_v21  ;;  %v1842_v29 = vpop.f32.mrb[3].mxu0  ;;  %v1965_v30 = vpop.f32.mrb[3].mxu1  ;;  %v9873_v26 = vld [vmem:[#allocation7 + $0x304] ss:$16 sps:$4 sm:$0xff]   ;;  %v9876_v27 = vld [vmem:[#allocation7 + $0x30c] ss:$16 sps:$4 sm:$0xff]  }
 0x22e   :  { %v2145_v31 = vadd.f32 %v2126_v17, %v2114_v24  ;;  %v2147_v33 = vadd.f32 %v2134_v19, %v2116_v25  ;;  %v9865_v24 = vld [vmem:[#allocation7 + $0x2e0] ss:$16 sps:$4 sm:$0xff]   ;;  %v9868_v25 = vld [vmem:[#allocation7 + $0x2e8] ss:$16 sps:$4 sm:$0xff]   ;;  %v9879_v30 = vld [vmem:[#allocation7 + $0x324] ss:$16 sps:$4 sm:$0xff]  }
 0x22f   :  { %vm2149_vm0 = vcmp.gt.f32.partialorder %v2144_v28, 0.0  ;;  %v2154_v34 = vmul.f32 0.2, %v2144_v28  ;;  %v9874_v29 = vld [vmem:[#allocation7 + $0x308] ss:$16 sps:$4 sm:$0xff]  }
 0x230   :  { %v2155_v35 = vmul.f32 0.2, %v2145_v31  ;;  %v2157_v36 = vmul.f32 0.2, %v2147_v33  ;;  %vm2150_vm1 = vcmp.gt.f32.partialorder %v2145_v31, 0.0  ;;  %vm2152_vm2 = vcmp.gt.f32.partialorder %v2147_v33, 0.0 }
 0x231   :  { %v2159_v48 = vsel %vm2149_vm0, %v2144_v28, %v2154_v34  ;;  %v9871_v28 = vld [vmem:[#allocation7 + $0x300] ss:$16 sps:$4 sm:$0xff]   ;;  %v9880_v34 = vld [vmem:[#allocation7 + $0x328] ss:$16 sps:$4 sm:$0xff]  }
 0x232   :  { %v2160_v20 = vsel %vm2150_vm1, %v2145_v31, %v2155_v35  ;;  %v2162_v39 = vsel %vm2152_vm2, %v2147_v33, %v2157_v36  ;;  %v2326_v40 = vpack.c.bf16 %v2159_v48, %v2159_v48  ;;  %v9882_v31 = vld [vmem:[#allocation7 + $0x32c] ss:$16 sps:$4 sm:$0xff]   ;;  %v9877_v33 = vld [vmem:[#allocation7 + $0x320] ss:$16 sps:$4 sm:$0xff]   ;;  %v9885_v35 = vld [vmem:[#allocation7 + $0x344] ss:$16 sps:$4 sm:$0xff]  }
 0x233   :  { %v2327_v37 = vpack.c.bf16 %v2160_v20, %v2160_v20  ;;  %v2329_v43 = vpack.c.bf16 %v2162_v39, %v2162_v39  ;;  %v9888_v36 = vld [vmem:[#allocation7 + $0x34c] ss:$16 sps:$4 sm:$0xff]   ;;  %v9883_v48 = vld [vmem:[#allocation7 + $0x340] ss:$16 sps:$4 sm:$0xff]   ;;  %v9886_v20 = vld [vmem:[#allocation7 + $0x348] ss:$16 sps:$4 sm:$0xff]  }
 0x234   :  { %v9889_v39 = vld [vmem:[#allocation7 + $0x360] ss:$16 sps:$4 sm:$0xff]  }
 0x235   :  { %3163 = vmatprep.mubr.bf16.mxu1 %v2327_v37  ;;  %3286 = vmatprep.mubr.bf16.mxu0 %v2327_v37  ;;  %v9891_v37 = vld [vmem:[#allocation7 + $0x364] ss:$16 sps:$4 sm:$0xff]  }
 0x236   :  { %3164 = vmatmul.mubr.bf16.vlgmr.msra.gmra.mrb[8].mxu1 %v2326_v40  ;;  %3287 = vmatmul.mubr.bf16.vlgmr.msra.gmra.mrb[12].mxu0 %v2326_v40  ;;  %v9892_v40 = vld [vmem:[#allocation7 + $0x368] ss:$16 sps:$4 sm:$0xff]  }
 0x237   :  { %3173 = vmatpush1.bf16.msra.mxu1 %v9823_v32  ;;  %3296 = vmatpush1.bf16.msra.mxu0 %v9826_v38  ;;  %v9894_v32 = vld [vmem:[#allocation7 + $0x36c] ss:$16 sps:$4 sm:$0xff]   ;;  %v11048_v38 = vsub.s32 2, %v11010_v3 }
 0x238   :  { %3204 = vmatprep.mubr.bf16.mxu1 %v2329_v43  ;;  %3327 = vmatprep.mubr.bf16.mxu0 %v2329_v43 }
 0x239   :  { %3174 = vmatprep.subr.bf16.mxu1 %v9831_v41  ;;  %3297 = vmatprep.subr.bf16.mxu0 %v9834_v42  ;;  %12510 = vst [vmem:[#allocation29_spill] sm:$0xff] %v11048_v38  ;;  %v9897_v41 = vld [vmem:[#allocation7 + $0x384] ss:$16 sps:$4 sm:$0xff]   ;;  %v9900_v42 = vld [vmem:[#allocation7 + $0x38c] ss:$16 sps:$4 sm:$0xff]   ;;  %v2099_v43 = vrot.slane %v11018_v6, %v11048_v38 }
 0x23b   :  { %3175 = vmatpush1.bf16.msra.mxu1 %v9829_v44  ;;  %3298 = vmatpush1.bf16.msra.mxu0 %v9832_v45  ;;  %v9895_v44 = vld [vmem:[#allocation7 + $0x380] ss:$16 sps:$4 sm:$0xff]   ;;  %v9898_v45 = vld [vmem:[#allocation7 + $0x388] ss:$16 sps:$4 sm:$0xff]  }
 0x23c   :  { %3176 = vmatprep.subr.bf16.mxu1 %v9837_v46  ;;  %3299 = vmatprep.subr.bf16.mxu0 %v9840_v47  ;;  %v9903_v46 = vld [vmem:[#allocation7 + $0x3a4] ss:$16 sps:$4 sm:$0xff]   ;;  %v9906_v47 = vld [vmem:[#allocation7 + $0x3ac] ss:$16 sps:$4 sm:$0xff]  }
 0x23f   :  { %3177 = vmatpush1.bf16.msra.mxu1 %v9835_v49  ;;  %3300 = vmatpush1.bf16.msra.mxu0 %v9838_v50  ;;  %v2115_v49 = vmul.f32 %v2099_v43, %v11039_v16  ;;  %v2130_v50 = vrot.slane %v11029_v9, %v11048_v38  ;;  %v9915_v16 = vld [vmem:[#allocation7 + $0x3e4] ss:$16 sps:$4 sm:$0xff]   ;;  %v9960_v43 = vld [vmem:[#allocation7 + $0x4cc] ss:$16 sps:$4 sm:$0xff]  }
 0x240   :  { %3178 = vmatprep.subr.bf16.mxu1 %v9843_v51  ;;  %3301 = vmatprep.subr.bf16.mxu0 %v9846_v52  ;;  %v9901_v51 = vld [vmem:[#allocation7 + $0x3a0] ss:$16 sps:$4 sm:$0xff]   ;;  %v9904_v52 = vld [vmem:[#allocation7 + $0x3a8] ss:$16 sps:$4 sm:$0xff]  }
 0x243   :  { %3179 = vmatpush1.bf16.msra.mxu1 %v9841_v53  ;;  %3302 = vmatpush1.bf16.msra.mxu0 %v9844_v54  ;;  %v9909_v53 = vld [vmem:[#allocation7 + $0x3c4] ss:$16 sps:$4 sm:$0xff]   ;;  %v9912_v54 = vld [vmem:[#allocation7 + $0x3cc] ss:$16 sps:$4 sm:$0xff]  }
 0x244   :  { %3180 = vmatprep.subr.bf16.mxu1 %v9849_v55  ;;  %3303 = vmatprep.subr.bf16.mxu0 %v9852_v56  ;;  %v2146_v55 = vadd.f32 %v2130_v50, %v2115_v49  ;;  %v9964_v50 = vld [vmem:[#allocation7 + $0x4e8] ss:$16 sps:$4 sm:$0xff]  }
 0x246   :  { %vm2151_vm3 = vcmp.gt.f32.partialorder %v2146_v55, 0.0 }
 0x247   :  { %3181 = vmatpush1.bf16.msra.mxu1 %v9847_v57  ;;  %3304 = vmatpush1.bf16.msra.mxu0 %v9850_v58  ;;  %v9907_v58 = vld [vmem:[#allocation7 + $0x3c0] ss:$16 sps:$4 sm:$0xff]  }
 0x248   :  { %3182 = vmatprep.subr.bf16.mxu1 %v9855_v59  ;;  %3305 = vmatprep.subr.bf16.mxu0 %v9858_v60  ;;  %v9910_v59 = vld [vmem:[#allocation7 + $0x3c8] ss:$16 sps:$4 sm:$0xff]  }
 0x24a   :  { %v9240_v1 = vpop.f32.mrb[4].mxu0  ;;  %v9262_v5 = vpop.f32.mrb[4].mxu1 }
 0x24b   :  { %3183 = vmatpush1.bf16.msra.mxu1 %v9853_v61  ;;  %3306 = vmatpush1.bf16.msra.mxu0 %v9856_v62  ;;  %v9241_v18 = vpop.f32.mrb[5].mxu0  ;;  %v9263_v10 = vpop.f32.mrb[5].mxu1  ;;  %v9918_v61 = vld [vmem:[#allocation7 + $0x3ec] ss:$16 sps:$4 sm:$0xff]  }
 0x24c   :  { %3184 = vmatprep.subr.bf16.mxu1 %v9861_v63  ;;  %3307 = vmatprep.subr.bf16.mxu0 %v9864_v0  ;;  %v9242_v14 = vadd.f32 %v9241_v18, %v9240_v1  ;;  %v9243_v15 = vpop.f32.mrb[6].mxu0  ;;  %v9264_v17 = vadd.f32 %v9263_v10, %v9262_v5  ;;  %v9265_v19 = vpop.f32.mrb[6].mxu1  ;;  %v2156_v63 = vmul.f32 0.2, %v2146_v55  ;;  %v9913_v5 = vld [vmem:[#allocation7 + $0x3e0] ss:$16 sps:$4 sm:$0xff]  }
 0x24d   :  { %v9244_v21 = vpop.f32.mrb[7].mxu0  ;;  %v9266_v22 = vpop.f32.mrb[7].mxu1  ;;  %v9924_v18 = vld [vmem:[#allocation7 + $0x40c] ss:$16 sps:$4 sm:$0xff]   ;;  %v9927_v15 = vld [vmem:[#allocation7 + $0x424] ss:$16 sps:$4 sm:$0xff]  }
 0x24e   :  { %v11045_v23 = vadd.f32 %v9264_v17, %v9242_v14  ;;  %v2161_v10 = vsel %vm2151_vm3, %v2146_v55, %v2156_v63  ;;  %v9930_v17 = vld [vmem:[#allocation7 + $0x42c] ss:$16 sps:$4 sm:$0xff]   ;;  %v9925_v19 = vld [vmem:[#allocation7 + $0x420] ss:$16 sps:$4 sm:$0xff]   ;;  %v9928_v21 = vld [vmem:[#allocation7 + $0x428] ss:$16 sps:$4 sm:$0xff]  }
 0x24f   :  { %3185 = vmatpush1.bf16.msra.mxu1 %v9859_v2  ;;  %3308 = vmatpush1.bf16.msra.mxu0 %v9862_v12  ;;  %v9916_v2 = vld [vmem:[#allocation7 + $0x3e8] ss:$16 sps:$4 sm:$0xff]   ;;  %v9921_v12 = vld [vmem:[#allocation7 + $0x404] ss:$16 sps:$4 sm:$0xff]   ;;  %v2328_v14 = vpack.c.bf16 %v2161_v10, %v2161_v10  ;;  %v9991_v10 = vld [vmem:[%s12318_s7 + $0x80] ss:$16 sps:$4 sm:$0xff]  }
 0x250   :  { %3186 = vmatprep.subr.bf16.mxu1 %v9867_v11  ;;  %3309 = vmatprep.subr.bf16.mxu0 %v9870_v13  ;;  %v9919_v11 = vld [vmem:[#allocation7 + $0x400] ss:$16 sps:$4 sm:$0xff]   ;;  %v9922_v13 = vld [vmem:[#allocation7 + $0x408] ss:$16 sps:$4 sm:$0xff]   ;;  %v9933_v22 = vld [vmem:[#allocation7 + $0x444] ss:$16 sps:$4 sm:$0xff]  }
 0x251   :  { %v9970_v55 = vld [vmem:[%s12318_s7 + $0x8] ss:$16 sps:$4 sm:$0xff]  }
 0x252   :  { %v9982_v63 = vld [vmem:[%s12318_s7 + $0x48] ss:$16 sps:$4 sm:$0xff]  }
 0x253   :  { %3187 = vmatpush1.bf16.msra.mxu1 %v9865_v24  ;;  %3310 = vmatpush1.bf16.msra.mxu0 %v9868_v25  ;;  %v12344_v24 = vmov 0   ;;  %v9931_v25 = vld [vmem:[#allocation7 + $0x440] ss:$16 sps:$4 sm:$0xff]  }
 0x254   :  { %3188 = vmatprep.subr.bf16.mxu1 %v9873_v26  ;;  %3311 = vmatprep.subr.bf16.mxu0 %v9876_v27  ;;  %v9934_v26 = vld [vmem:[#allocation7 + $0x448] ss:$16 sps:$4 sm:$0xff]   ;;  %v9939_v27 = vld [vmem:[#allocation7 + $0x464] ss:$16 sps:$4 sm:$0xff]  }
 0x257   :  { %3189 = vmatpush1.bf16.msra.mxu1 %v9871_v28  ;;  %3312 = vmatpush1.bf16.msra.mxu0 %v9874_v29  ;;  %v9942_v28 = vld [vmem:[#allocation7 + $0x46c] ss:$16 sps:$4 sm:$0xff]   ;;  %v2106_v29 = vsub.s32 4, %v11010_v3 }
 0x258   :  { %3190 = vmatprep.subr.bf16.mxu1 %v9879_v30  ;;  %3313 = vmatprep.subr.bf16.mxu0 %v9882_v31  ;;  %v9937_v30 = vld [vmem:[#allocation7 + $0x460] ss:$16 sps:$4 sm:$0xff]   ;;  %v9940_v31 = vld [vmem:[#allocation7 + $0x468] ss:$16 sps:$4 sm:$0xff]  }
 0x25b   :  { %3191 = vmatpush1.bf16.msra.mxu1 %v9877_v33  ;;  %3314 = vmatpush1.bf16.msra.mxu0 %v9880_v34  ;;  %v9945_v33 = vld [vmem:[#allocation7 + $0x484] ss:$16 sps:$4 sm:$0xff]   ;;  %v9948_v34 = vld [vmem:[#allocation7 + $0x48c] ss:$16 sps:$4 sm:$0xff]  }
 0x25c   :  { %3192 = vmatprep.subr.bf16.mxu1 %v9885_v35  ;;  %3315 = vmatprep.subr.bf16.mxu0 %v9888_v36  ;;  %v2107_v35 = vrot.slane %v11018_v6, %v2106_v29  ;;  %v9943_v36 = vld [vmem:[#allocation7 + $0x480] ss:$16 sps:$4 sm:$0xff]  }
 0x25f   :  { %3193 = vmatpush1.bf16.msra.mxu1 %v9883_v48  ;;  %3316 = vmatpush1.bf16.msra.mxu0 %v9886_v20  ;;  %v9946_v48 = vld [vmem:[#allocation7 + $0x488] ss:$16 sps:$4 sm:$0xff]   ;;  %v9951_v20 = vld [vmem:[#allocation7 + $0x4a4] ss:$16 sps:$4 sm:$0xff]  }
 0x260   :  { %3194 = vmatprep.subr.bf16.mxu1 %v9891_v37  ;;  %3317 = vmatprep.subr.bf16.mxu0 %v9894_v32  ;;  %v9954_v37 = vld [vmem:[#allocation7 + $0x4ac] ss:$16 sps:$4 sm:$0xff]  }
 0x263   :  { %3195 = vmatpush1.bf16.msra.mxu1 %v9889_v39  ;;  %3318 = vmatpush1.bf16.msra.mxu0 %v9892_v40  ;;  %v2138_v39 = vrot.slane %v11029_v9, %v2106_v29  ;;  %v9949_v40 = vld [vmem:[#allocation7 + $0x4a0] ss:$16 sps:$4 sm:$0xff]   ;;  %v10017_v29 = vld [vmem:[%s12318_s7 + $0x104] ss:$16 sps:$4 sm:$0xff]  }
 0x264   :  { %3196 = vmatprep.subr.bf16.mxu1 %v9897_v41  ;;  %3319 = vmatprep.subr.bf16.mxu0 %v9900_v42  ;;  %v9952_v41 = vld [vmem:[#allocation7 + $0x4a8] ss:$16 sps:$4 sm:$0xff]   ;;  %v9957_v42 = vld [vmem:[#allocation7 + $0x4c4] ss:$16 sps:$4 sm:$0xff]   ;;  %v9961_v9 = vld [vmem:[#allocation7 + $0x4e0] ss:$16 sps:$4 sm:$0xff]  }
 0x267   :  { %3197 = vmatpush1.bf16.msra.mxu1 %v9895_v44  ;;  %3320 = vmatpush1.bf16.msra.mxu0 %v9898_v45  ;;  %v9955_v44 = vld [vmem:[#allocation7 + $0x4c0] ss:$16 sps:$4 sm:$0xff]   ;;  %v9958_v45 = vld [vmem:[#allocation7 + $0x4c8] ss:$16 sps:$4 sm:$0xff]  }
 0x268   :  { %3198 = vmatprep.subr.bf16.mxu1 %v9903_v46  ;;  %3321 = vmatprep.subr.bf16.mxu0 %v9906_v47  ;;  %v9963_v46 = vld [vmem:[#allocation7 + $0x4e4] ss:$16 sps:$4 sm:$0xff]   ;;  %v9966_v47 = vld [vmem:[#allocation7 + $0x4ec] ss:$16 sps:$4 sm:$0xff]  }
 0x26a   :  { %v9284_v56 = vpop.f32.mrb[8].mxu0 }
 0x26b   :  { %3199 = vmatpush1.bf16.msra.mxu1 %v9901_v51  ;;  %3322 = vmatpush1.bf16.msra.mxu0 %v9904_v52  ;;  %v9285_v57 = vpop.f32.mrb[9].mxu0  ;;  %v9969_v51 = vld [vmem:[%s12318_s7 + $0x4] ss:$16 sps:$4 sm:$0xff]   ;;  %v9972_v52 = vld [vmem:[%s12318_s7 + $0xc] ss:$16 sps:$4 sm:$0xff]  }
 0x26c   :  { %v9286_v60 = vadd.f32 %v9285_v57, %v9284_v56  ;;  %3200 = vmatprep.subr.bf16.mxu1 %v9909_v53  ;;  %3323 = vmatprep.subr.bf16.mxu0 %v9912_v54  ;;  %v9287_v62 = vpop.f32.mrb[10].mxu0  ;;  %v9967_v54 = vld [vmem:[%s12318_s7] ss:$16 sps:$4 sm:$0xff]   ;;  %v9975_v57 = vld [vmem:[%s12318_s7 + $0x24] ss:$16 sps:$4 sm:$0xff]  }
 0x26d   :  { %v9288_v0 = vpop.f32.mrb[11].mxu0  ;;  %v9979_v62 = vld [vmem:[%s12318_s7 + $0x40] ss:$16 sps:$4 sm:$0xff]  }
 0x26e   :  { %v2082_v1 = vadd.f32 %v9286_v60, %v11045_v23  ;;  %v9936_v23 = vld [vmem:[#allocation7 + $0x44c] ss:$16 sps:$4 sm:$0xff]   ;;  %v9976_v60 = vld [vmem:[%s12318_s7 + $0x28] ss:$16 sps:$4 sm:$0xff]   ;;  %v9987_v0 = vld [vmem:[%s12318_s7 + $0x64] ss:$16 sps:$4 sm:$0xff]  }
 0x26f   :  { %3201 = vmatpush1.bf16.msra.mxu1 %v9907_v58  ;;  %3324 = vmatpush1.bf16.msra.mxu0 %v9910_v59  ;;  %v9978_v58 = vld [vmem:[%s12318_s7 + $0x2c] ss:$16 sps:$4 sm:$0xff]   ;;  %v9973_v59 = vld [vmem:[%s12318_s7 + $0x20] ss:$16 sps:$4 sm:$0xff]  }
 0x270   :  { %3202 = vmatprep.subr.bf16.mxu1 %v9915_v16  ;;  %3325 = vmatprep.subr.bf16.mxu0 %v9918_v61  ;;  %v2117_v32 = vmul.f32 %v2107_v35, %v2082_v1  ;;  %v9981_v16 = vld [vmem:[%s12318_s7 + $0x44] ss:$16 sps:$4 sm:$0xff]   ;;  %v9984_v61 = vld [vmem:[%s12318_s7 + $0x4c] ss:$16 sps:$4 sm:$0xff]  }
 0x271   :  { %v9990_v1 = vld [vmem:[%s12318_s7 + $0x6c] ss:$16 sps:$4 sm:$0xff]  }
 0x272   :  { %v2148_v6 = vadd.f32 %v2138_v39, %v2117_v32  ;;  %v10026_v35 = vld [vmem:[%s12318_s7 + $0x12c] ss:$16 sps:$4 sm:$0xff]   ;;  %v10027_v32 = vld [vmem:[%s12318_s7 + $0x140] ss:$16 sps:$4 sm:$0xff]   ;;  %v10030_v39 = vld [vmem:[%s12318_s7 + $0x148] ss:$16 sps:$4 sm:$0xff]  }
 0x273   :  { %3203 = vmatpush1.bf16.msra.mxu1 %v9913_v5  ;;  %3326 = vmatpush1.bf16.msra.mxu0 %v9916_v2  ;;  %v9985_v5 = vld [vmem:[%s12318_s7 + $0x60] ss:$16 sps:$4 sm:$0xff]   ;;  %v9988_v2 = vld [vmem:[%s12318_s7 + $0x68] ss:$16 sps:$4 sm:$0xff]  }
 0x274   :  { %3213 = vmatprep.subr.bf16.mxu1 %v9921_v12  ;;  %3336 = vmatprep.subr.bf16.mxu0 %v9924_v18  ;;  %v2158_v49 = vmul.f32 0.2, %v2148_v6  ;;  %vm2153_vm4 = vcmp.gt.f32.partialorder %v2148_v6, 0.0  ;;  %v9993_v12 = vld [vmem:[%s12318_s7 + $0x84] ss:$16 sps:$4 sm:$0xff]  }
 0x275   :  { %v9996_v18 = vld [vmem:[%s12318_s7 + $0x8c] ss:$16 sps:$4 sm:$0xff]  }
 0x276   :  { %3205 = vmatmul.mubr.bf16.vlgmr.msra.gmra.mrb[8].mxu1 %v2328_v14  ;;  %3328 = vmatmul.mubr.bf16.vlgmr.msra.gmra.mrb[12].mxu0 %v2328_v14  ;;  %v2163_v53 = vsel %vm2153_vm4, %v2148_v6, %v2158_v49  ;;  %v10002_v14 = vld [vmem:[%s12318_s7 + $0xac] ss:$16 sps:$4 sm:$0xff]   ;;  %v10041_v6 = vld [vmem:[%s12318_s7 + $0x184] ss:$16 sps:$4 sm:$0xff]  }
 0x277   :  { %3214 = vmatpush1.bf16.msra.mxu1 %v9919_v11  ;;  %3337 = vmatpush1.bf16.msra.mxu0 %v9922_v13  ;;  %v2330_v56 = vpack.c.bf16 %v2163_v53, %v2163_v53  ;;  %v9994_v11 = vld [vmem:[%s12318_s7 + $0x88] ss:$16 sps:$4 sm:$0xff]   ;;  %v9999_v13 = vld [vmem:[%s12318_s7 + $0xa4] ss:$16 sps:$4 sm:$0xff]   ;;  %v10050_v49 = vld [vmem:[%s12318_s7 + $0x1ac] ss:$16 sps:$4 sm:$0xff]  }
 0x278   :  { %3215 = vmatprep.subr.bf16.mxu1 %v9927_v15  ;;  %3338 = vmatprep.subr.bf16.mxu0 %v9930_v17  ;;  %v9997_v15 = vld [vmem:[%s12318_s7 + $0xa0] ss:$16 sps:$4 sm:$0xff]   ;;  %v10000_v17 = vld [vmem:[%s12318_s7 + $0xa8] ss:$16 sps:$4 sm:$0xff]  }
 0x279   :  { %3245 = vmatprep.mubr.bf16.mxu1 %v12344_v24  ;;  %3368 = vmatprep.mubr.bf16.mxu0 %v12344_v24  ;;  %v10051_v53 = vld [vmem:[%s12318_s7 + $0x1c0] ss:$16 sps:$4 sm:$0xff]  }
 0x27b   :  { %3216 = vmatpush1.bf16.msra.mxu1 %v9925_v19  ;;  %3339 = vmatpush1.bf16.msra.mxu0 %v9928_v21  ;;  %v10005_v19 = vld [vmem:[%s12318_s7 + $0xc4] ss:$16 sps:$4 sm:$0xff]   ;;  %v10008_v21 = vld [vmem:[%s12318_s7 + $0xcc] ss:$16 sps:$4 sm:$0xff]  }
 0x27c   :  { %3217 = vmatprep.subr.bf16.mxu1 %v9933_v22  ;;  %3340 = vmatprep.subr.bf16.mxu0 %v9936_v23  ;;  %v10003_v22 = vld [vmem:[%s12318_s7 + $0xc0] ss:$16 sps:$4 sm:$0xff]   ;;  %v10006_v23 = vld [vmem:[%s12318_s7 + $0xc8] ss:$16 sps:$4 sm:$0xff]  }
 0x27f   :  { %3218 = vmatpush1.bf16.msra.mxu1 %v9931_v25  ;;  %3341 = vmatpush1.bf16.msra.mxu0 %v9934_v26  ;;  %v10011_v25 = vld [vmem:[%s12318_s7 + $0xe4] ss:$16 sps:$4 sm:$0xff]   ;;  %v10014_v26 = vld [vmem:[%s12318_s7 + $0xec] ss:$16 sps:$4 sm:$0xff]  }
 0x280   :  { %3219 = vmatprep.subr.bf16.mxu1 %v9939_v27  ;;  %3342 = vmatprep.subr.bf16.mxu0 %v9942_v28  ;;  %v10009_v27 = vld [vmem:[%s12318_s7 + $0xe0] ss:$16 sps:$4 sm:$0xff]   ;;  %v10012_v28 = vld [vmem:[%s12318_s7 + $0xe8] ss:$16 sps:$4 sm:$0xff]  }
 0x283   :  { %3220 = vmatpush1.bf16.msra.mxu1 %v9937_v30  ;;  %3343 = vmatpush1.bf16.msra.mxu0 %v9940_v31  ;;  %v10020_v30 = vld [vmem:[%s12318_s7 + $0x10c] ss:$16 sps:$4 sm:$0xff]   ;;  %v10015_v31 = vld [vmem:[%s12318_s7 + $0x100] ss:$16 sps:$4 sm:$0xff]  }
 0x284   :  { %3221 = vmatprep.subr.bf16.mxu1 %v9945_v33  ;;  %3344 = vmatprep.subr.bf16.mxu0 %v9948_v34  ;;  %v10018_v33 = vld [vmem:[%s12318_s7 + $0x108] ss:$16 sps:$4 sm:$0xff]   ;;  %v10023_v34 = vld [vmem:[%s12318_s7 + $0x124] ss:$16 sps:$4 sm:$0xff]  }
 0x287   :  { %3222 = vmatpush1.bf16.msra.mxu1 %v9943_v36  ;;  %3345 = vmatpush1.bf16.msra.mxu0 %v9946_v48  ;;  %v10021_v36 = vld [vmem:[%s12318_s7 + $0x120] ss:$16 sps:$4 sm:$0xff]   ;;  %v10024_v48 = vld [vmem:[%s12318_s7 + $0x128] ss:$16 sps:$4 sm:$0xff]  }
 0x288   :  { %3223 = vmatprep.subr.bf16.mxu1 %v9951_v20  ;;  %3346 = vmatprep.subr.bf16.mxu0 %v9954_v37  ;;  %v10029_v20 = vld [vmem:[%s12318_s7 + $0x144] ss:$16 sps:$4 sm:$0xff]   ;;  %v10032_v37 = vld [vmem:[%s12318_s7 + $0x14c] ss:$16 sps:$4 sm:$0xff]  }
 0x28b   :  { %3224 = vmatpush1.bf16.msra.mxu1 %v9949_v40  ;;  %3347 = vmatpush1.bf16.msra.mxu0 %v9952_v41  ;;  %v10035_v40 = vld [vmem:[%s12318_s7 + $0x164] ss:$16 sps:$4 sm:$0xff]   ;;  %v10038_v41 = vld [vmem:[%s12318_s7 + $0x16c] ss:$16 sps:$4 sm:$0xff]  }
 0x28c   :  { %3225 = vmatprep.subr.bf16.mxu1 %v9957_v42  ;;  %3348 = vmatprep.subr.bf16.mxu0 %v9960_v43  ;;  %v10033_v42 = vld [vmem:[%s12318_s7 + $0x160] ss:$16 sps:$4 sm:$0xff]   ;;  %v10036_v43 = vld [vmem:[%s12318_s7 + $0x168] ss:$16 sps:$4 sm:$0xff]  }
 0x28f   :  { %3226 = vmatpush1.bf16.msra.mxu1 %v9955_v44  ;;  %3349 = vmatpush1.bf16.msra.mxu0 %v9958_v45  ;;  %v10044_v44 = vld [vmem:[%s12318_s7 + $0x18c] ss:$16 sps:$4 sm:$0xff]   ;;  %v10039_v45 = vld [vmem:[%s12318_s7 + $0x180] ss:$16 sps:$4 sm:$0xff]  }
 0x290   :  { %3227 = vmatprep.subr.bf16.mxu1 %v9963_v46  ;;  %3350 = vmatprep.subr.bf16.mxu0 %v9966_v47  ;;  %v10042_v46 = vld [vmem:[%s12318_s7 + $0x188] ss:$16 sps:$4 sm:$0xff]   ;;  %v10047_v47 = vld [vmem:[%s12318_s7 + $0x1a4] ss:$16 sps:$4 sm:$0xff]  }
 0x293   :  { %3228 = vmatpush1.bf16.msra.mxu1 %v9961_v9  ;;  %3351 = vmatpush1.bf16.msra.mxu0 %v9964_v50  ;;  %v10045_v9 = vld [vmem:[%s12318_s7 + $0x1a0] ss:$16 sps:$4 sm:$0xff]   ;;  %v10048_v50 = vld [vmem:[%s12318_s7 + $0x1a8] ss:$16 sps:$4 sm:$0xff]  }
 0x294   :  { %3948 = vmatprep.subr.bf16.mxu1 %v9969_v51  ;;  %3989 = vmatprep.subr.bf16.mxu0 %v9972_v52  ;;  %v10053_v51 = vld [vmem:[%s12318_s7 + $0x1c4] ss:$16 sps:$4 sm:$0xff]   ;;  %v10056_v52 = vld [vmem:[%s12318_s7 + $0x1cc] ss:$16 sps:$4 sm:$0xff]  }
 0x296   :  { %3246 = vmatmul.mubr.bf16.vlgmr.msra.gmra.mrb[8].mxu1 %v2330_v56  ;;  %3369 = vmatmul.mubr.bf16.vlgmr.msra.gmra.mrb[12].mxu0 %v2330_v56  ;;  %v10062_v56 = vld [vmem:[%s12318_s7 + $0x1ec] ss:$16 sps:$4 sm:$0xff]  }
 0x297   :  { %3949 = vmatpush1.bf16.msra.mxu1 %v9967_v54  ;;  %3990 = vmatpush1.bf16.msra.mxu0 %v9970_v55  ;;  %v10054_v54 = vld [vmem:[%s12318_s7 + $0x1c8] ss:$16 sps:$4 sm:$0xff]   ;;  %v10059_v55 = vld [vmem:[%s12318_s7 + $0x1e4] ss:$16 sps:$4 sm:$0xff]  }
 0x298   :  { %3950 = vmatprep.subr.bf16.mxu1 %v9975_v57  ;;  %3991 = vmatprep.subr.bf16.mxu0 %v9978_v58  ;;  %v10057_v57 = vld [vmem:[%s12318_s7 + $0x1e0] ss:$16 sps:$4 sm:$0xff]   ;;  %v10060_v58 = vld [vmem:[%s12318_s7 + $0x1e8] ss:$16 sps:$4 sm:$0xff]  }
 0x29b   :  { %3951 = vmatpush1.bf16.msra.mxu1 %v9973_v59  ;;  %3992 = vmatpush1.bf16.msra.mxu0 %v9976_v60  ;;  %v10065_v59 = vld [vmem:[#allocation9 + $0x4] ss:$16 sps:$4 sm:$0xff]   ;;  %v10068_v60 = vld [vmem:[#allocation9 + $0xc] ss:$16 sps:$4 sm:$0xff]  }
 0x29c   :  { %3952 = vmatprep.subr.bf16.mxu1 %v9981_v16  ;;  %3993 = vmatprep.subr.bf16.mxu0 %v9984_v61  ;;  %v2324_v16 = vld [vmem:[%s12511_s20] sm:$0x3] }
 0x29d   :  { %v2325_v61 = vld [vmem:[%s12512_s2] sm:$0x3] }
 0x29f   :  { %3953 = vmatpush1.bf16.msra.mxu1 %v9979_v62  ;;  %3994 = vmatpush1.bf16.msra.mxu0 %v9982_v63  ;;  %v3383_v62 = vrot.slane %v2324_v16, %v11013_v4 }
 0x2a0   :  { %3954 = vmatprep.subr.bf16.mxu1 %v9987_v0  ;;  %3995 = vmatprep.subr.bf16.mxu0 %v9990_v1  ;;  %v3387_v1 = vrot.slane %v2324_v16, %v11021_v7  ;;  %v10111_v16 = vld [vmem:[#allocation9 + $0x100] ss:$16 sps:$4 sm:$0xff]  }
 0x2a3   :  { %3955 = vmatpush1.bf16.msra.mxu1 %v9985_v5  ;;  %3996 = vmatpush1.bf16.msra.mxu0 %v9988_v2  ;;  %v3396_v2 = vrot.slane %v2325_v61, %v11013_v4 }
 0x2a4   :  { %3956 = vmatprep.subr.bf16.mxu1 %v9993_v12  ;;  %3997 = vmatprep.subr.bf16.mxu0 %v9996_v18 }
 0x2a7   :  { %3957 = vmatpush1.bf16.msra.mxu1 %v9991_v10  ;;  %3998 = vmatpush1.bf16.msra.mxu0 %v9994_v11  ;;  %v3400_v11 = vrot.slane %v2325_v61, %v11021_v7  ;;  %v10114_v61 = vld [vmem:[#allocation9 + $0x108] ss:$16 sps:$4 sm:$0xff]  }
 0x2a8   :  { %3958 = vmatprep.subr.bf16.mxu1 %v9999_v13  ;;  %3999 = vmatprep.subr.bf16.mxu0 %v10002_v14 }
 0x2ab   :  { %3959 = vmatpush1.bf16.msra.mxu1 %v9997_v15  ;;  %4000 = vmatpush1.bf16.msra.mxu0 %v10000_v17 }
 0x2ac   :  { %3960 = vmatprep.subr.bf16.mxu1 %v10005_v19  ;;  %4001 = vmatprep.subr.bf16.mxu0 %v10008_v21 }
 0x2af   :  { %3961 = vmatpush1.bf16.msra.mxu1 %v10003_v22  ;;  %4002 = vmatpush1.bf16.msra.mxu0 %v10006_v23 }
 0x2b0   :  { %3962 = vmatprep.subr.bf16.mxu1 %v10011_v25  ;;  %4003 = vmatprep.subr.bf16.mxu0 %v10014_v26 }
 0x2b3   :  { %3963 = vmatpush1.bf16.msra.mxu1 %v10009_v27  ;;  %4004 = vmatpush1.bf16.msra.mxu0 %v10012_v28 }
 0x2b4   :  { %3964 = vmatprep.subr.bf16.mxu1 %v10017_v29  ;;  %4005 = vmatprep.subr.bf16.mxu0 %v10020_v30  ;;  %v10063_v30 = vld [vmem:[#allocation9] ss:$16 sps:$4 sm:$0xff]  }
 0x2b7   :  { %3965 = vmatpush1.bf16.msra.mxu1 %v10015_v31  ;;  %4006 = vmatpush1.bf16.msra.mxu0 %v10018_v33  ;;  %v10066_v31 = vld [vmem:[#allocation9 + $0x8] ss:$16 sps:$4 sm:$0xff]  }
 0x2b8   :  { %3966 = vmatprep.subr.bf16.mxu1 %v10023_v34  ;;  %4007 = vmatprep.subr.bf16.mxu0 %v10026_v35  ;;  %v10071_v34 = vld [vmem:[#allocation9 + $0x24] ss:$16 sps:$4 sm:$0xff]   ;;  %v10074_v35 = vld [vmem:[#allocation9 + $0x2c] ss:$16 sps:$4 sm:$0xff]  }
 0x2bb   :  { %3967 = vmatpush1.bf16.msra.mxu1 %v10021_v36  ;;  %4008 = vmatpush1.bf16.msra.mxu0 %v10024_v48  ;;  %v10069_v36 = vld [vmem:[#allocation9 + $0x20] ss:$16 sps:$4 sm:$0xff]   ;;  %v10072_v48 = vld [vmem:[#allocation9 + $0x28] ss:$16 sps:$4 sm:$0xff]  }
 0x2bc   :  { %3968 = vmatprep.subr.bf16.mxu1 %v10029_v20  ;;  %4009 = vmatprep.subr.bf16.mxu0 %v10032_v37  ;;  %v10077_v20 = vld [vmem:[#allocation9 + $0x44] ss:$16 sps:$4 sm:$0xff]   ;;  %v10080_v37 = vld [vmem:[#allocation9 + $0x4c] ss:$16 sps:$4 sm:$0xff]  }
 0x2bf   :  { %3969 = vmatpush1.bf16.msra.mxu1 %v10027_v32  ;;  %4010 = vmatpush1.bf16.msra.mxu0 %v10030_v39  ;;  %v10075_v32 = vld [vmem:[#allocation9 + $0x40] ss:$16 sps:$4 sm:$0xff]   ;;  %v10078_v39 = vld [vmem:[#allocation9 + $0x48] ss:$16 sps:$4 sm:$0xff]  }
 0x2c0   :  { %3970 = vmatprep.subr.bf16.mxu1 %v10035_v40  ;;  %4011 = vmatprep.subr.bf16.mxu0 %v10038_v41  ;;  %v10083_v40 = vld [vmem:[#allocation9 + $0x64] ss:$16 sps:$4 sm:$0xff]   ;;  %v10086_v41 = vld [vmem:[#allocation9 + $0x6c] ss:$16 sps:$4 sm:$0xff]  }
 0x2c3   :  { %3971 = vmatpush1.bf16.msra.mxu1 %v10033_v42  ;;  %4012 = vmatpush1.bf16.msra.mxu0 %v10036_v43  ;;  %v10081_v42 = vld [vmem:[#allocation9 + $0x60] ss:$16 sps:$4 sm:$0xff]   ;;  %v10084_v43 = vld [vmem:[#allocation9 + $0x68] ss:$16 sps:$4 sm:$0xff]  }
 0x2c4   :  { %3972 = vmatprep.subr.bf16.mxu1 %v10041_v6  ;;  %4013 = vmatprep.subr.bf16.mxu0 %v10044_v44  ;;  %v10089_v6 = vld [vmem:[#allocation9 + $0x84] ss:$16 sps:$4 sm:$0xff]   ;;  %v10092_v44 = vld [vmem:[#allocation9 + $0x8c] ss:$16 sps:$4 sm:$0xff]  }
 0x2c7   :  { %3973 = vmatpush1.bf16.msra.mxu1 %v10039_v45  ;;  %4014 = vmatpush1.bf16.msra.mxu0 %v10042_v46  ;;  %v10087_v45 = vld [vmem:[#allocation9 + $0x80] ss:$16 sps:$4 sm:$0xff]   ;;  %v10090_v46 = vld [vmem:[#allocation9 + $0x88] ss:$16 sps:$4 sm:$0xff]  }
 0x2c8   :  { %3974 = vmatprep.subr.bf16.mxu1 %v10047_v47  ;;  %4015 = vmatprep.subr.bf16.mxu0 %v10050_v49  ;;  %v10095_v47 = vld [vmem:[#allocation9 + $0xa4] ss:$16 sps:$4 sm:$0xff]   ;;  %v10098_v49 = vld [vmem:[#allocation9 + $0xac] ss:$16 sps:$4 sm:$0xff]  }
 0x2cb   :  { %3975 = vmatpush1.bf16.msra.mxu1 %v10045_v9  ;;  %4016 = vmatpush1.bf16.msra.mxu0 %v10048_v50  ;;  %v10093_v9 = vld [vmem:[#allocation9 + $0xa0] ss:$16 sps:$4 sm:$0xff]   ;;  %v10096_v50 = vld [vmem:[#allocation9 + $0xa8] ss:$16 sps:$4 sm:$0xff]  }
 0x2cc   :  { %3976 = vmatprep.subr.bf16.mxu1 %v10053_v51  ;;  %4017 = vmatprep.subr.bf16.mxu0 %v10056_v52  ;;  %v10101_v51 = vld [vmem:[#allocation9 + $0xc4] ss:$16 sps:$4 sm:$0xff]   ;;  %v10104_v52 = vld [vmem:[#allocation9 + $0xcc] ss:$16 sps:$4 sm:$0xff]  }
 0x2cf   :  { %3977 = vmatpush1.bf16.msra.mxu1 %v10051_v53  ;;  %4018 = vmatpush1.bf16.msra.mxu0 %v10054_v54  ;;  %v10099_v53 = vld [vmem:[#allocation9 + $0xc0] ss:$16 sps:$4 sm:$0xff]   ;;  %v10102_v54 = vld [vmem:[#allocation9 + $0xc8] ss:$16 sps:$4 sm:$0xff]  }
 0x2d0   :  { %3978 = vmatprep.subr.bf16.mxu1 %v10059_v55  ;;  %4019 = vmatprep.subr.bf16.mxu0 %v10062_v56  ;;  %v10107_v55 = vld [vmem:[#allocation9 + $0xe4] ss:$16 sps:$4 sm:$0xff]   ;;  %v10110_v56 = vld [vmem:[#allocation9 + $0xec] ss:$16 sps:$4 sm:$0xff]  }
 0x2d3   :  { %3979 = vmatpush1.bf16.msra.mxu1 %v10057_v57  ;;  %4020 = vmatpush1.bf16.msra.mxu0 %v10060_v58  ;;  %v10105_v57 = vld [vmem:[#allocation9 + $0xe0] ss:$16 sps:$4 sm:$0xff]   ;;  %v10108_v58 = vld [vmem:[#allocation9 + $0xe8] ss:$16 sps:$4 sm:$0xff]  }
 0x2d4   :  { %4371 = vmatprep.subr.bf16.mxu1 %v10065_v59  ;;  %4412 = vmatprep.subr.bf16.mxu0 %v10068_v60  ;;  %v10113_v59 = vld [vmem:[#allocation9 + $0x104] ss:$16 sps:$4 sm:$0xff]   ;;  %v10116_v60 = vld [vmem:[#allocation9 + $0x10c] ss:$16 sps:$4 sm:$0xff]  }
 0x369   :  { %v3247_v63 = vpop.f32.mrb[8].mxu1  ;;  %v3370_v0 = vpop.f32.mrb[12].mxu0 }
 0x36a   :  { %v3377_v5 = vmax.f32 %v3247_v63, %v3370_v0  ;;  %v3249_v12 = vpop.f32.mrb[9].mxu1  ;;  %v3372_v18 = vpop.f32.mrb[13].mxu0  ;;  %v10122_v63 = vld [vmem:[#allocation9 + $0x12c] ss:$16 sps:$4 sm:$0xff]   ;;  %v10117_v0 = vld [vmem:[#allocation9 + $0x120] ss:$16 sps:$4 sm:$0xff]  }
 0x36b   :  { %v3378_v10 = vmax.f32 %v3249_v12, %v3372_v18  ;;  %v3251_v13 = vpop.f32.mrb[10].mxu1  ;;  %v3374_v14 = vpop.f32.mrb[14].mxu0  ;;  %v10123_v12 = vld [vmem:[#allocation9 + $0x140] ss:$16 sps:$4 sm:$0xff]   ;;  %v10126_v18 = vld [vmem:[#allocation9 + $0x148] ss:$16 sps:$4 sm:$0xff]  }
 0x36c   :  { %v3390_v15 = vmul.f32 %v3383_v62, %v3377_v5  ;;  %v3252_v17 = vpop.f32.mrb[11].mxu1  ;;  %v3375_v19 = vpop.f32.mrb[15].mxu0  ;;  %v10119_v62 = vld [vmem:[#allocation9 + $0x124] ss:$16 sps:$4 sm:$0xff]   ;;  %v10129_v13 = vld [vmem:[#allocation9 + $0x160] ss:$16 sps:$4 sm:$0xff]  }
 0x36d   :  { %v3391_v21 = vmul.f32 %v3387_v1, %v3378_v10  ;;  %v10120_v1 = vld [vmem:[#allocation9 + $0x128] ss:$16 sps:$4 sm:$0xff]   ;;  %v10125_v5 = vld [vmem:[#allocation9 + $0x144] ss:$16 sps:$4 sm:$0xff]   ;;  %v10140_v17 = vld [vmem:[#allocation9 + $0x18c] ss:$16 sps:$4 sm:$0xff]  }
 0x36e   :  { %v3403_v22 = vadd.f32 %v3396_v2, %v3390_v15  ;;  %v10128_v2 = vld [vmem:[#allocation9 + $0x14c] ss:$16 sps:$4 sm:$0xff]   ;;  %v10131_v10 = vld [vmem:[#allocation9 + $0x164] ss:$16 sps:$4 sm:$0xff]   ;;  %v10132_v14 = vld [vmem:[#allocation9 + $0x168] ss:$16 sps:$4 sm:$0xff]  }
 0x36f   :  { %v3404_v23 = vadd.f32 %v3400_v11, %v3391_v21  ;;  %v10134_v11 = vld [vmem:[#allocation9 + $0x16c] ss:$16 sps:$4 sm:$0xff]   ;;  %v10137_v15 = vld [vmem:[#allocation9 + $0x184] ss:$16 sps:$4 sm:$0xff]   ;;  %v10135_v19 = vld [vmem:[#allocation9 + $0x180] ss:$16 sps:$4 sm:$0xff]  }
 0x370   :  { %vm3405_vm5 = vcmp.gt.f32.partialorder %v3403_v22, 0.0  ;;  %v3407_v25 = vmul.f32 0.2, %v3403_v22  ;;  %v10138_v21 = vld [vmem:[#allocation9 + $0x188] ss:$16 sps:$4 sm:$0xff]  }
 0x371   :  { %vm3406_vm6 = vcmp.gt.f32.partialorder %v3404_v23, 0.0  ;;  %v3408_v26 = vmul.f32 0.2, %v3404_v23 }
 0x372   :  { %v3409_v27 = vsel %vm3405_vm5, %v3403_v22, %v3407_v25  ;;  %v10143_v22 = vld [vmem:[#allocation9 + $0x1a4] ss:$16 sps:$4 sm:$0xff]   ;;  %v10141_v25 = vld [vmem:[#allocation9 + $0x1a0] ss:$16 sps:$4 sm:$0xff]  }
 0x373   :  { %v3410_v28 = vsel %vm3406_vm6, %v3404_v23, %v3408_v26  ;;  %v11263_v33 = vpack.c.bf16 %v3409_v27, %v3409_v27  ;;  %v10146_v23 = vld [vmem:[#allocation9 + $0x1ac] ss:$16 sps:$4 sm:$0xff]   ;;  %v10144_v26 = vld [vmem:[#allocation9 + $0x1a8] ss:$16 sps:$4 sm:$0xff]   ;;  %v10149_v27 = vld [vmem:[#allocation9 + $0x1c4] ss:$16 sps:$4 sm:$0xff]  }
 0x374   :  { %v3606_v29 = vpack.c.bf16 %v3410_v28, %v3410_v28  ;;  %v10152_v28 = vld [vmem:[#allocation9 + $0x1cc] ss:$16 sps:$4 sm:$0xff]  }
 0x376   :  { %3980 = vmatprep.mubr.bf16.mxu1 %v3606_v29  ;;  %4021 = vmatprep.mubr.bf16.mxu0 %v3606_v29 }
 0x377   :  { %3981 = vmatmul.mubr.bf16.vlgmr.msra.gmra.mrb[12].mxu1 %v11263_v33  ;;  %4022 = vmatmul.mubr.bf16.vlgmr.msra.gmra.mrb[16].mxu0 %v11263_v33 }
 0x378   :  { %4372 = vmatpush1.bf16.msra.mxu1 %v10063_v30  ;;  %4413 = vmatpush1.bf16.msra.mxu0 %v10066_v31  ;;  %v10150_v30 = vld [vmem:[#allocation9 + $0x1c8] ss:$16 sps:$4 sm:$0xff]   ;;  %v10155_v31 = vld [vmem:[#allocation9 + $0x1e4] ss:$16 sps:$4 sm:$0xff]  }
 0x379   :  { %4403 = vmatprep.mubr.bf16.mxu1 %v3606_v29  ;;  %4444 = vmatprep.mubr.bf16.mxu0 %v3606_v29  ;;  %v10147_v29 = vld [vmem:[#allocation9 + $0x1c0] ss:$16 sps:$4 sm:$0xff]  }
 0x37a   :  { %4373 = vmatprep.subr.bf16.mxu1 %v10071_v34  ;;  %4414 = vmatprep.subr.bf16.mxu0 %v10074_v35  ;;  %v10158_v34 = vld [vmem:[#allocation9 + $0x1ec] ss:$16 sps:$4 sm:$0xff]   ;;  %v3539_v35 = vld [vmem:[#allocation10] sm:$0xff] }
 0x37c   :  { %4374 = vmatpush1.bf16.msra.mxu1 %v10069_v36  ;;  %4415 = vmatpush1.bf16.msra.mxu0 %v10072_v48  ;;  %v3543_v36 = vld [vmem:[#allocation10 + $0x20] sm:$0xff]  ;;  %v3540_v48 = vld [vmem:[#allocation10 + $0x8] sm:$0xff] }
 0x37d   :  { %4375 = vmatprep.subr.bf16.mxu1 %v10077_v20  ;;  %4416 = vmatprep.subr.bf16.mxu0 %v10080_v37  ;;  %v3544_v20 = vld [vmem:[#allocation10 + $0x28] sm:$0xff]  ;;  %v10153_v37 = vld [vmem:[#allocation9 + $0x1e0] ss:$16 sps:$4 sm:$0xff]  }
 0x380   :  { %4376 = vmatpush1.bf16.msra.mxu1 %v10075_v32  ;;  %4417 = vmatpush1.bf16.msra.mxu0 %v10078_v39  ;;  %v10156_v32 = vld [vmem:[#allocation9 + $0x1e8] ss:$16 sps:$4 sm:$0xff]   ;;  %v11267_v39 = vcombine.high %v3539_v35, %v3543_v36 }
 0x381   :  { %4377 = vmatprep.subr.bf16.mxu1 %v10083_v40  ;;  %4418 = vmatprep.subr.bf16.mxu0 %v10086_v41  ;;  %v11269_v40 = vcombine.high %v3540_v48, %v3544_v20  ;;  %v3547_v41 = vld [vmem:[#allocation10 + $0x40] sm:$0xff] }
 0x384   :  { %4378 = vmatpush1.bf16.msra.mxu1 %v10081_v42  ;;  %4419 = vmatpush1.bf16.msra.mxu0 %v10084_v43  ;;  %v3551_v42 = vld [vmem:[#allocation10 + $0x60] sm:$0xff]  ;;  %v3548_v43 = vld [vmem:[#allocation10 + $0x48] sm:$0xff] }
 0x385   :  { %4379 = vmatprep.subr.bf16.mxu1 %v10089_v6  ;;  %4420 = vmatprep.subr.bf16.mxu0 %v10092_v44  ;;  %v3552_v6 = vld [vmem:[#allocation10 + $0x68] sm:$0xff]  ;;  %v11271_v44 = vcombine.low %v3539_v35, %v3543_v36 }
 0x386   :  { %v3596_v35 = vld [vmem:[#allocation10 + $0x1c8] sm:$0xff] }
 0x387   :  { %v3600_v36 = vld [vmem:[#allocation10 + $0x1e8] sm:$0xff] }
 0x388   :  { %4380 = vmatpush1.bf16.msra.mxu1 %v10087_v45  ;;  %4421 = vmatpush1.bf16.msra.mxu0 %v10090_v46  ;;  %v11273_v45 = vcombine.low %v3540_v48, %v3544_v20  ;;  %v11277_v46 = vcombine.high %v3547_v41, %v3551_v42 }
 0x389   :  { %4381 = vmatprep.subr.bf16.mxu1 %v10095_v47  ;;  %4422 = vmatprep.subr.bf16.mxu0 %v10098_v49  ;;  %v11279_v47 = vcombine.high %v3548_v43, %v3552_v6  ;;  %v3555_v49 = vld [vmem:[#allocation10 + $0x80] sm:$0xff] }
 0x38c   :  { %4382 = vmatpush1.bf16.msra.mxu1 %v10093_v9  ;;  %4423 = vmatpush1.bf16.msra.mxu0 %v10096_v50  ;;  %v3559_v9 = vld [vmem:[#allocation10 + $0xa0] sm:$0xff]  ;;  %v3556_v50 = vld [vmem:[#allocation10 + $0x88] sm:$0xff] }
 0x38d   :  { %4383 = vmatprep.subr.bf16.mxu1 %v10101_v51  ;;  %4424 = vmatprep.subr.bf16.mxu0 %v10104_v52  ;;  %v3560_v51 = vld [vmem:[#allocation10 + $0xa8] sm:$0xff]  ;;  %v11285_v52 = vcombine.low %v3547_v41, %v3551_v42  ;;  %v3541_v41 = vld [vmem:[#allocation10 + $0x10] sm:$0xff] }
 0x38e   :  { %v3545_v42 = vld [vmem:[#allocation10 + $0x30] sm:$0xff] }
 0x390   :  { %4384 = vmatpush1.bf16.msra.mxu1 %v10099_v53  ;;  %4425 = vmatpush1.bf16.msra.mxu0 %v10102_v54  ;;  %v11287_v53 = vcombine.low %v3548_v43, %v3552_v6  ;;  %v11291_v54 = vcombine.high %v3555_v49, %v3559_v9  ;;  %v3542_v43 = vld [vmem:[#allocation10 + $0x18] sm:$0xff] }
 0x391   :  { %4385 = vmatprep.subr.bf16.mxu1 %v10107_v55  ;;  %4426 = vmatprep.subr.bf16.mxu0 %v10110_v56  ;;  %v11293_v55 = vcombine.high %v3556_v50, %v3560_v51  ;;  %v3563_v56 = vld [vmem:[#allocation10 + $0xc0] sm:$0xff]  ;;  %v3546_v6 = vld [vmem:[#allocation10 + $0x38] sm:$0xff] }
 0x393   :  { %12513 = vst [vmem:[#allocation30_spill] sm:$0xff] %v11293_v55 }
 0x394   :  { %4386 = vmatpush1.bf16.msra.mxu1 %v10105_v57  ;;  %4427 = vmatpush1.bf16.msra.mxu0 %v10108_v58  ;;  %v3567_v57 = vld [vmem:[#allocation10 + $0xe0] sm:$0xff]  ;;  %v3564_v58 = vld [vmem:[#allocation10 + $0xc8] sm:$0xff] }
 0x395   :  { %4387 = vmatprep.subr.bf16.mxu1 %v10113_v59  ;;  %4428 = vmatprep.subr.bf16.mxu0 %v10116_v60  ;;  %v11299_v59 = vcombine.low %v3555_v49, %v3559_v9  ;;  %v11301_v60 = vcombine.low %v3556_v50, %v3560_v51  ;;  %v11361_v9 = vcombine.low %v3596_v35, %v3600_v36 }
 0x396   :  { %v11365_v50 = vcombine.high %v3541_v41, %v3545_v42  ;;  %v11367_v51 = vcombine.high %v3542_v43, %v3546_v6 }
 0x397   :  { %12514 = vst [vmem:[#allocation31_spill] sm:$0xff] %v11299_v59  ;;  %12515 = vst [vmem:[#allocation32_spill] sm:$0xff] %v11301_v60 }
 0x398   :  { %4388 = vmatpush1.bf16.msra.mxu1 %v10111_v16  ;;  %4429 = vmatpush1.bf16.msra.mxu0 %v10114_v61  ;;  %v11305_v16 = vcombine.high %v3563_v56, %v3567_v57  ;;  %12535 = vst [vmem:[#allocation52_spill] sm:$0xff] %v11361_v9  ;;  %12536 = vst [vmem:[#allocation53_spill] sm:$0xff] %v11365_v50 }
 0x399   :  { %4389 = vmatprep.subr.bf16.mxu1 %v10119_v62  ;;  %4430 = vmatprep.subr.bf16.mxu0 %v10122_v63  ;;  %v3571_v62 = vld [vmem:[#allocation10 + $0x100] sm:$0xff]  ;;  %12537 = vst [vmem:[#allocation54_spill] sm:$0xff] %v11367_v51 }
 0x39a   :  { %12516 = vst [vmem:[#allocation33_spill] sm:$0xff] %v11305_v16  ;;  %v3575_v63 = vld [vmem:[#allocation10 + $0x120] sm:$0xff] }
 0x39c   :  { %4390 = vmatpush1.bf16.msra.mxu1 %v10117_v0  ;;  %4431 = vmatpush1.bf16.msra.mxu0 %v10120_v1  ;;  %v3572_v0 = vld [vmem:[#allocation10 + $0x108] sm:$0xff] }
 0x39d   :  { %4391 = vmatprep.subr.bf16.mxu1 %v10125_v5  ;;  %4432 = vmatprep.subr.bf16.mxu0 %v10128_v2  ;;  %v3576_v1 = vld [vmem:[#allocation10 + $0x128] sm:$0xff]  ;;  %v11311_v5 = vcombine.low %v3563_v56, %v3567_v57  ;;  %v3549_v56 = vld [vmem:[#allocation10 + $0x50] sm:$0xff] }
 0x39e   :  { %v3553_v57 = vld [vmem:[#allocation10 + $0x70] sm:$0xff] }
 0x39f   :  { %12518 = vst [vmem:[#allocation35_spill] sm:$0xff] %v11311_v5 }
 0x3a0   :  { %4392 = vmatpush1.bf16.msra.mxu1 %v10123_v12  ;;  %4433 = vmatpush1.bf16.msra.mxu0 %v10126_v18  ;;  %v11317_v12 = vcombine.high %v3571_v62, %v3575_v63  ;;  %v11319_v18 = vcombine.high %v3572_v0, %v3576_v1 }
 0x3a1   :  { %4393 = vmatprep.subr.bf16.mxu1 %v10131_v10  ;;  %4434 = vmatprep.subr.bf16.mxu0 %v10134_v11  ;;  %v3579_v10 = vld [vmem:[#allocation10 + $0x140] sm:$0xff] }
 0x3a2   :  { %12520 = vst [vmem:[#allocation37_spill] sm:$0xff] %v11317_v12  ;;  %12521 = vst [vmem:[#allocation38_spill] sm:$0xff] %v11319_v18  ;;  %v3583_v11 = vld [vmem:[#allocation10 + $0x160] sm:$0xff] }
 0x3a4   :  { %4394 = vmatpush1.bf16.msra.mxu1 %v10129_v13  ;;  %4435 = vmatpush1.bf16.msra.mxu0 %v10132_v14  ;;  %v3580_v13 = vld [vmem:[#allocation10 + $0x148] sm:$0xff] }
 0x3a5   :  { %4395 = vmatprep.subr.bf16.mxu1 %v10137_v15  ;;  %4436 = vmatprep.subr.bf16.mxu0 %v10140_v17  ;;  %v3584_v14 = vld [vmem:[#allocation10 + $0x168] sm:$0xff]  ;;  %v11323_v15 = vcombine.low %v3571_v62, %v3575_v63  ;;  %v11325_v17 = vcombine.low %v3572_v0, %v3576_v1  ;;  %v11371_v62 = vcombine.low %v3541_v41, %v3545_v42 }
 0x3a6   :  { %v11373_v63 = vcombine.low %v3542_v43, %v3546_v6  ;;  %v11377_v0 = vcombine.high %v3549_v56, %v3553_v57 }
 0x3a7   :  { %12522 = vst [vmem:[#allocation39_spill] sm:$0xff] %v11323_v15  ;;  %12523 = vst [vmem:[#allocation40_spill] sm:$0xff] %v11325_v17 }
 0x3a8   :  { %4396 = vmatpush1.bf16.msra.mxu1 %v10135_v19  ;;  %4437 = vmatpush1.bf16.msra.mxu0 %v10138_v21  ;;  %v11329_v19 = vcombine.high %v3579_v10, %v3583_v11  ;;  %v11331_v21 = vcombine.high %v3580_v13, %v3584_v14 }
 0x3a9   :  { %4397 = vmatprep.subr.bf16.mxu1 %v10143_v22  ;;  %4438 = vmatprep.subr.bf16.mxu0 %v10146_v23  ;;  %v3587_v22 = vld [vmem:[#allocation10 + $0x180] sm:$0xff] }
 0x3aa   :  { %12524 = vst [vmem:[#allocation41_spill] sm:$0xff] %v11329_v19  ;;  %12525 = vst [vmem:[#allocation42_spill] sm:$0xff] %v11331_v21  ;;  %v3591_v23 = vld [vmem:[#allocation10 + $0x1a0] sm:$0xff] }
 0x3ab   :  { %v11347_v48 = vcombine.low %v3587_v22, %v3591_v23 }
 0x3ac   :  { %4398 = vmatpush1.bf16.msra.mxu1 %v10141_v25  ;;  %4439 = vmatpush1.bf16.msra.mxu0 %v10144_v26  ;;  %v3588_v25 = vld [vmem:[#allocation10 + $0x188] sm:$0xff] }
 0x3ad   :  { %4399 = vmatprep.subr.bf16.mxu1 %v10149_v27  ;;  %4440 = vmatprep.subr.bf16.mxu0 %v10152_v28  ;;  %v3592_v26 = vld [vmem:[#allocation10 + $0x1a8] sm:$0xff]  ;;  %v11335_v27 = vcombine.low %v3579_v10, %v3583_v11  ;;  %v11337_v28 = vcombine.low %v3580_v13, %v3584_v14  ;;  %12530 = vst [vmem:[#allocation47_spill] sm:$0xff] %v11347_v48  ;;  %v3557_v10 = vld [vmem:[#allocation10 + $0x90] sm:$0xff]  ;;  %v3558_v13 = vld [vmem:[#allocation10 + $0x98] sm:$0xff] }
 0x3ae   :  { %v11349_v20 = vcombine.low %v3588_v25, %v3592_v26  ;;  %v3561_v11 = vld [vmem:[#allocation10 + $0xb0] sm:$0xff]  ;;  %v3562_v14 = vld [vmem:[#allocation10 + $0xb8] sm:$0xff] }
 0x3af   :  { %12526 = vst [vmem:[#allocation43_spill] sm:$0xff] %v11335_v27  ;;  %12527 = vst [vmem:[#allocation44_spill] sm:$0xff] %v11337_v28  ;;  %v11399_v41 = vcombine.low %v3557_v10, %v3561_v11  ;;  %v11401_v42 = vcombine.low %v3558_v13, %v3562_v14 }
 0x3b0   :  { %4400 = vmatpush1.bf16.msra.mxu1 %v10147_v29  ;;  %4441 = vmatpush1.bf16.msra.mxu0 %v10150_v30  ;;  %v11341_v29 = vcombine.high %v3587_v22, %v3591_v23  ;;  %v11343_v30 = vcombine.high %v3588_v25, %v3592_v26  ;;  %12531 = vst [vmem:[#allocation48_spill] sm:$0xff] %v11349_v20 }
 0x3b1   :  { %4401 = vmatprep.subr.bf16.mxu1 %v10155_v31  ;;  %4442 = vmatprep.subr.bf16.mxu0 %v10158_v34  ;;  %v3595_v31 = vld [vmem:[#allocation10 + $0x1c0] sm:$0xff]  ;;  %v11385_v22 = vcombine.low %v3549_v56, %v3553_v57  ;;  %v11391_v25 = vcombine.high %v3557_v10, %v3561_v11  ;;  %v11393_v26 = vcombine.high %v3558_v13, %v3562_v14  ;;  %v3573_v56 = vld [vmem:[#allocation10 + $0x110] sm:$0xff] }
 0x3b2   :  { %12528 = vst [vmem:[#allocation45_spill] sm:$0xff] %v11341_v29  ;;  %12529 = vst [vmem:[#allocation46_spill] sm:$0xff] %v11343_v30  ;;  %v3599_v34 = vld [vmem:[#allocation10 + $0x1e0] sm:$0xff]  ;;  %v3577_v57 = vld [vmem:[#allocation10 + $0x130] sm:$0xff] }
 0x3b3   :  { %v11359_v49 = vcombine.low %v3595_v31, %v3599_v34  ;;  %12539 = vst [vmem:[#allocation56_spill] sm:$0xff] %v11391_v25  ;;  %12540 = vst [vmem:[#allocation57_spill] sm:$0xff] %v11393_v26  ;;  %v11417_v13 = vcombine.high %v3573_v56, %v3577_v57 }
 0x3b4   :  { %4402 = vmatpush1.bf16.msra.mxu1 %v10153_v37  ;;  %4443 = vmatpush1.bf16.msra.mxu0 %v10156_v32  ;;  %v11353_v37 = vcombine.high %v3595_v31, %v3599_v34  ;;  %v11355_v32 = vcombine.high %v3596_v35, %v3600_v36  ;;  %v3565_v31 = vld [vmem:[#allocation10 + $0xd0] sm:$0xff]  ;;  %v3566_v35 = vld [vmem:[#allocation10 + $0xd8] sm:$0xff]  ;;  %12541 = vst [vmem:[#allocation58_spill] sm:$0xff] %v11399_v41  ;;  %12542 = vst [vmem:[#allocation59_spill] sm:$0xff] %v11401_v42 }
 0x3b5   :  { %4861 = vmatprep.subr.bf16.mxu1 %v11267_v39  ;;  %4902 = vmatprep.subr.bf16.mxu0 %v11269_v40  ;;  %12534 = vst [vmem:[#allocation51_spill] sm:$0xff] %v11359_v49  ;;  %v3569_v34 = vld [vmem:[#allocation10 + $0xf0] sm:$0xff]  ;;  %v3570_v36 = vld [vmem:[#allocation10 + $0xf8] sm:$0xff]  ;;  %12547 = vst [vmem:[#allocation64_spill] sm:$0xff] %v11417_v13 }
 0x3b6   :  { %12532 = vst [vmem:[#allocation49_spill] sm:$0xff] %v11353_v37  ;;  %12533 = vst [vmem:[#allocation50_spill] sm:$0xff] %v11355_v32  ;;  %v11405_v43 = vcombine.high %v3565_v31, %v3569_v34  ;;  %v11407_v6 = vcombine.high %v3566_v35, %v3570_v36  ;;  %v11411_v10 = vcombine.low %v3565_v31, %v3569_v34 }
 0x3b7   :  { %4404 = vmatmul.mubr.bf16.vlgmr.msra.gmra.mrb[16].mxu1 %v11263_v33  ;;  %4445 = vmatmul.mubr.bf16.vlgmr.msra.gmra.mrb[20].mxu0 %v11263_v33  ;;  %v3568_v33 = vld [vmem:[#allocation10 + $0xe8] sm:$0xff]  ;;  %v11413_v11 = vcombine.low %v3566_v35, %v3570_v36  ;;  %v11423_v31 = vcombine.low %v3573_v56, %v3577_v57 }
 0x3b8   :  { %4862 = vmatpush1.bf16.msra.mxu1 %v11271_v44  ;;  %4903 = vmatpush1.bf16.msra.mxu0 %v11273_v45  ;;  %v11307_v61 = vcombine.high %v3564_v58, %v3568_v33  ;;  %v11313_v2 = vcombine.low %v3564_v58, %v3568_v33  ;;  %v3550_v58 = vld [vmem:[#allocation10 + $0x58] sm:$0xff]  ;;  %12543 = vst [vmem:[#allocation60_spill] sm:$0xff] %v11405_v43  ;;  %12544 = vst [vmem:[#allocation61_spill] sm:$0xff] %v11407_v6 }
 0x3b9   :  { %4863 = vmatprep.subr.bf16.mxu1 %v11277_v46  ;;  %4904 = vmatprep.subr.bf16.mxu0 %v11279_v47  ;;  %v3554_v33 = vld [vmem:[#allocation10 + $0x78] sm:$0xff]  ;;  %12545 = vst [vmem:[#allocation62_spill] sm:$0xff] %v11411_v10  ;;  %12546 = vst [vmem:[#allocation63_spill] sm:$0xff] %v11413_v11 }
 0x3ba   :  { %4893 = vmatprep.mubr.bf16.mxu1 %v12344_v24  ;;  %4934 = vmatprep.mubr.bf16.mxu0 %v12344_v24  ;;  %12517 = vst [vmem:[#allocation34_spill] sm:$0xff] %v11307_v61  ;;  %12519 = vst [vmem:[#allocation36_spill] sm:$0xff] %v11313_v2  ;;  %v11379_v1 = vcombine.high %v3550_v58, %v3554_v33  ;;  %v11387_v23 = vcombine.low %v3550_v58, %v3554_v33  ;;  %v3574_v58 = vld [vmem:[#allocation10 + $0x118] sm:$0xff] }
 0x3bb   :  { %v3578_v33 = vld [vmem:[#allocation10 + $0x138] sm:$0xff] }
 0x3bc   :  { %4864 = vmatpush1.bf16.msra.mxu1 %v11285_v52  ;;  %4905 = vmatpush1.bf16.msra.mxu0 %v11287_v53  ;;  %12538 = vst [vmem:[#allocation55_spill] sm:$0xff] %v11387_v23  ;;  %v11419_v14 = vcombine.high %v3574_v58, %v3578_v33  ;;  %v11425_v34 = vcombine.low %v3574_v58, %v3578_v33 }
 0x3bd   :  { %4865 = vmatprep.subr.bf16.mxu1 %v11291_v54  ;;  %4906 = vmatprep.subr.bf16.mxu0 %v11293_v55 }
 0x3be   :  { %12548 = vst [vmem:[#allocation65_spill] sm:$0xff] %v11419_v14 }
 0x3c0   :  { %4866 = vmatpush1.bf16.msra.mxu1 %v11299_v59  ;;  %4907 = vmatpush1.bf16.msra.mxu0 %v11301_v60 }
 0x3c1   :  { %4867 = vmatprep.subr.bf16.mxu1 %v11305_v16  ;;  %4908 = vmatprep.subr.bf16.mxu0 %v11307_v61 }
 0x3c4   :  { %4868 = vmatpush1.bf16.msra.mxu1 %v11311_v5  ;;  %4909 = vmatpush1.bf16.msra.mxu0 %v11313_v2 }
 0x3c5   :  { %4869 = vmatprep.subr.bf16.mxu1 %v11317_v12  ;;  %4910 = vmatprep.subr.bf16.mxu0 %v11319_v18 }
 0x3c8   :  { %4870 = vmatpush1.bf16.msra.mxu1 %v11323_v15  ;;  %4911 = vmatpush1.bf16.msra.mxu0 %v11325_v17 }
 0x3c9   :  { %4871 = vmatprep.subr.bf16.mxu1 %v11329_v19  ;;  %4912 = vmatprep.subr.bf16.mxu0 %v11331_v21 }
 0x3cc   :  { %4872 = vmatpush1.bf16.msra.mxu1 %v11335_v27  ;;  %4913 = vmatpush1.bf16.msra.mxu0 %v11337_v28 }
 0x3cd   :  { %4873 = vmatprep.subr.bf16.mxu1 %v11341_v29  ;;  %4914 = vmatprep.subr.bf16.mxu0 %v11343_v30 }
 0x3d0   :  { %4874 = vmatpush1.bf16.msra.mxu1 %v11347_v48  ;;  %4915 = vmatpush1.bf16.msra.mxu0 %v11349_v20 }
 0x3d1   :  { %4875 = vmatprep.subr.bf16.mxu1 %v11353_v37  ;;  %4916 = vmatprep.subr.bf16.mxu0 %v11355_v32 }
 0x3d4   :  { %4876 = vmatpush1.bf16.msra.mxu1 %v11359_v49  ;;  %4917 = vmatpush1.bf16.msra.mxu0 %v11361_v9 }
 0x3d5   :  { %4943 = vmatprep.subr.bf16.mxu1 %v11365_v50  ;;  %4984 = vmatprep.subr.bf16.mxu0 %v11367_v51 }
 0x3d7   :  { %4894 = vmatmul.mubr.bf16.vlgmr.msra.gmra.mrb[20].mxu1 %v12344_v24  ;;  %4935 = vmatmul.mubr.bf16.vlgmr.msra.gmra.mrb[24].mxu0 %v12344_v24 }
 0x3d8   :  { %4944 = vmatpush1.bf16.msra.mxu1 %v11371_v62  ;;  %4985 = vmatpush1.bf16.msra.mxu0 %v11373_v63 }
 0x3d9   :  { %4945 = vmatprep.subr.bf16.mxu1 %v11377_v0  ;;  %4986 = vmatprep.subr.bf16.mxu0 %v11379_v1 }
 0x3da   :  { %4975 = vmatprep.mubr.bf16.mxu1 %v12344_v24  ;;  %5016 = vmatprep.mubr.bf16.mxu0 %v12344_v24  ;;  %v3581_v24 = vld [vmem:[#allocation10 + $0x150] sm:$0xff] }
 0x3dc   :  { %4946 = vmatpush1.bf16.msra.mxu1 %v11385_v22  ;;  %4987 = vmatpush1.bf16.msra.mxu0 %v11387_v23  ;;  %v3586_v23 = vld [vmem:[#allocation10 + $0x178] sm:$0xff] }
 0x3dd   :  { %4947 = vmatprep.subr.bf16.mxu1 %v11391_v25  ;;  %4988 = vmatprep.subr.bf16.mxu0 %v11393_v26  ;;  %v3585_v26 = vld [vmem:[#allocation10 + $0x170] sm:$0xff]  ;;  %v3582_v25 = vld [vmem:[#allocation10 + $0x158] sm:$0xff] }
 0x3de   :  { %v11429_v35 = vcombine.high %v3581_v24, %v3585_v26  ;;  %v11431_v36 = vcombine.high %v3582_v25, %v3586_v23  ;;  %v11435_v56 = vcombine.low %v3581_v24, %v3585_v26  ;;  %v11437_v57 = vcombine.low %v3582_v25, %v3586_v23 }
 0x3e0   :  { %4948 = vmatpush1.bf16.msra.mxu1 %v11399_v41  ;;  %4989 = vmatpush1.bf16.msra.mxu0 %v11401_v42  ;;  %12549 = vst [vmem:[#allocation66_spill] sm:$0xff] %v11431_v36  ;;  %v3590_v42 = vld [vmem:[#allocation10 + $0x198] sm:$0xff]  ;;  %12550 = vst [vmem:[#allocation67_spill] sm:$0xff] %v11435_v56 }
 0x3e1   :  { %4949 = vmatprep.subr.bf16.mxu1 %v11405_v43  ;;  %4990 = vmatprep.subr.bf16.mxu0 %v11407_v6  ;;  %v3589_v6 = vld [vmem:[#allocation10 + $0x190] sm:$0xff]  ;;  %v3594_v41 = vld [vmem:[#allocation10 + $0x1b8] sm:$0xff] }
 0x3e2   :  { %v3593_v43 = vld [vmem:[#allocation10 + $0x1b0] sm:$0xff]  ;;  %v11443_v33 = vcombine.high %v3590_v42, %v3594_v41  ;;  %v11449_v23 = vcombine.low %v3590_v42, %v3594_v41  ;;  %v12551_v41 = vmov 0  }
 0x3e3   :  { %v11441_v58 = vcombine.high %v3589_v6, %v3593_v43  ;;  %v11447_v24 = vcombine.low %v3589_v6, %v3593_v43  ;;  %v3603_v42 = vld [vmem:[%s12321_s10] sm:$0xf] }
 0x3e4   :  { %4950 = vmatpush1.bf16.msra.mxu1 %v11411_v10  ;;  %4991 = vmatpush1.bf16.msra.mxu0 %v11413_v11  ;;  %v3598_v11 = vld [vmem:[#allocation10 + $0x1d8] sm:$0xff]  ;;  %v3611_v43 = vrot.slane %v3603_v42, %v11013_v4  ;;  %v3619_v6 = vrot.slane %v3603_v42, %v11048_v38 }
 0x3e5   :  { %4951 = vmatprep.subr.bf16.mxu1 %v11417_v13  ;;  %4992 = vmatprep.subr.bf16.mxu0 %v11419_v14  ;;  %v3597_v14 = vld [vmem:[#allocation10 + $0x1d0] sm:$0xff]  ;;  %v3602_v10 = vld [vmem:[#allocation10 + $0x1f8] sm:$0xff] }
 0x3e6   :  { %v3601_v13 = vld [vmem:[#allocation10 + $0x1f0] sm:$0xff]  ;;  %v11455_v26 = vcombine.high %v3598_v11, %v3602_v10 }
 0x3e7   :  { %v11453_v25 = vcombine.high %v3597_v14, %v3601_v13 }
 0x3e8   :  { %4952 = vmatpush1.bf16.msra.mxu1 %v11423_v31  ;;  %4993 = vmatpush1.bf16.msra.mxu0 %v11425_v34 }
 0x3e9   :  { %4953 = vmatprep.subr.bf16.mxu1 %v11429_v35  ;;  %4994 = vmatprep.subr.bf16.mxu0 %v11431_v36  ;;  %v11459_v36 = vcombine.low %v3597_v14, %v3601_v13 }
 0x3ec   :  { %4954 = vmatpush1.bf16.msra.mxu1 %v11435_v56  ;;  %4995 = vmatpush1.bf16.msra.mxu0 %v11437_v57  ;;  %v11461_v56 = vcombine.low %v3598_v11, %v3602_v10  ;;  %v3615_v10 = vrot.slane %v3603_v42, %v11021_v7  ;;  %v3623_v11 = vrot.slane %v3603_v42, %v11024_v8 }
 0x3ed   :  { %4955 = vmatprep.subr.bf16.mxu1 %v11441_v58  ;;  %4996 = vmatprep.subr.bf16.mxu0 %v11443_v33 }
 0x3f0   :  { %4956 = vmatpush1.bf16.msra.mxu1 %v11447_v24  ;;  %4997 = vmatpush1.bf16.msra.mxu0 %v11449_v23 }
 0x3f1   :  { %4957 = vmatprep.subr.bf16.mxu1 %v11453_v25  ;;  %4998 = vmatprep.subr.bf16.mxu0 %v11455_v26 }
 0x3f4   :  { %4958 = vmatpush1.bf16.msra.mxu1 %v11459_v36  ;;  %4999 = vmatpush1.bf16.msra.mxu0 %v11461_v56 }
 0x3f5   :  { %5067 = vmatprep.subr.bf16.mxu1 %v11267_v39  ;;  %5108 = vmatprep.subr.bf16.mxu0 %v11269_v40 }
 0x3f7   :  { %4976 = vmatmul.mubr.bf16.vlgmr.msra.gmra.mrb[24].mxu1 %v12551_v41  ;;  %5017 = vmatmul.mubr.bf16.vlgmr.msra.gmra.mrb[28].mxu0 %v12551_v41 }
 0x3f8   :  { %5068 = vmatpush1.bf16.msra.mxu1 %v11271_v44  ;;  %5109 = vmatpush1.bf16.msra.mxu0 %v11273_v45 }
 0x3f9   :  { %5069 = vmatprep.subr.bf16.mxu1 %v11277_v46  ;;  %5110 = vmatprep.subr.bf16.mxu0 %v11279_v47 }
 0x3fa   :  { %5099 = vmatprep.mubr.bf16.mxu1 %v12551_v41  ;;  %5140 = vmatprep.mubr.bf16.mxu0 %v12551_v41 }
 0x3fc   :  { %5070 = vmatpush1.bf16.msra.mxu1 %v11285_v52  ;;  %5111 = vmatpush1.bf16.msra.mxu0 %v11287_v53 }
 0x3fd   :  { %5071 = vmatprep.subr.bf16.mxu1 %v11291_v54  ;;  %5112 = vmatprep.subr.bf16.mxu0 %v11293_v55 }
 0x400   :  { %5072 = vmatpush1.bf16.msra.mxu1 %v11299_v59  ;;  %5113 = vmatpush1.bf16.msra.mxu0 %v11301_v60 }
 0x401   :  { %5073 = vmatprep.subr.bf16.mxu1 %v11305_v16  ;;  %5114 = vmatprep.subr.bf16.mxu0 %v11307_v61 }
 0x404   :  { %5074 = vmatpush1.bf16.msra.mxu1 %v11311_v5  ;;  %5115 = vmatpush1.bf16.msra.mxu0 %v11313_v2 }
 0x405   :  { %5075 = vmatprep.subr.bf16.mxu1 %v11317_v12  ;;  %5116 = vmatprep.subr.bf16.mxu0 %v11319_v18 }
 0x408   :  { %5076 = vmatpush1.bf16.msra.mxu1 %v11323_v15  ;;  %5117 = vmatpush1.bf16.msra.mxu0 %v11325_v17 }
 0x409   :  { %5077 = vmatprep.subr.bf16.mxu1 %v11329_v19  ;;  %5118 = vmatprep.subr.bf16.mxu0 %v11331_v21 }
 0x40c   :  { %5078 = vmatpush1.bf16.msra.mxu1 %v11335_v27  ;;  %5119 = vmatpush1.bf16.msra.mxu0 %v11337_v28 }
 0x40d   :  { %5079 = vmatprep.subr.bf16.mxu1 %v11341_v29  ;;  %5120 = vmatprep.subr.bf16.mxu0 %v11343_v30 }
 0x410   :  { %5080 = vmatpush1.bf16.msra.mxu1 %v11347_v48  ;;  %5121 = vmatpush1.bf16.msra.mxu0 %v11349_v20 }
 0x411   :  { %5081 = vmatprep.subr.bf16.mxu1 %v11353_v37  ;;  %5122 = vmatprep.subr.bf16.mxu0 %v11355_v32 }
 0x414   :  { %5082 = vmatpush1.bf16.msra.mxu1 %v11359_v49  ;;  %5123 = vmatpush1.bf16.msra.mxu0 %v11361_v9 }
 0x415   :  { %5149 = vmatprep.subr.bf16.mxu1 %v11365_v50  ;;  %5190 = vmatprep.subr.bf16.mxu0 %v11367_v51 }
 0x44a   :  { %v3982_v13 = vpop.f32.mrb[12].mxu1  ;;  %v4023_v14 = vpop.f32.mrb[16].mxu0 }
 0x44b   :  { %v3983_v49 = vadd.f32 %v3982_v13, %v3611_v43  ;;  %v4024_v9 = vadd.f32 %v4023_v14, %v3619_v6  ;;  %v3984_v32 = vpop.f32.mrb[13].mxu1  ;;  %v4025_v50 = vpop.f32.mrb[17].mxu0 }
 0x44c   :  { %v3985_v37 = vadd.f32 %v3984_v32, %v3615_v10  ;;  %v4026_v51 = vadd.f32 %v4025_v50, %v3623_v11  ;;  %v3986_v20 = vpop.f32.mrb[14].mxu1  ;;  %v4027_v48 = vpop.f32.mrb[18].mxu0 }
 0x44d   :  { %4453 = vst [vmem:[#allocation3] sm:$0x3] %v3983_v49  ;;  %v4477_v30 = vrot.slane %v3983_v49, 6  ;;  %v4501_v29 = vrot.slane %v3983_v49, 4  ;;  %v4517_v28 = vrot.slane %v3983_v49, 2  ;;  %v4479_v27 = vrot.slane %v4024_v9, 6 }
 0x44e   :  { %4455 = vst [vmem:[#allocation3 + $0x10] sm:$0x3] %v4024_v9  ;;  %v3987_v21 = vpop.f32.mrb[15].mxu1  ;;  %v4028_v19 = vpop.f32.mrb[19].mxu0  ;;  %v4503_v17 = vrot.slane %v4024_v9, 4  ;;  %v4519_v42 = vrot.slane %v4024_v9, 2 }
 0x44f   :  { %4454 = vst [vmem:[#allocation3 + $0x8] sm:$0x3] %v3985_v37  ;;  %v4478_v15 = vrot.slane %v3985_v37, 6  ;;  %v4502_v43 = vrot.slane %v3985_v37, 4  ;;  %4456 = vst [vmem:[#allocation3 + $0x18] sm:$0x3] %v4026_v51 }
 0x450   :  { %4485 = vst [vmem:[#allocation3] sm:$0x30] %v4477_v30  ;;  %4509 = vst [vmem:[#allocation3 + $0x20] sm:$0x3] %v4501_v29  ;;  %v4518_v20 = vrot.slane %v3985_v37, 2  ;;  %v4480_v48 = vrot.slane %v4026_v51, 6 }
 0x451   :  { %4525 = vst [vmem:[#allocation3 + $0x20] sm:$0x30] %v4517_v28  ;;  %4487 = vst [vmem:[#allocation3 + $0x10] sm:$0x30] %v4479_v27  ;;  %v4504_v32 = vrot.slane %v4026_v51, 4  ;;  %v4520_v50 = vrot.slane %v4026_v51, 2 }
 0x452   :  { %4511 = vst [vmem:[#allocation3 + $0x30] sm:$0x3] %v4503_v17  ;;  %4527 = vst [vmem:[#allocation3 + $0x30] sm:$0x30] %v4519_v42  ;;  %v3604_v19 = vld [vmem:[%s12322_s11] sm:$0xf] }
 0x453   :  { %4486 = vst [vmem:[#allocation3 + $0x8] sm:$0x30] %v4478_v15  ;;  %4510 = vst [vmem:[#allocation3 + $0x28] sm:$0x3] %v4502_v43  ;;  %v4034_v21 = vrot.slane %v3604_v19, %v11013_v4  ;;  %v4042_v27 = vrot.slane %v3604_v19, %v11048_v38  ;;  %v4038_v28 = vrot.slane %v3604_v19, %v11021_v7  ;;  %v12575_v7 = vld [vmem:[#allocation49_spill] sm:$0xff]  ;;  %v12576_v38 = vld [vmem:[#allocation50_spill] sm:$0xff] }
 0x454   :  { %4526 = vst [vmem:[#allocation3 + $0x28] sm:$0x30] %v4518_v20  ;;  %4488 = vst [vmem:[#allocation3 + $0x18] sm:$0x30] %v4480_v48  ;;  %v4046_v29 = vrot.slane %v3604_v19, %v11024_v8  ;;  %v12577_v4 = vld [vmem:[#allocation51_spill] sm:$0xff] }
 0x455   :  { %4512 = vst [vmem:[#allocation3 + $0x38] sm:$0x3] %v4504_v32  ;;  %4528 = vst [vmem:[#allocation3 + $0x38] sm:$0x30] %v4520_v50 }
 0x48a   :  { %v4405_v17 = vpop.f32.mrb[16].mxu1  ;;  %v4446_v30 = vpop.f32.mrb[20].mxu0 }
 0x48b   :  { %v4406_v15 = vadd.f32 %v4405_v17, %v4034_v21  ;;  %v4447_v37 = vadd.f32 %v4446_v30, %v4042_v27  ;;  %v4407_v49 = vpop.f32.mrb[17].mxu1  ;;  %v4448_v9 = vpop.f32.mrb[21].mxu0 }
 0x48c   :  { %v4408_v51 = vadd.f32 %v4407_v49, %v4038_v28  ;;  %v4449_v6 = vadd.f32 %v4448_v9, %v4046_v29  ;;  %v4409_v10 = vpop.f32.mrb[18].mxu1  ;;  %v4450_v11 = vpop.f32.mrb[22].mxu0 }
 0x48d   :  { %v4461_v13 = vrot.slane %v4406_v15, 4  ;;  %v4489_v14 = vrot.slane %v4406_v15, 6  ;;  %4513 = vst [vmem:[#allocation3 + $0x20] sm:$0xc] %v4406_v15  ;;  %v4529_v42 = vrot.slane %v4406_v15, 2  ;;  %v4463_v43 = vrot.slane %v4447_v37, 4 }
 0x48e   :  { %4515 = vst [vmem:[#allocation3 + $0x30] sm:$0xc] %v4447_v37  ;;  %v4410_v20 = vpop.f32.mrb[19].mxu1  ;;  %v4451_v48 = vpop.f32.mrb[23].mxu0  ;;  %v4491_v32 = vrot.slane %v4447_v37, 6  ;;  %v4531_v50 = vrot.slane %v4447_v37, 2 }
 0x48f   :  { %v4462_v19 = vrot.slane %v4408_v51, 4  ;;  %v4490_v8 = vrot.slane %v4408_v51, 6  ;;  %4514 = vst [vmem:[#allocation3 + $0x28] sm:$0xc] %v4408_v51  ;;  %4516 = vst [vmem:[#allocation3 + $0x38] sm:$0xc] %v4449_v6 }
 0x490   :  { %4469 = vst [vmem:[#allocation3] sm:$0xc] %v4461_v13  ;;  %4497 = vst [vmem:[#allocation3] sm:$0xc0] %v4489_v14  ;;  %v4530_v21 = vrot.slane %v4408_v51, 2  ;;  %v4464_v27 = vrot.slane %v4449_v6, 4 }
 0x491   :  { %4537 = vst [vmem:[#allocation3 + $0x20] sm:$0xc0] %v4529_v42  ;;  %4471 = vst [vmem:[#allocation3 + $0x10] sm:$0xc] %v4463_v43  ;;  %v4492_v28 = vrot.slane %v4449_v6, 6  ;;  %v4532_v29 = vrot.slane %v4449_v6, 2 }
 0x492   :  { %4499 = vst [vmem:[#allocation3 + $0x10] sm:$0xc0] %v4491_v32  ;;  %4539 = vst [vmem:[#allocation3 + $0x30] sm:$0xc0] %v4531_v50 }
 0x493   :  { %4470 = vst [vmem:[#allocation3 + $0x8] sm:$0xc] %v4462_v19  ;;  %4498 = vst [vmem:[#allocation3 + $0x8] sm:$0xc0] %v4490_v8 }
 0x494   :  { %4538 = vst [vmem:[#allocation3 + $0x28] sm:$0xc0] %v4530_v21  ;;  %4472 = vst [vmem:[#allocation3 + $0x18] sm:$0xc] %v4464_v27 }
 0x495   :  { %4500 = vst [vmem:[#allocation3 + $0x18] sm:$0xc0] %v4492_v28  ;;  %4540 = vst [vmem:[#allocation3 + $0x38] sm:$0xc0] %v4532_v29 }
 0x497   :  { %v5029_v8 = vld [vmem:[#allocation3] sm:$0xf] }
 0x49a   :  { %v5030_v32 = vld [vmem:[#allocation3 + $0x8] sm:$0xf] }
 0x4aa   :  { %v4895_v17 = vpop.f32.mrb[20].mxu1  ;;  %v4936_v30 = vpop.f32.mrb[24].mxu0 }
 0x4ab   :  { %v4897_v15 = vpop.f32.mrb[21].mxu1  ;;  %v4938_v37 = vpop.f32.mrb[25].mxu0 }
 0x4ac   :  { %v4899_v49 = vpop.f32.mrb[22].mxu1  ;;  %v4940_v9 = vpop.f32.mrb[26].mxu0 }
 0x4ad   :  { %v4900_v10 = vpop.f32.mrb[23].mxu1  ;;  %v4941_v11 = vpop.f32.mrb[27].mxu0 }
 0x4ae   :  { %v5031_v10 = vld [vmem:[#allocation3 + $0x10] sm:$0xf] }
 0x4ca   :  { %v4977_v51 = vpop.f32.mrb[24].mxu1  ;;  %v5018_v6 = vpop.f32.mrb[28].mxu0 }
 0x4cb   :  { %v5025_v13 = vsel %vm170_vm7, %v4895_v17, %v4977_v51  ;;  %v5027_v14 = vsel %vm170_vm7, %v4936_v30, %v5018_v6  ;;  %v4979_v42 = vpop.f32.mrb[25].mxu1  ;;  %v5020_v43 = vpop.f32.mrb[29].mxu0  ;;  %v5032_v30 = vld [vmem:[#allocation3 + $0x18] sm:$0xf] }
 0x4cc   :  { %v5033_v20 = vadd.f32 %v5029_v8, %v5025_v13  ;;  %v5026_v48 = vsel %vm170_vm7, %v4897_v15, %v4979_v42  ;;  %v5028_v50 = vsel %vm170_vm7, %v4938_v37, %v5020_v43  ;;  %v4981_v19 = vpop.f32.mrb[26].mxu1  ;;  %v5022_v21 = vpop.f32.mrb[30].mxu0  ;;  %v5035_v51 = vadd.f32 %v5031_v10, %v5027_v14  ;;  %v12556_v10 = vld [vmem:[#allocation59_spill] sm:$0xff] }
 0x4cd   :  { %v5034_v27 = vadd.f32 %v5030_v32, %v5026_v48  ;;  %v4982_v28 = vpop.f32.mrb[27].mxu1  ;;  %v5023_v29 = vpop.f32.mrb[31].mxu0  ;;  %v5036_v9 = vadd.f32 %v5032_v30, %v5028_v50  ;;  %v12554_v30 = vld [vmem:[#allocation57_spill] sm:$0xff] }
 0x4ce   :  { %v8982_v17 = vmul.f32 -1.442695, %v5033_v20 }
 0x4cf   :  { %v8983_v49 = vmul.f32 -1.442695, %v5034_v27  ;;  %v8984_v11 = vmul.f32 -1.442695, %v5036_v9  ;;  %v12555_v9 = vld [vmem:[#allocation58_spill] sm:$0xff] }
 0x4d0   :  { %10375 = vpow2.f32 %v8982_v17  ;;  %v12552_v17 = vld [vmem:[#allocation55_spill] sm:$0xff] }
 0x4d1   :  { %10377 = vpow2.f32 %v8983_v49  ;;  %v12553_v49 = vld [vmem:[#allocation56_spill] sm:$0xff] }
 0x4d2   :  { %10379 = vpow2.f32 %v8984_v11  ;;  %v12557_v11 = vld [vmem:[#allocation60_spill] sm:$0xff] }
 0x4d3   :  { %10381 = vtanh.f32 %v5035_v51  ;;  %v12558_v51 = vld [vmem:[#allocation61_spill] sm:$0xff] }
 0x4da   :  { %v10376_v6 = vpop.eup %10375 }
 0x4db   :  { %v10378_v15 = vpop.eup %10377  ;;  %v5040_v13 = vadd.f32 1.0, %v10376_v6  ;;  %v12559_v6 = vld [vmem:[#allocation62_spill] sm:$0xff] }
 0x4dc   :  { %v5046_v37 = vadd.f32 1.0, %v10378_v15  ;;  %v10380_v8 = vpop.eup %10379  ;;  %v12560_v15 = vld [vmem:[#allocation63_spill] sm:$0xff] }
 0x4dd   :  { %10383 = vrcp.f32 %v5040_v13  ;;  %v10382_v42 = vpop.eup %10381  ;;  %v5053_v32 = vadd.f32 1.0, %v10380_v8  ;;  %v12561_v13 = vld [vmem:[#allocation64_spill] sm:$0xff]  ;;  %v12563_v8 = vld [vmem:[#allocation66_spill] sm:$0xff] }
 0x4de   :  { %10385 = vrcp.f32 %v5046_v37  ;;  %v12562_v37 = vld [vmem:[#allocation65_spill] sm:$0xff] }
 0x4df   :  { %10387 = vrcp.f32 %v5053_v32  ;;  %v12568_v32 = vld [vmem:[#allocation42_spill] sm:$0xff] }
 0x4e7   :  { %v10384_v43 = vpop.eup %10383 }
 0x4e8   :  { %v10386_v20 = vpop.eup %10385  ;;  %v5057_v48 = vmul.f32 %v10384_v43, %v10382_v42  ;;  %v12564_v42 = vld [vmem:[#allocation67_spill] sm:$0xff] }
 0x4e9   :  { %v5056_v19 = vmul.f32 0.0, %v10386_v20  ;;  %v10388_v14 = vpop.eup %10387  ;;  %v12565_v43 = vld [vmem:[#allocation39_spill] sm:$0xff]  ;;  %v12566_v20 = vld [vmem:[#allocation40_spill] sm:$0xff] }
 0x4eb   :  { %v11528_v21 = vadd.f32 %v5057_v48, %v5056_v19  ;;  %v12567_v48 = vld [vmem:[#allocation41_spill] sm:$0xff]  ;;  %v12569_v19 = vld [vmem:[#allocation43_spill] sm:$0xff] }
 0x4ed   :  { %10389 = vtanh.f32 %v11528_v21 }
 0x4f7   :  { %v10390_v50 = vpop.eup %10389 }
 0x4f8   :  { %v5060_v27 = vmul.f32 %v10390_v50, %v10388_v14  ;;  %v12570_v14 = vld [vmem:[#allocation44_spill] sm:$0xff]  ;;  %v12571_v50 = vld [vmem:[#allocation45_spill] sm:$0xff] }
 0x4fa   :  { %5061 = vst [vmem:[#allocation2] sm:$0x3] %v5060_v27  ;;  %v5063_v28 = vrot.slane %v5060_v27, 4  ;;  %v5066_v29 = vpack.c.bf16 %v5060_v27, %v5060_v27  ;;  %v12572_v27 = vld [vmem:[#allocation46_spill] sm:$0xff] }
 0x4fc   :  { %5065 = vst [vmem:[#allocation2 + $0x8] sm:$0xc0] %v5063_v28  ;;  %5100 = vmatmul.mubr.bf16.vlgmr.msra.gmra.mrb[28].mxu1 %v5066_v29  ;;  %5141 = vmatmul.mubr.bf16.vlgmr.msra.gmra.mrb[32].mxu0 %v5066_v29  ;;  %v12573_v28 = vld [vmem:[#allocation47_spill] sm:$0xff] }
 0x4fd   :  { %5150 = vmatpush1.bf16.msra.mxu1 %v11371_v62  ;;  %5191 = vmatpush1.bf16.msra.mxu0 %v11373_v63 }
 0x4fe   :  { %5151 = vmatprep.subr.bf16.mxu1 %v11377_v0  ;;  %5192 = vmatprep.subr.bf16.mxu0 %v11379_v1 }
 0x4ff   :  { %5181 = vmatprep.mubr.bf16.mxu1 %v12551_v41  ;;  %5222 = vmatprep.mubr.bf16.mxu0 %v12551_v41 }
 0x501   :  { %5152 = vmatpush1.bf16.msra.mxu1 %v11385_v22  ;;  %5193 = vmatpush1.bf16.msra.mxu0 %v12552_v17 }
 0x502   :  { %5153 = vmatprep.subr.bf16.mxu1 %v12553_v49  ;;  %5194 = vmatprep.subr.bf16.mxu0 %v12554_v30 }
 0x505   :  { %5154 = vmatpush1.bf16.msra.mxu1 %v12555_v9  ;;  %5195 = vmatpush1.bf16.msra.mxu0 %v12556_v10 }
 0x506   :  { %5155 = vmatprep.subr.bf16.mxu1 %v12557_v11  ;;  %5196 = vmatprep.subr.bf16.mxu0 %v12558_v51 }
 0x509   :  { %5156 = vmatpush1.bf16.msra.mxu1 %v12559_v6  ;;  %5197 = vmatpush1.bf16.msra.mxu0 %v12560_v15 }
 0x50a   :  { %5157 = vmatprep.subr.bf16.mxu1 %v12561_v13  ;;  %5198 = vmatprep.subr.bf16.mxu0 %v12562_v37 }
 0x50d   :  { %5158 = vmatpush1.bf16.msra.mxu1 %v11423_v31  ;;  %5199 = vmatpush1.bf16.msra.mxu0 %v11425_v34 }
 0x50e   :  { %5159 = vmatprep.subr.bf16.mxu1 %v11429_v35  ;;  %5200 = vmatprep.subr.bf16.mxu0 %v12563_v8 }
 0x511   :  { %5160 = vmatpush1.bf16.msra.mxu1 %v12564_v42  ;;  %5201 = vmatpush1.bf16.msra.mxu0 %v11437_v57 }
 0x512   :  { %5161 = vmatprep.subr.bf16.mxu1 %v11441_v58  ;;  %5202 = vmatprep.subr.bf16.mxu0 %v11443_v33 }
 0x515   :  { %5162 = vmatpush1.bf16.msra.mxu1 %v11447_v24  ;;  %5203 = vmatpush1.bf16.msra.mxu0 %v11449_v23 }
 0x516   :  { %5163 = vmatprep.subr.bf16.mxu1 %v11453_v25  ;;  %5204 = vmatprep.subr.bf16.mxu0 %v11455_v26 }
 0x519   :  { %5164 = vmatpush1.bf16.msra.mxu1 %v11459_v36  ;;  %5205 = vmatpush1.bf16.msra.mxu0 %v11461_v56 }
 0x51a   :  { %5291 = vmatprep.subr.bf16.mxu1 %v11267_v39  ;;  %5332 = vmatprep.subr.bf16.mxu0 %v11269_v40 }
 0x51c   :  { %5182 = vmatmul.mubr.bf16.vlgmr.msra.gmra.mrb[32].mxu1 %v5066_v29  ;;  %5223 = vmatmul.mubr.bf16.vlgmr.msra.gmra.mrb[36].mxu0 %v5066_v29  ;;  %v12574_v29 = vld [vmem:[#allocation48_spill] sm:$0xff] }
 0x51d   :  { %5292 = vmatpush1.bf16.msra.mxu1 %v11271_v44  ;;  %5333 = vmatpush1.bf16.msra.mxu0 %v11273_v45 }
 0x51e   :  { %5293 = vmatprep.subr.bf16.mxu1 %v11277_v46  ;;  %5334 = vmatprep.subr.bf16.mxu0 %v11279_v47 }
 0x51f   :  { %5323 = vmatprep.mubr.bf16.mxu1 %v12551_v41  ;;  %5364 = vmatprep.mubr.bf16.mxu0 %v12551_v41 }
 0x521   :  { %5294 = vmatpush1.bf16.msra.mxu1 %v11285_v52  ;;  %5335 = vmatpush1.bf16.msra.mxu0 %v11287_v53 }
 0x522   :  { %5295 = vmatprep.subr.bf16.mxu1 %v11291_v54  ;;  %5336 = vmatprep.subr.bf16.mxu0 %v11293_v55 }
 0x525   :  { %5296 = vmatpush1.bf16.msra.mxu1 %v11299_v59  ;;  %5337 = vmatpush1.bf16.msra.mxu0 %v11301_v60 }
 0x526   :  { %5297 = vmatprep.subr.bf16.mxu1 %v11305_v16  ;;  %5338 = vmatprep.subr.bf16.mxu0 %v11307_v61 }
 0x529   :  { %5298 = vmatpush1.bf16.msra.mxu1 %v11311_v5  ;;  %5339 = vmatpush1.bf16.msra.mxu0 %v11313_v2 }
 0x52a   :  { %5299 = vmatprep.subr.bf16.mxu1 %v11317_v12  ;;  %5340 = vmatprep.subr.bf16.mxu0 %v11319_v18 }
 0x52d   :  { %5300 = vmatpush1.bf16.msra.mxu1 %v12565_v43  ;;  %5341 = vmatpush1.bf16.msra.mxu0 %v12566_v20 }
 0x52e   :  { %5301 = vmatprep.subr.bf16.mxu1 %v12567_v48  ;;  %5342 = vmatprep.subr.bf16.mxu0 %v12568_v32  ;;  %v12578_v48 = vld [vmem:[#allocation52_spill] sm:$0xff]  ;;  %v12579_v32 = vld [vmem:[#allocation53_spill] sm:$0xff] }
 0x531   :  { %5302 = vmatpush1.bf16.msra.mxu1 %v12569_v19  ;;  %5343 = vmatpush1.bf16.msra.mxu0 %v12570_v14  ;;  %v12580_v19 = vld [vmem:[#allocation54_spill] sm:$0xff] }
 0x532   :  { %5303 = vmatprep.subr.bf16.mxu1 %v12571_v50  ;;  %5344 = vmatprep.subr.bf16.mxu0 %v12572_v27 }
 0x535   :  { %5304 = vmatpush1.bf16.msra.mxu1 %v12573_v28  ;;  %5345 = vmatpush1.bf16.msra.mxu0 %v12574_v29 }
 0x536   :  { %5305 = vmatprep.subr.bf16.mxu1 %v12575_v7  ;;  %5346 = vmatprep.subr.bf16.mxu0 %v12576_v38 }
 0x539   :  { %5306 = vmatpush1.bf16.msra.mxu1 %v12577_v4  ;;  %5347 = vmatpush1.bf16.msra.mxu0 %v12578_v48 }
 0x53a   :  { %5373 = vmatprep.subr.bf16.mxu1 %v12579_v32  ;;  %5414 = vmatprep.subr.bf16.mxu0 %v12580_v19 }
 0x5cf   :  { %v5101_v14 = vpop.f32.mrb[28].mxu1  ;;  %v5142_v50 = vpop.f32.mrb[32].mxu0 }
 0x5d0   :  { %v5103_v20 = vpop.f32.mrb[29].mxu1  ;;  %v5144_v27 = vpop.f32.mrb[33].mxu0 }
 0x5d1   :  { %v5105_v43 = vpop.f32.mrb[30].mxu1  ;;  %v5146_v28 = vpop.f32.mrb[34].mxu0 }
 0x5d2   :  { %v5106_v18 = vpop.f32.mrb[31].mxu1  ;;  %v5147_v29 = vpop.f32.mrb[35].mxu0 }
 0x5d3   :  { %v5235_v29 = vld [vmem:[#allocation3] sm:$0xf0] }
 0x5ef   :  { %v5183_v12 = vpop.f32.mrb[32].mxu1  ;;  %v5224_v7 = vpop.f32.mrb[36].mxu0 }
 0x5f0   :  { %v5231_v38 = vsel %vm170_vm7, %v5101_v14, %v5183_v12  ;;  %v5233_v48 = vsel %vm170_vm7, %v5142_v50, %v5224_v7  ;;  %v5185_v4 = vpop.f32.mrb[33].mxu1  ;;  %v5226_v32 = vpop.f32.mrb[37].mxu0  ;;  %v5236_v12 = vld [vmem:[#allocation3 + $0x8] sm:$0xf0] }
 0x5f1   :  { %v5243_v2 = vrot.slane %v5231_v38, 4  ;;  %v5232_v19 = vsel %vm170_vm7, %v5103_v20, %v5185_v4  ;;  %v5234_v43 = vsel %vm170_vm7, %v5144_v27, %v5226_v32  ;;  %v5187_v28 = vpop.f32.mrb[34].mxu1  ;;  %v5228_v18 = vpop.f32.mrb[38].mxu0  ;;  %v5238_v38 = vld [vmem:[#allocation3 + $0x18] sm:$0xf0]  ;;  %v5245_v4 = vrot.slane %v5233_v48, 4 }
 0x5f2   :  { %v5244_v5 = vrot.slane %v5232_v19, 4  ;;  %v5188_v61 = vpop.f32.mrb[35].mxu1  ;;  %v5229_v16 = vpop.f32.mrb[39].mxu0  ;;  %v5246_v50 = vrot.slane %v5234_v43, 4  ;;  %v5237_v20 = vld [vmem:[#allocation3 + $0x10] sm:$0xf0] }
 0x5f3   :  { %v5251_v60 = vadd.f32 %v5243_v2, %v5235_v29  ;;  %v5253_v32 = vadd.f32 %v5245_v4, %v5237_v20  ;;  %v12592_v4 = vld [vmem:[#allocation41_spill] sm:$0xff]  ;;  %v12593_v20 = vld [vmem:[#allocation42_spill] sm:$0xff] }
 0x5f4   :  { %v5252_v14 = vadd.f32 %v5244_v5, %v5236_v12  ;;  %v5254_v55 = vadd.f32 %v5246_v50, %v5238_v38  ;;  %v12588_v38 = vld [vmem:[#allocation37_spill] sm:$0xff] }
 0x5f5   :  { %v8985_v59 = vmul.f32 -1.442695, %v5251_v60 }
 0x5f6   :  { %v8986_v7 = vmul.f32 -1.442695, %v5252_v14  ;;  %v8987_v3 = vmul.f32 -1.442695, %v5254_v55 }
 0x5f7   :  { %10391 = vpow2.f32 %v8985_v59  ;;  %v5275_v59 = vrot.slane %v11528_v21, 4  ;;  %v12587_v21 = vld [vmem:[#allocation36_spill] sm:$0xff] }
 0x5f8   :  { %10393 = vpow2.f32 %v8986_v7 }
 0x5f9   :  { %10395 = vpow2.f32 %v8987_v3 }
 0x5fa   :  { %10397 = vtanh.f32 %v5253_v32  ;;  %v12594_v32 = vld [vmem:[#allocation43_spill] sm:$0xff] }
 0x601   :  { %v10392_v27 = vpop.eup %10391 }
 0x602   :  { %v10394_v28 = vpop.eup %10393  ;;  %v5258_v18 = vadd.f32 1.0, %v10392_v27  ;;  %v12595_v27 = vld [vmem:[#allocation44_spill] sm:$0xff] }
 0x603   :  { %v5264_v16 = vadd.f32 1.0, %v10394_v28  ;;  %v10396_v61 = vpop.eup %10395  ;;  %v12596_v28 = vld [vmem:[#allocation45_spill] sm:$0xff] }
 0x604   :  { %10399 = vrcp.f32 %v5258_v18  ;;  %v10398_v60 = vpop.eup %10397  ;;  %v5271_v43 = vadd.f32 1.0, %v10396_v61  ;;  %v12597_v18 = vld [vmem:[#allocation46_spill] sm:$0xff]  ;;  %v12599_v61 = vld [vmem:[#allocation48_spill] sm:$0xff] }
 0x605   :  { %10401 = vrcp.f32 %v5264_v16  ;;  %v12598_v16 = vld [vmem:[#allocation47_spill] sm:$0xff] }
 0x606   :  { %10403 = vrcp.f32 %v5271_v43  ;;  %v12605_v43 = vld [vmem:[#allocation54_spill] sm:$0xff] }
 0x60e   :  { %v10400_v5 = vpop.eup %10399 }
 0x60f   :  { %v10402_v2 = vpop.eup %10401  ;;  %v5278_v19 = vmul.f32 %v10400_v5, %v10398_v60  ;;  %v12600_v60 = vld [vmem:[#allocation49_spill] sm:$0xff]  ;;  %v12601_v5 = vld [vmem:[#allocation50_spill] sm:$0xff] }
 0x610   :  { %v5277_v48 = vmul.f32 %v10402_v2, %v5275_v59  ;;  %v10404_v55 = vpop.eup %10403  ;;  %v12602_v59 = vld [vmem:[#allocation51_spill] sm:$0xff]  ;;  %v12603_v2 = vld [vmem:[#allocation52_spill] sm:$0xff] }
 0x612   :  { %v11608_v29 = vadd.f32 %v5278_v19, %v5277_v48  ;;  %v12604_v19 = vld [vmem:[#allocation53_spill] sm:$0xff] }
 0x614   :  { %10405 = vtanh.f32 %v11608_v29 }
 0x61e   :  { %v10406_v3 = vpop.eup %10405 }
 0x61f   :  { %v5281_v12 = vmul.f32 %v10406_v3, %v10404_v55 }
 0x621   :  { %v5283_v14 = vrot.slane %v5281_v12, 2  ;;  %v5287_v7 = vpack.c.bf16 %v5281_v12, %v5281_v12 }
 0x623   :  { %5285 = vst [vmem:[#allocation2] ss:$12 sps:$4 sm:$0x3c] %v5283_v14   ;;  %v5289_v50 = vrot.slane %v5287_v7, 2 }
 0x625   :  { %5324 = vmatmul.mubr.bf16.vlgmr.msra.gmra.mrb[36].mxu1 %v5289_v50  ;;  %5365 = vmatmul.mubr.bf16.vlgmr.msra.gmra.mrb[40].mxu0 %v5289_v50 }
 0x626   :  { %5374 = vmatpush1.bf16.msra.mxu1 %v11371_v62  ;;  %5415 = vmatpush1.bf16.msra.mxu0 %v11373_v63 }
 0x627   :  { %5375 = vmatprep.subr.bf16.mxu1 %v11377_v0  ;;  %5416 = vmatprep.subr.bf16.mxu0 %v11379_v1 }
 0x628   :  { %5405 = vmatprep.mubr.bf16.mxu1 %v12551_v41  ;;  %5446 = vmatprep.mubr.bf16.mxu0 %v12551_v41 }
 0x62a   :  { %5376 = vmatpush1.bf16.msra.mxu1 %v11385_v22  ;;  %5417 = vmatpush1.bf16.msra.mxu0 %v12552_v17 }
 0x62b   :  { %5377 = vmatprep.subr.bf16.mxu1 %v12553_v49  ;;  %5418 = vmatprep.subr.bf16.mxu0 %v12554_v30 }
 0x62e   :  { %5378 = vmatpush1.bf16.msra.mxu1 %v12555_v9  ;;  %5419 = vmatpush1.bf16.msra.mxu0 %v12556_v10 }
 0x62f   :  { %5379 = vmatprep.subr.bf16.mxu1 %v12557_v11  ;;  %5420 = vmatprep.subr.bf16.mxu0 %v12558_v51 }
 0x632   :  { %5380 = vmatpush1.bf16.msra.mxu1 %v12559_v6  ;;  %5421 = vmatpush1.bf16.msra.mxu0 %v12560_v15 }
 0x633   :  { %5381 = vmatprep.subr.bf16.mxu1 %v12561_v13  ;;  %5422 = vmatprep.subr.bf16.mxu0 %v12562_v37 }
 0x636   :  { %5382 = vmatpush1.bf16.msra.mxu1 %v11423_v31  ;;  %5423 = vmatpush1.bf16.msra.mxu0 %v11425_v34 }
 0x637   :  { %5383 = vmatprep.subr.bf16.mxu1 %v11429_v35  ;;  %5424 = vmatprep.subr.bf16.mxu0 %v12563_v8 }
 0x63a   :  { %5384 = vmatpush1.bf16.msra.mxu1 %v12564_v42  ;;  %5425 = vmatpush1.bf16.msra.mxu0 %v11437_v57 }
 0x63b   :  { %5385 = vmatprep.subr.bf16.mxu1 %v11441_v58  ;;  %5426 = vmatprep.subr.bf16.mxu0 %v11443_v33 }
 0x63e   :  { %5386 = vmatpush1.bf16.msra.mxu1 %v11447_v24  ;;  %5427 = vmatpush1.bf16.msra.mxu0 %v11449_v23 }
 0x63f   :  { %5387 = vmatprep.subr.bf16.mxu1 %v11453_v25  ;;  %5428 = vmatprep.subr.bf16.mxu0 %v11455_v26 }
 0x642   :  { %5388 = vmatpush1.bf16.msra.mxu1 %v11459_v36  ;;  %5429 = vmatpush1.bf16.msra.mxu0 %v11461_v56 }
 0x643   :  { %5500 = vmatprep.subr.bf16.mxu1 %v11267_v39  ;;  %5541 = vmatprep.subr.bf16.mxu0 %v11269_v40  ;;  %v12581_v39 = vld [vmem:[#allocation30_spill] sm:$0xff]  ;;  %v12582_v40 = vld [vmem:[#allocation31_spill] sm:$0xff] }
 0x645   :  { %5406 = vmatmul.mubr.bf16.vlgmr.msra.gmra.mrb[40].mxu1 %v5289_v50  ;;  %5447 = vmatmul.mubr.bf16.vlgmr.msra.gmra.mrb[44].mxu0 %v5289_v50 }
 0x646   :  { %5501 = vmatpush1.bf16.msra.mxu1 %v11271_v44  ;;  %5542 = vmatpush1.bf16.msra.mxu0 %v11273_v45  ;;  %v12583_v44 = vld [vmem:[#allocation32_spill] sm:$0xff]  ;;  %v12584_v45 = vld [vmem:[#allocation33_spill] sm:$0xff] }
 0x647   :  { %5502 = vmatprep.subr.bf16.mxu1 %v11277_v46  ;;  %5543 = vmatprep.subr.bf16.mxu0 %v11279_v47  ;;  %v12585_v46 = vld [vmem:[#allocation34_spill] sm:$0xff]  ;;  %v12586_v47 = vld [vmem:[#allocation35_spill] sm:$0xff] }
 0x648   :  { %5532 = vmatprep.mubr.bf16.mxu1 %v12551_v41  ;;  %5573 = vmatprep.mubr.bf16.mxu0 %v12551_v41 }
 0x64a   :  { %5503 = vmatpush1.bf16.msra.mxu1 %v11285_v52  ;;  %5544 = vmatpush1.bf16.msra.mxu0 %v11287_v53  ;;  %v12589_v52 = vld [vmem:[#allocation38_spill] sm:$0xff]  ;;  %v12590_v53 = vld [vmem:[#allocation39_spill] sm:$0xff] }
 0x64b   :  { %5504 = vmatprep.subr.bf16.mxu1 %v11291_v54  ;;  %5545 = vmatprep.subr.bf16.mxu0 %v12581_v39  ;;  %v12591_v54 = vld [vmem:[#allocation40_spill] sm:$0xff] }
 0x64e   :  { %5505 = vmatpush1.bf16.msra.mxu1 %v12582_v40  ;;  %5546 = vmatpush1.bf16.msra.mxu0 %v12583_v44 }
 0x64f   :  { %5506 = vmatprep.subr.bf16.mxu1 %v12584_v45  ;;  %5547 = vmatprep.subr.bf16.mxu0 %v12585_v46 }
 0x652   :  { %5507 = vmatpush1.bf16.msra.mxu1 %v12586_v47  ;;  %5548 = vmatpush1.bf16.msra.mxu0 %v12587_v21  ;;  %v5459_v47 = vld [vmem:[#allocation3 + $0x20] sm:$0xf] }
 0x653   :  { %5508 = vmatprep.subr.bf16.mxu1 %v12588_v38  ;;  %5549 = vmatprep.subr.bf16.mxu0 %v12589_v52 }
 0x656   :  { %5509 = vmatpush1.bf16.msra.mxu1 %v12590_v53  ;;  %5550 = vmatpush1.bf16.msra.mxu0 %v12591_v54 }
 0x657   :  { %5510 = vmatprep.subr.bf16.mxu1 %v12592_v4  ;;  %5551 = vmatprep.subr.bf16.mxu0 %v12593_v20  ;;  %v5460_v4 = vld [vmem:[#allocation3 + $0x28] sm:$0xf] }
 0x65a   :  { %5511 = vmatpush1.bf16.msra.mxu1 %v12594_v32  ;;  %5552 = vmatpush1.bf16.msra.mxu0 %v12595_v27 }
 0x65b   :  { %5512 = vmatprep.subr.bf16.mxu1 %v12596_v28  ;;  %5553 = vmatprep.subr.bf16.mxu0 %v12597_v18 }
 0x65e   :  { %5513 = vmatpush1.bf16.msra.mxu1 %v12598_v16  ;;  %5554 = vmatpush1.bf16.msra.mxu0 %v12599_v61 }
 0x65f   :  { %5514 = vmatprep.subr.bf16.mxu1 %v12600_v60  ;;  %5555 = vmatprep.subr.bf16.mxu0 %v12601_v5  ;;  %v5462_v5 = vld [vmem:[#allocation3 + $0x38] sm:$0xf] }
 0x662   :  { %5515 = vmatpush1.bf16.msra.mxu1 %v12602_v59  ;;  %5556 = vmatpush1.bf16.msra.mxu0 %v12603_v2  ;;  %v5461_v2 = vld [vmem:[#allocation3 + $0x30] sm:$0xf] }
 0x663   :  { %5582 = vmatprep.subr.bf16.mxu1 %v12604_v19  ;;  %5623 = vmatprep.subr.bf16.mxu0 %v12605_v43 }
 0x6f8   :  { %v5325_v48 = vpop.f32.mrb[36].mxu1  ;;  %v5366_v55 = vpop.f32.mrb[40].mxu0 }
 0x6f9   :  { %v5327_v3 = vpop.f32.mrb[37].mxu1  ;;  %v5368_v12 = vpop.f32.mrb[41].mxu0 }
 0x6fa   :  { %v5329_v14 = vpop.f32.mrb[38].mxu1  ;;  %v5370_v7 = vpop.f32.mrb[42].mxu0 }
 0x6fb   :  { %v5330_v50 = vpop.f32.mrb[39].mxu1  ;;  %v5371_v39 = vpop.f32.mrb[43].mxu0 }
 0x6fc   :  { %v5487_v39 = vrot.slane %v11608_v29, 4  ;;  %v10201_v29 = vld [vmem:[#allocation12 + $0xe0] ss:$16 sps:$4 sm:$0xff]  }
 0x718   :  { %v5407_v40 = vpop.f32.mrb[40].mxu1  ;;  %v5448_v44 = vpop.f32.mrb[44].mxu0 }
 0x719   :  { %v5455_v46 = vsel %vm170_vm7, %v5325_v48, %v5407_v40  ;;  %v5457_v21 = vsel %vm170_vm7, %v5366_v55, %v5448_v44  ;;  %v5409_v38 = vpop.f32.mrb[41].mxu1  ;;  %v5450_v52 = vpop.f32.mrb[45].mxu0 }
 0x71a   :  { %v5463_v53 = vadd.f32 %v5459_v47, %v5455_v46  ;;  %v5456_v54 = vsel %vm170_vm7, %v5327_v3, %v5409_v38  ;;  %v5458_v20 = vsel %vm170_vm7, %v5368_v12, %v5450_v52  ;;  %v5411_v32 = vpop.f32.mrb[42].mxu1  ;;  %v5452_v27 = vpop.f32.mrb[46].mxu0  ;;  %v5465_v43 = vadd.f32 %v5461_v2, %v5457_v21  ;;  %v10224_v2 = vld [vmem:[#allocation12 + $0x14c] ss:$16 sps:$4 sm:$0xff]  }
 0x71b   :  { %v5464_v28 = vadd.f32 %v5460_v4, %v5456_v54  ;;  %v5412_v18 = vpop.f32.mrb[43].mxu1  ;;  %v5453_v16 = vpop.f32.mrb[47].mxu0  ;;  %v5466_v59 = vadd.f32 %v5462_v5, %v5458_v20  ;;  %v10204_v20 = vld [vmem:[#allocation12 + $0xe8] ss:$16 sps:$4 sm:$0xff]   ;;  %v10209_v32 = vld [vmem:[#allocation12 + $0x104] ss:$16 sps:$4 sm:$0xff]  }
 0x71c   :  { %v8988_v61 = vmul.f32 -1.442695, %v5463_v53  ;;  %v10212_v27 = vld [vmem:[#allocation12 + $0x10c] ss:$16 sps:$4 sm:$0xff]   ;;  %v10210_v18 = vld [vmem:[#allocation12 + $0x108] ss:$16 sps:$4 sm:$0xff]  }
 0x71d   :  { %v8989_v60 = vmul.f32 -1.442695, %v5464_v28  ;;  %v8990_v19 = vmul.f32 -1.442695, %v5466_v59  ;;  %v10207_v28 = vld [vmem:[#allocation12 + $0x100] ss:$16 sps:$4 sm:$0xff]  }
 0x71e   :  { %10407 = vpow2.f32 %v8988_v61  ;;  %v10215_v16 = vld [vmem:[#allocation12 + $0x124] ss:$16 sps:$4 sm:$0xff]   ;;  %v10218_v61 = vld [vmem:[#allocation12 + $0x12c] ss:$16 sps:$4 sm:$0xff]   ;;  %v10216_v5 = vld [vmem:[#allocation12 + $0x128] ss:$16 sps:$4 sm:$0xff]  }
 0x71f   :  { %10409 = vpow2.f32 %v8989_v60  ;;  %v10213_v60 = vld [vmem:[#allocation12 + $0x120] ss:$16 sps:$4 sm:$0xff]   ;;  %v10221_v59 = vld [vmem:[#allocation12 + $0x144] ss:$16 sps:$4 sm:$0xff]  }
 0x720   :  { %10411 = vpow2.f32 %v8990_v19  ;;  %v10219_v19 = vld [vmem:[#allocation12 + $0x140] ss:$16 sps:$4 sm:$0xff]  }
 0x721   :  { %10413 = vtanh.f32 %v5465_v43  ;;  %v10222_v43 = vld [vmem:[#allocation12 + $0x148] ss:$16 sps:$4 sm:$0xff]  }
 0x728   :  { %v10408_v48 = vpop.eup %10407 }
 0x729   :  { %v10410_v55 = vpop.eup %10409  ;;  %v5470_v3 = vadd.f32 1.0, %v10408_v48  ;;  %v10227_v48 = vld [vmem:[#allocation12 + $0x164] ss:$16 sps:$4 sm:$0xff]  }
 0x72a   :  { %v5476_v12 = vadd.f32 1.0, %v10410_v55  ;;  %v10412_v14 = vpop.eup %10411  ;;  %v10230_v55 = vld [vmem:[#allocation12 + $0x16c] ss:$16 sps:$4 sm:$0xff]  }
 0x72b   :  { %10415 = vrcp.f32 %v5470_v3  ;;  %v10414_v7 = vpop.eup %10413  ;;  %v5483_v46 = vadd.f32 1.0, %v10412_v14  ;;  %v10225_v3 = vld [vmem:[#allocation12 + $0x160] ss:$16 sps:$4 sm:$0xff]   ;;  %v10233_v14 = vld [vmem:[#allocation12 + $0x184] ss:$16 sps:$4 sm:$0xff]  }
 0x72c   :  { %10417 = vrcp.f32 %v5476_v12  ;;  %v10228_v12 = vld [vmem:[#allocation12 + $0x168] ss:$16 sps:$4 sm:$0xff]  }
 0x72d   :  { %10419 = vrcp.f32 %v5483_v46  ;;  %v10237_v46 = vld [vmem:[#allocation12 + $0x1a0] ss:$16 sps:$4 sm:$0xff]  }
 0x735   :  { %v10416_v50 = vpop.eup %10415 }
 0x736   :  { %v10418_v40 = vpop.eup %10417  ;;  %v5490_v44 = vmul.f32 %v10416_v50, %v10414_v7  ;;  %v10236_v7 = vld [vmem:[#allocation12 + $0x18c] ss:$16 sps:$4 sm:$0xff]   ;;  %v10231_v50 = vld [vmem:[#allocation12 + $0x180] ss:$16 sps:$4 sm:$0xff]  }
 0x737   :  { %v5489_v47 = vmul.f32 %v10418_v40, %v5487_v39  ;;  %v10420_v21 = vpop.eup %10419  ;;  %v10234_v39 = vld [vmem:[#allocation12 + $0x188] ss:$16 sps:$4 sm:$0xff]   ;;  %v10239_v40 = vld [vmem:[#allocation12 + $0x1a4] ss:$16 sps:$4 sm:$0xff]  }
 0x739   :  { %v11688_v38 = vadd.f32 %v5490_v44, %v5489_v47  ;;  %v10242_v44 = vld [vmem:[#allocation12 + $0x1ac] ss:$16 sps:$4 sm:$0xff]   ;;  %v10240_v47 = vld [vmem:[#allocation12 + $0x1a8] ss:$16 sps:$4 sm:$0xff]  }
 0x73b   :  { %10421 = vtanh.f32 %v11688_v38 }
 0x745   :  { %v10422_v52 = vpop.eup %10421 }
 0x746   :  { %v5493_v53 = vmul.f32 %v10422_v52, %v10420_v21  ;;  %v10243_v21 = vld [vmem:[#allocation12 + $0x1c0] ss:$16 sps:$4 sm:$0xff]   ;;  %v10245_v52 = vld [vmem:[#allocation12 + $0x1c4] ss:$16 sps:$4 sm:$0xff]  }
 0x748   :  { %v5495_v54 = vrot.slane %v5493_v53, 4  ;;  %5498 = vst [vmem:[#allocation2 + $0x8] sm:$0xc] %v5493_v53  ;;  %v5499_v4 = vpack.c.bf16 %v5493_v53, %v5493_v53  ;;  %v10246_v53 = vld [vmem:[#allocation12 + $0x1c8] ss:$16 sps:$4 sm:$0xff]  }
 0x74a   :  { %5497 = vst [vmem:[#allocation2] sm:$0x30] %v5495_v54  ;;  %5533 = vmatmul.mubr.bf16.vlgmr.msra.gmra.mrb[44].mxu1 %v5499_v4  ;;  %5574 = vmatmul.mubr.bf16.vlgmr.msra.gmra.mrb[48].mxu0 %v5499_v4  ;;  %v10248_v54 = vld [vmem:[#allocation12 + $0x1cc] ss:$16 sps:$4 sm:$0xff]  }
 0x74b   :  { %5583 = vmatpush1.bf16.msra.mxu1 %v11371_v62  ;;  %5624 = vmatpush1.bf16.msra.mxu0 %v11373_v63  ;;  %v10159_v62 = vld [vmem:[#allocation12] ss:$16 sps:$4 sm:$0xff]   ;;  %v10161_v63 = vld [vmem:[#allocation12 + $0x4] ss:$16 sps:$4 sm:$0xff]  }
 0x74c   :  { %5584 = vmatprep.subr.bf16.mxu1 %v11377_v0  ;;  %5625 = vmatprep.subr.bf16.mxu0 %v11379_v1  ;;  %v10162_v0 = vld [vmem:[#allocation12 + $0x8] ss:$16 sps:$4 sm:$0xff]   ;;  %v10164_v1 = vld [vmem:[#allocation12 + $0xc] ss:$16 sps:$4 sm:$0xff]  }
 0x74d   :  { %5614 = vmatprep.mubr.bf16.mxu1 %v12551_v41  ;;  %5655 = vmatprep.mubr.bf16.mxu0 %v12551_v41 }
 0x74f   :  { %5585 = vmatpush1.bf16.msra.mxu1 %v11385_v22  ;;  %5626 = vmatpush1.bf16.msra.mxu0 %v12552_v17  ;;  %v10167_v22 = vld [vmem:[#allocation12 + $0x24] ss:$16 sps:$4 sm:$0xff]   ;;  %v10188_v17 = vld [vmem:[#allocation12 + $0x8c] ss:$16 sps:$4 sm:$0xff]  }
 0x750   :  { %5586 = vmatprep.subr.bf16.mxu1 %v12553_v49  ;;  %5627 = vmatprep.subr.bf16.mxu0 %v12554_v30  ;;  %v10183_v49 = vld [vmem:[#allocation12 + $0x80] ss:$16 sps:$4 sm:$0xff]   ;;  %v10186_v30 = vld [vmem:[#allocation12 + $0x88] ss:$16 sps:$4 sm:$0xff]  }
 0x753   :  { %5587 = vmatpush1.bf16.msra.mxu1 %v12555_v9  ;;  %5628 = vmatpush1.bf16.msra.mxu0 %v12556_v10  ;;  %v10191_v9 = vld [vmem:[#allocation12 + $0xa4] ss:$16 sps:$4 sm:$0xff]   ;;  %v10194_v10 = vld [vmem:[#allocation12 + $0xac] ss:$16 sps:$4 sm:$0xff]  }
 0x754   :  { %5588 = vmatprep.subr.bf16.mxu1 %v12557_v11  ;;  %5629 = vmatprep.subr.bf16.mxu0 %v12558_v51  ;;  %v10189_v11 = vld [vmem:[#allocation12 + $0xa0] ss:$16 sps:$4 sm:$0xff]   ;;  %v10192_v51 = vld [vmem:[#allocation12 + $0xa8] ss:$16 sps:$4 sm:$0xff]  }
 0x757   :  { %5589 = vmatpush1.bf16.msra.mxu1 %v12559_v6  ;;  %5630 = vmatpush1.bf16.msra.mxu0 %v12560_v15  ;;  %v10197_v6 = vld [vmem:[#allocation12 + $0xc4] ss:$16 sps:$4 sm:$0xff]   ;;  %v10200_v15 = vld [vmem:[#allocation12 + $0xcc] ss:$16 sps:$4 sm:$0xff]  }
 0x758   :  { %5590 = vmatprep.subr.bf16.mxu1 %v12561_v13  ;;  %5631 = vmatprep.subr.bf16.mxu0 %v12562_v37  ;;  %v10195_v13 = vld [vmem:[#allocation12 + $0xc0] ss:$16 sps:$4 sm:$0xff]   ;;  %v10198_v37 = vld [vmem:[#allocation12 + $0xc8] ss:$16 sps:$4 sm:$0xff]  }
 0x75b   :  { %5591 = vmatpush1.bf16.msra.mxu1 %v11423_v31  ;;  %5632 = vmatpush1.bf16.msra.mxu0 %v11425_v34  ;;  %v10170_v31 = vld [vmem:[#allocation12 + $0x2c] ss:$16 sps:$4 sm:$0xff]   ;;  %v10165_v34 = vld [vmem:[#allocation12 + $0x20] ss:$16 sps:$4 sm:$0xff]  }
 0x75c   :  { %5592 = vmatprep.subr.bf16.mxu1 %v11429_v35  ;;  %5633 = vmatprep.subr.bf16.mxu0 %v12563_v8  ;;  %v10168_v35 = vld [vmem:[#allocation12 + $0x28] ss:$16 sps:$4 sm:$0xff]   ;;  %v10203_v8 = vld [vmem:[#allocation12 + $0xe4] ss:$16 sps:$4 sm:$0xff]  }
 0x75f   :  { %5593 = vmatpush1.bf16.msra.mxu1 %v12564_v42  ;;  %5634 = vmatpush1.bf16.msra.mxu0 %v11437_v57  ;;  %v10171_v57 = vld [vmem:[#allocation12 + $0x40] ss:$16 sps:$4 sm:$0xff]   ;;  %v10206_v42 = vld [vmem:[#allocation12 + $0xec] ss:$16 sps:$4 sm:$0xff]  }
 0x760   :  { %5594 = vmatprep.subr.bf16.mxu1 %v11441_v58  ;;  %5635 = vmatprep.subr.bf16.mxu0 %v11443_v33  ;;  %v10174_v58 = vld [vmem:[#allocation12 + $0x48] ss:$16 sps:$4 sm:$0xff]   ;;  %v10179_v33 = vld [vmem:[#allocation12 + $0x64] ss:$16 sps:$4 sm:$0xff]  }
 0x763   :  { %5595 = vmatpush1.bf16.msra.mxu1 %v11447_v24  ;;  %5636 = vmatpush1.bf16.msra.mxu0 %v11449_v23  ;;  %v10182_v24 = vld [vmem:[#allocation12 + $0x6c] ss:$16 sps:$4 sm:$0xff]   ;;  %v10177_v23 = vld [vmem:[#allocation12 + $0x60] ss:$16 sps:$4 sm:$0xff]  }
 0x764   :  { %5596 = vmatprep.subr.bf16.mxu1 %v11453_v25  ;;  %5637 = vmatprep.subr.bf16.mxu0 %v11455_v26  ;;  %v10180_v25 = vld [vmem:[#allocation12 + $0x68] ss:$16 sps:$4 sm:$0xff]   ;;  %v10185_v26 = vld [vmem:[#allocation12 + $0x84] ss:$16 sps:$4 sm:$0xff]  }
 0x767   :  { %5597 = vmatpush1.bf16.msra.mxu1 %v11459_v36  ;;  %5638 = vmatpush1.bf16.msra.mxu0 %v11461_v56  ;;  %v10173_v36 = vld [vmem:[#allocation12 + $0x44] ss:$16 sps:$4 sm:$0xff]   ;;  %v10176_v56 = vld [vmem:[#allocation12 + $0x4c] ss:$16 sps:$4 sm:$0xff]  }
 0x768   :  { %6259 = vmatprep.subr.bf16.mxu1 %v10161_v63  ;;  %6300 = vmatprep.subr.bf16.mxu0 %v10164_v1  ;;  %v10249_v63 = vld [vmem:[#allocation12 + $0x1e0] ss:$16 sps:$4 sm:$0xff]   ;;  %v10257_v1 = vld [vmem:[#allocation13 + $0x4] ss:$16 sps:$4 sm:$0xff]  }
 0x76a   :  { %5615 = vmatmul.mubr.bf16.vlgmr.msra.gmra.mrb[48].mxu1 %v5499_v4  ;;  %5656 = vmatmul.mubr.bf16.vlgmr.msra.gmra.mrb[52].mxu0 %v5499_v4  ;;  %v10251_v4 = vld [vmem:[#allocation12 + $0x1e4] ss:$16 sps:$4 sm:$0xff]  }
 0x76b   :  { %6260 = vmatpush1.bf16.msra.mxu1 %v10159_v62  ;;  %6301 = vmatpush1.bf16.msra.mxu0 %v10162_v0  ;;  %v10254_v62 = vld [vmem:[#allocation12 + $0x1ec] ss:$16 sps:$4 sm:$0xff]   ;;  %v10252_v0 = vld [vmem:[#allocation12 + $0x1e8] ss:$16 sps:$4 sm:$0xff]  }
 0x76c   :  { %6261 = vmatprep.subr.bf16.mxu1 %v10167_v22  ;;  %6302 = vmatprep.subr.bf16.mxu0 %v10170_v31  ;;  %v10260_v22 = vld [vmem:[#allocation13 + $0xc] ss:$16 sps:$4 sm:$0xff]  }
 0x76f   :  { %6262 = vmatpush1.bf16.msra.mxu1 %v10165_v34  ;;  %6303 = vmatpush1.bf16.msra.mxu0 %v10168_v35 }
 0x770   :  { %6263 = vmatprep.subr.bf16.mxu1 %v10173_v36  ;;  %6304 = vmatprep.subr.bf16.mxu0 %v10176_v56 }
 0x773   :  { %6264 = vmatpush1.bf16.msra.mxu1 %v10171_v57  ;;  %6305 = vmatpush1.bf16.msra.mxu0 %v10174_v58 }
 0x774   :  { %6265 = vmatprep.subr.bf16.mxu1 %v10179_v33  ;;  %6306 = vmatprep.subr.bf16.mxu0 %v10182_v24 }
 0x777   :  { %6266 = vmatpush1.bf16.msra.mxu1 %v10177_v23  ;;  %6307 = vmatpush1.bf16.msra.mxu0 %v10180_v25 }
 0x778   :  { %6267 = vmatprep.subr.bf16.mxu1 %v10185_v26  ;;  %6308 = vmatprep.subr.bf16.mxu0 %v10188_v17 }
 0x77b   :  { %6268 = vmatpush1.bf16.msra.mxu1 %v10183_v49  ;;  %6309 = vmatpush1.bf16.msra.mxu0 %v10186_v30 }
 0x77c   :  { %6269 = vmatprep.subr.bf16.mxu1 %v10191_v9  ;;  %6310 = vmatprep.subr.bf16.mxu0 %v10194_v10 }
 0x77f   :  { %6270 = vmatpush1.bf16.msra.mxu1 %v10189_v11  ;;  %6311 = vmatpush1.bf16.msra.mxu0 %v10192_v51 }
 0x780   :  { %6271 = vmatprep.subr.bf16.mxu1 %v10197_v6  ;;  %6312 = vmatprep.subr.bf16.mxu0 %v10200_v15  ;;  %v5668_v6 = vld [vmem:[#allocation3 + $0x20] sm:$0xf0] }
 0x783   :  { %6272 = vmatpush1.bf16.msra.mxu1 %v10195_v13  ;;  %6313 = vmatpush1.bf16.msra.mxu0 %v10198_v37 }
 0x784   :  { %6273 = vmatprep.subr.bf16.mxu1 %v10203_v8  ;;  %6314 = vmatprep.subr.bf16.mxu0 %v10206_v42  ;;  %v5669_v42 = vld [vmem:[#allocation3 + $0x28] sm:$0xf0] }
 0x787   :  { %6274 = vmatpush1.bf16.msra.mxu1 %v10201_v29  ;;  %6315 = vmatpush1.bf16.msra.mxu0 %v10204_v20 }
 0x788   :  { %6275 = vmatprep.subr.bf16.mxu1 %v10209_v32  ;;  %6316 = vmatprep.subr.bf16.mxu0 %v10212_v27 }
 0x78b   :  { %6276 = vmatpush1.bf16.msra.mxu1 %v10207_v28  ;;  %6317 = vmatpush1.bf16.msra.mxu0 %v10210_v18  ;;  %v5671_v28 = vld [vmem:[#allocation3 + $0x38] sm:$0xf0] }
 0x78c   :  { %6277 = vmatprep.subr.bf16.mxu1 %v10215_v16  ;;  %6318 = vmatprep.subr.bf16.mxu0 %v10218_v61  ;;  %v5670_v61 = vld [vmem:[#allocation3 + $0x30] sm:$0xf0] }
 0x78f   :  { %6278 = vmatpush1.bf16.msra.mxu1 %v10213_v60  ;;  %6319 = vmatpush1.bf16.msra.mxu0 %v10216_v5 }
 0x790   :  { %6279 = vmatprep.subr.bf16.mxu1 %v10221_v59  ;;  %6320 = vmatprep.subr.bf16.mxu0 %v10224_v2 }
 0x793   :  { %6280 = vmatpush1.bf16.msra.mxu1 %v10219_v19  ;;  %6321 = vmatpush1.bf16.msra.mxu0 %v10222_v43 }
 0x794   :  { %6281 = vmatprep.subr.bf16.mxu1 %v10227_v48  ;;  %6322 = vmatprep.subr.bf16.mxu0 %v10230_v55 }
 0x797   :  { %6282 = vmatpush1.bf16.msra.mxu1 %v10225_v3  ;;  %6323 = vmatpush1.bf16.msra.mxu0 %v10228_v12  ;;  %v5708_v12 = vrot.slane %v11688_v38, 4  ;;  %v10263_v38 = vld [vmem:[#allocation13 + $0x24] ss:$16 sps:$4 sm:$0xff]  }
 0x798   :  { %6283 = vmatprep.subr.bf16.mxu1 %v10233_v14  ;;  %6324 = vmatprep.subr.bf16.mxu0 %v10236_v7 }
 0x79b   :  { %6284 = vmatpush1.bf16.msra.mxu1 %v10231_v50  ;;  %6325 = vmatpush1.bf16.msra.mxu0 %v10234_v39 }
 0x79c   :  { %6285 = vmatprep.subr.bf16.mxu1 %v10239_v40  ;;  %6326 = vmatprep.subr.bf16.mxu0 %v10242_v44 }
 0x79f   :  { %6286 = vmatpush1.bf16.msra.mxu1 %v10237_v46  ;;  %6327 = vmatpush1.bf16.msra.mxu0 %v10240_v47 }
 0x7a0   :  { %6287 = vmatprep.subr.bf16.mxu1 %v10245_v52  ;;  %6328 = vmatprep.subr.bf16.mxu0 %v10248_v54 }
 0x7a3   :  { %6288 = vmatpush1.bf16.msra.mxu1 %v10243_v21  ;;  %6329 = vmatpush1.bf16.msra.mxu0 %v10246_v53 }
 0x7a4   :  { %6289 = vmatprep.subr.bf16.mxu1 %v10251_v4  ;;  %6330 = vmatprep.subr.bf16.mxu0 %v10254_v62  ;;  %v10255_v4 = vld [vmem:[#allocation13] ss:$16 sps:$4 sm:$0xff]   ;;  %v10258_v62 = vld [vmem:[#allocation13 + $0x8] ss:$16 sps:$4 sm:$0xff]  }
 0x7a7   :  { %6290 = vmatpush1.bf16.msra.mxu1 %v10249_v63  ;;  %6331 = vmatpush1.bf16.msra.mxu0 %v10252_v0  ;;  %v10266_v0 = vld [vmem:[#allocation13 + $0x2c] ss:$16 sps:$4 sm:$0xff]  }
 0x7a8   :  { %6682 = vmatprep.subr.bf16.mxu1 %v10257_v1  ;;  %6723 = vmatprep.subr.bf16.mxu0 %v10260_v22  ;;  %v10261_v1 = vld [vmem:[#allocation13 + $0x20] ss:$16 sps:$4 sm:$0xff]   ;;  %v10264_v22 = vld [vmem:[#allocation13 + $0x28] ss:$16 sps:$4 sm:$0xff]  }
 0x81d   :  { %v5534_v31 = vpop.f32.mrb[44].mxu1  ;;  %v5575_v34 = vpop.f32.mrb[48].mxu0 }
 0x81e   :  { %v5536_v35 = vpop.f32.mrb[45].mxu1  ;;  %v5577_v36 = vpop.f32.mrb[49].mxu0 }
 0x81f   :  { %v5538_v56 = vpop.f32.mrb[46].mxu1  ;;  %v5579_v57 = vpop.f32.mrb[50].mxu0 }
 0x820   :  { %v5539_v58 = vpop.f32.mrb[47].mxu1  ;;  %v5580_v33 = vpop.f32.mrb[51].mxu0  ;;  %v10275_v56 = vld [vmem:[#allocation13 + $0x64] ss:$16 sps:$4 sm:$0xff]   ;;  %v10278_v57 = vld [vmem:[#allocation13 + $0x6c] ss:$16 sps:$4 sm:$0xff]  }
 0x821   :  { %v10273_v58 = vld [vmem:[#allocation13 + $0x60] ss:$16 sps:$4 sm:$0xff]   ;;  %v10276_v33 = vld [vmem:[#allocation13 + $0x68] ss:$16 sps:$4 sm:$0xff]  }
 0x83d   :  { %v5616_v24 = vpop.f32.mrb[48].mxu1  ;;  %v5657_v23 = vpop.f32.mrb[52].mxu0 }
 0x83e   :  { %v5664_v25 = vsel %vm170_vm7, %v5534_v31, %v5616_v24  ;;  %v5666_v26 = vsel %vm170_vm7, %v5575_v34, %v5657_v23  ;;  %v5618_v17 = vpop.f32.mrb[49].mxu1  ;;  %v5659_v49 = vpop.f32.mrb[53].mxu0  ;;  %v10269_v31 = vld [vmem:[#allocation13 + $0x44] ss:$16 sps:$4 sm:$0xff]   ;;  %v10272_v34 = vld [vmem:[#allocation13 + $0x4c] ss:$16 sps:$4 sm:$0xff]  }
 0x83f   :  { %v5676_v30 = vrot.slane %v5664_v25, 4  ;;  %v5665_v9 = vsel %vm170_vm7, %v5536_v35, %v5618_v17  ;;  %v5667_v10 = vsel %vm170_vm7, %v5577_v36, %v5659_v49  ;;  %v5620_v11 = vpop.f32.mrb[50].mxu1  ;;  %v5661_v51 = vpop.f32.mrb[54].mxu0  ;;  %v5678_v16 = vrot.slane %v5666_v26, 4  ;;  %v10267_v35 = vld [vmem:[#allocation13 + $0x40] ss:$16 sps:$4 sm:$0xff]  }
 0x840   :  { %v5677_v15 = vrot.slane %v5665_v9, 4  ;;  %v5621_v13 = vpop.f32.mrb[51].mxu1  ;;  %v5662_v37 = vpop.f32.mrb[55].mxu0  ;;  %v5679_v27 = vrot.slane %v5667_v10, 4  ;;  %v10270_v36 = vld [vmem:[#allocation13 + $0x48] ss:$16 sps:$4 sm:$0xff]  }
 0x841   :  { %v5684_v8 = vadd.f32 %v5676_v30, %v5668_v6  ;;  %v5686_v5 = vadd.f32 %v5678_v16, %v5670_v61  ;;  %v10281_v24 = vld [vmem:[#allocation13 + $0x84] ss:$16 sps:$4 sm:$0xff]   ;;  %v10284_v23 = vld [vmem:[#allocation13 + $0x8c] ss:$16 sps:$4 sm:$0xff]   ;;  %v10279_v25 = vld [vmem:[#allocation13 + $0x80] ss:$16 sps:$4 sm:$0xff]  }
 0x842   :  { %v5685_v29 = vadd.f32 %v5677_v15, %v5669_v42  ;;  %v5687_v18 = vadd.f32 %v5679_v27, %v5671_v28  ;;  %v10282_v26 = vld [vmem:[#allocation13 + $0x88] ss:$16 sps:$4 sm:$0xff]   ;;  %v10287_v17 = vld [vmem:[#allocation13 + $0xa4] ss:$16 sps:$4 sm:$0xff]   ;;  %v10290_v49 = vld [vmem:[#allocation13 + $0xac] ss:$16 sps:$4 sm:$0xff]  }
 0x843   :  { %v8991_v20 = vmul.f32 -1.442695, %v5684_v8  ;;  %v10285_v30 = vld [vmem:[#allocation13 + $0xa0] ss:$16 sps:$4 sm:$0xff]   ;;  %v10288_v9 = vld [vmem:[#allocation13 + $0xa8] ss:$16 sps:$4 sm:$0xff]  }
 0x844   :  { %v8992_v32 = vmul.f32 -1.442695, %v5685_v29  ;;  %v8993_v60 = vmul.f32 -1.442695, %v5687_v18  ;;  %v10293_v10 = vld [vmem:[#allocation13 + $0xc4] ss:$16 sps:$4 sm:$0xff]  }
 0x845   :  { %10423 = vpow2.f32 %v8991_v20  ;;  %v10296_v11 = vld [vmem:[#allocation13 + $0xcc] ss:$16 sps:$4 sm:$0xff]   ;;  %v10291_v51 = vld [vmem:[#allocation13 + $0xc0] ss:$16 sps:$4 sm:$0xff]   ;;  %v10294_v6 = vld [vmem:[#allocation13 + $0xc8] ss:$16 sps:$4 sm:$0xff]  }
 0x846   :  { %10425 = vpow2.f32 %v8992_v32  ;;  %v10299_v15 = vld [vmem:[#allocation13 + $0xe4] ss:$16 sps:$4 sm:$0xff]   ;;  %v10302_v13 = vld [vmem:[#allocation13 + $0xec] ss:$16 sps:$4 sm:$0xff]   ;;  %v10297_v37 = vld [vmem:[#allocation13 + $0xe0] ss:$16 sps:$4 sm:$0xff]  }
 0x847   :  { %10427 = vpow2.f32 %v8993_v60  ;;  %v10300_v8 = vld [vmem:[#allocation13 + $0xe8] ss:$16 sps:$4 sm:$0xff]   ;;  %v10305_v42 = vld [vmem:[#allocation13 + $0x104] ss:$16 sps:$4 sm:$0xff]   ;;  %v10308_v29 = vld [vmem:[#allocation13 + $0x10c] ss:$16 sps:$4 sm:$0xff]  }
 0x848   :  { %10429 = vtanh.f32 %v5686_v5  ;;  %v10303_v20 = vld [vmem:[#allocation13 + $0x100] ss:$16 sps:$4 sm:$0xff]   ;;  %v10306_v32 = vld [vmem:[#allocation13 + $0x108] ss:$16 sps:$4 sm:$0xff]   ;;  %v10311_v27 = vld [vmem:[#allocation13 + $0x124] ss:$16 sps:$4 sm:$0xff]  }
 0x849   :  { %v10314_v28 = vld [vmem:[#allocation13 + $0x12c] ss:$16 sps:$4 sm:$0xff]   ;;  %v10309_v18 = vld [vmem:[#allocation13 + $0x120] ss:$16 sps:$4 sm:$0xff]   ;;  %v10312_v16 = vld [vmem:[#allocation13 + $0x128] ss:$16 sps:$4 sm:$0xff]  }
 0x84a   :  { %v10317_v61 = vld [vmem:[#allocation13 + $0x144] ss:$16 sps:$4 sm:$0xff]   ;;  %v10320_v60 = vld [vmem:[#allocation13 + $0x14c] ss:$16 sps:$4 sm:$0xff]   ;;  %v10315_v5 = vld [vmem:[#allocation13 + $0x140] ss:$16 sps:$4 sm:$0xff]  }
 0x84f   :  { %v10424_v59 = vpop.eup %10423 }
 0x850   :  { %v10426_v2 = vpop.eup %10425  ;;  %v5691_v19 = vadd.f32 1.0, %v10424_v59  ;;  %v10318_v59 = vld [vmem:[#allocation13 + $0x148] ss:$16 sps:$4 sm:$0xff]  }
 0x851   :  { %v5697_v43 = vadd.f32 1.0, %v10426_v2  ;;  %v10428_v48 = vpop.eup %10427  ;;  %v10323_v2 = vld [vmem:[#allocation13 + $0x164] ss:$16 sps:$4 sm:$0xff]  }
 0x852   :  { %10431 = vrcp.f32 %v5691_v19  ;;  %v10430_v55 = vpop.eup %10429  ;;  %v5704_v50 = vadd.f32 1.0, %v10428_v48  ;;  %v10326_v19 = vld [vmem:[#allocation13 + $0x16c] ss:$16 sps:$4 sm:$0xff]   ;;  %v10324_v48 = vld [vmem:[#allocation13 + $0x168] ss:$16 sps:$4 sm:$0xff]  }
 0x853   :  { %10433 = vrcp.f32 %v5697_v43  ;;  %v10321_v43 = vld [vmem:[#allocation13 + $0x160] ss:$16 sps:$4 sm:$0xff]  }
 0x854   :  { %10435 = vrcp.f32 %v5704_v50  ;;  %v10338_v50 = vld [vmem:[#allocation13 + $0x1ac] ss:$16 sps:$4 sm:$0xff]  }
 0x85c   :  { %v10432_v3 = vpop.eup %10431 }
 0x85d   :  { %v10434_v14 = vpop.eup %10433  ;;  %v5711_v7 = vmul.f32 %v10432_v3, %v10430_v55  ;;  %v10329_v55 = vld [vmem:[#allocation13 + $0x184] ss:$16 sps:$4 sm:$0xff]   ;;  %v10332_v3 = vld [vmem:[#allocation13 + $0x18c] ss:$16 sps:$4 sm:$0xff]  }
 0x85e   :  { %v5710_v39 = vmul.f32 %v10434_v14, %v5708_v12  ;;  %v10436_v44 = vpop.eup %10435  ;;  %v10327_v12 = vld [vmem:[#allocation13 + $0x180] ss:$16 sps:$4 sm:$0xff]   ;;  %v10330_v14 = vld [vmem:[#allocation13 + $0x188] ss:$16 sps:$4 sm:$0xff]  }
 0x860   :  { %v5712_v40 = vadd.f32 %v5711_v7, %v5710_v39  ;;  %v10335_v7 = vld [vmem:[#allocation13 + $0x1a4] ss:$16 sps:$4 sm:$0xff]   ;;  %v10333_v39 = vld [vmem:[#allocation13 + $0x1a0] ss:$16 sps:$4 sm:$0xff]  }
 0x862   :  { %10437 = vtanh.f32 %v5712_v40  ;;  %v10336_v40 = vld [vmem:[#allocation13 + $0x1a8] ss:$16 sps:$4 sm:$0xff]  }
 0x86c   :  { %v10438_v46 = vpop.eup %10437 }
 0x86d   :  { %v5714_v47 = vmul.f32 %v10438_v46, %v10436_v44  ;;  %v10341_v44 = vld [vmem:[#allocation13 + $0x1c4] ss:$16 sps:$4 sm:$0xff]   ;;  %v10344_v46 = vld [vmem:[#allocation13 + $0x1cc] ss:$16 sps:$4 sm:$0xff]  }
 0x86f   :  { %v5716_v21 = vrot.slane %v5714_v47, 6  ;;  %v10339_v47 = vld [vmem:[#allocation13 + $0x1c0] ss:$16 sps:$4 sm:$0xff]  }
 0x871   :  { %5718 = vst [vmem:[#allocation2 + $0x8] ss:$-4 sps:$4 sm:$0xc3] %v5716_v21   ;;  %v10342_v21 = vld [vmem:[#allocation13 + $0x1c8] ss:$16 sps:$4 sm:$0xff]  }
 0x878   :  { %v5721_v52 = vld [vmem:[#allocation2 + $0x8] sm:$0xff]  ;;  %v5720_v53 = vld [vmem:[#allocation2] sm:$0xff] }
 0x879   :  { %v5917_v54 = vpack.c.bf16 %v5721_v52, %v5721_v52  ;;  %v11732_v63 = vpack.c.bf16 %v5720_v53, %v5720_v53  ;;  %v10347_v52 = vld [vmem:[#allocation13 + $0x1e4] ss:$16 sps:$4 sm:$0xff]   ;;  %v10350_v53 = vld [vmem:[#allocation13 + $0x1ec] ss:$16 sps:$4 sm:$0xff]  }
 0x87b   :  { %6291 = vmatprep.mubr.bf16.mxu1 %v5917_v54  ;;  %6332 = vmatprep.mubr.bf16.mxu0 %v5917_v54 }
 0x87c   :  { %6292 = vmatmul.mubr.bf16.vlgmr.msra.gmra.mrb[52].mxu1 %v11732_v63  ;;  %6333 = vmatmul.mubr.bf16.vlgmr.msra.gmra.mrb[56].mxu0 %v11732_v63 }
 0x87d   :  { %6683 = vmatpush1.bf16.msra.mxu1 %v10255_v4  ;;  %6724 = vmatpush1.bf16.msra.mxu0 %v10258_v62  ;;  %v5854_v4 = vld [vmem:[#allocation15 + $0x20] sm:$0xff]  ;;  %v5851_v62 = vld [vmem:[#allocation15 + $0x8] sm:$0xff] }
 0x87e   :  { %6714 = vmatprep.mubr.bf16.mxu1 %v5917_v54  ;;  %6755 = vmatprep.mubr.bf16.mxu0 %v5917_v54  ;;  %v5850_v54 = vld [vmem:[#allocation15] sm:$0xff] }
 0x87f   :  { %6684 = vmatprep.subr.bf16.mxu1 %v10263_v38  ;;  %6725 = vmatprep.subr.bf16.mxu0 %v10266_v0  ;;  %v5855_v38 = vld [vmem:[#allocation15 + $0x28] sm:$0xff]  ;;  %v10345_v0 = vld [vmem:[#allocation13 + $0x1e0] ss:$16 sps:$4 sm:$0xff]  }
 0x881   :  { %6685 = vmatpush1.bf16.msra.mxu1 %v10261_v1  ;;  %6726 = vmatpush1.bf16.msra.mxu0 %v10264_v22  ;;  %v10348_v1 = vld [vmem:[#allocation13 + $0x1e8] ss:$16 sps:$4 sm:$0xff]   ;;  %v11736_v22 = vcombine.high %v5850_v54, %v5854_v4 }
 0x882   :  { %6686 = vmatprep.subr.bf16.mxu1 %v10269_v31  ;;  %6727 = vmatprep.subr.bf16.mxu0 %v10272_v34  ;;  %v11738_v31 = vcombine.high %v5851_v62, %v5855_v38  ;;  %v5858_v34 = vld [vmem:[#allocation15 + $0x40] sm:$0xff] }
 0x885   :  { %6687 = vmatpush1.bf16.msra.mxu1 %v10267_v35  ;;  %6728 = vmatpush1.bf16.msra.mxu0 %v10270_v36  ;;  %v5862_v35 = vld [vmem:[#allocation15 + $0x60] sm:$0xff]  ;;  %v5859_v36 = vld [vmem:[#allocation15 + $0x48] sm:$0xff] }
 0x886   :  { %6688 = vmatprep.subr.bf16.mxu1 %v10275_v56  ;;  %6729 = vmatprep.subr.bf16.mxu0 %v10278_v57  ;;  %v5863_v56 = vld [vmem:[#allocation15 + $0x68] sm:$0xff]  ;;  %v11740_v57 = vcombine.low %v5850_v54, %v5854_v4 }
 0x889   :  { %6689 = vmatpush1.bf16.msra.mxu1 %v10273_v58  ;;  %6730 = vmatpush1.bf16.msra.mxu0 %v10276_v33  ;;  %v11742_v58 = vcombine.low %v5851_v62, %v5855_v38  ;;  %v11746_v33 = vcombine.high %v5858_v34, %v5862_v35  ;;  %v5852_v62 = vld [vmem:[#allocation15 + $0x10] sm:$0xff] }
 0x88a   :  { %6690 = vmatprep.subr.bf16.mxu1 %v10281_v24  ;;  %6731 = vmatprep.subr.bf16.mxu0 %v10284_v23  ;;  %v11748_v24 = vcombine.high %v5859_v36, %v5863_v56  ;;  %v5866_v23 = vld [vmem:[#allocation15 + $0x80] sm:$0xff]  ;;  %v5856_v38 = vld [vmem:[#allocation15 + $0x30] sm:$0xff] }
 0x88d   :  { %6691 = vmatpush1.bf16.msra.mxu1 %v10279_v25  ;;  %6732 = vmatpush1.bf16.msra.mxu0 %v10282_v26  ;;  %v5870_v25 = vld [vmem:[#allocation15 + $0xa0] sm:$0xff]  ;;  %v5867_v26 = vld [vmem:[#allocation15 + $0x88] sm:$0xff] }
 0x88e   :  { %6692 = vmatprep.subr.bf16.mxu1 %v10287_v17  ;;  %6733 = vmatprep.subr.bf16.mxu0 %v10290_v49  ;;  %v5871_v17 = vld [vmem:[#allocation15 + $0xa8] sm:$0xff]  ;;  %v11754_v49 = vcombine.low %v5858_v34, %v5862_v35 }
 0x891   :  { %6693 = vmatpush1.bf16.msra.mxu1 %v10285_v30  ;;  %6734 = vmatpush1.bf16.msra.mxu0 %v10288_v9  ;;  %v11756_v30 = vcombine.low %v5859_v36, %v5863_v56  ;;  %v11760_v9 = vcombine.high %v5866_v23, %v5870_v25  ;;  %v11834_v36 = vcombine.high %v5852_v62, %v5856_v38 }
 0x892   :  { %6694 = vmatprep.subr.bf16.mxu1 %v10293_v10  ;;  %6735 = vmatprep.subr.bf16.mxu0 %v10296_v11  ;;  %v11762_v10 = vcombine.high %v5867_v26, %v5871_v17  ;;  %v5874_v11 = vld [vmem:[#allocation15 + $0xc0] sm:$0xff] }
 0x893   :  { %12630 = vst [vmem:[#allocation40_spill] sm:$0xff] %v11834_v36 }
 0x894   :  { %12607 = vst [vmem:[#allocation55_spill] sm:$0xff] %v11762_v10 }
 0x895   :  { %6695 = vmatpush1.bf16.msra.mxu1 %v10291_v51  ;;  %6736 = vmatpush1.bf16.msra.mxu0 %v10294_v6  ;;  %v5878_v51 = vld [vmem:[#allocation15 + $0xe0] sm:$0xff]  ;;  %v5875_v6 = vld [vmem:[#allocation15 + $0xc8] sm:$0xff] }
 0x896   :  { %6696 = vmatprep.subr.bf16.mxu1 %v10299_v15  ;;  %6737 = vmatprep.subr.bf16.mxu0 %v10302_v13  ;;  %v11768_v15 = vcombine.low %v5866_v23, %v5870_v25  ;;  %v11770_v13 = vcombine.low %v5867_v26, %v5871_v17  ;;  %v5860_v23 = vld [vmem:[#allocation15 + $0x50] sm:$0xff]  ;;  %v5861_v26 = vld [vmem:[#allocation15 + $0x58] sm:$0xff] }
 0x897   :  { %v5864_v25 = vld [vmem:[#allocation15 + $0x70] sm:$0xff]  ;;  %v5865_v17 = vld [vmem:[#allocation15 + $0x78] sm:$0xff] }
 0x898   :  { %12608 = vst [vmem:[#allocation56_spill] sm:$0xff] %v11768_v15  ;;  %12609 = vst [vmem:[#allocation57_spill] sm:$0xff] %v11770_v13 }
 0x899   :  { %6697 = vmatpush1.bf16.msra.mxu1 %v10297_v37  ;;  %6738 = vmatpush1.bf16.msra.mxu0 %v10300_v8  ;;  %v11774_v37 = vcombine.high %v5874_v11, %v5878_v51 }
 0x89a   :  { %6698 = vmatprep.subr.bf16.mxu1 %v10305_v42  ;;  %6739 = vmatprep.subr.bf16.mxu0 %v10308_v29  ;;  %v5882_v42 = vld [vmem:[#allocation15 + $0x100] sm:$0xff] }
 0x89b   :  { %12610 = vst [vmem:[#allocation58_spill] sm:$0xff] %v11774_v37  ;;  %v5886_v29 = vld [vmem:[#allocation15 + $0x120] sm:$0xff] }
 0x89d   :  { %6699 = vmatpush1.bf16.msra.mxu1 %v10303_v20  ;;  %6740 = vmatpush1.bf16.msra.mxu0 %v10306_v32  ;;  %v5883_v20 = vld [vmem:[#allocation15 + $0x108] sm:$0xff] }
 0x89e   :  { %6700 = vmatprep.subr.bf16.mxu1 %v10311_v27  ;;  %6741 = vmatprep.subr.bf16.mxu0 %v10314_v28  ;;  %v5887_v32 = vld [vmem:[#allocation15 + $0x128] sm:$0xff]  ;;  %v11780_v27 = vcombine.low %v5874_v11, %v5878_v51  ;;  %v11840_v11 = vcombine.low %v5852_v62, %v5856_v38  ;;  %v5884_v62 = vld [vmem:[#allocation15 + $0x110] sm:$0xff] }
 0x89f   :  { %v5888_v38 = vld [vmem:[#allocation15 + $0x130] sm:$0xff] }
 0x8a0   :  { %12612 = vst [vmem:[#allocation60_spill] sm:$0xff] %v11780_v27 }
 0x8a1   :  { %6701 = vmatpush1.bf16.msra.mxu1 %v10309_v18  ;;  %6742 = vmatpush1.bf16.msra.mxu0 %v10312_v16  ;;  %v11786_v18 = vcombine.high %v5882_v42, %v5886_v29  ;;  %v11788_v16 = vcombine.high %v5883_v20, %v5887_v32 }
 0x8a2   :  { %6702 = vmatprep.subr.bf16.mxu1 %v10317_v61  ;;  %6743 = vmatprep.subr.bf16.mxu0 %v10320_v60  ;;  %v5890_v61 = vld [vmem:[#allocation15 + $0x140] sm:$0xff] }
 0x8a3   :  { %12614 = vst [vmem:[#allocation62_spill] sm:$0xff] %v11786_v18  ;;  %12615 = vst [vmem:[#allocation63_spill] sm:$0xff] %v11788_v16  ;;  %v5894_v60 = vld [vmem:[#allocation15 + $0x160] sm:$0xff] }
 0x8a5   :  { %6703 = vmatpush1.bf16.msra.mxu1 %v10315_v5  ;;  %6744 = vmatpush1.bf16.msra.mxu0 %v10318_v59  ;;  %v5891_v5 = vld [vmem:[#allocation15 + $0x148] sm:$0xff] }
 0x8a6   :  { %6704 = vmatprep.subr.bf16.mxu1 %v10323_v2  ;;  %6745 = vmatprep.subr.bf16.mxu0 %v10326_v19  ;;  %v5895_v59 = vld [vmem:[#allocation15 + $0x168] sm:$0xff]  ;;  %v11792_v2 = vcombine.low %v5882_v42, %v5886_v29  ;;  %v11794_v19 = vcombine.low %v5883_v20, %v5887_v32  ;;  %v5868_v42 = vld [vmem:[#allocation15 + $0x90] sm:$0xff]  ;;  %v5869_v20 = vld [vmem:[#allocation15 + $0x98] sm:$0xff] }
 0x8a7   :  { %v5872_v29 = vld [vmem:[#allocation15 + $0xb0] sm:$0xff]  ;;  %v5873_v32 = vld [vmem:[#allocation15 + $0xb8] sm:$0xff] }
 0x8a8   :  { %12616 = vst [vmem:[#allocation64_spill] sm:$0xff] %v11792_v2  ;;  %12617 = vst [vmem:[#allocation65_spill] sm:$0xff] %v11794_v19 }
 0x8a9   :  { %6705 = vmatpush1.bf16.msra.mxu1 %v10321_v43  ;;  %6746 = vmatpush1.bf16.msra.mxu0 %v10324_v48  ;;  %v11798_v43 = vcombine.high %v5890_v61, %v5894_v60  ;;  %v11800_v48 = vcombine.high %v5891_v5, %v5895_v59 }
 0x8aa   :  { %6706 = vmatprep.subr.bf16.mxu1 %v10329_v55  ;;  %6747 = vmatprep.subr.bf16.mxu0 %v10332_v3  ;;  %v5898_v55 = vld [vmem:[#allocation15 + $0x180] sm:$0xff] }
 0x8ab   :  { %12618 = vst [vmem:[#allocation66_spill] sm:$0xff] %v11798_v43  ;;  %12619 = vst [vmem:[#allocation67_spill] sm:$0xff] %v11800_v48  ;;  %v5902_v3 = vld [vmem:[#allocation15 + $0x1a0] sm:$0xff] }
 0x8ad   :  { %6707 = vmatpush1.bf16.msra.mxu1 %v10327_v12  ;;  %6748 = vmatpush1.bf16.msra.mxu0 %v10330_v14  ;;  %v5899_v12 = vld [vmem:[#allocation15 + $0x188] sm:$0xff] }
 0x8ae   :  { %6708 = vmatprep.subr.bf16.mxu1 %v10335_v7  ;;  %6749 = vmatprep.subr.bf16.mxu0 %v10338_v50  ;;  %v5903_v14 = vld [vmem:[#allocation15 + $0x1a8] sm:$0xff]  ;;  %v11804_v7 = vcombine.low %v5890_v61, %v5894_v60  ;;  %v11806_v50 = vcombine.low %v5891_v5, %v5895_v59  ;;  %v11854_v61 = vcombine.low %v5860_v23, %v5864_v25 }
 0x8af   :  { %v11856_v60 = vcombine.low %v5861_v26, %v5865_v17  ;;  %v11860_v5 = vcombine.high %v5868_v42, %v5872_v29  ;;  %v11862_v59 = vcombine.high %v5869_v20, %v5873_v32 }
 0x8b0   :  { %12620 = vst [vmem:[#allocation30_spill] sm:$0xff] %v11804_v7  ;;  %12621 = vst [vmem:[#allocation31_spill] sm:$0xff] %v11806_v50 }
 0x8b1   :  { %6709 = vmatpush1.bf16.msra.mxu1 %v10333_v39  ;;  %6750 = vmatpush1.bf16.msra.mxu0 %v10336_v40  ;;  %v11810_v39 = vcombine.high %v5898_v55, %v5902_v3  ;;  %v11812_v40 = vcombine.high %v5899_v12, %v5903_v14 }
 0x8b2   :  { %6710 = vmatprep.subr.bf16.mxu1 %v10341_v44  ;;  %6751 = vmatprep.subr.bf16.mxu0 %v10344_v46  ;;  %v5906_v44 = vld [vmem:[#allocation15 + $0x1c0] sm:$0xff] }
 0x8b3   :  { %12622 = vst [vmem:[#allocation32_spill] sm:$0xff] %v11810_v39  ;;  %12623 = vst [vmem:[#allocation33_spill] sm:$0xff] %v11812_v40  ;;  %v5910_v46 = vld [vmem:[#allocation15 + $0x1e0] sm:$0xff] }
 0x8b4   :  { %v11822_v54 = vcombine.high %v5906_v44, %v5910_v46  ;;  %v11828_v34 = vcombine.low %v5906_v44, %v5910_v46  ;;  %v11868_v44 = vcombine.low %v5868_v42, %v5872_v29  ;;  %v11870_v46 = vcombine.low %v5869_v20, %v5873_v32  ;;  %v5892_v42 = vld [vmem:[#allocation15 + $0x150] sm:$0xff]  ;;  %v5893_v20 = vld [vmem:[#allocation15 + $0x158] sm:$0xff] }
 0x8b5   :  { %6711 = vmatpush1.bf16.msra.mxu1 %v10339_v47  ;;  %6752 = vmatpush1.bf16.msra.mxu0 %v10342_v21  ;;  %v5907_v47 = vld [vmem:[#allocation15 + $0x1c8] sm:$0xff]  ;;  %v5896_v29 = vld [vmem:[#allocation15 + $0x170] sm:$0xff]  ;;  %v5897_v32 = vld [vmem:[#allocation15 + $0x178] sm:$0xff] }
 0x8b6   :  { %6712 = vmatprep.subr.bf16.mxu1 %v10347_v52  ;;  %6753 = vmatprep.subr.bf16.mxu0 %v10350_v53  ;;  %v5911_v21 = vld [vmem:[#allocation15 + $0x1e8] sm:$0xff]  ;;  %v11816_v52 = vcombine.low %v5898_v55, %v5902_v3  ;;  %v11818_v53 = vcombine.low %v5899_v12, %v5903_v14  ;;  %12626 = vst [vmem:[#allocation36_spill] sm:$0xff] %v11822_v54  ;;  %12628 = vst [vmem:[#allocation38_spill] sm:$0xff] %v11828_v34  ;;  %v5876_v55 = vld [vmem:[#allocation15 + $0xd0] sm:$0xff] }
 0x8b7   :  { %v11824_v4 = vcombine.high %v5907_v47, %v5911_v21  ;;  %v11830_v35 = vcombine.low %v5907_v47, %v5911_v21  ;;  %v5880_v3 = vld [vmem:[#allocation15 + $0xf0] sm:$0xff]  ;;  %v5877_v12 = vld [vmem:[#allocation15 + $0xd8] sm:$0xff]  ;;  %12632 = vst [vmem:[#allocation42_spill] sm:$0xff] %v11868_v44  ;;  %12633 = vst [vmem:[#allocation43_spill] sm:$0xff] %v11870_v46 }
 0x8b8   :  { %12624 = vst [vmem:[#allocation34_spill] sm:$0xff] %v11816_v52  ;;  %12625 = vst [vmem:[#allocation35_spill] sm:$0xff] %v11818_v53  ;;  %v5881_v14 = vld [vmem:[#allocation15 + $0xf8] sm:$0xff]  ;;  %v11874_v47 = vcombine.high %v5876_v55, %v5880_v3 }
 0x8b9   :  { %6713 = vmatpush1.bf16.msra.mxu1 %v10345_v0  ;;  %6754 = vmatpush1.bf16.msra.mxu0 %v10348_v1  ;;  %12627 = vst [vmem:[#allocation37_spill] sm:$0xff] %v11824_v4  ;;  %v5853_v0 = vld [vmem:[#allocation15 + $0x18] sm:$0xff]  ;;  %12629 = vst [vmem:[#allocation39_spill] sm:$0xff] %v11830_v35  ;;  %v11876_v21 = vcombine.high %v5877_v12, %v5881_v14 }
 0x8ba   :  { %7172 = vmatprep.subr.bf16.mxu1 %v11736_v22  ;;  %7213 = vmatprep.subr.bf16.mxu0 %v11738_v31  ;;  %v5857_v1 = vld [vmem:[#allocation15 + $0x38] sm:$0xff]  ;;  %12634 = vst [vmem:[#allocation44_spill] sm:$0xff] %v11874_v47 }
 0x8bb   :  { %v11836_v56 = vcombine.high %v5853_v0, %v5857_v1  ;;  %v11842_v51 = vcombine.low %v5853_v0, %v5857_v1  ;;  %12635 = vst [vmem:[#allocation45_spill] sm:$0xff] %v11876_v21  ;;  %v5885_v0 = vld [vmem:[#allocation15 + $0x118] sm:$0xff] }
 0x8bc   :  { %6715 = vmatmul.mubr.bf16.vlgmr.msra.gmra.mrb[56].mxu1 %v11732_v63  ;;  %6756 = vmatmul.mubr.bf16.vlgmr.msra.gmra.mrb[60].mxu0 %v11732_v63  ;;  %v5879_v63 = vld [vmem:[#allocation15 + $0xe8] sm:$0xff]  ;;  %v5889_v1 = vld [vmem:[#allocation15 + $0x138] sm:$0xff] }
 0x8bd   :  { %7173 = vmatpush1.bf16.msra.mxu1 %v11740_v57  ;;  %7214 = vmatpush1.bf16.msra.mxu0 %v11742_v58  ;;  %v11776_v8 = vcombine.high %v5875_v6, %v5879_v63  ;;  %v11782_v28 = vcombine.low %v5875_v6, %v5879_v63  ;;  %12631 = vst [vmem:[#allocation41_spill] sm:$0xff] %v11836_v56 }
 0x8be   :  { %7174 = vmatprep.subr.bf16.mxu1 %v11746_v33  ;;  %7215 = vmatprep.subr.bf16.mxu0 %v11748_v24  ;;  %v11846_v6 = vcombine.high %v5860_v23, %v5864_v25  ;;  %v11848_v63 = vcombine.high %v5861_v26, %v5865_v17  ;;  %v11880_v23 = vcombine.low %v5876_v55, %v5880_v3 }
 0x8bf   :  { %7204 = vmatprep.mubr.bf16.mxu1 %v12551_v41  ;;  %7245 = vmatprep.mubr.bf16.mxu0 %v12551_v41  ;;  %12611 = vst [vmem:[#allocation59_spill] sm:$0xff] %v11776_v8  ;;  %12613 = vst [vmem:[#allocation61_spill] sm:$0xff] %v11782_v28  ;;  %v11882_v25 = vcombine.low %v5877_v12, %v5881_v14  ;;  %v11886_v26 = vcombine.high %v5884_v62, %v5888_v38 }
 0x8c0   :  { %12636 = vst [vmem:[#allocation46_spill] sm:$0xff] %v11880_v23  ;;  %v11888_v17 = vcombine.high %v5885_v0, %v5889_v1  ;;  %v11892_v55 = vcombine.low %v5884_v62, %v5888_v38  ;;  %v11894_v3 = vcombine.low %v5885_v0, %v5889_v1  ;;  %v11898_v12 = vcombine.high %v5892_v42, %v5896_v29 }
 0x8c1   :  { %7175 = vmatpush1.bf16.msra.mxu1 %v11754_v49  ;;  %7216 = vmatpush1.bf16.msra.mxu0 %v11756_v30  ;;  %12637 = vst [vmem:[#allocation47_spill] sm:$0xff] %v11882_v25  ;;  %12638 = vst [vmem:[#allocation48_spill] sm:$0xff] %v11886_v26  ;;  %v11900_v14 = vcombine.high %v5893_v20, %v5897_v32  ;;  %v11904_v62 = vcombine.low %v5892_v42, %v5896_v29 }
 0x8c2   :  { %7176 = vmatprep.subr.bf16.mxu1 %v11760_v9  ;;  %7217 = vmatprep.subr.bf16.mxu0 %v11762_v10  ;;  %12639 = vst [vmem:[#allocation49_spill] sm:$0xff] %v11888_v17  ;;  %v11906_v38 = vcombine.low %v5893_v20, %v5897_v32 }
 0x8c3   :  { %12640 = vst [vmem:[#allocation50_spill] sm:$0xff] %v11900_v14  ;;  %12641 = vst [vmem:[#allocation51_spill] sm:$0xff] %v11904_v62 }
 0x8c5   :  { %7177 = vmatpush1.bf16.msra.mxu1 %v11768_v15  ;;  %7218 = vmatpush1.bf16.msra.mxu0 %v11770_v13 }
 0x8c6   :  { %7178 = vmatprep.subr.bf16.mxu1 %v11774_v37  ;;  %7219 = vmatprep.subr.bf16.mxu0 %v11776_v8 }
 0x8c9   :  { %7179 = vmatpush1.bf16.msra.mxu1 %v11780_v27  ;;  %7220 = vmatpush1.bf16.msra.mxu0 %v11782_v28 }
 0x8ca   :  { %7180 = vmatprep.subr.bf16.mxu1 %v11786_v18  ;;  %7221 = vmatprep.subr.bf16.mxu0 %v11788_v16 }
 0x8cd   :  { %7181 = vmatpush1.bf16.msra.mxu1 %v11792_v2  ;;  %7222 = vmatpush1.bf16.msra.mxu0 %v11794_v19 }
 0x8ce   :  { %7182 = vmatprep.subr.bf16.mxu1 %v11798_v43  ;;  %7223 = vmatprep.subr.bf16.mxu0 %v11800_v48 }
 0x8d1   :  { %7183 = vmatpush1.bf16.msra.mxu1 %v11804_v7  ;;  %7224 = vmatpush1.bf16.msra.mxu0 %v11806_v50 }
 0x8d2   :  { %7184 = vmatprep.subr.bf16.mxu1 %v11810_v39  ;;  %7225 = vmatprep.subr.bf16.mxu0 %v11812_v40 }
 0x8d5   :  { %7185 = vmatpush1.bf16.msra.mxu1 %v11816_v52  ;;  %7226 = vmatpush1.bf16.msra.mxu0 %v11818_v53 }
 0x8d6   :  { %7186 = vmatprep.subr.bf16.mxu1 %v11822_v54  ;;  %7227 = vmatprep.subr.bf16.mxu0 %v11824_v4 }
 0x8d9   :  { %7187 = vmatpush1.bf16.msra.mxu1 %v11828_v34  ;;  %7228 = vmatpush1.bf16.msra.mxu0 %v11830_v35 }
 0x8da   :  { %7254 = vmatprep.subr.bf16.mxu1 %v11834_v36  ;;  %7295 = vmatprep.subr.bf16.mxu0 %v11836_v56 }
 0x8dc   :  { %7205 = vmatmul.mubr.bf16.vlgmr.msra.gmra.mrb[60].mxu1 %v12551_v41  ;;  %7246 = vmatmul.mubr.bf16.vlgmr.msra.gmra.mrb[64].mxu0 %v12551_v41 }
 0x8dd   :  { %7255 = vmatpush1.bf16.msra.mxu1 %v11840_v11  ;;  %7296 = vmatpush1.bf16.msra.mxu0 %v11842_v51 }
 0x8de   :  { %7256 = vmatprep.subr.bf16.mxu1 %v11846_v6  ;;  %7297 = vmatprep.subr.bf16.mxu0 %v11848_v63 }
 0x8df   :  { %7286 = vmatprep.mubr.bf16.mxu1 %v12551_v41  ;;  %7327 = vmatprep.mubr.bf16.mxu0 %v12551_v41 }
 0x8e1   :  { %7257 = vmatpush1.bf16.msra.mxu1 %v11854_v61  ;;  %7298 = vmatpush1.bf16.msra.mxu0 %v11856_v60 }
 0x8e2   :  { %7258 = vmatprep.subr.bf16.mxu1 %v11860_v5  ;;  %7299 = vmatprep.subr.bf16.mxu0 %v11862_v59 }
 0x8e5   :  { %7259 = vmatpush1.bf16.msra.mxu1 %v11868_v44  ;;  %7300 = vmatpush1.bf16.msra.mxu0 %v11870_v46  ;;  %v5901_v46 = vld [vmem:[#allocation15 + $0x198] sm:$0xff] }
 0x8e6   :  { %7260 = vmatprep.subr.bf16.mxu1 %v11874_v47  ;;  %7301 = vmatprep.subr.bf16.mxu0 %v11876_v21  ;;  %v5900_v21 = vld [vmem:[#allocation15 + $0x190] sm:$0xff]  ;;  %v5905_v44 = vld [vmem:[#allocation15 + $0x1b8] sm:$0xff] }
 0x8e7   :  { %v5904_v47 = vld [vmem:[#allocation15 + $0x1b0] sm:$0xff]  ;;  %v11912_v1 = vcombine.high %v5901_v46, %v5905_v44  ;;  %v11918_v29 = vcombine.low %v5901_v46, %v5905_v44  ;;  %v12642_v46 = vld [vmem:[#allocation26_spill] sm:$0xff] }
 0x8e8   :  { %v11910_v0 = vcombine.high %v5900_v21, %v5904_v47  ;;  %v11916_v42 = vcombine.low %v5900_v21, %v5904_v47  ;;  %v5914_v44 = vld [vmem:[%s12326_s15] sm:$0xf]  ;;  %v12643_v21 = vld [vmem:[#allocation29_spill] sm:$0xff] }
 0x8e9   :  { %7261 = vmatpush1.bf16.msra.mxu1 %v11880_v23  ;;  %7302 = vmatpush1.bf16.msra.mxu0 %v11882_v25  ;;  %v5909_v25 = vld [vmem:[#allocation15 + $0x1d8] sm:$0xff]  ;;  %v5922_v47 = vrot.slane %v5914_v44, %v12642_v46 }
 0x8ea   :  { %7262 = vmatprep.subr.bf16.mxu1 %v11886_v26  ;;  %7303 = vmatprep.subr.bf16.mxu0 %v11888_v17  ;;  %v5908_v17 = vld [vmem:[#allocation15 + $0x1d0] sm:$0xff]  ;;  %v5913_v23 = vld [vmem:[#allocation15 + $0x1f8] sm:$0xff] }
 0x8eb   :  { %v5912_v26 = vld [vmem:[#allocation15 + $0x1f0] sm:$0xff]  ;;  %v11924_v32 = vcombine.high %v5909_v25, %v5913_v23 }
 0x8ec   :  { %v11922_v20 = vcombine.high %v5908_v17, %v5912_v26 }
 0x8ed   :  { %7263 = vmatpush1.bf16.msra.mxu1 %v11892_v55  ;;  %7304 = vmatpush1.bf16.msra.mxu0 %v11894_v3 }
 0x8ee   :  { %7264 = vmatprep.subr.bf16.mxu1 %v11898_v12  ;;  %7305 = vmatprep.subr.bf16.mxu0 %v11900_v14  ;;  %v11928_v14 = vcombine.low %v5908_v17, %v5912_v26  ;;  %v12645_v17 = vld [vmem:[#allocation28_spill] sm:$0xff] }
 0x8f1   :  { %7265 = vmatpush1.bf16.msra.mxu1 %v11904_v62  ;;  %7306 = vmatpush1.bf16.msra.mxu0 %v11906_v38  ;;  %v11930_v62 = vcombine.low %v5909_v25, %v5913_v23  ;;  %v5930_v23 = vrot.slane %v5914_v44, %v12643_v21  ;;  %v12644_v25 = vld [vmem:[#allocation27_spill] sm:$0xff] }
 0x8f2   :  { %7266 = vmatprep.subr.bf16.mxu1 %v11910_v0  ;;  %7307 = vmatprep.subr.bf16.mxu0 %v11912_v1  ;;  %v5926_v26 = vrot.slane %v5914_v44, %v12644_v25 }
 0x8f5   :  { %7267 = vmatpush1.bf16.msra.mxu1 %v11916_v42  ;;  %7308 = vmatpush1.bf16.msra.mxu0 %v11918_v29 }
 0x8f6   :  { %7268 = vmatprep.subr.bf16.mxu1 %v11922_v20  ;;  %7309 = vmatprep.subr.bf16.mxu0 %v11924_v32 }
 0x8f9   :  { %7269 = vmatpush1.bf16.msra.mxu1 %v11928_v14  ;;  %7310 = vmatpush1.bf16.msra.mxu0 %v11930_v62 }
 0x8fa   :  { %7384 = vmatprep.subr.bf16.mxu1 %v11736_v22  ;;  %7425 = vmatprep.subr.bf16.mxu0 %v11738_v31 }
 0x8fc   :  { %7287 = vmatmul.mubr.bf16.vlgmr.msra.gmra.mrb[64].mxu1 %v12551_v41  ;;  %7328 = vmatmul.mubr.bf16.vlgmr.msra.gmra.mrb[68].mxu0 %v12551_v41 }
 0x8fd   :  { %7385 = vmatpush1.bf16.msra.mxu1 %v11740_v57  ;;  %7426 = vmatpush1.bf16.msra.mxu0 %v11742_v58 }
 0x8fe   :  { %7386 = vmatprep.subr.bf16.mxu1 %v11746_v33  ;;  %7427 = vmatprep.subr.bf16.mxu0 %v11748_v24 }
 0x8ff   :  { %7416 = vmatprep.mubr.bf16.mxu1 %v12551_v41  ;;  %7457 = vmatprep.mubr.bf16.mxu0 %v12551_v41 }
 0x901   :  { %7387 = vmatpush1.bf16.msra.mxu1 %v11754_v49  ;;  %7428 = vmatpush1.bf16.msra.mxu0 %v11756_v30 }
 0x902   :  { %7388 = vmatprep.subr.bf16.mxu1 %v11760_v9  ;;  %7429 = vmatprep.subr.bf16.mxu0 %v11762_v10 }
 0x905   :  { %7389 = vmatpush1.bf16.msra.mxu1 %v11768_v15  ;;  %7430 = vmatpush1.bf16.msra.mxu0 %v11770_v13 }
 0x906   :  { %7390 = vmatprep.subr.bf16.mxu1 %v11774_v37  ;;  %7431 = vmatprep.subr.bf16.mxu0 %v11776_v8 }
 0x909   :  { %7391 = vmatpush1.bf16.msra.mxu1 %v11780_v27  ;;  %7432 = vmatpush1.bf16.msra.mxu0 %v11782_v28 }
 0x90a   :  { %7392 = vmatprep.subr.bf16.mxu1 %v11786_v18  ;;  %7433 = vmatprep.subr.bf16.mxu0 %v11788_v16 }
 0x90d   :  { %7393 = vmatpush1.bf16.msra.mxu1 %v11792_v2  ;;  %7434 = vmatpush1.bf16.msra.mxu0 %v11794_v19 }
 0x90e   :  { %7394 = vmatprep.subr.bf16.mxu1 %v11798_v43  ;;  %7435 = vmatprep.subr.bf16.mxu0 %v11800_v48 }
 0x911   :  { %7395 = vmatpush1.bf16.msra.mxu1 %v11804_v7  ;;  %7436 = vmatpush1.bf16.msra.mxu0 %v11806_v50 }
 0x912   :  { %7396 = vmatprep.subr.bf16.mxu1 %v11810_v39  ;;  %7437 = vmatprep.subr.bf16.mxu0 %v11812_v40 }
 0x915   :  { %7397 = vmatpush1.bf16.msra.mxu1 %v11816_v52  ;;  %7438 = vmatpush1.bf16.msra.mxu0 %v11818_v53 }
 0x916   :  { %7398 = vmatprep.subr.bf16.mxu1 %v11822_v54  ;;  %7439 = vmatprep.subr.bf16.mxu0 %v11824_v4  ;;  %v5934_v4 = vrot.slane %v5914_v44, %v12645_v17 }
 0x919   :  { %7399 = vmatpush1.bf16.msra.mxu1 %v11828_v34  ;;  %7440 = vmatpush1.bf16.msra.mxu0 %v11830_v35 }
 0x91a   :  { %7466 = vmatprep.subr.bf16.mxu1 %v11834_v36  ;;  %7507 = vmatprep.subr.bf16.mxu0 %v11836_v56 }
 0x94f   :  { %v6293_v54 = vpop.f32.mrb[52].mxu1  ;;  %v6334_v34 = vpop.f32.mrb[56].mxu0 }
 0x950   :  { %v6294_v53 = vadd.f32 %v6293_v54, %v5922_v47  ;;  %v6335_v35 = vadd.f32 %v6334_v34, %v5930_v23  ;;  %v6295_v52 = vpop.f32.mrb[53].mxu1  ;;  %v6336_v36 = vpop.f32.mrb[57].mxu0 }
 0x951   :  { %v6296_v40 = vadd.f32 %v6295_v52, %v5926_v26  ;;  %v6337_v56 = vadd.f32 %v6336_v36, %v5934_v4  ;;  %v6297_v39 = vpop.f32.mrb[54].mxu1  ;;  %v6338_v50 = vpop.f32.mrb[58].mxu0 }
 0x952   :  { %6764 = vst [vmem:[#allocation3] sm:$0x3] %v6294_v53  ;;  %v6788_v7 = vrot.slane %v6294_v53, 6  ;;  %v6812_v48 = vrot.slane %v6294_v53, 4  ;;  %v6828_v43 = vrot.slane %v6294_v53, 2  ;;  %v6790_v19 = vrot.slane %v6335_v35, 6 }
 0x953   :  { %6766 = vst [vmem:[#allocation3 + $0x10] sm:$0x3] %v6335_v35  ;;  %v6298_v2 = vpop.f32.mrb[55].mxu1  ;;  %v6339_v16 = vpop.f32.mrb[59].mxu0  ;;  %v6814_v18 = vrot.slane %v6335_v35, 4  ;;  %v6830_v44 = vrot.slane %v6335_v35, 2 }
 0x954   :  { %6765 = vst [vmem:[#allocation3 + $0x8] sm:$0x3] %v6296_v40  ;;  %v6789_v28 = vrot.slane %v6296_v40, 6  ;;  %v6813_v54 = vrot.slane %v6296_v40, 4  ;;  %6767 = vst [vmem:[#allocation3 + $0x18] sm:$0x3] %v6337_v56 }
 0x955   :  { %6796 = vst [vmem:[#allocation3] sm:$0x30] %v6788_v7  ;;  %6820 = vst [vmem:[#allocation3 + $0x20] sm:$0x3] %v6812_v48  ;;  %v6829_v39 = vrot.slane %v6296_v40, 2  ;;  %v6791_v50 = vrot.slane %v6337_v56, 6 }
 0x956   :  { %6836 = vst [vmem:[#allocation3 + $0x20] sm:$0x30] %v6828_v43  ;;  %6798 = vst [vmem:[#allocation3 + $0x10] sm:$0x30] %v6790_v19  ;;  %v6815_v52 = vrot.slane %v6337_v56, 4  ;;  %v6831_v4 = vrot.slane %v6337_v56, 2 }
 0x957   :  { %6822 = vst [vmem:[#allocation3 + $0x30] sm:$0x3] %v6814_v18  ;;  %6838 = vst [vmem:[#allocation3 + $0x30] sm:$0x30] %v6830_v44  ;;  %v5915_v16 = vld [vmem:[%s12327_s16] sm:$0xf] }
 0x958   :  { %6797 = vst [vmem:[#allocation3 + $0x8] sm:$0x30] %v6789_v28  ;;  %6821 = vst [vmem:[#allocation3 + $0x28] sm:$0x3] %v6813_v54  ;;  %v6345_v2 = vrot.slane %v5915_v16, %v12642_v46  ;;  %v6353_v19 = vrot.slane %v5915_v16, %v12643_v21  ;;  %v6349_v43 = vrot.slane %v5915_v16, %v12644_v25 }
 0x959   :  { %6837 = vst [vmem:[#allocation3 + $0x28] sm:$0x30] %v6829_v39  ;;  %6799 = vst [vmem:[#allocation3 + $0x18] sm:$0x30] %v6791_v50  ;;  %v6357_v48 = vrot.slane %v5915_v16, %v12645_v17 }
 0x95a   :  { %6823 = vst [vmem:[#allocation3 + $0x38] sm:$0x3] %v6815_v52  ;;  %6839 = vst [vmem:[#allocation3 + $0x38] sm:$0x30] %v6831_v4 }
 0x98f   :  { %v6716_v18 = vpop.f32.mrb[56].mxu1  ;;  %v6757_v7 = vpop.f32.mrb[60].mxu0 }
 0x990   :  { %v6717_v28 = vadd.f32 %v6716_v18, %v6345_v2  ;;  %v6758_v40 = vadd.f32 %v6757_v7, %v6353_v19  ;;  %v6718_v53 = vpop.f32.mrb[57].mxu1  ;;  %v6759_v34 = vpop.f32.mrb[61].mxu0 }
 0x991   :  { %v6719_v35 = vadd.f32 %v6718_v53, %v6349_v43  ;;  %v6760_v36 = vadd.f32 %v6759_v34, %v6357_v48  ;;  %v6720_v56 = vpop.f32.mrb[58].mxu1  ;;  %v6761_v47 = vpop.f32.mrb[62].mxu0 }
 0x992   :  { %v6772_v23 = vrot.slane %v6717_v28, 4  ;;  %v6800_v26 = vrot.slane %v6717_v28, 6  ;;  %6824 = vst [vmem:[#allocation3 + $0x20] sm:$0xc] %v6717_v28  ;;  %v6840_v46 = vrot.slane %v6717_v28, 2  ;;  %v6774_v44 = vrot.slane %v6758_v40, 4 }
 0x993   :  { %6826 = vst [vmem:[#allocation3 + $0x30] sm:$0xc] %v6758_v40  ;;  %v6721_v21 = vpop.f32.mrb[59].mxu1  ;;  %v6762_v25 = vpop.f32.mrb[63].mxu0  ;;  %v6802_v54 = vrot.slane %v6758_v40, 6  ;;  %v6842_v17 = vrot.slane %v6758_v40, 2 }
 0x994   :  { %v6773_v39 = vrot.slane %v6719_v35, 4  ;;  %v6801_v50 = vrot.slane %v6719_v35, 6  ;;  %6825 = vst [vmem:[#allocation3 + $0x28] sm:$0xc] %v6719_v35  ;;  %6827 = vst [vmem:[#allocation3 + $0x38] sm:$0xc] %v6760_v36 }
 0x995   :  { %6780 = vst [vmem:[#allocation3] sm:$0xc] %v6772_v23  ;;  %6808 = vst [vmem:[#allocation3] sm:$0xc0] %v6800_v26  ;;  %v6841_v52 = vrot.slane %v6719_v35, 2  ;;  %v6775_v4 = vrot.slane %v6760_v36, 4 }
 0x996   :  { %6848 = vst [vmem:[#allocation3 + $0x20] sm:$0xc0] %v6840_v46  ;;  %6782 = vst [vmem:[#allocation3 + $0x10] sm:$0xc] %v6774_v44  ;;  %v6803_v16 = vrot.slane %v6760_v36, 6  ;;  %v6843_v2 = vrot.slane %v6760_v36, 2 }
 0x997   :  { %6810 = vst [vmem:[#allocation3 + $0x10] sm:$0xc0] %v6802_v54  ;;  %6850 = vst [vmem:[#allocation3 + $0x30] sm:$0xc0] %v6842_v17 }
 0x998   :  { %6781 = vst [vmem:[#allocation3 + $0x8] sm:$0xc] %v6773_v39  ;;  %6809 = vst [vmem:[#allocation3 + $0x8] sm:$0xc0] %v6801_v50 }
 0x999   :  { %6849 = vst [vmem:[#allocation3 + $0x28] sm:$0xc0] %v6841_v52  ;;  %6783 = vst [vmem:[#allocation3 + $0x18] sm:$0xc] %v6775_v4 }
 0x99a   :  { %6811 = vst [vmem:[#allocation3 + $0x18] sm:$0xc0] %v6803_v16  ;;  %6851 = vst [vmem:[#allocation3 + $0x38] sm:$0xc0] %v6843_v2 }
 0x99c   :  { %v7340_v56 = vld [vmem:[#allocation3] sm:$0xf] }
 0x99f   :  { %v7341_v21 = vld [vmem:[#allocation3 + $0x8] sm:$0xf] }
 0x9a0   :  { %v7343_v2 = vld [vmem:[#allocation3 + $0x18] sm:$0xf] }
 0x9af   :  { %v7206_v19 = vpop.f32.mrb[60].mxu1  ;;  %v7247_v43 = vpop.f32.mrb[64].mxu0 }
 0x9b0   :  { %v7208_v48 = vpop.f32.mrb[61].mxu1  ;;  %v7249_v18 = vpop.f32.mrb[65].mxu0 }
 0x9b1   :  { %v7210_v7 = vpop.f32.mrb[62].mxu1  ;;  %v7251_v28 = vpop.f32.mrb[66].mxu0 }
 0x9b2   :  { %v7211_v40 = vpop.f32.mrb[63].mxu1  ;;  %v7252_v53 = vpop.f32.mrb[67].mxu0 }
 0x9cf   :  { %v7288_v34 = vpop.f32.mrb[64].mxu1  ;;  %v7329_v35 = vpop.f32.mrb[68].mxu0 }
 0x9d0   :  { %v7336_v36 = vsel %vm170_vm7, %v7206_v19, %v7288_v34  ;;  %v7338_v47 = vsel %vm170_vm7, %v7247_v43, %v7329_v35  ;;  %v7290_v23 = vpop.f32.mrb[65].mxu1  ;;  %v7331_v26 = vpop.f32.mrb[69].mxu0  ;;  %v7342_v43 = vld [vmem:[#allocation3 + $0x10] sm:$0xf] }
 0x9d1   :  { %v7344_v46 = vadd.f32 %v7340_v56, %v7336_v36  ;;  %v7337_v44 = vsel %vm170_vm7, %v7208_v48, %v7290_v23  ;;  %v7339_v25 = vsel %vm170_vm7, %v7249_v18, %v7331_v26  ;;  %v7292_v54 = vpop.f32.mrb[66].mxu1  ;;  %v7333_v17 = vpop.f32.mrb[70].mxu0  ;;  %v7346_v28 = vadd.f32 %v7342_v43, %v7338_v47  ;;  %v12651_v43 = vld [vmem:[#allocation47_spill] sm:$0xff] }
 0x9d2   :  { %v7345_v39 = vadd.f32 %v7341_v21, %v7337_v44  ;;  %v7293_v50 = vpop.f32.mrb[67].mxu1  ;;  %v7334_v52 = vpop.f32.mrb[71].mxu0  ;;  %v7347_v19 = vadd.f32 %v7343_v2, %v7339_v25  ;;  %v12649_v2 = vld [vmem:[#allocation45_spill] sm:$0xff] }
 0x9d3   :  { %v9186_v4 = vmul.f32 -1.442695, %v7344_v46  ;;  %v12646_v52 = vld [vmem:[#allocation42_spill] sm:$0xff] }
 0x9d4   :  { %v9187_v16 = vmul.f32 -1.442695, %v7345_v39  ;;  %v9188_v7 = vmul.f32 -1.442695, %v7347_v19  ;;  %v12650_v19 = vld [vmem:[#allocation46_spill] sm:$0xff] }
 0x9d5   :  { %10439 = vpow2.f32 %v9186_v4  ;;  %v12647_v4 = vld [vmem:[#allocation43_spill] sm:$0xff] }
 0x9d6   :  { %10441 = vpow2.f32 %v9187_v16  ;;  %v12648_v16 = vld [vmem:[#allocation44_spill] sm:$0xff] }
 0x9d7   :  { %10443 = vpow2.f32 %v9188_v7  ;;  %v12652_v7 = vld [vmem:[#allocation48_spill] sm:$0xff] }
 0x9d8   :  { %10445 = vtanh.f32 %v7346_v28  ;;  %v12653_v28 = vld [vmem:[#allocation49_spill] sm:$0xff] }
 0x9df   :  { %v10440_v40 = vpop.eup %10439 }
 0x9e0   :  { %v10442_v48 = vpop.eup %10441  ;;  %v7351_v53 = vadd.f32 1.0, %v10440_v40  ;;  %v12654_v40 = vld [vmem:[#allocation50_spill] sm:$0xff] }
 0x9e1   :  { %v7357_v18 = vadd.f32 1.0, %v10442_v48  ;;  %v10444_v34 = vpop.eup %10443  ;;  %v12655_v48 = vld [vmem:[#allocation51_spill] sm:$0xff] }
 0x9e2   :  { %10447 = vrcp.f32 %v7351_v53  ;;  %v10446_v35 = vpop.eup %10445  ;;  %v7364_v26 = vadd.f32 1.0, %v10444_v34  ;;  %v12656_v53 = vld [vmem:[#allocation61_spill] sm:$0xff]  ;;  %v12658_v34 = vld [vmem:[#allocation63_spill] sm:$0xff] }
 0x9e3   :  { %10449 = vrcp.f32 %v7357_v18  ;;  %v12657_v18 = vld [vmem:[#allocation62_spill] sm:$0xff] }
 0x9e4   :  { %10451 = vrcp.f32 %v7364_v26  ;;  %v12663_v26 = vld [vmem:[#allocation30_spill] sm:$0xff] }
 0x9ec   :  { %v10448_v36 = vpop.eup %10447 }
 0x9ed   :  { %v10450_v56 = vpop.eup %10449  ;;  %v7368_v23 = vmul.f32 %v10448_v36, %v10446_v35  ;;  %v12659_v35 = vld [vmem:[#allocation64_spill] sm:$0xff]  ;;  %v12660_v36 = vld [vmem:[#allocation65_spill] sm:$0xff] }
 0x9ee   :  { %v7367_v46 = vmul.f32 0.0, %v10450_v56  ;;  %v10452_v47 = vpop.eup %10451  ;;  %v12661_v56 = vld [vmem:[#allocation66_spill] sm:$0xff] }
 0x9f0   :  { %v11996_v44 = vadd.f32 %v7368_v23, %v7367_v46  ;;  %v12662_v23 = vld [vmem:[#allocation67_spill] sm:$0xff] }
 0x9f1   :  { %v12664_v46 = vld [vmem:[#allocation31_spill] sm:$0xff] }
 0x9f2   :  { %10453 = vtanh.f32 %v11996_v44 }
 0x9fc   :  { %v10454_v21 = vpop.eup %10453 }
 0x9fd   :  { %v7371_v25 = vmul.f32 %v10454_v21, %v10452_v47  ;;  %v12665_v47 = vld [vmem:[#allocation32_spill] sm:$0xff]  ;;  %v12666_v21 = vld [vmem:[#allocation33_spill] sm:$0xff] }
 0x9ff   :  { %7372 = vst [vmem:[#allocation16] sm:$0x1] %v7371_v25  ;;  %v7374_v54 = vrot.slane %v7371_v25, 2  ;;  %v7377_v17 = vrot.slane %v7371_v25, 1  ;;  %v7380_v39 = vrot.slane %v7371_v25, 3  ;;  %v7383_v50 = vpack.c.bf16 %v7371_v25, %v7371_v25  ;;  %v12667_v25 = vld [vmem:[#allocation34_spill] sm:$0xff] }
 0xa01   :  { %7376 = vst [vmem:[#allocation16 + $0xb] sm:$0x1] %v7374_v54  ;;  %7379 = vst [vmem:[#allocation16 + $0x4] sm:$0x1] %v7377_v17  ;;  %7417 = vmatmul.mubr.bf16.vlgmr.msra.gmra.mrb[68].mxu1 %v7383_v50  ;;  %7458 = vmatmul.mubr.bf16.vlgmr.msra.gmra.mrb[72].mxu0 %v7383_v50  ;;  %v12668_v54 = vld [vmem:[#allocation35_spill] sm:$0xff]  ;;  %v12669_v17 = vld [vmem:[#allocation36_spill] sm:$0xff] }
 0xa02   :  { %7382 = vst [vmem:[#allocation16 + $0xf] sm:$0x1] %v7380_v39  ;;  %7467 = vmatpush1.bf16.msra.mxu1 %v11840_v11  ;;  %7508 = vmatpush1.bf16.msra.mxu0 %v11842_v51  ;;  %v12670_v39 = vld [vmem:[#allocation37_spill] sm:$0xff] }
 0xa03   :  { %7468 = vmatprep.subr.bf16.mxu1 %v11846_v6  ;;  %7509 = vmatprep.subr.bf16.mxu0 %v11848_v63 }
 0xa04   :  { %7498 = vmatprep.mubr.bf16.mxu1 %v12551_v41  ;;  %7539 = vmatprep.mubr.bf16.mxu0 %v12551_v41 }
 0xa06   :  { %7469 = vmatpush1.bf16.msra.mxu1 %v11854_v61  ;;  %7510 = vmatpush1.bf16.msra.mxu0 %v11856_v60 }
 0xa07   :  { %7470 = vmatprep.subr.bf16.mxu1 %v11860_v5  ;;  %7511 = vmatprep.subr.bf16.mxu0 %v11862_v59 }
 0xa0a   :  { %7471 = vmatpush1.bf16.msra.mxu1 %v12646_v52  ;;  %7512 = vmatpush1.bf16.msra.mxu0 %v12647_v4 }
 0xa0b   :  { %7472 = vmatprep.subr.bf16.mxu1 %v12648_v16  ;;  %7513 = vmatprep.subr.bf16.mxu0 %v12649_v2 }
 0xa0e   :  { %7473 = vmatpush1.bf16.msra.mxu1 %v12650_v19  ;;  %7514 = vmatpush1.bf16.msra.mxu0 %v12651_v43 }
 0xa0f   :  { %7474 = vmatprep.subr.bf16.mxu1 %v12652_v7  ;;  %7515 = vmatprep.subr.bf16.mxu0 %v12653_v28 }
 0xa12   :  { %7475 = vmatpush1.bf16.msra.mxu1 %v11892_v55  ;;  %7516 = vmatpush1.bf16.msra.mxu0 %v11894_v3 }
 0xa13   :  { %7476 = vmatprep.subr.bf16.mxu1 %v11898_v12  ;;  %7517 = vmatprep.subr.bf16.mxu0 %v12654_v40 }
 0xa16   :  { %7477 = vmatpush1.bf16.msra.mxu1 %v12655_v48  ;;  %7518 = vmatpush1.bf16.msra.mxu0 %v11906_v38 }
 0xa17   :  { %7478 = vmatprep.subr.bf16.mxu1 %v11910_v0  ;;  %7519 = vmatprep.subr.bf16.mxu0 %v11912_v1 }
 0xa1a   :  { %7479 = vmatpush1.bf16.msra.mxu1 %v11916_v42  ;;  %7520 = vmatpush1.bf16.msra.mxu0 %v11918_v29 }
 0xa1b   :  { %7480 = vmatprep.subr.bf16.mxu1 %v11922_v20  ;;  %7521 = vmatprep.subr.bf16.mxu0 %v11924_v32 }
 0xa1e   :  { %7481 = vmatpush1.bf16.msra.mxu1 %v11928_v14  ;;  %7522 = vmatpush1.bf16.msra.mxu0 %v11930_v62 }
 0xa1f   :  { %7616 = vmatprep.subr.bf16.mxu1 %v11736_v22  ;;  %7657 = vmatprep.subr.bf16.mxu0 %v11738_v31 }
 0xa21   :  { %7499 = vmatmul.mubr.bf16.vlgmr.msra.gmra.mrb[72].mxu1 %v7383_v50  ;;  %7540 = vmatmul.mubr.bf16.vlgmr.msra.gmra.mrb[76].mxu0 %v7383_v50  ;;  %v12671_v50 = vld [vmem:[#allocation38_spill] sm:$0xff] }
 0xa22   :  { %7617 = vmatpush1.bf16.msra.mxu1 %v11740_v57  ;;  %7658 = vmatpush1.bf16.msra.mxu0 %v11742_v58 }
 0xa23   :  { %7618 = vmatprep.subr.bf16.mxu1 %v11746_v33  ;;  %7659 = vmatprep.subr.bf16.mxu0 %v11748_v24 }
 0xa24   :  { %7648 = vmatprep.mubr.bf16.mxu1 %v12551_v41  ;;  %7689 = vmatprep.mubr.bf16.mxu0 %v12551_v41 }
 0xa26   :  { %7619 = vmatpush1.bf16.msra.mxu1 %v11754_v49  ;;  %7660 = vmatpush1.bf16.msra.mxu0 %v11756_v30 }
 0xa27   :  { %7620 = vmatprep.subr.bf16.mxu1 %v11760_v9  ;;  %7661 = vmatprep.subr.bf16.mxu0 %v11762_v10 }
 0xa2a   :  { %7621 = vmatpush1.bf16.msra.mxu1 %v11768_v15  ;;  %7662 = vmatpush1.bf16.msra.mxu0 %v11770_v13 }
 0xa2b   :  { %7622 = vmatprep.subr.bf16.mxu1 %v11774_v37  ;;  %7663 = vmatprep.subr.bf16.mxu0 %v11776_v8 }
 0xa2e   :  { %7623 = vmatpush1.bf16.msra.mxu1 %v11780_v27  ;;  %7664 = vmatpush1.bf16.msra.mxu0 %v12656_v53 }
 0xa2f   :  { %7624 = vmatprep.subr.bf16.mxu1 %v12657_v18  ;;  %7665 = vmatprep.subr.bf16.mxu0 %v12658_v34 }
 0xa32   :  { %7625 = vmatpush1.bf16.msra.mxu1 %v12659_v35  ;;  %7666 = vmatpush1.bf16.msra.mxu0 %v12660_v36 }
 0xa33   :  { %7626 = vmatprep.subr.bf16.mxu1 %v12661_v56  ;;  %7667 = vmatprep.subr.bf16.mxu0 %v12662_v23  ;;  %v12672_v56 = vld [vmem:[#allocation39_spill] sm:$0xff]  ;;  %v12673_v23 = vld [vmem:[#allocation40_spill] sm:$0xff] }
 0xa36   :  { %7627 = vmatpush1.bf16.msra.mxu1 %v12663_v26  ;;  %7668 = vmatpush1.bf16.msra.mxu0 %v12664_v46  ;;  %v12674_v26 = vld [vmem:[#allocation41_spill] sm:$0xff] }
 0xa37   :  { %7628 = vmatprep.subr.bf16.mxu1 %v12665_v47  ;;  %7669 = vmatprep.subr.bf16.mxu0 %v12666_v21 }
 0xa3a   :  { %7629 = vmatpush1.bf16.msra.mxu1 %v12667_v25  ;;  %7670 = vmatpush1.bf16.msra.mxu0 %v12668_v54 }
 0xa3b   :  { %7630 = vmatprep.subr.bf16.mxu1 %v12669_v17  ;;  %7671 = vmatprep.subr.bf16.mxu0 %v12670_v39 }
 0xa3e   :  { %7631 = vmatpush1.bf16.msra.mxu1 %v12671_v50  ;;  %7672 = vmatpush1.bf16.msra.mxu0 %v12672_v56 }
 0xa3f   :  { %7698 = vmatprep.subr.bf16.mxu1 %v12673_v23  ;;  %7739 = vmatprep.subr.bf16.mxu0 %v12674_v26 }
 0xad4   :  { %v7418_v46 = vpop.f32.mrb[68].mxu1  ;;  %v7459_v47 = vpop.f32.mrb[72].mxu0 }
 0xad5   :  { %v7420_v36 = vpop.f32.mrb[69].mxu1  ;;  %v7461_v21 = vpop.f32.mrb[73].mxu0 }
 0xad6   :  { %v7422_v35 = vpop.f32.mrb[70].mxu1  ;;  %v7463_v25 = vpop.f32.mrb[74].mxu0 }
 0xad7   :  { %v7423_v34 = vpop.f32.mrb[71].mxu1  ;;  %v7464_v54 = vpop.f32.mrb[75].mxu0 }
 0xad8   :  { %v7552_v54 = vld [vmem:[#allocation3] sm:$0xf0] }
 0xaf4   :  { %v7500_v18 = vpop.f32.mrb[72].mxu1  ;;  %v7541_v17 = vpop.f32.mrb[76].mxu0 }
 0xaf5   :  { %v7548_v39 = vsel %vm170_vm7, %v7418_v46, %v7500_v18  ;;  %v7550_v56 = vsel %vm170_vm7, %v7459_v47, %v7541_v17  ;;  %v7502_v50 = vpop.f32.mrb[73].mxu1  ;;  %v7543_v23 = vpop.f32.mrb[77].mxu0  ;;  %v7553_v18 = vld [vmem:[#allocation3 + $0x8] sm:$0xf0] }
 0xaf6   :  { %v7560_v53 = vrot.slane %v7548_v39, 4  ;;  %v7549_v26 = vsel %vm170_vm7, %v7420_v36, %v7502_v50  ;;  %v7551_v35 = vsel %vm170_vm7, %v7461_v21, %v7543_v23  ;;  %v7504_v25 = vpop.f32.mrb[74].mxu1  ;;  %v7545_v34 = vpop.f32.mrb[78].mxu0  ;;  %v7555_v39 = vld [vmem:[#allocation3 + $0x18] sm:$0xf0]  ;;  %v7562_v36 = vrot.slane %v7550_v56, 4 }
 0xaf7   :  { %v7561_v27 = vrot.slane %v7549_v26, 4  ;;  %v7505_v8 = vpop.f32.mrb[75].mxu1  ;;  %v7546_v37 = vpop.f32.mrb[79].mxu0  ;;  %v7563_v17 = vrot.slane %v7551_v35, 4  ;;  %v7554_v50 = vld [vmem:[#allocation3 + $0x10] sm:$0xf0] }
 0xaf8   :  { %v7568_v13 = vadd.f32 %v7560_v53, %v7552_v54  ;;  %v7570_v23 = vadd.f32 %v7562_v36, %v7554_v50  ;;  %v12681_v50 = vld [vmem:[#allocation61_spill] sm:$0xff] }
 0xaf9   :  { %v7569_v46 = vadd.f32 %v7561_v27, %v7553_v18  ;;  %v7571_v10 = vadd.f32 %v7563_v17, %v7555_v39 }
 0xafa   :  { %v9189_v15 = vmul.f32 -1.442695, %v7568_v13 }
 0xafb   :  { %v9190_v47 = vmul.f32 -1.442695, %v7569_v46  ;;  %v9191_v45 = vmul.f32 -1.442695, %v7571_v10 }
 0xafc   :  { %10455 = vpow2.f32 %v9189_v15  ;;  %v7592_v15 = vrot.slane %v11996_v44, 4 }
 0xafd   :  { %10457 = vpow2.f32 %v9190_v47 }
 0xafe   :  { %10459 = vpow2.f32 %v9191_v45 }
 0xaff   :  { %10461 = vtanh.f32 %v7570_v23  ;;  %v12682_v23 = vld [vmem:[#allocation62_spill] sm:$0xff] }
 0xb06   :  { %v10456_v21 = vpop.eup %10455 }
 0xb07   :  { %v10458_v25 = vpop.eup %10457  ;;  %v7575_v34 = vadd.f32 1.0, %v10456_v21  ;;  %v12686_v21 = vld [vmem:[#allocation66_spill] sm:$0xff] }
 0xb08   :  { %v7581_v37 = vadd.f32 1.0, %v10458_v25  ;;  %v10460_v8 = vpop.eup %10459  ;;  %v12687_v25 = vld [vmem:[#allocation67_spill] sm:$0xff] }
 0xb09   :  { %10463 = vrcp.f32 %v7575_v34  ;;  %v10462_v13 = vpop.eup %10461  ;;  %v7588_v35 = vadd.f32 1.0, %v10460_v8  ;;  %v12688_v34 = vld [vmem:[#allocation30_spill] sm:$0xff]  ;;  %v12690_v8 = vld [vmem:[#allocation32_spill] sm:$0xff] }
 0xb0a   :  { %10465 = vrcp.f32 %v7581_v37  ;;  %v12689_v37 = vld [vmem:[#allocation31_spill] sm:$0xff] }
 0xb0b   :  { %10467 = vrcp.f32 %v7588_v35  ;;  %v12696_v35 = vld [vmem:[#allocation38_spill] sm:$0xff] }
 0xb13   :  { %v10464_v27 = vpop.eup %10463 }
 0xb14   :  { %v10466_v53 = vpop.eup %10465  ;;  %v7595_v26 = vmul.f32 %v10464_v27, %v10462_v13  ;;  %v12691_v13 = vld [vmem:[#allocation33_spill] sm:$0xff]  ;;  %v12692_v27 = vld [vmem:[#allocation34_spill] sm:$0xff] }
 0xb15   :  { %v7594_v56 = vmul.f32 %v10466_v53, %v7592_v15  ;;  %v10468_v10 = vpop.eup %10467  ;;  %v12693_v15 = vld [vmem:[#allocation35_spill] sm:$0xff]  ;;  %v12694_v53 = vld [vmem:[#allocation36_spill] sm:$0xff] }
 0xb17   :  { %v12076_v54 = vadd.f32 %v7595_v26, %v7594_v56  ;;  %v12695_v26 = vld [vmem:[#allocation37_spill] sm:$0xff]  ;;  %v12697_v56 = vld [vmem:[#allocation39_spill] sm:$0xff] }
 0xb19   :  { %10469 = vtanh.f32 %v12076_v54 }
 0xb23   :  { %v10470_v45 = vpop.eup %10469 }
 0xb24   :  { %v7598_v18 = vmul.f32 %v10470_v45, %v10468_v10  ;;  %v12698_v10 = vld [vmem:[#allocation40_spill] sm:$0xff]  ;;  %v12699_v45 = vld [vmem:[#allocation41_spill] sm:$0xff] }
 0xb26   :  { %v7600_v46 = vrot.slane %v7598_v18, 4  ;;  %v7603_v47 = vrot.slane %v7598_v18, 6  ;;  %v7606_v17 = vrot.slane %v7598_v18, 5  ;;  %v7609_v39 = vrot.slane %v7598_v18, 7 }
 0xb27   :  { %v7612_v36 = vpack.c.bf16 %v7598_v18, %v7598_v18 }
 0xb28   :  { %7602 = vst [vmem:[#allocation16 + $0x1] sm:$0x1] %v7600_v46  ;;  %7605 = vst [vmem:[#allocation16 + $0xa] sm:$0x1] %v7603_v47 }
 0xb29   :  { %7608 = vst [vmem:[#allocation16 + $0x5] sm:$0x1] %v7606_v17  ;;  %7611 = vst [vmem:[#allocation16 + $0xe] sm:$0x1] %v7609_v39  ;;  %v7614_v44 = vrot.slane %v7612_v36, 2 }
 0xb2b   :  { %7649 = vmatmul.mubr.bf16.vlgmr.msra.gmra.mrb[76].mxu1 %v7614_v44  ;;  %7690 = vmatmul.mubr.bf16.vlgmr.msra.gmra.mrb[80].mxu0 %v7614_v44 }
 0xb2c   :  { %7699 = vmatpush1.bf16.msra.mxu1 %v11840_v11  ;;  %7740 = vmatpush1.bf16.msra.mxu0 %v11842_v51 }
 0xb2d   :  { %7700 = vmatprep.subr.bf16.mxu1 %v11846_v6  ;;  %7741 = vmatprep.subr.bf16.mxu0 %v11848_v63 }
 0xb2e   :  { %7730 = vmatprep.mubr.bf16.mxu1 %v12551_v41  ;;  %7771 = vmatprep.mubr.bf16.mxu0 %v12551_v41 }
 0xb30   :  { %7701 = vmatpush1.bf16.msra.mxu1 %v11854_v61  ;;  %7742 = vmatpush1.bf16.msra.mxu0 %v11856_v60 }
 0xb31   :  { %7702 = vmatprep.subr.bf16.mxu1 %v11860_v5  ;;  %7743 = vmatprep.subr.bf16.mxu0 %v11862_v59 }
 0xb34   :  { %7703 = vmatpush1.bf16.msra.mxu1 %v12646_v52  ;;  %7744 = vmatpush1.bf16.msra.mxu0 %v12647_v4 }
 0xb35   :  { %7704 = vmatprep.subr.bf16.mxu1 %v12648_v16  ;;  %7745 = vmatprep.subr.bf16.mxu0 %v12649_v2 }
 0xb38   :  { %7705 = vmatpush1.bf16.msra.mxu1 %v12650_v19  ;;  %7746 = vmatpush1.bf16.msra.mxu0 %v12651_v43 }
 0xb39   :  { %7706 = vmatprep.subr.bf16.mxu1 %v12652_v7  ;;  %7747 = vmatprep.subr.bf16.mxu0 %v12653_v28 }
 0xb3c   :  { %7707 = vmatpush1.bf16.msra.mxu1 %v11892_v55  ;;  %7748 = vmatpush1.bf16.msra.mxu0 %v11894_v3 }
 0xb3d   :  { %7708 = vmatprep.subr.bf16.mxu1 %v11898_v12  ;;  %7749 = vmatprep.subr.bf16.mxu0 %v12654_v40 }
 0xb40   :  { %7709 = vmatpush1.bf16.msra.mxu1 %v12655_v48  ;;  %7750 = vmatpush1.bf16.msra.mxu0 %v11906_v38 }
 0xb41   :  { %7710 = vmatprep.subr.bf16.mxu1 %v11910_v0  ;;  %7751 = vmatprep.subr.bf16.mxu0 %v11912_v1 }
 0xb44   :  { %7711 = vmatpush1.bf16.msra.mxu1 %v11916_v42  ;;  %7752 = vmatpush1.bf16.msra.mxu0 %v11918_v29 }
 0xb45   :  { %7712 = vmatprep.subr.bf16.mxu1 %v11922_v20  ;;  %7753 = vmatprep.subr.bf16.mxu0 %v11924_v32 }
 0xb48   :  { %7713 = vmatpush1.bf16.msra.mxu1 %v11928_v14  ;;  %7754 = vmatpush1.bf16.msra.mxu0 %v11930_v62 }
 0xb49   :  { %7831 = vmatprep.subr.bf16.mxu1 %v11736_v22  ;;  %7872 = vmatprep.subr.bf16.mxu0 %v11738_v31  ;;  %v12675_v22 = vld [vmem:[#allocation55_spill] sm:$0xff]  ;;  %v12676_v31 = vld [vmem:[#allocation56_spill] sm:$0xff] }
 0xb4b   :  { %7731 = vmatmul.mubr.bf16.vlgmr.msra.gmra.mrb[80].mxu1 %v7614_v44  ;;  %7772 = vmatmul.mubr.bf16.vlgmr.msra.gmra.mrb[84].mxu0 %v7614_v44 }
 0xb4c   :  { %7832 = vmatpush1.bf16.msra.mxu1 %v11740_v57  ;;  %7873 = vmatpush1.bf16.msra.mxu0 %v11742_v58  ;;  %v12677_v57 = vld [vmem:[#allocation57_spill] sm:$0xff]  ;;  %v12678_v58 = vld [vmem:[#allocation58_spill] sm:$0xff] }
 0xb4d   :  { %7833 = vmatprep.subr.bf16.mxu1 %v11746_v33  ;;  %7874 = vmatprep.subr.bf16.mxu0 %v11748_v24  ;;  %v12679_v33 = vld [vmem:[#allocation59_spill] sm:$0xff]  ;;  %v12680_v24 = vld [vmem:[#allocation60_spill] sm:$0xff] }
 0xb4e   :  { %7863 = vmatprep.mubr.bf16.mxu1 %v12551_v41  ;;  %7904 = vmatprep.mubr.bf16.mxu0 %v12551_v41 }
 0xb50   :  { %7834 = vmatpush1.bf16.msra.mxu1 %v11754_v49  ;;  %7875 = vmatpush1.bf16.msra.mxu0 %v11756_v30  ;;  %v12683_v49 = vld [vmem:[#allocation63_spill] sm:$0xff]  ;;  %v12684_v30 = vld [vmem:[#allocation64_spill] sm:$0xff] }
 0xb51   :  { %7835 = vmatprep.subr.bf16.mxu1 %v11760_v9  ;;  %7876 = vmatprep.subr.bf16.mxu0 %v12675_v22  ;;  %v12685_v9 = vld [vmem:[#allocation65_spill] sm:$0xff] }
 0xb54   :  { %7836 = vmatpush1.bf16.msra.mxu1 %v12676_v31  ;;  %7877 = vmatpush1.bf16.msra.mxu0 %v12677_v57 }
 0xb55   :  { %7837 = vmatprep.subr.bf16.mxu1 %v12678_v58  ;;  %7878 = vmatprep.subr.bf16.mxu0 %v12679_v33 }
 0xb58   :  { %7838 = vmatpush1.bf16.msra.mxu1 %v12680_v24  ;;  %7879 = vmatpush1.bf16.msra.mxu0 %v12681_v50  ;;  %v7784_v24 = vld [vmem:[#allocation3 + $0x20] sm:$0xf] }
 0xb59   :  { %7839 = vmatprep.subr.bf16.mxu1 %v12682_v23  ;;  %7880 = vmatprep.subr.bf16.mxu0 %v12683_v49 }
 0xb5c   :  { %7840 = vmatpush1.bf16.msra.mxu1 %v12684_v30  ;;  %7881 = vmatpush1.bf16.msra.mxu0 %v12685_v9 }
 0xb5d   :  { %7841 = vmatprep.subr.bf16.mxu1 %v12686_v21  ;;  %7882 = vmatprep.subr.bf16.mxu0 %v12687_v25  ;;  %v7785_v21 = vld [vmem:[#allocation3 + $0x28] sm:$0xf] }
 0xb60   :  { %7842 = vmatpush1.bf16.msra.mxu1 %v12688_v34  ;;  %7883 = vmatpush1.bf16.msra.mxu0 %v12689_v37 }
 0xb61   :  { %7843 = vmatprep.subr.bf16.mxu1 %v12690_v8  ;;  %7884 = vmatprep.subr.bf16.mxu0 %v12691_v13 }
 0xb64   :  { %7844 = vmatpush1.bf16.msra.mxu1 %v12692_v27  ;;  %7885 = vmatpush1.bf16.msra.mxu0 %v12693_v15 }
 0xb65   :  { %7845 = vmatprep.subr.bf16.mxu1 %v12694_v53  ;;  %7886 = vmatprep.subr.bf16.mxu0 %v12695_v26  ;;  %v7787_v26 = vld [vmem:[#allocation3 + $0x38] sm:$0xf] }
 0xb68   :  { %7846 = vmatpush1.bf16.msra.mxu1 %v12696_v35  ;;  %7887 = vmatpush1.bf16.msra.mxu0 %v12697_v56  ;;  %v7786_v56 = vld [vmem:[#allocation3 + $0x30] sm:$0xf] }
 0xb69   :  { %7913 = vmatprep.subr.bf16.mxu1 %v12698_v10  ;;  %7954 = vmatprep.subr.bf16.mxu0 %v12699_v45 }
 0xbfe   :  { %v7650_v18 = vpop.f32.mrb[76].mxu1  ;;  %v7691_v46 = vpop.f32.mrb[80].mxu0 }
 0xbff   :  { %v7652_v47 = vpop.f32.mrb[77].mxu1  ;;  %v7693_v17 = vpop.f32.mrb[81].mxu0 }
 0xc00   :  { %v7654_v39 = vpop.f32.mrb[78].mxu1  ;;  %v7695_v36 = vpop.f32.mrb[82].mxu0 }
 0xc01   :  { %v7655_v44 = vpop.f32.mrb[79].mxu1  ;;  %v7696_v22 = vpop.f32.mrb[83].mxu0 }
 0xc02   :  { %v7812_v22 = vrot.slane %v12076_v54, 4 }
 0xc1e   :  { %v7732_v31 = vpop.f32.mrb[80].mxu1  ;;  %v7773_v57 = vpop.f32.mrb[84].mxu0 }
 0xc1f   :  { %v7780_v33 = vsel %vm170_vm7, %v7650_v18, %v7732_v31  ;;  %v7782_v50 = vsel %vm170_vm7, %v7691_v46, %v7773_v57  ;;  %v7734_v23 = vpop.f32.mrb[81].mxu1  ;;  %v7775_v49 = vpop.f32.mrb[85].mxu0 }
 0xc20   :  { %v7788_v30 = vadd.f32 %v7784_v24, %v7780_v33  ;;  %v7781_v9 = vsel %vm170_vm7, %v7652_v47, %v7734_v23  ;;  %v7783_v25 = vsel %vm170_vm7, %v7693_v17, %v7775_v49  ;;  %v7736_v34 = vpop.f32.mrb[82].mxu1  ;;  %v7777_v37 = vpop.f32.mrb[86].mxu0  ;;  %v7790_v45 = vadd.f32 %v7786_v56, %v7782_v50 }
 0xc21   :  { %v7789_v8 = vadd.f32 %v7785_v21, %v7781_v9  ;;  %v7737_v13 = vpop.f32.mrb[83].mxu1  ;;  %v7778_v27 = vpop.f32.mrb[87].mxu0  ;;  %v7791_v35 = vadd.f32 %v7787_v26, %v7783_v25 }
 0xc22   :  { %v9192_v15 = vmul.f32 -1.442695, %v7788_v30 }
 0xc23   :  { %v9193_v53 = vmul.f32 -1.442695, %v7789_v8  ;;  %v9194_v10 = vmul.f32 -1.442695, %v7791_v35 }
 0xc24   :  { %10471 = vpow2.f32 %v9192_v15 }
 0xc25   :  { %10473 = vpow2.f32 %v9193_v53 }
 0xc26   :  { %10475 = vpow2.f32 %v9194_v10  ;;  %v7999_v10 = vld [vmem:[#allocation3 + $0x20] sm:$0xf0] }
 0xc27   :  { %10477 = vtanh.f32 %v7790_v45 }
 0xc2e   :  { %v10472_v18 = vpop.eup %10471 }
 0xc2f   :  { %v10474_v46 = vpop.eup %10473  ;;  %v7795_v47 = vadd.f32 1.0, %v10472_v18 }
 0xc30   :  { %v7801_v17 = vadd.f32 1.0, %v10474_v46  ;;  %v10476_v39 = vpop.eup %10475 }
 0xc31   :  { %10479 = vrcp.f32 %v7795_v47  ;;  %v10478_v36 = vpop.eup %10477  ;;  %v7808_v33 = vadd.f32 1.0, %v10476_v39 }
 0xc32   :  { %10481 = vrcp.f32 %v7801_v17  ;;  %v8000_v17 = vld [vmem:[#allocation3 + $0x28] sm:$0xf0] }
 0xc33   :  { %10483 = vrcp.f32 %v7808_v33 }
 0xc3b   :  { %v10480_v44 = vpop.eup %10479 }
 0xc3c   :  { %v10482_v31 = vpop.eup %10481  ;;  %v7815_v57 = vmul.f32 %v10480_v44, %v10478_v36 }
 0xc3d   :  { %v7814_v24 = vmul.f32 %v10482_v31, %v7812_v22  ;;  %v10484_v50 = vpop.eup %10483  ;;  %v8002_v31 = vld [vmem:[#allocation3 + $0x38] sm:$0xf0] }
 0xc3f   :  { %v12156_v23 = vadd.f32 %v7815_v57, %v7814_v24  ;;  %v8001_v24 = vld [vmem:[#allocation3 + $0x30] sm:$0xf0] }
 0xc41   :  { %10485 = vtanh.f32 %v12156_v23 }
 0xc4b   :  { %v10486_v49 = vpop.eup %10485 }
 0xc4c   :  { %v7818_v30 = vmul.f32 %v10486_v49, %v10484_v50 }
 0xc4e   :  { %7819 = vst [vmem:[#allocation16 + $0x2] sm:$0x1] %v7818_v30  ;;  %v7821_v9 = vrot.slane %v7818_v30, 2  ;;  %v7824_v21 = vrot.slane %v7818_v30, 1  ;;  %v7827_v25 = vrot.slane %v7818_v30, 3  ;;  %v7830_v34 = vpack.c.bf16 %v7818_v30, %v7818_v30 }
 0xc50   :  { %7823 = vst [vmem:[#allocation16 + $0x9] sm:$0x1] %v7821_v9  ;;  %7826 = vst [vmem:[#allocation16 + $0x6] sm:$0x1] %v7824_v21  ;;  %7864 = vmatmul.mubr.bf16.vlgmr.msra.gmra.mrb[84].mxu1 %v7830_v34  ;;  %7905 = vmatmul.mubr.bf16.vlgmr.msra.gmra.mrb[88].mxu0 %v7830_v34 }
 0xc51   :  { %7829 = vst [vmem:[#allocation16 + $0xd] sm:$0x1] %v7827_v25  ;;  %7914 = vmatpush1.bf16.msra.mxu1 %v11840_v11  ;;  %7955 = vmatpush1.bf16.msra.mxu0 %v11842_v51  ;;  %v10352_v11 = vld [vmem:[%s12328_s17] sm:$0xff]   ;;  %v10353_v51 = vld [vmem:[%s12328_s17 + $0x48] sm:$0xff]  }
 0xc52   :  { %7915 = vmatprep.subr.bf16.mxu1 %v11846_v6  ;;  %7956 = vmatprep.subr.bf16.mxu0 %v11848_v63  ;;  %v10354_v6 = vld [vmem:[%s12328_s17 + $0x8] sm:$0xff]   ;;  %v10355_v63 = vld [vmem:[%s12328_s17 + $0x50] sm:$0xff]  }
 0xc53   :  { %7945 = vmatprep.mubr.bf16.mxu1 %v12551_v41  ;;  %7986 = vmatprep.mubr.bf16.mxu0 %v12551_v41  ;;  %v10351_v41 = vld [vmem:[%s12328_s17 + $0x40] sm:$0xff]  }
 0xc55   :  { %7916 = vmatpush1.bf16.msra.mxu1 %v11854_v61  ;;  %7957 = vmatpush1.bf16.msra.mxu0 %v11856_v60  ;;  %v10356_v61 = vld [vmem:[%s12328_s17 + $0x10] sm:$0xff]   ;;  %v10357_v60 = vld [vmem:[%s12328_s17 + $0x58] sm:$0xff]  }
 0xc56   :  { %7917 = vmatprep.subr.bf16.mxu1 %v11860_v5  ;;  %7958 = vmatprep.subr.bf16.mxu0 %v11862_v59  ;;  %v10358_v5 = vld [vmem:[%s12328_s17 + $0x18] sm:$0xff]   ;;  %v10359_v59 = vld [vmem:[%s12328_s17 + $0x60] sm:$0xff]  }
 0xc59   :  { %7918 = vmatpush1.bf16.msra.mxu1 %v12646_v52  ;;  %7959 = vmatpush1.bf16.msra.mxu0 %v12647_v4  ;;  %v10371_v52 = vld [vmem:[%s12330_s19 + $0x20] sm:$0xff]  }
 0xc5a   :  { %7919 = vmatprep.subr.bf16.mxu1 %v12648_v16  ;;  %7960 = vmatprep.subr.bf16.mxu0 %v12649_v2 }
 0xc5d   :  { %7920 = vmatpush1.bf16.msra.mxu1 %v12650_v19  ;;  %7961 = vmatpush1.bf16.msra.mxu0 %v12651_v43 }
 0xc5e   :  { %7921 = vmatprep.subr.bf16.mxu1 %v12652_v7  ;;  %7962 = vmatprep.subr.bf16.mxu0 %v12653_v28 }
 0xc61   :  { %7922 = vmatpush1.bf16.msra.mxu1 %v11892_v55  ;;  %7963 = vmatpush1.bf16.msra.mxu0 %v11894_v3  ;;  %v10360_v55 = vld [vmem:[%s12328_s17 + $0x20] sm:$0xff]   ;;  %v10361_v3 = vld [vmem:[%s12328_s17 + $0x68] sm:$0xff]  }
 0xc62   :  { %7923 = vmatprep.subr.bf16.mxu1 %v11898_v12  ;;  %7964 = vmatprep.subr.bf16.mxu0 %v12654_v40  ;;  %v10362_v12 = vld [vmem:[%s12328_s17 + $0x28] sm:$0xff]  }
 0xc65   :  { %7924 = vmatpush1.bf16.msra.mxu1 %v12655_v48  ;;  %7965 = vmatpush1.bf16.msra.mxu0 %v11906_v38  ;;  %v10365_v38 = vld [vmem:[%s12328_s17 + $0x78] sm:$0xff]  }
 0xc66   :  { %7925 = vmatprep.subr.bf16.mxu1 %v11910_v0  ;;  %7966 = vmatprep.subr.bf16.mxu0 %v11912_v1  ;;  %v10366_v0 = vld [vmem:[%s12328_s17 + $0x38] sm:$0xff]   ;;  %v10367_v1 = vld [vmem:[%s12330_s19] sm:$0xff]  }
 0xc69   :  { %7926 = vmatpush1.bf16.msra.mxu1 %v11916_v42  ;;  %7967 = vmatpush1.bf16.msra.mxu0 %v11918_v29  ;;  %v10727_v42 = vmov 0.0   ;;  %v10368_v29 = vld [vmem:[%s12330_s19 + $0x8] sm:$0xff]  }
 0xc6a   :  { %7927 = vmatprep.subr.bf16.mxu1 %v11922_v20  ;;  %7968 = vmatprep.subr.bf16.mxu0 %v11924_v32  ;;  %v10369_v20 = vld [vmem:[%s12330_s19 + $0x10] sm:$0xff]   ;;  %v10370_v32 = vld [vmem:[%s12330_s19 + $0x18] sm:$0xff]  }
 0xc6d   :  { %7928 = vmatpush1.bf16.msra.mxu1 %v11928_v14  ;;  %7969 = vmatpush1.bf16.msra.mxu0 %v11930_v62  ;;  %v10363_v14 = vld [vmem:[%s12328_s17 + $0x70] sm:$0xff]  }
 0xc6e   :  { %9290 = vmatprep.subr.bf16.mxu1 %v10351_v41  ;;  %v10364_v62 = vld [vmem:[%s12328_s17 + $0x30] sm:$0xff]   ;;  %9321 = vmatprep.subr.bf16.mxu0 %v10727_v42 }
 0xc70   :  { %7946 = vmatmul.mubr.bf16.vlgmr.msra.gmra.mrb[88].mxu1 %v7830_v34  ;;  %7987 = vmatmul.mubr.bf16.vlgmr.msra.gmra.mrb[92].mxu0 %v7830_v34 }
 0xc71   :  { %9291 = vmatpush3.bf16.msra.mxu1 %v10352_v11  ;;  %9322 = vmatpush3.bf16.msra.mxu0 %v10367_v1  ;;  %v8039_v11 = vrot.slane %v12156_v23, 4 }
 0xc72   :  { %9292 = vmatprep.subr.bf16.mxu1 %v10353_v51  ;;  %9323 = vmatprep.subr.bf16.mxu0 %v10727_v42 }
 0xc73   :  { %9337 = vmatprep.mubr.msk.bf16.mxu0 %vm10728_vm8, %v10727_v42 }
 0xc75   :  { %9293 = vmatpush3.bf16.msra.mxu1 %v10354_v6  ;;  %9324 = vmatpush3.bf16.msra.mxu0 %v10368_v29  ;;  %v10372_v29 = vld [vmem:[%s12330_s19 + $0x28] sm:$0xff]  }
 0xc76   :  { %9294 = vmatprep.subr.bf16.mxu1 %v10355_v63  ;;  %9325 = vmatprep.subr.bf16.mxu0 %v10727_v42 }
 0xc79   :  { %9295 = vmatpush3.bf16.msra.mxu1 %v10356_v61  ;;  %9326 = vmatpush3.bf16.msra.mxu0 %v10369_v20  ;;  %v10373_v20 = vld [vmem:[%s12330_s19 + $0x30] sm:$0xff]  }
 0xc7a   :  { %9296 = vmatprep.subr.bf16.mxu1 %v10357_v60  ;;  %9327 = vmatprep.subr.bf16.mxu0 %v10727_v42 }
 0xc7d   :  { %9297 = vmatpush3.bf16.msra.mxu1 %v10358_v5  ;;  %9328 = vmatpush3.bf16.msra.mxu0 %v10370_v32  ;;  %v10374_v32 = vld [vmem:[%s12330_s19 + $0x38] sm:$0xff]   ;;  %s10729_s19 = smov [#allocation16]  }
 0xc7e   :  { %9298 = vmatprep.subr.bf16.mxu1 %v10359_v59  ;;  %9329 = vmatprep.subr.bf16.mxu0 %v10727_v42  ;;  %s8364_s14 = sshll.u32 %s10729_s19, 4  ;;  %s8365_s14 = int_to_ptr.vmem [resolvable:$true] %s8364_s14 }
 0xc7f   :  { %s10657_s11 = scalar_lea.vmem %s8365_s14, 256  ;;  %p10662_p1 = scmp.lt.s32.totalorder %s8365_s14, %s8365_s14 }
 0xc80   :  { %p10658_p0 = scmp.ne.s32.totalorder %s8365_s14, %s10657_s11  ;;  %p10663_p2 = scmp.lt.s32.totalorder %s10657_s11, %s10657_s11 }
 0xc81   :  { %9299 = vmatpush3.bf16.msra.mxu1 %v10360_v55  ;;  %9330 = vmatpush3.bf16.msra.mxu0 %v10371_v52 }
 0xc82   :  { %9300 = vmatprep.subr.bf16.mxu1 %v10361_v3  ;;  %9331 = vmatprep.subr.bf16.mxu0 %v10727_v42  ;;  %p10664_p3 = por %p10663_p2, %p10662_p1 }
 0xc84   :  { %p10665_p4 = pnand %p10664_p3, %p10658_p0 }
 0xc85   :  { %9301 = vmatpush3.bf16.msra.mxu1 %v10362_v12  ;;  %9332 = vmatpush3.bf16.msra.mxu0 %v10372_v29 }
 0xc86   :  { %9302 = vmatprep.subr.bf16.mxu1 %v10363_v14  ;;  %9333 = vmatprep.subr.bf16.mxu0 %v10727_v42 }
 0xc89   :  { %9303 = vmatpush3.bf16.msra.mxu1 %v10364_v62  ;;  %9334 = vmatpush3.bf16.msra.mxu0 %v10373_v20 }
 0xc8a   :  { %9304 = vmatprep.subr.bf16.mxu1 %v10365_v38  ;;  %9335 = vmatprep.subr.bf16.mxu0 %v10727_v42 }
 0xc8d   :  { %9305 = vmatpush3.bf16.msra.mxu1 %v10366_v0  ;;  %9336 = vmatpush3.bf16.msra.mxu0 %v10374_v32 }
 0xd23   :  { %v7865_v4 = vpop.f32.mrb[84].mxu1  ;;  %v7906_v16 = vpop.f32.mrb[88].mxu0 }
 0xd24   :  { %v7867_v2 = vpop.f32.mrb[85].mxu1  ;;  %v7908_v19 = vpop.f32.mrb[89].mxu0 }
 0xd25   :  { %v7869_v43 = vpop.f32.mrb[86].mxu1  ;;  %v7910_v7 = vpop.f32.mrb[90].mxu0 }
 0xd26   :  { %v7870_v28 = vpop.f32.mrb[87].mxu1  ;;  %v7911_v40 = vpop.f32.mrb[91].mxu0 }
 0xd43   :  { %v7947_v48 = vpop.f32.mrb[88].mxu1  ;;  %v7988_v54 = vpop.f32.mrb[92].mxu0 }
 0xd44   :  { %v7995_v37 = vsel %vm170_vm7, %v7865_v4, %v7947_v48  ;;  %v7997_v8 = vsel %vm170_vm7, %v7906_v16, %v7988_v54  ;;  %v7949_v13 = vpop.f32.mrb[89].mxu1  ;;  %v7990_v27 = vpop.f32.mrb[93].mxu0  ;;  %v9198_v4 = vld [vmem:[%s12329_s18] ss:$0 sm:$0xff] }
 0xd45   :  { %v8007_v15 = vrot.slane %v7995_v37, 4  ;;  %v7996_v53 = vsel %vm170_vm7, %v7867_v2, %v7949_v13  ;;  %v7998_v26 = vsel %vm170_vm7, %v7908_v19, %v7990_v27  ;;  %v7951_v35 = vpop.f32.mrb[90].mxu1  ;;  %v7992_v56 = vpop.f32.mrb[94].mxu0  ;;  %v8009_v33 = vrot.slane %v7997_v8, 4 }
 0xd46   :  { %v8008_v45 = vrot.slane %v7996_v53, 4  ;;  %v7952_v18 = vpop.f32.mrb[91].mxu1  ;;  %v7993_v46 = vpop.f32.mrb[95].mxu0  ;;  %v8010_v22 = vrot.slane %v7998_v26, 4 }
 0xd47   :  { %v8015_v47 = vadd.f32 %v8007_v15, %v7999_v10  ;;  %v8017_v50 = vadd.f32 %v8009_v33, %v8001_v24 }
 0xd48   :  { %v8016_v39 = vadd.f32 %v8008_v45, %v8000_v17  ;;  %v8018_v57 = vadd.f32 %v8010_v22, %v8002_v31 }
 0xd49   :  { %v9195_v36 = vmul.f32 -1.442695, %v8015_v47 }
 0xd4a   :  { %v9196_v44 = vmul.f32 -1.442695, %v8016_v39  ;;  %v9197_v58 = vmul.f32 -1.442695, %v8018_v57 }
 0xd4b   :  { %10487 = vpow2.f32 %v9195_v36 }
 0xd4c   :  { %10489 = vpow2.f32 %v9196_v44 }
 0xd4d   :  { %10491 = vpow2.f32 %v9197_v58 }
 0xd4e   :  { %10493 = vtanh.f32 %v8017_v50 }
 0xd55   :  { %v10488_v49 = vpop.eup %10487 }
 0xd56   :  { %v10490_v30 = vpop.eup %10489  ;;  %v8022_v9 = vadd.f32 1.0, %v10488_v49 }
 0xd57   :  { %v8028_v21 = vadd.f32 1.0, %v10490_v30  ;;  %v10492_v25 = vpop.eup %10491 }
 0xd58   :  { %10495 = vrcp.f32 %v8022_v9  ;;  %v10494_v34 = vpop.eup %10493  ;;  %v8035_v63 = vadd.f32 1.0, %v10492_v25 }
 0xd59   :  { %10497 = vrcp.f32 %v8028_v21 }
 0xd5a   :  { %10499 = vrcp.f32 %v8035_v63 }
 0xd62   :  { %v10496_v41 = vpop.eup %10495 }
 0xd63   :  { %v10498_v51 = vpop.eup %10497  ;;  %v8042_v6 = vmul.f32 %v10496_v41, %v10494_v34 }
 0xd64   :  { %v8041_v61 = vmul.f32 %v10498_v51, %v8039_v11  ;;  %v10500_v5 = vpop.eup %10499 }
 0xd66   :  { %v8043_v60 = vadd.f32 %v8042_v6, %v8041_v61 }
 0xd68   :  { %10501 = vtanh.f32 %v8043_v60 }
 0xd72   :  { %v10502_v59 = vpop.eup %10501 }
 0xd73   :  { %v8045_v55 = vmul.f32 %v10502_v59, %v10500_v5 }
 0xd75   :  { %v8047_v3 = vrot.slane %v8045_v55, 4  ;;  %v8050_v12 = vrot.slane %v8045_v55, 6  ;;  %v8053_v14 = vrot.slane %v8045_v55, 5  ;;  %v8056_v62 = vrot.slane %v8045_v55, 7 }
 0xd77   :  { %8049 = vst [vmem:[#allocation16 + $0x3] sm:$0x1] %v8047_v3  ;;  %8052 = vst [vmem:[#allocation16 + $0x8] sm:$0x1] %v8050_v12 }
 0xd78   :  { %8055 = vst [vmem:[#allocation16 + $0x7] sm:$0x1] %v8053_v14  ;;  %8058 = vst [vmem:[#allocation16 + $0xc] sm:$0x1] %v8056_v62 }
 0xd7f   :  { %v8060_v38 = vld [vmem:[#allocation16 + $0x8] sm:$0xff]  ;;  %v8059_v23 = vld [vmem:[#allocation16] sm:$0xff] }
 0xd80   :  { %v8062_v0 = vpack.c.bf16 %v8060_v38, %v8060_v38  ;;  %v8061_v1 = vpack.c.bf16 %v8059_v23, %v8059_v23 }
 0xd82   :  { %8230 = vmatprep.mubr.bf16.mxu1 %v8062_v0 }
 0xd83   :  { %8231 = vmatmul.mubr.bf16.vlgmr.msra.gmra.mrb[92].mxu1 %v8061_v1 }
 0xe56   :  { %v9306_v52 = vpop.f32.mrb[92].mxu1 }
 0xe57   :  { %v9307_v16 = vpop.f32.mrb[93].mxu1 }
 0xe58   :  { %v9308_v2 = vadd.f32 %v9307_v16, %v9306_v52  ;;  %v9309_v19 = vpop.f32.mrb[94].mxu1 }
 0xe59   :  { %v9310_v43 = vpop.f32.mrb[95].mxu1 }
 0xe5a   :  { %v8233_v7 = vadd.f32 %v9308_v2, %v9198_v4 }
 0xe5c   :  { %vm8238_vm9 = vcmp.gt.f32.partialorder %v8233_v7, 0.0  ;;  %v8239_v28 = vmul.f32 0.2, %v8233_v7 }
 0xe5e   :  { %v8240_v40 = vsel %vm8238_vm9, %v8233_v7, %v8239_v28 }
 0xe5f   :  { %v8241_v48 = vpack.c.bf16 %v8240_v40, %v8240_v40 }
 0xe61   :  { %9338 = vmatmul.mubr.bf16.vlgmr.msra.gmra.mrb[96].mxu0 %v8241_v48 }
 0xe62   :  { %10668 = shalt.err (!%p10665_p4)
}
 0xe63   :  { %s10669_s15 = scalar_lea.hbm %s12332_s21, 256 }
 0xe64   :  { %p10670_p5 = scmp.ne.s32.totalorder %s12332_s21, %s10669_s15  ;;  %p10673_p6 = scmp.lt.u32.totalorder %s10669_s15, %s12332_s21 }
 0xe66   :  { %p10675_p7 = pnand %p10673_p6, %p10670_p5 }
 0xe68   :  { %10678 = shalt.err (!%p10675_p7)
}
 0xe69   :  { %8367 = dma.vmem_to_hbm [thread:$0]  %s8365_s14, 256, %s12332_s21, [#allocation6]   ;;  %vm8356_vm11 = vcmask 523264  }
 0xe6a   :  { %s12701_s24 = sld [smem:[#allocation75_spill]]  ;;  %s10730_s6 = smov [#allocation17]  }
 0xe6b   :  { %s8374_s9 = sshll.u32 %s10730_s6, 4  ;;  %s8375_s9 = int_to_ptr.vmem [resolvable:$true] %s8374_s9 }
 0xe6c   :  { %s10679_s23 = scalar_lea.vmem %s8375_s9, 128  ;;  %p10684_p9 = scmp.lt.s32.totalorder %s8375_s9, %s8375_s9 }
 0xe6d   :  { %p10680_p8 = scmp.ne.s32.totalorder %s8375_s9, %s10679_s23  ;;  %p10685_p10 = scmp.lt.s32.totalorder %s10679_s23, %s10679_s23 }
 0xe6f   :  { %p10686_p11 = por %p10685_p10, %p10684_p9 }
 0xe70   :  { %v9215_v42 = vld [vmem:[%s12701_s24] ss:$0 sm:$0xff] }
 0xe71   :  { %p10687_p12 = pnand %p10686_p11, %p10680_p8 }
 0xf34   :  { %v8347_v54 = vpop.f32.mrb[96].mxu0 }
 0xf35   :  { %v8348_v37 = vadd.f32 %v9215_v42, %v8347_v54  ;;  %v9339_v8 = vpop.f32.mrb[97].mxu0 }
 0xf36   :  { %v8350_v13 = vpop.f32.mrb[98].mxu0 }
 0xf37   :  { %vm8353_vm10 = vcmp.gt.f32.partialorder %v8348_v37, 0.0  ;;  %v8354_v27 = vmul.f32 0.2, %v8348_v37  ;;  %v9340_v15 = vpop.f32.mrb[99].mxu0 }
 0xf39   :  { %v8355_v53 = vsel %vm8353_vm10, %v8348_v37, %v8354_v27 }
 0xf3a   :  { %8357 = vst.msk [vmem:[#allocation17] sm:$0xff] %vm8356_vm11, %v8355_v53 }
 0xf3b   :  { %10690 = shalt.err (!%p10687_p12)
}
 0xf3c   :  { %s12702_s25 = sld [smem:[#allocation76_spill]] }
 0xf42   :  { %s10691_s13 = scalar_lea.hbm %s12702_s25, 128 }
 0xf43   :  { %p10692_p13 = scmp.ne.s32.totalorder %s12702_s25, %s10691_s13  ;;  %p10695_p0 = scmp.lt.u32.totalorder %s10691_s13, %s12702_s25 }
 0xf45   :  { %p10697_p1 = pnand %p10695_p0, %p10692_p13 }
 0xf47   :  { %10700 = shalt.err (!%p10697_p1)
}
 0xf48   :  { %8377 = dma.vmem_to_hbm [thread:$0]  %s8375_s9, 128, %s12702_s25, [#allocation18]  }
 0xf49   :  { %10709 = dma.done.wait [#allocation6], 256  }
 0xf4a   :  { %10710 = vsyncadd [#allocation6], 4294967040 }
 0xf4b   :  { %10711 = dma.done.wait [#allocation18], 128  }
 0xf4c   :  { %10712 = vsyncadd [#allocation18], 4294967168 }
 0xf4d   :  { %8384 = vsyncpa [#allocation5], 1 }
 0xf4e   :  { %8385 = vsyncpa [#allocation8], 1 }
 0xf4f   :  { %8386 = vsyncpa [#allocation11], 1 }
 0xf50   :  { %8387 = vsyncpa [#allocation14], 1 }
 0xf51   :  { %8388 = vsyncpa [#allocation6], 1 }
 0xf52   :  { %8389 = vsyncpa [#allocation18], 1 }

</bundles_post_ra>
